<compile_context>
chip_gen: v6e
topology: v6e:2x2x1
jax: 0.10.0
libtpu: 0.0.40
codegen_flags: <defaults>
</compile_context>

<pallas_src>
import functools

import numpy as np
import jax
import jax.numpy as jnp
from jax.experimental import pallas as pl
from jax.experimental.pallas import tpu as pltpu


# ----------------------------------------------------------------------------
# Deterministic "gaussian" kernel, same math as the PyTorch kernel_gauss()
# ----------------------------------------------------------------------------
def gauss_kernel_np(size=5, sigma=2.0):
    if size % 2 != 1:
        raise ValueError("kernel size must be uneven")
    grid = np.float32(np.mgrid[0:size, 0:size].T)                   # (s, s, 2)
    gaussian = lambda x: np.exp((x - size // 2) ** 2 / (-2 * sigma ** 2)) ** 2
    kernel = np.sum(gaussian(grid), axis=2)                          # (s, s)
    kernel = kernel / np.sum(kernel)
    return np.asarray(kernel, dtype=np.float32)


def separable_taps_np(size=5, sigma=2.0):
    """1-D taps a with kernel2d[i, j] == a[i] + a[j] (the kernel is rank-2)."""
    g = np.exp(-((np.arange(size, dtype=np.float64) - size // 2) ** 2)
               / (sigma ** 2))
    a = g / (2.0 * size * np.sum(g))
    k2d = gauss_kernel_np(size, sigma)
    if not np.allclose(a[:, None] + a[None, :], k2d, rtol=1e-4, atol=1e-6):
        raise ValueError("gaussian kernel is not rank-2 separable (unexpected)")
    return tuple(float(v) for v in a)


# ----------------------------------------------------------------------------
# Host-side (numpy) matrices: clamp-baked horizontal bands + 2x2 pool selectors
# ----------------------------------------------------------------------------
def band_matrices_np(q, taps):
    """(q, q) banded matrices with replicate ("edge") clamping baked in.

    (row @ wt)[x]  = sum_j taps[j] * row[clip(x + j - r, 0, q-1)]
    (row @ box)[x] = sum_j           row[clip(x + j - r, 0, q-1)]
    """
    ks = len(taps)
    r = ks // 2
    wt = np.zeros((q, q), np.float32)
    box = np.zeros((q, q), np.float32)
    for x in range(q):
        for j in range(ks):
            s = min(max(x + j - r, 0), q - 1)
            wt[s, x] += np.float32(taps[j])
            box[s, x] += np.float32(1.0)
    return wt, box


def pool_cols_np(q):
    """(q, q//2): 0.5 where src_col // 2 == dst_col (column-pair average)."""
    m = np.zeros((q, q // 2), np.float32)
    for s in range(q):
        m[s, s // 2] = 0.5
    return m


def pool_rows_np(p):
    """(p//2, p): 0.5 where src_row // 2 == dst_row (row-pair average)."""
    m = np.zeros((p // 2, p), np.float32)
    for s in range(p):
        m[s // 2, s] = 0.5
    return m


# ----------------------------------------------------------------------------
# Small helpers
# ----------------------------------------------------------------------------
def _tree_sum(terms):
    """Balanced-tree sum (short f32 dependence chains for VALU ILP)."""
    terms = list(terms)
    while len(terms) > 1:
        nxt = [terms[i] + terms[i + 1] for i in range(0, len(terms) - 1, 2)]
        if len(terms) % 2 == 1:
            nxt.append(terms[-1])
        terms = nxt
    return terms[0]


def _padded_rows(p):
    """Rows of the replicate-padded slab: >= p+4, rounded up to 8 sublanes."""
    return ((p + 4 + 7) // 8) * 8


def _vmem_capacity_bytes():
    try:
        return int(pltpu.get_tpu_info().vmem_capacity_bytes)
    except Exception:
        return 64 * 1024 * 1024          # conservative: v7x physical VMEM


def _pick_plane_block(nc, h, w, vmem_budget_bytes, max_planes=8, live_mult=36):
    """Planes per grid step: fit the ~live_mult x plane-bytes working set in
    the VMEM budget, cap at max_planes, prefer >= 4 grid steps (megacore)."""
    per_plane_bytes = h * w * 4
    cap = max(1, vmem_budget_bytes // (live_mult * per_plane_bytes))
    cap = min(cap, max_planes, nc)
    best = 1
    for b in range(1, cap + 1):
        if nc % b == 0:
            best = b
    while best > 1 and nc // best < 4:
        nxt = best - 1
        while nxt > 1 and nc % nxt != 0:
            nxt -= 1
        best = nxt
    return best


# ----------------------------------------------------------------------------
# The fused kernel: all pyramid levels + residual L1 + MSE for one plane batch
# ----------------------------------------------------------------------------
def _laploss_kernel(o_ref, t_ref, *refs, planes, height, width,
                    max_levels, taps):
    *mat_refs, sums_ref = refs
    B = planes
    ks = len(taps)

    # Stack output/target planes: [0:B] = output, [B:2B] = target.
    cur = jnp.concatenate([o_ref[...], t_ref[...]], axis=0)   # (2B, H, W) f32

    # Fused MSE partial: reuses the full-resolution planes already in VMEM.
    d0 = cur[:B] - cur[B:]
    l2_part = jnp.sum(d0 * d0)

    parts = []
    p, q = height, width
    for lvl in range(max_levels):
        rhs_ref = mat_refs[3 * lvl + 0]   # (q, 2q)   [H_wt | H_box], bf16
        sc_ref = mat_refs[3 * lvl + 1]    # (q, q//2) column-pair avg, bf16
        srt_ref = mat_refs[3 * lvl + 2]   # (p//2, p) row-pair avg, bf16

        # Replicate row padding to a multiple of 8 rows (layout-free reshapes).
        P = _padded_rows(p)
        top = cur[:, :1, :]
        bot = cur[:, p - 1:p, :]
        curp = jnp.concatenate([top, top, cur] + [bot] * (P - p - 2), axis=1)

        # Horizontal blur halves: ONE wide bf16 matmul per level.
        flat = curp.reshape(2 * B * P, q).astype(jnp.bfloat16)
        h3 = jnp.dot(flat, rhs_ref[...],
                     preferred_element_type=jnp.float32
                     ).reshape(2 * B, P, 2 * q)
        # TODO(synk): for W >= ~256 replace the dense band matmul with 5
        # pltpu.roll lane shifts + boundary-column fixups (O(5) MACs/elem).
        hwt = h3[:, :, :q]
        hbox = h3[:, :, q:]

        # Vertical 5-tap half (replicate handled by the padded rows).
        blur = (_tree_sum([taps[i] * hbox[:, i:i + p, :] for i in range(ks)])
                + _tree_sum([hwt[:, i:i + p, :] for i in range(ks)]))

        # Laplacian-level L1 partial.
        lap = cur - blur
        parts.append(jnp.sum(jnp.abs(lap[:B] - lap[B:])))

        # 2x2 average pool -> next level: one column-pool matmul over all
        # planes + one batched row-pool einsum (no per-plane loops/concats).
        colp = jnp.dot(blur.reshape(2 * B * p, q).astype(jnp.bfloat16),
                       sc_ref[...],
                       preferred_element_type=jnp.float32
                       ).reshape(2 * B, p, q // 2)
        srt_b = jnp.broadcast_to(srt_ref[...][None, :, :], (2 * B, p // 2, p))
        cur = jnp.einsum('brp,bpc->brc', srt_b, colp.astype(jnp.bfloat16),
                         preferred_element_type=jnp.float32)
        p, q = p // 2, q // 2
        # TODO(synk): for deep levels (q < 128) pack the plane dim into lanes
        # instead of running sub-vreg slabs / tiny matmuls.

    # Low-pass residual level of the pyramid (fused; never leaves VMEM).
    parts.append(jnp.sum(jnp.abs(cur[:B] - cur[B:])))
    parts.append(l2_part)

    n = max_levels + 2
    lane = jax.lax.broadcasted_iota(jnp.int32, (1, n), 1)
    row = jnp.zeros((1, n), jnp.float32)
    for idx, s in enumerate(parts):
        row = row + jnp.where(lane == idx, s, jnp.float32(0.0))
    sums_ref[0] = row


# ----------------------------------------------------------------------------
# Wrapper
# ----------------------------------------------------------------------------
class LapLossPallas:
    """Pallas-TPU forward pass of the PyTorch LapLoss module."""

    def __init__(self, max_levels=5, k_size=5, sigma=2.0, n_channels=1):
        self.max_levels = max_levels
        self.n_channels = n_channels
        self.kernel2d = gauss_kernel_np(size=k_size, sigma=sigma)
        self.taps = separable_taps_np(size=k_size, sigma=sigma)
        self._mat_cache = {}

    def _level_matrices(self, H, W):
        key = (H, W)
        if key not in self._mat_cache:
            mats = []
            p, q = H, W
            for _ in range(self.max_levels):
                wt, box = band_matrices_np(q, self.taps)
                rhs = np.concatenate([wt, box], axis=1)          # (q, 2q)
                mats.append(jnp.asarray(rhs, dtype=jnp.bfloat16))
                mats.append(jnp.asarray(pool_cols_np(q), dtype=jnp.bfloat16))
                mats.append(jnp.asarray(pool_rows_np(p), dtype=jnp.bfloat16))
                p, q = p // 2, q // 2
            self._mat_cache[key] = mats
        mats = self._mat_cache[key]
        specs = [pl.BlockSpec(tuple(m.shape), lambda i: (0, 0)) for m in mats]
        return mats, specs

    def _cost_estimate(self, NC, H, W, G):
        flops = 0
        p, q = H, W
        for _ in range(self.max_levels):
            P = _padded_rows(p)
            flops += 2 * (2 * NC) * P * q * (2 * q)           # horizontal blur
            flops += 2 * (2 * NC) * p * q * (q // 2)          # column pool
            flops += 2 * (2 * NC) * (p // 2) * p * (q // 2)   # row pool
            flops += 14 * (2 * NC) * p * q                    # vertical + misc
            p, q = p // 2, q // 2
        n_out = self.max_levels + 2
        bytes_accessed = 2 * NC * H * W * 4 + G * n_out * 4
        return pl.CostEstimate(flops=int(flops), transcendentals=0,
                               bytes_accessed=int(bytes_accessed))

    def __call__(self, output, target):
        # layout: output/target are NCHW float32 (PyTorch convention)
        N, C, H, W = output.shape
        assert C == self.n_channels, "n_channels must match input channels"
        L = self.max_levels
        assert H % (1 << L) == 0 and W % (1 << L) == 0, (
            "spatial dims must be divisible by 2**max_levels")
        NC = N * C
        o = output.reshape(NC, H, W).astype(jnp.float32)
        t = target.reshape(NC, H, W).astype(jnp.float32)

        vmem_cap = _vmem_capacity_bytes()
        vmem_limit = int(min(vmem_cap * 3 // 4, 100 * (1 << 20)))
        # TODO(synk): for very large planes (one plane's level-0 working set
        # beyond the budget, e.g. >1k^2 on v7x) add H-tiling with a 2-row blur
        # halo via an inner pltpu.emit_pipeline.
        B = _pick_plane_block(NC, H, W, int(vmem_limit * 0.8))
        G = NC // B
        n_out = L + 2

        mats, mat_specs = self._level_matrices(H, W)
        kern = functools.partial(
            _laploss_kernel, planes=B, height=H, width=W,
            max_levels=L, taps=self.taps)
        partials = pl.pallas_call(
            kern,
            out_shape=jax.ShapeDtypeStruct((G, 1, n_out), jnp.float32),
            grid=(G,),
            in_specs=[pl.BlockSpec((B, H, W), lambda i: (i, 0, 0)),
                      pl.BlockSpec((B, H, W), lambda i: (i, 0, 0))] + mat_specs,
            out_specs=pl.BlockSpec((1, 1, n_out), lambda i: (i, 0, 0)),
            compiler_params=pltpu.CompilerParams(
                dimension_semantics=("parallel",),
                vmem_limit_bytes=vmem_limit),
            cost_estimate=self._cost_estimate(NC, H, W, G),
        )(o, t, *mats)

        sums = jnp.sum(partials, axis=(0, 1))                 # (L+2,)
        loss = jnp.float32(0.0)
        h, w = H, W
        for l in range(L):
            loss = loss + sums[l] / jnp.float32(NC * h * w)   # F.l1_loss mean
            h, w = h // 2, w // 2
        loss = loss + sums[L] / jnp.float32(NC * h * w)       # residual level
        loss = loss + sums[L + 1] / jnp.float32(NC * H * W)   # nn.MSELoss mean
        return loss


# ----------------------------------------------------------------------------
# Pure-JAX reference (direct 25-tap conv, no Pallas) for correctness check
# ----------------------------------------------------------------------------
def _ref_lap_loss(output, target, kernel2d, max_levels):
    k = jnp.asarray(kernel2d, jnp.float32)
    ks = k.shape[0]
    r = ks // 2

    def conv_gauss(img):
        H, W = img.shape[2], img.shape[3]
        p = jnp.pad(img, ((0, 0), (0, 0), (r, r), (r, r)), mode="edge")
        acc = jnp.zeros_like(img)
        for ki in range(ks):
            for kj in range(ks):
                acc = acc + k[ki, kj] * p[:, :, ki:ki + H, kj:kj + W]
        return acc

    def pool(x):
        N, C, H, W = x.shape
        return x.reshape(N, C, H // 2, 2, W // 2, 2).mean(axis=(3, 5))

    def pyramid(img):
        cur, pyr = img, []
        for _ in range(max_levels):
            b = conv_gauss(cur)
            pyr.append(cur - b)
            cur = pool(b)
        pyr.append(cur)
        return pyr

    po, pt = pyramid(output), pyramid(target)
    lap1 = sum(jnp.mean(jnp.abs(a - b)) for a, b in zip(po, pt))
    l2 = jnp.mean((output - target) ** 2)
    return lap1 + l2


if __name__ == "__main__":
    # 64x64 so that 5 pyramid levels are valid for the PyTorch module
    # (replicate pad of 2 requires every blurred level to be wider than 2).
    N, C, H, W = 2, 4, 64, 64
    key = jax.random.PRNGKey(0)
    k1, k2 = jax.random.split(key)
    out = jax.random.normal(k1, (N, C, H, W), dtype=jnp.float32)
    tgt = jax.random.normal(k2, (N, C, H, W), dtype=jnp.float32)

    loss_fn = LapLossPallas(max_levels=5, k_size=5, sigma=2.0, n_channels=C)
    loss = jax.block_until_ready(loss_fn(out, tgt))

    # bf16 MXU operands (f32 accumulation) -> tolerance relaxed vs pure f32.
    ref = jax.block_until_ready(_ref_lap_loss(out, tgt, loss_fn.kernel2d, 5))
    np.testing.assert_allclose(np.asarray(loss), np.asarray(ref),
                               rtol=2e-2, atol=2e-2)
    print("KERNEL_OK")
</pallas_src>

<mosaic_0001>
module attributes {stable_mosaic.version = 11 : i64} {
  func.func @_laploss_kernel(%arg0: i32, %arg1: memref<2x64x64xf32, #tpu.memory_space<vmem>>, %arg2: memref<2x64x64xf32, #tpu.memory_space<vmem>>, %arg3: memref<64x128xbf16, #tpu.memory_space<vmem>>, %arg4: memref<64x32xbf16, #tpu.memory_space<vmem>>, %arg5: memref<32x64xbf16, #tpu.memory_space<vmem>>, %arg6: memref<32x64xbf16, #tpu.memory_space<vmem>>, %arg7: memref<32x16xbf16, #tpu.memory_space<vmem>>, %arg8: memref<16x32xbf16, #tpu.memory_space<vmem>>, %arg9: memref<16x32xbf16, #tpu.memory_space<vmem>>, %arg10: memref<16x8xbf16, #tpu.memory_space<vmem>>, %arg11: memref<8x16xbf16, #tpu.memory_space<vmem>>, %arg12: memref<8x16xbf16, #tpu.memory_space<vmem>>, %arg13: memref<8x4xbf16, #tpu.memory_space<vmem>>, %arg14: memref<4x8xbf16, #tpu.memory_space<vmem>>, %arg15: memref<4x8xbf16, #tpu.memory_space<vmem>>, %arg16: memref<4x2xbf16, #tpu.memory_space<vmem>>, %arg17: memref<2x4xbf16, #tpu.memory_space<vmem>>, %arg18: memref<1x1x7xf32, #tpu.memory_space<vmem>>) attributes {dimension_semantics = [#tpu.dimension_semantics<parallel>], iteration_bounds = array<i64: 4>, scalar_prefetch = 0 : i64, scratch_operands = 0 : i64, tpu.core_type = #tpu.core_type<tc>, window_params = [{transform_indices = @transform_0, window_bounds = array<i64: 2, 64, 64>}, {transform_indices = @transform_1, window_bounds = array<i64: 2, 64, 64>}, {pipeline_mode = #tpu.pipeline_mode<synchronous>, transform_indices = @transform_2, window_bounds = array<i64: 64, 128>}, {pipeline_mode = #tpu.pipeline_mode<synchronous>, transform_indices = @transform_3, window_bounds = array<i64: 64, 32>}, {pipeline_mode = #tpu.pipeline_mode<synchronous>, transform_indices = @transform_4, window_bounds = array<i64: 32, 64>}, {pipeline_mode = #tpu.pipeline_mode<synchronous>, transform_indices = @transform_5, window_bounds = array<i64: 32, 64>}, {pipeline_mode = #tpu.pipeline_mode<synchronous>, transform_indices = @transform_6, window_bounds = array<i64: 32, 16>}, {pipeline_mode = #tpu.pipeline_mode<synchronous>, transform_indices = @transform_7, window_bounds = array<i64: 16, 32>}, {pipeline_mode = #tpu.pipeline_mode<synchronous>, transform_indices = @transform_8, window_bounds = array<i64: 16, 32>}, {pipeline_mode = #tpu.pipeline_mode<synchronous>, transform_indices = @transform_9, window_bounds = array<i64: 16, 8>}, {pipeline_mode = #tpu.pipeline_mode<synchronous>, transform_indices = @transform_10, window_bounds = array<i64: 8, 16>}, {pipeline_mode = #tpu.pipeline_mode<synchronous>, transform_indices = @transform_11, window_bounds = array<i64: 8, 16>}, {pipeline_mode = #tpu.pipeline_mode<synchronous>, transform_indices = @transform_12, window_bounds = array<i64: 8, 4>}, {pipeline_mode = #tpu.pipeline_mode<synchronous>, transform_indices = @transform_13, window_bounds = array<i64: 4, 8>}, {pipeline_mode = #tpu.pipeline_mode<synchronous>, transform_indices = @transform_14, window_bounds = array<i64: 4, 8>}, {pipeline_mode = #tpu.pipeline_mode<synchronous>, transform_indices = @transform_15, window_bounds = array<i64: 4, 2>}, {pipeline_mode = #tpu.pipeline_mode<synchronous>, transform_indices = @transform_16, window_bounds = array<i64: 2, 4>}, {transform_indices = @transform_17, window_bounds = array<i64: 1, 1, 7>}]} {
    %c0 = arith.constant 0 : index
    %c0_0 = arith.constant 0 : index
    %c0_1 = arith.constant 0 : index
    %0 = vector.load %arg1[%c0, %c0_0, %c0_1] : memref<2x64x64xf32, #tpu.memory_space<vmem>>, vector<2x64x64xf32>
    %c0_2 = arith.constant 0 : index
    %c0_3 = arith.constant 0 : index
    %c0_4 = arith.constant 0 : index
    %1 = vector.load %arg2[%c0_2, %c0_3, %c0_4] : memref<2x64x64xf32, #tpu.memory_space<vmem>>, vector<2x64x64xf32>
    %2 = tpu.concatenate %0, %1 in 0 : vector<2x64x64xf32>, vector<2x64x64xf32> -> vector<4x64x64xf32>
    %3 = vector.extract_strided_slice %2 {offsets = [0, 0, 0], sizes = [2, 64, 64], strides = [1, 1, 1]} : vector<4x64x64xf32> to vector<2x64x64xf32>
    %4 = vector.extract_strided_slice %2 {offsets = [2, 0, 0], sizes = [2, 64, 64], strides = [1, 1, 1]} : vector<4x64x64xf32> to vector<2x64x64xf32>
    %5 = arith.subf %3, %4 : vector<2x64x64xf32>
    %6 = arith.mulf %5, %5 : vector<2x64x64xf32>
    %7 = vector.shape_cast %6 : vector<2x64x64xf32> to vector<1x2x64x64xf32>
    %cst = arith.constant dense<0.000000e+00> : vector<1xf32>
    %8 = vector.multi_reduction <add>, %7, %cst [1, 2, 3] : vector<1x2x64x64xf32> to vector<1xf32>
    %9 = vector.shape_cast %8 : vector<1xf32> to vector<1x1x1x1xf32>
    %10 = vector.extract %9[0, 0, 0, 0] : f32 from vector<1x1x1x1xf32>
    %11 = vector.extract_strided_slice %2 {offsets = [0, 0, 0], sizes = [4, 1, 64], strides = [1, 1, 1]} : vector<4x64x64xf32> to vector<4x1x64xf32>
    %12 = vector.extract_strided_slice %2 {offsets = [0, 63, 0], sizes = [4, 1, 64], strides = [1, 1, 1]} : vector<4x64x64xf32> to vector<4x1x64xf32>
    %13 = tpu.concatenate %11, %11, %2, %12, %12, %12, %12, %12, %12 in 1 : vector<4x1x64xf32>, vector<4x1x64xf32>, vector<4x64x64xf32>, vector<4x1x64xf32>, vector<4x1x64xf32>, vector<4x1x64xf32>, vector<4x1x64xf32>, vector<4x1x64xf32>, vector<4x1x64xf32> -> vector<4x72x64xf32>
    %14 = vector.shape_cast %13 : vector<4x72x64xf32> to vector<288x64xf32>
    %15 = arith.truncf %14 : vector<288x64xf32> to vector<288x64xbf16>
    %c0_5 = arith.constant 0 : index
    %c0_6 = arith.constant 0 : index
    %16 = vector.load %arg3[%c0_5, %c0_6] : memref<64x128xbf16, #tpu.memory_space<vmem>>, vector<64x128xbf16>
    %cst_7 = arith.constant dense<0.000000e+00> : vector<288x128xf32>
    %17 = tpu.matmul %15, %16, %cst_7 {dimension_numbers = #tpu.dot_dimension_numbers<[1], [0], [0], [1], [0, 0, 1, 1], [], []>} : vector<288x64xbf16>, vector<64x128xbf16>, vector<288x128xf32> -> vector<288x128xf32>
    %18 = vector.shape_cast %17 : vector<288x128xf32> to vector<4x72x128xf32>
    %19 = vector.extract_strided_slice %18 {offsets = [0, 0, 0], sizes = [4, 72, 64], strides = [1, 1, 1]} : vector<4x72x128xf32> to vector<4x72x64xf32>
    %20 = vector.extract_strided_slice %18 {offsets = [0, 0, 64], sizes = [4, 72, 64], strides = [1, 1, 1]} : vector<4x72x128xf32> to vector<4x72x64xf32>
    %21 = vector.extract_strided_slice %20 {offsets = [0, 0, 0], sizes = [4, 64, 64], strides = [1, 1, 1]} : vector<4x72x64xf32> to vector<4x64x64xf32>
    %cst_8 = arith.constant 0.011170336 : f32
    %22 = vector.broadcast %cst_8 : f32 to vector<4x64x64xf32>
    %23 = arith.mulf %22, %21 : vector<4x64x64xf32>
    %24 = vector.extract_strided_slice %20 {offsets = [0, 1, 0], sizes = [4, 64, 64], strides = [1, 1, 1]} : vector<4x72x64xf32> to vector<4x64x64xf32>
    %cst_9 = arith.constant 0.0236476026 : f32
    %25 = vector.broadcast %cst_9 : f32 to vector<4x64x64xf32>
    %26 = arith.mulf %25, %24 : vector<4x64x64xf32>
    %27 = vector.extract_strided_slice %20 {offsets = [0, 2, 0], sizes = [4, 64, 64], strides = [1, 1, 1]} : vector<4x72x64xf32> to vector<4x64x64xf32>
    %cst_10 = arith.constant 0.0303641222 : f32
    %28 = vector.broadcast %cst_10 : f32 to vector<4x64x64xf32>
    %29 = arith.mulf %28, %27 : vector<4x64x64xf32>
    %30 = vector.extract_strided_slice %20 {offsets = [0, 3, 0], sizes = [4, 64, 64], strides = [1, 1, 1]} : vector<4x72x64xf32> to vector<4x64x64xf32>
    %cst_11 = arith.constant 0.0236476026 : f32
    %31 = vector.broadcast %cst_11 : f32 to vector<4x64x64xf32>
    %32 = arith.mulf %31, %30 : vector<4x64x64xf32>
    %33 = vector.extract_strided_slice %20 {offsets = [0, 4, 0], sizes = [4, 64, 64], strides = [1, 1, 1]} : vector<4x72x64xf32> to vector<4x64x64xf32>
    %cst_12 = arith.constant 0.011170336 : f32
    %34 = vector.broadcast %cst_12 : f32 to vector<4x64x64xf32>
    %35 = arith.mulf %34, %33 : vector<4x64x64xf32>
    %36 = arith.addf %23, %26 : vector<4x64x64xf32>
    %37 = arith.addf %29, %32 : vector<4x64x64xf32>
    %38 = arith.addf %36, %37 : vector<4x64x64xf32>
    %39 = arith.addf %38, %35 : vector<4x64x64xf32>
    %40 = vector.extract_strided_slice %19 {offsets = [0, 0, 0], sizes = [4, 64, 64], strides = [1, 1, 1]} : vector<4x72x64xf32> to vector<4x64x64xf32>
    %41 = vector.extract_strided_slice %19 {offsets = [0, 1, 0], sizes = [4, 64, 64], strides = [1, 1, 1]} : vector<4x72x64xf32> to vector<4x64x64xf32>
    %42 = vector.extract_strided_slice %19 {offsets = [0, 2, 0], sizes = [4, 64, 64], strides = [1, 1, 1]} : vector<4x72x64xf32> to vector<4x64x64xf32>
    %43 = vector.extract_strided_slice %19 {offsets = [0, 3, 0], sizes = [4, 64, 64], strides = [1, 1, 1]} : vector<4x72x64xf32> to vector<4x64x64xf32>
    %44 = vector.extract_strided_slice %19 {offsets = [0, 4, 0], sizes = [4, 64, 64], strides = [1, 1, 1]} : vector<4x72x64xf32> to vector<4x64x64xf32>
    %45 = arith.addf %40, %41 : vector<4x64x64xf32>
    %46 = arith.addf %42, %43 : vector<4x64x64xf32>
    %47 = arith.addf %45, %46 : vector<4x64x64xf32>
    %48 = arith.addf %47, %44 : vector<4x64x64xf32>
    %49 = arith.addf %39, %48 : vector<4x64x64xf32>
    %50 = arith.subf %2, %49 : vector<4x64x64xf32>
    %51 = vector.extract_strided_slice %50 {offsets = [0, 0, 0], sizes = [2, 64, 64], strides = [1, 1, 1]} : vector<4x64x64xf32> to vector<2x64x64xf32>
    %52 = vector.extract_strided_slice %50 {offsets = [2, 0, 0], sizes = [2, 64, 64], strides = [1, 1, 1]} : vector<4x64x64xf32> to vector<2x64x64xf32>
    %53 = arith.subf %51, %52 : vector<2x64x64xf32>
    %54 = math.absf %53 : vector<2x64x64xf32>
    %55 = vector.shape_cast %54 : vector<2x64x64xf32> to vector<1x2x64x64xf32>
    %cst_13 = arith.constant dense<0.000000e+00> : vector<1xf32>
    %56 = vector.multi_reduction <add>, %55, %cst_13 [1, 2, 3] : vector<1x2x64x64xf32> to vector<1xf32>
    %57 = vector.shape_cast %56 : vector<1xf32> to vector<1x1x1x1xf32>
    %58 = vector.extract %57[0, 0, 0, 0] : f32 from vector<1x1x1x1xf32>
    %59 = vector.shape_cast %49 : vector<4x64x64xf32> to vector<256x64xf32>
    %60 = arith.truncf %59 : vector<256x64xf32> to vector<256x64xbf16>
    %c0_14 = arith.constant 0 : index
    %c0_15 = arith.constant 0 : index
    %61 = vector.load %arg4[%c0_14, %c0_15] : memref<64x32xbf16, #tpu.memory_space<vmem>>, vector<64x32xbf16>
    %cst_16 = arith.constant dense<0.000000e+00> : vector<256x32xf32>
    %62 = tpu.matmul %60, %61, %cst_16 {dimension_numbers = #tpu.dot_dimension_numbers<[1], [0], [0], [1], [0, 0, 1, 1], [], []>} : vector<256x64xbf16>, vector<64x32xbf16>, vector<256x32xf32> -> vector<256x32xf32>
    %63 = vector.shape_cast %62 : vector<256x32xf32> to vector<4x64x32xf32>
    %c0_17 = arith.constant 0 : index
    %c0_18 = arith.constant 0 : index
    %64 = vector.load %arg5[%c0_17, %c0_18] : memref<32x64xbf16, #tpu.memory_space<vmem>>, vector<32x64xbf16>
    %65 = vector.shape_cast %64 : vector<32x64xbf16> to vector<1x32x64xbf16>
    %66 = vector.shape_cast %65 : vector<1x32x64xbf16> to vector<1x32x64xbf16>
    %67 = vector.broadcast %66 : vector<1x32x64xbf16> to vector<4x32x64xbf16>
    %68 = arith.truncf %63 : vector<4x64x32xf32> to vector<4x64x32xbf16>
    "tpu.trace_start"() <{level = 10 : i32, message = "brp,bpc->brc"}> : () -> ()
    %cst_19 = arith.constant dense<0.000000e+00> : vector<4x32x32xf32>
    %69 = tpu.matmul %67, %68, %cst_19 {dimension_numbers = #tpu.dot_dimension_numbers<[2], [1], [1], [2], [0, 0, 0, 1, 1, 2], [0], [0]>} : vector<4x32x64xbf16>, vector<4x64x32xbf16>, vector<4x32x32xf32> -> vector<4x32x32xf32>
    "tpu.trace_stop"() : () -> ()
    %70 = vector.extract_strided_slice %69 {offsets = [0, 0, 0], sizes = [4, 1, 32], strides = [1, 1, 1]} : vector<4x32x32xf32> to vector<4x1x32xf32>
    %71 = vector.extract_strided_slice %69 {offsets = [0, 31, 0], sizes = [4, 1, 32], strides = [1, 1, 1]} : vector<4x32x32xf32> to vector<4x1x32xf32>
    %72 = tpu.concatenate %70, %70, %69, %71, %71, %71, %71, %71, %71 in 1 : vector<4x1x32xf32>, vector<4x1x32xf32>, vector<4x32x32xf32>, vector<4x1x32xf32>, vector<4x1x32xf32>, vector<4x1x32xf32>, vector<4x1x32xf32>, vector<4x1x32xf32>, vector<4x1x32xf32> -> vector<4x40x32xf32>
    %73 = vector.shape_cast %72 : vector<4x40x32xf32> to vector<160x32xf32>
    %74 = arith.truncf %73 : vector<160x32xf32> to vector<160x32xbf16>
    %c0_20 = arith.constant 0 : index
    %c0_21 = arith.constant 0 : index
    %75 = vector.load %arg6[%c0_20, %c0_21] : memref<32x64xbf16, #tpu.memory_space<vmem>>, vector<32x64xbf16>
    %cst_22 = arith.constant dense<0.000000e+00> : vector<160x64xf32>
    %76 = tpu.matmul %74, %75, %cst_22 {dimension_numbers = #tpu.dot_dimension_numbers<[1], [0], [0], [1], [0, 0, 1, 1], [], []>} : vector<160x32xbf16>, vector<32x64xbf16>, vector<160x64xf32> -> vector<160x64xf32>
    %77 = vector.shape_cast %76 : vector<160x64xf32> to vector<4x40x64xf32>
    %78 = vector.extract_strided_slice %77 {offsets = [0, 0, 0], sizes = [4, 40, 32], strides = [1, 1, 1]} : vector<4x40x64xf32> to vector<4x40x32xf32>
    %79 = vector.extract_strided_slice %77 {offsets = [0, 0, 32], sizes = [4, 40, 32], strides = [1, 1, 1]} : vector<4x40x64xf32> to vector<4x40x32xf32>
    %80 = vector.extract_strided_slice %79 {offsets = [0, 0, 0], sizes = [4, 32, 32], strides = [1, 1, 1]} : vector<4x40x32xf32> to vector<4x32x32xf32>
    %cst_23 = arith.constant 0.011170336 : f32
    %81 = vector.broadcast %cst_23 : f32 to vector<4x32x32xf32>
    %82 = arith.mulf %81, %80 : vector<4x32x32xf32>
    %83 = vector.extract_strided_slice %79 {offsets = [0, 1, 0], sizes = [4, 32, 32], strides = [1, 1, 1]} : vector<4x40x32xf32> to vector<4x32x32xf32>
    %cst_24 = arith.constant 0.0236476026 : f32
    %84 = vector.broadcast %cst_24 : f32 to vector<4x32x32xf32>
    %85 = arith.mulf %84, %83 : vector<4x32x32xf32>
    %86 = vector.extract_strided_slice %79 {offsets = [0, 2, 0], sizes = [4, 32, 32], strides = [1, 1, 1]} : vector<4x40x32xf32> to vector<4x32x32xf32>
    %cst_25 = arith.constant 0.0303641222 : f32
    %87 = vector.broadcast %cst_25 : f32 to vector<4x32x32xf32>
    %88 = arith.mulf %87, %86 : vector<4x32x32xf32>
    %89 = vector.extract_strided_slice %79 {offsets = [0, 3, 0], sizes = [4, 32, 32], strides = [1, 1, 1]} : vector<4x40x32xf32> to vector<4x32x32xf32>
    %cst_26 = arith.constant 0.0236476026 : f32
    %90 = vector.broadcast %cst_26 : f32 to vector<4x32x32xf32>
    %91 = arith.mulf %90, %89 : vector<4x32x32xf32>
    %92 = vector.extract_strided_slice %79 {offsets = [0, 4, 0], sizes = [4, 32, 32], strides = [1, 1, 1]} : vector<4x40x32xf32> to vector<4x32x32xf32>
    %cst_27 = arith.constant 0.011170336 : f32
    %93 = vector.broadcast %cst_27 : f32 to vector<4x32x32xf32>
    %94 = arith.mulf %93, %92 : vector<4x32x32xf32>
    %95 = arith.addf %82, %85 : vector<4x32x32xf32>
    %96 = arith.addf %88, %91 : vector<4x32x32xf32>
    %97 = arith.addf %95, %96 : vector<4x32x32xf32>
    %98 = arith.addf %97, %94 : vector<4x32x32xf32>
    %99 = vector.extract_strided_slice %78 {offsets = [0, 0, 0], sizes = [4, 32, 32], strides = [1, 1, 1]} : vector<4x40x32xf32> to vector<4x32x32xf32>
    %100 = vector.extract_strided_slice %78 {offsets = [0, 1, 0], sizes = [4, 32, 32], strides = [1, 1, 1]} : vector<4x40x32xf32> to vector<4x32x32xf32>
    %101 = vector.extract_strided_slice %78 {offsets = [0, 2, 0], sizes = [4, 32, 32], strides = [1, 1, 1]} : vector<4x40x32xf32> to vector<4x32x32xf32>
    %102 = vector.extract_strided_slice %78 {offsets = [0, 3, 0], sizes = [4, 32, 32], strides = [1, 1, 1]} : vector<4x40x32xf32> to vector<4x32x32xf32>
    %103 = vector.extract_strided_slice %78 {offsets = [0, 4, 0], sizes = [4, 32, 32], strides = [1, 1, 1]} : vector<4x40x32xf32> to vector<4x32x32xf32>
    %104 = arith.addf %99, %100 : vector<4x32x32xf32>
    %105 = arith.addf %101, %102 : vector<4x32x32xf32>
    %106 = arith.addf %104, %105 : vector<4x32x32xf32>
    %107 = arith.addf %106, %103 : vector<4x32x32xf32>
    %108 = arith.addf %98, %107 : vector<4x32x32xf32>
    %109 = arith.subf %69, %108 : vector<4x32x32xf32>
    %110 = vector.extract_strided_slice %109 {offsets = [0, 0, 0], sizes = [2, 32, 32], strides = [1, 1, 1]} : vector<4x32x32xf32> to vector<2x32x32xf32>
    %111 = vector.extract_strided_slice %109 {offsets = [2, 0, 0], sizes = [2, 32, 32], strides = [1, 1, 1]} : vector<4x32x32xf32> to vector<2x32x32xf32>
    %112 = arith.subf %110, %111 : vector<2x32x32xf32>
    %113 = math.absf %112 : vector<2x32x32xf32>
    %114 = vector.shape_cast %113 : vector<2x32x32xf32> to vector<1x2x32x32xf32>
    %cst_28 = arith.constant dense<0.000000e+00> : vector<1xf32>
    %115 = vector.multi_reduction <add>, %114, %cst_28 [1, 2, 3] : vector<1x2x32x32xf32> to vector<1xf32>
    %116 = vector.shape_cast %115 : vector<1xf32> to vector<1x1x1x1xf32>
    %117 = vector.extract %116[0, 0, 0, 0] : f32 from vector<1x1x1x1xf32>
    %118 = vector.shape_cast %108 : vector<4x32x32xf32> to vector<128x32xf32>
    %119 = arith.truncf %118 : vector<128x32xf32> to vector<128x32xbf16>
    %c0_29 = arith.constant 0 : index
    %c0_30 = arith.constant 0 : index
    %120 = vector.load %arg7[%c0_29, %c0_30] : memref<32x16xbf16, #tpu.memory_space<vmem>>, vector<32x16xbf16>
    %cst_31 = arith.constant dense<0.000000e+00> : vector<128x16xf32>
    %121 = tpu.matmul %119, %120, %cst_31 {dimension_numbers = #tpu.dot_dimension_numbers<[1], [0], [0], [1], [0, 0, 1, 1], [], []>} : vector<128x32xbf16>, vector<32x16xbf16>, vector<128x16xf32> -> vector<128x16xf32>
    %122 = vector.shape_cast %121 : vector<128x16xf32> to vector<4x32x16xf32>
    %c0_32 = arith.constant 0 : index
    %c0_33 = arith.constant 0 : index
    %123 = vector.load %arg8[%c0_32, %c0_33] : memref<16x32xbf16, #tpu.memory_space<vmem>>, vector<16x32xbf16>
    %124 = vector.shape_cast %123 : vector<16x32xbf16> to vector<1x16x32xbf16>
    %125 = vector.shape_cast %124 : vector<1x16x32xbf16> to vector<1x16x32xbf16>
    %126 = vector.broadcast %125 : vector<1x16x32xbf16> to vector<4x16x32xbf16>
    %127 = arith.truncf %122 : vector<4x32x16xf32> to vector<4x32x16xbf16>
    "tpu.trace_start"() <{level = 10 : i32, message = "brp,bpc->brc"}> : () -> ()
    %cst_34 = arith.constant dense<0.000000e+00> : vector<4x16x16xf32>
    %128 = tpu.matmul %126, %127, %cst_34 {dimension_numbers = #tpu.dot_dimension_numbers<[2], [1], [1], [2], [0, 0, 0, 1, 1, 2], [0], [0]>} : vector<4x16x32xbf16>, vector<4x32x16xbf16>, vector<4x16x16xf32> -> vector<4x16x16xf32>
    "tpu.trace_stop"() : () -> ()
    %129 = vector.extract_strided_slice %128 {offsets = [0, 0, 0], sizes = [4, 1, 16], strides = [1, 1, 1]} : vector<4x16x16xf32> to vector<4x1x16xf32>
    %130 = vector.extract_strided_slice %128 {offsets = [0, 15, 0], sizes = [4, 1, 16], strides = [1, 1, 1]} : vector<4x16x16xf32> to vector<4x1x16xf32>
    %131 = tpu.concatenate %129, %129, %128, %130, %130, %130, %130, %130, %130 in 1 : vector<4x1x16xf32>, vector<4x1x16xf32>, vector<4x16x16xf32>, vector<4x1x16xf32>, vector<4x1x16xf32>, vector<4x1x16xf32>, vector<4x1x16xf32>, vector<4x1x16xf32>, vector<4x1x16xf32> -> vector<4x24x16xf32>
    %132 = vector.shape_cast %131 : vector<4x24x16xf32> to vector<96x16xf32>
    %133 = arith.truncf %132 : vector<96x16xf32> to vector<96x16xbf16>
    %c0_35 = arith.constant 0 : index
    %c0_36 = arith.constant 0 : index
    %134 = vector.load %arg9[%c0_35, %c0_36] : memref<16x32xbf16, #tpu.memory_space<vmem>>, vector<16x32xbf16>
    %cst_37 = arith.constant dense<0.000000e+00> : vector<96x32xf32>
    %135 = tpu.matmul %133, %134, %cst_37 {dimension_numbers = #tpu.dot_dimension_numbers<[1], [0], [0], [1], [0, 0, 1, 1], [], []>} : vector<96x16xbf16>, vector<16x32xbf16>, vector<96x32xf32> -> vector<96x32xf32>
    %136 = vector.shape_cast %135 : vector<96x32xf32> to vector<4x24x32xf32>
    %137 = vector.extract_strided_slice %136 {offsets = [0, 0, 0], sizes = [4, 24, 16], strides = [1, 1, 1]} : vector<4x24x32xf32> to vector<4x24x16xf32>
    %138 = vector.extract_strided_slice %136 {offsets = [0, 0, 16], sizes = [4, 24, 16], strides = [1, 1, 1]} : vector<4x24x32xf32> to vector<4x24x16xf32>
    %139 = vector.extract_strided_slice %138 {offsets = [0, 0, 0], sizes = [4, 16, 16], strides = [1, 1, 1]} : vector<4x24x16xf32> to vector<4x16x16xf32>
    %cst_38 = arith.constant 0.011170336 : f32
    %140 = vector.broadcast %cst_38 : f32 to vector<4x16x16xf32>
    %141 = arith.mulf %140, %139 : vector<4x16x16xf32>
    %142 = vector.extract_strided_slice %138 {offsets = [0, 1, 0], sizes = [4, 16, 16], strides = [1, 1, 1]} : vector<4x24x16xf32> to vector<4x16x16xf32>
    %cst_39 = arith.constant 0.0236476026 : f32
    %143 = vector.broadcast %cst_39 : f32 to vector<4x16x16xf32>
    %144 = arith.mulf %143, %142 : vector<4x16x16xf32>
    %145 = vector.extract_strided_slice %138 {offsets = [0, 2, 0], sizes = [4, 16, 16], strides = [1, 1, 1]} : vector<4x24x16xf32> to vector<4x16x16xf32>
    %cst_40 = arith.constant 0.0303641222 : f32
    %146 = vector.broadcast %cst_40 : f32 to vector<4x16x16xf32>
    %147 = arith.mulf %146, %145 : vector<4x16x16xf32>
    %148 = vector.extract_strided_slice %138 {offsets = [0, 3, 0], sizes = [4, 16, 16], strides = [1, 1, 1]} : vector<4x24x16xf32> to vector<4x16x16xf32>
    %cst_41 = arith.constant 0.0236476026 : f32
    %149 = vector.broadcast %cst_41 : f32 to vector<4x16x16xf32>
    %150 = arith.mulf %149, %148 : vector<4x16x16xf32>
    %151 = vector.extract_strided_slice %138 {offsets = [0, 4, 0], sizes = [4, 16, 16], strides = [1, 1, 1]} : vector<4x24x16xf32> to vector<4x16x16xf32>
    %cst_42 = arith.constant 0.011170336 : f32
    %152 = vector.broadcast %cst_42 : f32 to vector<4x16x16xf32>
    %153 = arith.mulf %152, %151 : vector<4x16x16xf32>
    %154 = arith.addf %141, %144 : vector<4x16x16xf32>
    %155 = arith.addf %147, %150 : vector<4x16x16xf32>
    %156 = arith.addf %154, %155 : vector<4x16x16xf32>
    %157 = arith.addf %156, %153 : vector<4x16x16xf32>
    %158 = vector.extract_strided_slice %137 {offsets = [0, 0, 0], sizes = [4, 16, 16], strides = [1, 1, 1]} : vector<4x24x16xf32> to vector<4x16x16xf32>
    %159 = vector.extract_strided_slice %137 {offsets = [0, 1, 0], sizes = [4, 16, 16], strides = [1, 1, 1]} : vector<4x24x16xf32> to vector<4x16x16xf32>
    %160 = vector.extract_strided_slice %137 {offsets = [0, 2, 0], sizes = [4, 16, 16], strides = [1, 1, 1]} : vector<4x24x16xf32> to vector<4x16x16xf32>
    %161 = vector.extract_strided_slice %137 {offsets = [0, 3, 0], sizes = [4, 16, 16], strides = [1, 1, 1]} : vector<4x24x16xf32> to vector<4x16x16xf32>
    %162 = vector.extract_strided_slice %137 {offsets = [0, 4, 0], sizes = [4, 16, 16], strides = [1, 1, 1]} : vector<4x24x16xf32> to vector<4x16x16xf32>
    %163 = arith.addf %158, %159 : vector<4x16x16xf32>
    %164 = arith.addf %160, %161 : vector<4x16x16xf32>
    %165 = arith.addf %163, %164 : vector<4x16x16xf32>
    %166 = arith.addf %165, %162 : vector<4x16x16xf32>
    %167 = arith.addf %157, %166 : vector<4x16x16xf32>
    %168 = arith.subf %128, %167 : vector<4x16x16xf32>
    %169 = vector.extract_strided_slice %168 {offsets = [0, 0, 0], sizes = [2, 16, 16], strides = [1, 1, 1]} : vector<4x16x16xf32> to vector<2x16x16xf32>
    %170 = vector.extract_strided_slice %168 {offsets = [2, 0, 0], sizes = [2, 16, 16], strides = [1, 1, 1]} : vector<4x16x16xf32> to vector<2x16x16xf32>
    %171 = arith.subf %169, %170 : vector<2x16x16xf32>
    %172 = math.absf %171 : vector<2x16x16xf32>
    %173 = vector.shape_cast %172 : vector<2x16x16xf32> to vector<1x2x16x16xf32>
    %cst_43 = arith.constant dense<0.000000e+00> : vector<1xf32>
    %174 = vector.multi_reduction <add>, %173, %cst_43 [1, 2, 3] : vector<1x2x16x16xf32> to vector<1xf32>
    %175 = vector.shape_cast %174 : vector<1xf32> to vector<1x1x1x1xf32>
    %176 = vector.extract %175[0, 0, 0, 0] : f32 from vector<1x1x1x1xf32>
    %177 = vector.shape_cast %167 : vector<4x16x16xf32> to vector<64x16xf32>
    %178 = arith.truncf %177 : vector<64x16xf32> to vector<64x16xbf16>
    %c0_44 = arith.constant 0 : index
    %c0_45 = arith.constant 0 : index
    %179 = vector.load %arg10[%c0_44, %c0_45] : memref<16x8xbf16, #tpu.memory_space<vmem>>, vector<16x8xbf16>
    %cst_46 = arith.constant dense<0.000000e+00> : vector<64x8xf32>
    %180 = tpu.matmul %178, %179, %cst_46 {dimension_numbers = #tpu.dot_dimension_numbers<[1], [0], [0], [1], [0, 0, 1, 1], [], []>} : vector<64x16xbf16>, vector<16x8xbf16>, vector<64x8xf32> -> vector<64x8xf32>
    %181 = vector.shape_cast %180 : vector<64x8xf32> to vector<4x16x8xf32>
    %c0_47 = arith.constant 0 : index
    %c0_48 = arith.constant 0 : index
    %182 = vector.load %arg11[%c0_47, %c0_48] : memref<8x16xbf16, #tpu.memory_space<vmem>>, vector<8x16xbf16>
    %183 = vector.shape_cast %182 : vector<8x16xbf16> to vector<1x8x16xbf16>
    %184 = vector.shape_cast %183 : vector<1x8x16xbf16> to vector<1x8x16xbf16>
    %185 = vector.broadcast %184 : vector<1x8x16xbf16> to vector<4x8x16xbf16>
    %186 = arith.truncf %181 : vector<4x16x8xf32> to vector<4x16x8xbf16>
    "tpu.trace_start"() <{level = 10 : i32, message = "brp,bpc->brc"}> : () -> ()
    %cst_49 = arith.constant dense<0.000000e+00> : vector<4x8x8xf32>
    %187 = tpu.matmul %185, %186, %cst_49 {dimension_numbers = #tpu.dot_dimension_numbers<[2], [1], [1], [2], [0, 0, 0, 1, 1, 2], [0], [0]>} : vector<4x8x16xbf16>, vector<4x16x8xbf16>, vector<4x8x8xf32> -> vector<4x8x8xf32>
    "tpu.trace_stop"() : () -> ()
    %188 = vector.extract_strided_slice %187 {offsets = [0, 0, 0], sizes = [4, 1, 8], strides = [1, 1, 1]} : vector<4x8x8xf32> to vector<4x1x8xf32>
    %189 = vector.extract_strided_slice %187 {offsets = [0, 7, 0], sizes = [4, 1, 8], strides = [1, 1, 1]} : vector<4x8x8xf32> to vector<4x1x8xf32>
    %190 = tpu.concatenate %188, %188, %187, %189, %189, %189, %189, %189, %189 in 1 : vector<4x1x8xf32>, vector<4x1x8xf32>, vector<4x8x8xf32>, vector<4x1x8xf32>, vector<4x1x8xf32>, vector<4x1x8xf32>, vector<4x1x8xf32>, vector<4x1x8xf32>, vector<4x1x8xf32> -> vector<4x16x8xf32>
    %191 = vector.shape_cast %190 : vector<4x16x8xf32> to vector<64x8xf32>
    %192 = arith.truncf %191 : vector<64x8xf32> to vector<64x8xbf16>
    %c0_50 = arith.constant 0 : index
    %c0_51 = arith.constant 0 : index
    %193 = vector.load %arg12[%c0_50, %c0_51] : memref<8x16xbf16, #tpu.memory_space<vmem>>, vector<8x16xbf16>
    %cst_52 = arith.constant dense<0.000000e+00> : vector<64x16xf32>
    %194 = tpu.matmul %192, %193, %cst_52 {dimension_numbers = #tpu.dot_dimension_numbers<[1], [0], [0], [1], [0, 0, 1, 1], [], []>} : vector<64x8xbf16>, vector<8x16xbf16>, vector<64x16xf32> -> vector<64x16xf32>
    %195 = vector.shape_cast %194 : vector<64x16xf32> to vector<4x16x16xf32>
    %196 = vector.extract_strided_slice %195 {offsets = [0, 0, 0], sizes = [4, 16, 8], strides = [1, 1, 1]} : vector<4x16x16xf32> to vector<4x16x8xf32>
    %197 = vector.extract_strided_slice %195 {offsets = [0, 0, 8], sizes = [4, 16, 8], strides = [1, 1, 1]} : vector<4x16x16xf32> to vector<4x16x8xf32>
    %198 = vector.extract_strided_slice %197 {offsets = [0, 0, 0], sizes = [4, 8, 8], strides = [1, 1, 1]} : vector<4x16x8xf32> to vector<4x8x8xf32>
    %cst_53 = arith.constant 0.011170336 : f32
    %199 = vector.broadcast %cst_53 : f32 to vector<4x8x8xf32>
    %200 = arith.mulf %199, %198 : vector<4x8x8xf32>
    %201 = vector.extract_strided_slice %197 {offsets = [0, 1, 0], sizes = [4, 8, 8], strides = [1, 1, 1]} : vector<4x16x8xf32> to vector<4x8x8xf32>
    %cst_54 = arith.constant 0.0236476026 : f32
    %202 = vector.broadcast %cst_54 : f32 to vector<4x8x8xf32>
    %203 = arith.mulf %202, %201 : vector<4x8x8xf32>
    %204 = vector.extract_strided_slice %197 {offsets = [0, 2, 0], sizes = [4, 8, 8], strides = [1, 1, 1]} : vector<4x16x8xf32> to vector<4x8x8xf32>
    %cst_55 = arith.constant 0.0303641222 : f32
    %205 = vector.broadcast %cst_55 : f32 to vector<4x8x8xf32>
    %206 = arith.mulf %205, %204 : vector<4x8x8xf32>
    %207 = vector.extract_strided_slice %197 {offsets = [0, 3, 0], sizes = [4, 8, 8], strides = [1, 1, 1]} : vector<4x16x8xf32> to vector<4x8x8xf32>
    %cst_56 = arith.constant 0.0236476026 : f32
    %208 = vector.broadcast %cst_56 : f32 to vector<4x8x8xf32>
    %209 = arith.mulf %208, %207 : vector<4x8x8xf32>
    %210 = vector.extract_strided_slice %197 {offsets = [0, 4, 0], sizes = [4, 8, 8], strides = [1, 1, 1]} : vector<4x16x8xf32> to vector<4x8x8xf32>
    %cst_57 = arith.constant 0.011170336 : f32
    %211 = vector.broadcast %cst_57 : f32 to vector<4x8x8xf32>
    %212 = arith.mulf %211, %210 : vector<4x8x8xf32>
    %213 = arith.addf %200, %203 : vector<4x8x8xf32>
    %214 = arith.addf %206, %209 : vector<4x8x8xf32>
    %215 = arith.addf %213, %214 : vector<4x8x8xf32>
    %216 = arith.addf %215, %212 : vector<4x8x8xf32>
    %217 = vector.extract_strided_slice %196 {offsets = [0, 0, 0], sizes = [4, 8, 8], strides = [1, 1, 1]} : vector<4x16x8xf32> to vector<4x8x8xf32>
    %218 = vector.extract_strided_slice %196 {offsets = [0, 1, 0], sizes = [4, 8, 8], strides = [1, 1, 1]} : vector<4x16x8xf32> to vector<4x8x8xf32>
    %219 = vector.extract_strided_slice %196 {offsets = [0, 2, 0], sizes = [4, 8, 8], strides = [1, 1, 1]} : vector<4x16x8xf32> to vector<4x8x8xf32>
    %220 = vector.extract_strided_slice %196 {offsets = [0, 3, 0], sizes = [4, 8, 8], strides = [1, 1, 1]} : vector<4x16x8xf32> to vector<4x8x8xf32>
    %221 = vector.extract_strided_slice %196 {offsets = [0, 4, 0], sizes = [4, 8, 8], strides = [1, 1, 1]} : vector<4x16x8xf32> to vector<4x8x8xf32>
    %222 = arith.addf %217, %218 : vector<4x8x8xf32>
    %223 = arith.addf %219, %220 : vector<4x8x8xf32>
    %224 = arith.addf %222, %223 : vector<4x8x8xf32>
    %225 = arith.addf %224, %221 : vector<4x8x8xf32>
    %226 = arith.addf %216, %225 : vector<4x8x8xf32>
    %227 = arith.subf %187, %226 : vector<4x8x8xf32>
    %228 = vector.extract_strided_slice %227 {offsets = [0, 0, 0], sizes = [2, 8, 8], strides = [1, 1, 1]} : vector<4x8x8xf32> to vector<2x8x8xf32>
    %229 = vector.extract_strided_slice %227 {offsets = [2, 0, 0], sizes = [2, 8, 8], strides = [1, 1, 1]} : vector<4x8x8xf32> to vector<2x8x8xf32>
    %230 = arith.subf %228, %229 : vector<2x8x8xf32>
    %231 = math.absf %230 : vector<2x8x8xf32>
    %232 = vector.shape_cast %231 : vector<2x8x8xf32> to vector<1x2x8x8xf32>
    %cst_58 = arith.constant dense<0.000000e+00> : vector<1xf32>
    %233 = vector.multi_reduction <add>, %232, %cst_58 [1, 2, 3] : vector<1x2x8x8xf32> to vector<1xf32>
    %234 = vector.shape_cast %233 : vector<1xf32> to vector<1x1x1x1xf32>
    %235 = vector.extract %234[0, 0, 0, 0] : f32 from vector<1x1x1x1xf32>
    %236 = vector.shape_cast %226 : vector<4x8x8xf32> to vector<32x8xf32>
    %237 = arith.truncf %236 : vector<32x8xf32> to vector<32x8xbf16>
    %c0_59 = arith.constant 0 : index
    %c0_60 = arith.constant 0 : index
    %238 = vector.load %arg13[%c0_59, %c0_60] : memref<8x4xbf16, #tpu.memory_space<vmem>>, vector<8x4xbf16>
    %cst_61 = arith.constant dense<0.000000e+00> : vector<32x4xf32>
    %239 = tpu.matmul %237, %238, %cst_61 {dimension_numbers = #tpu.dot_dimension_numbers<[1], [0], [0], [1], [0, 0, 1, 1], [], []>} : vector<32x8xbf16>, vector<8x4xbf16>, vector<32x4xf32> -> vector<32x4xf32>
    %240 = vector.shape_cast %239 : vector<32x4xf32> to vector<4x8x4xf32>
    %c0_62 = arith.constant 0 : index
    %c0_63 = arith.constant 0 : index
    %241 = vector.load %arg14[%c0_62, %c0_63] : memref<4x8xbf16, #tpu.memory_space<vmem>>, vector<4x8xbf16>
    %242 = vector.shape_cast %241 : vector<4x8xbf16> to vector<1x4x8xbf16>
    %243 = vector.shape_cast %242 : vector<1x4x8xbf16> to vector<1x4x8xbf16>
    %244 = vector.broadcast %243 : vector<1x4x8xbf16> to vector<4x4x8xbf16>
    %245 = arith.truncf %240 : vector<4x8x4xf32> to vector<4x8x4xbf16>
    "tpu.trace_start"() <{level = 10 : i32, message = "brp,bpc->brc"}> : () -> ()
    %cst_64 = arith.constant dense<0.000000e+00> : vector<4x4x4xf32>
    %246 = tpu.matmul %244, %245, %cst_64 {dimension_numbers = #tpu.dot_dimension_numbers<[2], [1], [1], [2], [0, 0, 0, 1, 1, 2], [0], [0]>} : vector<4x4x8xbf16>, vector<4x8x4xbf16>, vector<4x4x4xf32> -> vector<4x4x4xf32>
    "tpu.trace_stop"() : () -> ()
    %247 = vector.extract_strided_slice %246 {offsets = [0, 0, 0], sizes = [4, 1, 4], strides = [1, 1, 1]} : vector<4x4x4xf32> to vector<4x1x4xf32>
    %248 = vector.extract_strided_slice %246 {offsets = [0, 3, 0], sizes = [4, 1, 4], strides = [1, 1, 1]} : vector<4x4x4xf32> to vector<4x1x4xf32>
    %249 = tpu.concatenate %247, %247, %246, %248, %248 in 1 : vector<4x1x4xf32>, vector<4x1x4xf32>, vector<4x4x4xf32>, vector<4x1x4xf32>, vector<4x1x4xf32> -> vector<4x8x4xf32>
    %250 = vector.shape_cast %249 : vector<4x8x4xf32> to vector<32x4xf32>
    %251 = arith.truncf %250 : vector<32x4xf32> to vector<32x4xbf16>
    %c0_65 = arith.constant 0 : index
    %c0_66 = arith.constant 0 : index
    %252 = vector.load %arg15[%c0_65, %c0_66] : memref<4x8xbf16, #tpu.memory_space<vmem>>, vector<4x8xbf16>
    %cst_67 = arith.constant dense<0.000000e+00> : vector<32x8xf32>
    %253 = tpu.matmul %251, %252, %cst_67 {dimension_numbers = #tpu.dot_dimension_numbers<[1], [0], [0], [1], [0, 0, 1, 1], [], []>} : vector<32x4xbf16>, vector<4x8xbf16>, vector<32x8xf32> -> vector<32x8xf32>
    %254 = vector.shape_cast %253 : vector<32x8xf32> to vector<4x8x8xf32>
    %255 = vector.extract_strided_slice %254 {offsets = [0, 0, 0], sizes = [4, 8, 4], strides = [1, 1, 1]} : vector<4x8x8xf32> to vector<4x8x4xf32>
    %256 = vector.extract_strided_slice %254 {offsets = [0, 0, 4], sizes = [4, 8, 4], strides = [1, 1, 1]} : vector<4x8x8xf32> to vector<4x8x4xf32>
    %257 = vector.extract_strided_slice %256 {offsets = [0, 0, 0], sizes = [4, 4, 4], strides = [1, 1, 1]} : vector<4x8x4xf32> to vector<4x4x4xf32>
    %cst_68 = arith.constant 0.011170336 : f32
    %258 = vector.broadcast %cst_68 : f32 to vector<4x4x4xf32>
    %259 = arith.mulf %258, %257 : vector<4x4x4xf32>
    %260 = vector.extract_strided_slice %256 {offsets = [0, 1, 0], sizes = [4, 4, 4], strides = [1, 1, 1]} : vector<4x8x4xf32> to vector<4x4x4xf32>
    %cst_69 = arith.constant 0.0236476026 : f32
    %261 = vector.broadcast %cst_69 : f32 to vector<4x4x4xf32>
    %262 = arith.mulf %261, %260 : vector<4x4x4xf32>
    %263 = vector.extract_strided_slice %256 {offsets = [0, 2, 0], sizes = [4, 4, 4], strides = [1, 1, 1]} : vector<4x8x4xf32> to vector<4x4x4xf32>
    %cst_70 = arith.constant 0.0303641222 : f32
    %264 = vector.broadcast %cst_70 : f32 to vector<4x4x4xf32>
    %265 = arith.mulf %264, %263 : vector<4x4x4xf32>
    %266 = vector.extract_strided_slice %256 {offsets = [0, 3, 0], sizes = [4, 4, 4], strides = [1, 1, 1]} : vector<4x8x4xf32> to vector<4x4x4xf32>
    %cst_71 = arith.constant 0.0236476026 : f32
    %267 = vector.broadcast %cst_71 : f32 to vector<4x4x4xf32>
    %268 = arith.mulf %267, %266 : vector<4x4x4xf32>
    %269 = vector.extract_strided_slice %256 {offsets = [0, 4, 0], sizes = [4, 4, 4], strides = [1, 1, 1]} : vector<4x8x4xf32> to vector<4x4x4xf32>
    %cst_72 = arith.constant 0.011170336 : f32
    %270 = vector.broadcast %cst_72 : f32 to vector<4x4x4xf32>
    %271 = arith.mulf %270, %269 : vector<4x4x4xf32>
    %272 = arith.addf %259, %262 : vector<4x4x4xf32>
    %273 = arith.addf %265, %268 : vector<4x4x4xf32>
    %274 = arith.addf %272, %273 : vector<4x4x4xf32>
    %275 = arith.addf %274, %271 : vector<4x4x4xf32>
    %276 = vector.extract_strided_slice %255 {offsets = [0, 0, 0], sizes = [4, 4, 4], strides = [1, 1, 1]} : vector<4x8x4xf32> to vector<4x4x4xf32>
    %277 = vector.extract_strided_slice %255 {offsets = [0, 1, 0], sizes = [4, 4, 4], strides = [1, 1, 1]} : vector<4x8x4xf32> to vector<4x4x4xf32>
    %278 = vector.extract_strided_slice %255 {offsets = [0, 2, 0], sizes = [4, 4, 4], strides = [1, 1, 1]} : vector<4x8x4xf32> to vector<4x4x4xf32>
    %279 = vector.extract_strided_slice %255 {offsets = [0, 3, 0], sizes = [4, 4, 4], strides = [1, 1, 1]} : vector<4x8x4xf32> to vector<4x4x4xf32>
    %280 = vector.extract_strided_slice %255 {offsets = [0, 4, 0], sizes = [4, 4, 4], strides = [1, 1, 1]} : vector<4x8x4xf32> to vector<4x4x4xf32>
    %281 = arith.addf %276, %277 : vector<4x4x4xf32>
    %282 = arith.addf %278, %279 : vector<4x4x4xf32>
    %283 = arith.addf %281, %282 : vector<4x4x4xf32>
    %284 = arith.addf %283, %280 : vector<4x4x4xf32>
    %285 = arith.addf %275, %284 : vector<4x4x4xf32>
    %286 = arith.subf %246, %285 : vector<4x4x4xf32>
    %287 = vector.extract_strided_slice %286 {offsets = [0, 0, 0], sizes = [2, 4, 4], strides = [1, 1, 1]} : vector<4x4x4xf32> to vector<2x4x4xf32>
    %288 = vector.extract_strided_slice %286 {offsets = [2, 0, 0], sizes = [2, 4, 4], strides = [1, 1, 1]} : vector<4x4x4xf32> to vector<2x4x4xf32>
    %289 = arith.subf %287, %288 : vector<2x4x4xf32>
    %290 = math.absf %289 : vector<2x4x4xf32>
    %291 = vector.shape_cast %290 : vector<2x4x4xf32> to vector<1x2x4x4xf32>
    %cst_73 = arith.constant dense<0.000000e+00> : vector<1xf32>
    %292 = vector.multi_reduction <add>, %291, %cst_73 [1, 2, 3] : vector<1x2x4x4xf32> to vector<1xf32>
    %293 = vector.shape_cast %292 : vector<1xf32> to vector<1x1x1x1xf32>
    %294 = vector.extract %293[0, 0, 0, 0] : f32 from vector<1x1x1x1xf32>
    %295 = vector.shape_cast %285 : vector<4x4x4xf32> to vector<16x4xf32>
    %296 = arith.truncf %295 : vector<16x4xf32> to vector<16x4xbf16>
    %c0_74 = arith.constant 0 : index
    %c0_75 = arith.constant 0 : index
    %297 = vector.load %arg16[%c0_74, %c0_75] : memref<4x2xbf16, #tpu.memory_space<vmem>>, vector<4x2xbf16>
    %cst_76 = arith.constant dense<0.000000e+00> : vector<16x2xf32>
    %298 = tpu.matmul %296, %297, %cst_76 {dimension_numbers = #tpu.dot_dimension_numbers<[1], [0], [0], [1], [0, 0, 1, 1], [], []>} : vector<16x4xbf16>, vector<4x2xbf16>, vector<16x2xf32> -> vector<16x2xf32>
    %299 = vector.shape_cast %298 : vector<16x2xf32> to vector<4x4x2xf32>
    %c0_77 = arith.constant 0 : index
    %c0_78 = arith.constant 0 : index
    %300 = vector.load %arg17[%c0_77, %c0_78] : memref<2x4xbf16, #tpu.memory_space<vmem>>, vector<2x4xbf16>
    %301 = vector.shape_cast %300 : vector<2x4xbf16> to vector<1x2x4xbf16>
    %302 = vector.shape_cast %301 : vector<1x2x4xbf16> to vector<1x2x4xbf16>
    %303 = vector.broadcast %302 : vector<1x2x4xbf16> to vector<4x2x4xbf16>
    %304 = arith.truncf %299 : vector<4x4x2xf32> to vector<4x4x2xbf16>
    "tpu.trace_start"() <{level = 10 : i32, message = "brp,bpc->brc"}> : () -> ()
    %cst_79 = arith.constant dense<0.000000e+00> : vector<4x2x2xf32>
    %305 = tpu.matmul %303, %304, %cst_79 {dimension_numbers = #tpu.dot_dimension_numbers<[2], [1], [1], [2], [0, 0, 0, 1, 1, 2], [0], [0]>} : vector<4x2x4xbf16>, vector<4x4x2xbf16>, vector<4x2x2xf32> -> vector<4x2x2xf32>
    "tpu.trace_stop"() : () -> ()
    %306 = vector.extract_strided_slice %305 {offsets = [0, 0, 0], sizes = [2, 2, 2], strides = [1, 1, 1]} : vector<4x2x2xf32> to vector<2x2x2xf32>
    %307 = vector.extract_strided_slice %305 {offsets = [2, 0, 0], sizes = [2, 2, 2], strides = [1, 1, 1]} : vector<4x2x2xf32> to vector<2x2x2xf32>
    %308 = arith.subf %306, %307 : vector<2x2x2xf32>
    %309 = math.absf %308 : vector<2x2x2xf32>
    %310 = vector.shape_cast %309 : vector<2x2x2xf32> to vector<1x2x2x2xf32>
    %cst_80 = arith.constant dense<0.000000e+00> : vector<1xf32>
    %311 = vector.multi_reduction <add>, %310, %cst_80 [1, 2, 3] : vector<1x2x2x2xf32> to vector<1xf32>
    %312 = vector.shape_cast %311 : vector<1xf32> to vector<1x1x1x1xf32>
    %313 = vector.extract %312[0, 0, 0, 0] : f32 from vector<1x1x1x1xf32>
    %314 = tpu.iota {dimensions = array<i32: 1>} : vector<1x7xi32>
    %cst_81 = arith.constant 0.000000e+00 : f32
    %315 = vector.broadcast %cst_81 : f32 to vector<1x7xf32>
    %c0_i32 = arith.constant 0 : i32
    %316 = vector.broadcast %c0_i32 : i32 to vector<1x7xi32>
    %317 = arith.cmpi eq, %314, %316 : vector<1x7xi32>
    %cst_82 = arith.constant 0.000000e+00 : f32
    %318 = vector.broadcast %58 : f32 to vector<1x7xf32>
    %319 = vector.broadcast %cst_82 : f32 to vector<1x7xf32>
    %320 = arith.select %317, %318, %319 : vector<1x7xi1>, vector<1x7xf32>
    %321 = arith.addf %315, %320 : vector<1x7xf32>
    %c1_i32 = arith.constant 1 : i32
    %322 = vector.broadcast %c1_i32 : i32 to vector<1x7xi32>
    %323 = arith.cmpi eq, %314, %322 : vector<1x7xi32>
    %cst_83 = arith.constant 0.000000e+00 : f32
    %324 = vector.broadcast %117 : f32 to vector<1x7xf32>
    %325 = vector.broadcast %cst_83 : f32 to vector<1x7xf32>
    %326 = arith.select %323, %324, %325 : vector<1x7xi1>, vector<1x7xf32>
    %327 = arith.addf %321, %326 : vector<1x7xf32>
    %c2_i32 = arith.constant 2 : i32
    %328 = vector.broadcast %c2_i32 : i32 to vector<1x7xi32>
    %329 = arith.cmpi eq, %314, %328 : vector<1x7xi32>
    %cst_84 = arith.constant 0.000000e+00 : f32
    %330 = vector.broadcast %176 : f32 to vector<1x7xf32>
    %331 = vector.broadcast %cst_84 : f32 to vector<1x7xf32>
    %332 = arith.select %329, %330, %331 : vector<1x7xi1>, vector<1x7xf32>
    %333 = arith.addf %327, %332 : vector<1x7xf32>
    %c3_i32 = arith.constant 3 : i32
    %334 = vector.broadcast %c3_i32 : i32 to vector<1x7xi32>
    %335 = arith.cmpi eq, %314, %334 : vector<1x7xi32>
    %cst_85 = arith.constant 0.000000e+00 : f32
    %336 = vector.broadcast %235 : f32 to vector<1x7xf32>
    %337 = vector.broadcast %cst_85 : f32 to vector<1x7xf32>
    %338 = arith.select %335, %336, %337 : vector<1x7xi1>, vector<1x7xf32>
    %339 = arith.addf %333, %338 : vector<1x7xf32>
    %c4_i32 = arith.constant 4 : i32
    %340 = vector.broadcast %c4_i32 : i32 to vector<1x7xi32>
    %341 = arith.cmpi eq, %314, %340 : vector<1x7xi32>
    %cst_86 = arith.constant 0.000000e+00 : f32
    %342 = vector.broadcast %294 : f32 to vector<1x7xf32>
    %343 = vector.broadcast %cst_86 : f32 to vector<1x7xf32>
    %344 = arith.select %341, %342, %343 : vector<1x7xi1>, vector<1x7xf32>
    %345 = arith.addf %339, %344 : vector<1x7xf32>
    %c5_i32 = arith.constant 5 : i32
    %346 = vector.broadcast %c5_i32 : i32 to vector<1x7xi32>
    %347 = arith.cmpi eq, %314, %346 : vector<1x7xi32>
    %cst_87 = arith.constant 0.000000e+00 : f32
    %348 = vector.broadcast %313 : f32 to vector<1x7xf32>
    %349 = vector.broadcast %cst_87 : f32 to vector<1x7xf32>
    %350 = arith.select %347, %348, %349 : vector<1x7xi1>, vector<1x7xf32>
    %351 = arith.addf %345, %350 : vector<1x7xf32>
    %c6_i32 = arith.constant 6 : i32
    %352 = vector.broadcast %c6_i32 : i32 to vector<1x7xi32>
    %353 = arith.cmpi eq, %314, %352 : vector<1x7xi32>
    %cst_88 = arith.constant 0.000000e+00 : f32
    %354 = vector.broadcast %10 : f32 to vector<1x7xf32>
    %355 = vector.broadcast %cst_88 : f32 to vector<1x7xf32>
    %356 = arith.select %353, %354, %355 : vector<1x7xi1>, vector<1x7xf32>
    %357 = arith.addf %351, %356 : vector<1x7xf32>
    %c0_89 = arith.constant 0 : index
    %c0_90 = arith.constant 0 : index
    %c0_91 = arith.constant 0 : index
    %358 = vector.load %arg18[%c0_89, %c0_90, %c0_91] : memref<1x1x7xf32, #tpu.memory_space<vmem>>, vector<1x1x7xf32>
    %359 = vector.shape_cast %358 : vector<1x1x7xf32> to vector<1x7xf32>
    %360 = vector.shape_cast %357 : vector<1x7xf32> to vector<1x1x7xf32>
    tpu.vector_store %arg18[%c0_89, %c0_90, %c0_91], %360 {strides = array<i32>} : memref<1x1x7xf32, #tpu.memory_space<vmem>>, vector<1x1x7xf32>,
    return
  }
  func.func @transform_0(%arg0: i32) -> (i32, i32, i32) {
    %c0_i32 = arith.constant 0 : i32
    %c0_i32_0 = arith.constant 0 : i32
    %c0_i32_1 = arith.constant 0 : i32
    return %arg0, %c0_i32, %c0_i32_0 : i32, i32, i32
  }
  func.func @transform_1(%arg0: i32) -> (i32, i32, i32) {
    %c0_i32 = arith.constant 0 : i32
    %c0_i32_0 = arith.constant 0 : i32
    %c0_i32_1 = arith.constant 0 : i32
    return %arg0, %c0_i32, %c0_i32_0 : i32, i32, i32
  }
  func.func @transform_2(%arg0: i32) -> (i32, i32) {
    %c0_i32 = arith.constant 0 : i32
    %c0_i32_0 = arith.constant 0 : i32
    %c0_i32_1 = arith.constant 0 : i32
    return %c0_i32, %c0_i32_0 : i32, i32
  }
  func.func @transform_3(%arg0: i32) -> (i32, i32) {
    %c0_i32 = arith.constant 0 : i32
    %c0_i32_0 = arith.constant 0 : i32
    %c0_i32_1 = arith.constant 0 : i32
    return %c0_i32, %c0_i32_0 : i32, i32
  }
  func.func @transform_4(%arg0: i32) -> (i32, i32) {
    %c0_i32 = arith.constant 0 : i32
    %c0_i32_0 = arith.constant 0 : i32
    %c0_i32_1 = arith.constant 0 : i32
    return %c0_i32, %c0_i32_0 : i32, i32
  }
  func.func @transform_5(%arg0: i32) -> (i32, i32) {
    %c0_i32 = arith.constant 0 : i32
    %c0_i32_0 = arith.constant 0 : i32
    %c0_i32_1 = arith.constant 0 : i32
    return %c0_i32, %c0_i32_0 : i32, i32
  }
  func.func @transform_6(%arg0: i32) -> (i32, i32) {
    %c0_i32 = arith.constant 0 : i32
    %c0_i32_0 = arith.constant 0 : i32
    %c0_i32_1 = arith.constant 0 : i32
    return %c0_i32, %c0_i32_0 : i32, i32
  }
  func.func @transform_7(%arg0: i32) -> (i32, i32) {
    %c0_i32 = arith.constant 0 : i32
    %c0_i32_0 = arith.constant 0 : i32
    %c0_i32_1 = arith.constant 0 : i32
    return %c0_i32, %c0_i32_0 : i32, i32
  }
  func.func @transform_8(%arg0: i32) -> (i32, i32) {
    %c0_i32 = arith.constant 0 : i32
    %c0_i32_0 = arith.constant 0 : i32
    %c0_i32_1 = arith.constant 0 : i32
    return %c0_i32, %c0_i32_0 : i32, i32
  }
  func.func @transform_9(%arg0: i32) -> (i32, i32) {
    %c0_i32 = arith.constant 0 : i32
    %c0_i32_0 = arith.constant 0 : i32
    %c0_i32_1 = arith.constant 0 : i32
    return %c0_i32, %c0_i32_0 : i32, i32
  }
  func.func @transform_10(%arg0: i32) -> (i32, i32) {
    %c0_i32 = arith.constant 0 : i32
    %c0_i32_0 = arith.constant 0 : i32
    %c0_i32_1 = arith.constant 0 : i32
    return %c0_i32, %c0_i32_0 : i32, i32
  }
  func.func @transform_11(%arg0: i32) -> (i32, i32) {
    %c0_i32 = arith.constant 0 : i32
    %c0_i32_0 = arith.constant 0 : i32
    %c0_i32_1 = arith.constant 0 : i32
    return %c0_i32, %c0_i32_0 : i32, i32
  }
  func.func @transform_12(%arg0: i32) -> (i32, i32) {
    %c0_i32 = arith.constant 0 : i32
    %c0_i32_0 = arith.constant 0 : i32
    %c0_i32_1 = arith.constant 0 : i32
    return %c0_i32, %c0_i32_0 : i32, i32
  }
  func.func @transform_13(%arg0: i32) -> (i32, i32) {
    %c0_i32 = arith.constant 0 : i32
    %c0_i32_0 = arith.constant 0 : i32
    %c0_i32_1 = arith.constant 0 : i32
    return %c0_i32, %c0_i32_0 : i32, i32
  }
  func.func @transform_14(%arg0: i32) -> (i32, i32) {
    %c0_i32 = arith.constant 0 : i32
    %c0_i32_0 = arith.constant 0 : i32
    %c0_i32_1 = arith.constant 0 : i32
    return %c0_i32, %c0_i32_0 : i32, i32
  }
  func.func @transform_15(%arg0: i32) -> (i32, i32) {
    %c0_i32 = arith.constant 0 : i32
    %c0_i32_0 = arith.constant 0 : i32
    %c0_i32_1 = arith.constant 0 : i32
    return %c0_i32, %c0_i32_0 : i32, i32
  }
  func.func @transform_16(%arg0: i32) -> (i32, i32) {
    %c0_i32 = arith.constant 0 : i32
    %c0_i32_0 = arith.constant 0 : i32
    %c0_i32_1 = arith.constant 0 : i32
    return %c0_i32, %c0_i32_0 : i32, i32
  }
  func.func @transform_17(%arg0: i32) -> (i32, i32, i32) {
    %c0_i32 = arith.constant 0 : i32
    %c0_i32_0 = arith.constant 0 : i32
    %c0_i32_1 = arith.constant 0 : i32
    return %arg0, %c0_i32, %c0_i32_0 : i32, i32, i32
  }
}

</mosaic_0001>

<bundles_post_ra>
// kernel: tpu_custom_call.1
= control target key start
LH: loop header
LB: loop body
LE: loop exit
PB: predicated region body
PF: predicated region fallthrough
CT: control target
= control target key end

     0   :  { %s11272_s0 = inlined_call_operand.hbm [shape: f32[8,64,64], index: 0, kind: input, shape index: {}]   ;;  %s11273_s1 = inlined_call_operand.hbm [shape: f32[8,64,64], index: 1, kind: input, shape index: {}]   ;;  %s11274_s2 = inlined_call_operand.vmem [shape: bf16[64,128], index: 2, kind: input, shape index: {}]   ;;  %s11275_s3 = inlined_call_operand.vmem [shape: bf16[64,32], index: 3, kind: input, shape index: {}]   ;;  %s11276_s4 = inlined_call_operand.vmem [shape: bf16[32,64], index: 4, kind: input, shape index: {}]   ;;  %s11277_s5 = inlined_call_operand.vmem [shape: bf16[32,64], index: 5, kind: input, shape index: {}]   ;;  %s11278_s6 = inlined_call_operand.vmem [shape: bf16[32,16], index: 6, kind: input, shape index: {}]   ;;  %s11279_s7 = inlined_call_operand.vmem [shape: bf16[16,32], index: 7, kind: input, shape index: {}]   ;;  %s11280_s8 = inlined_call_operand.vmem [shape: bf16[16,32], index: 8, kind: input, shape index: {}]   ;;  %s11281_s9 = inlined_call_operand.vmem [shape: bf16[16,8], index: 9, kind: input, shape index: {}]   ;;  %s11282_s10 = inlined_call_operand.hbm [shape: bf16[8,16], index: 10, kind: input, shape index: {}]   ;;  %s11283_s11 = inlined_call_operand.vmem [shape: bf16[8,16], index: 11, kind: input, shape index: {}]   ;;  %s11284_s12 = inlined_call_operand.vmem [shape: bf16[8,4], index: 12, kind: input, shape index: {}]   ;;  %s11285_s13 = inlined_call_operand.vmem [shape: bf16[4,8], index: 13, kind: input, shape index: {}]   ;;  %s11286_s14 = inlined_call_operand.vmem [shape: bf16[4,8], index: 14, kind: input, shape index: {}]   ;;  %s11287_s15 = inlined_call_operand.vmem [shape: bf16[4,2], index: 15, kind: input, shape index: {}]   ;;  %s11288_s16 = inlined_call_operand.vmem [shape: bf16[2,4], index: 16, kind: input, shape index: {}]   ;;  %s11289_s17 = inlined_call_operand.hbm [shape: f32[4,1,7], index: 17, kind: output, shape index: {}]  }
   0x1   :  { %11487 = sst [smem:[#allocation105_spill]] %s11272_s0 }
   0x2   :  { %11488 = sst [smem:[#allocation106_spill]] %s11273_s1 }
   0x3   :  { %11489 = sst [smem:[#allocation107_spill]] %s11282_s10 }
   0x4   :  { %11490 = sst [smem:[#allocation108_spill]] %s11284_s12 }
   0x5   :  { %11491 = sst [smem:[#allocation109_spill]] %s11285_s13 }
   0x6   :  { %11492 = sst [smem:[#allocation110_spill]] %s11286_s14 }
   0x7   :  { %11493 = sst [smem:[#allocation111_spill]] %s11287_s15 }
   0x8   :  { %11494 = sst [smem:[#allocation112_spill]] %s11288_s16 }
   0x9   :  { %11495 = sst [smem:[#allocation113_spill]] %s11289_s17 }
   0xa   :  { %22 = vsyncpa [#allocation3], 0 }
   0xb   :  { %24 = vsyncpa [#allocation3 + $0x1], 0 }
   0xc   :  { %25 = vsyncpa [#allocation6], 0 }
   0xd   :  { %27 = vsyncpa [#allocation6 + $0x1], 0 }
   0xe   :  { %28 = vsyncpa [#allocation4], 0 }
   0xf   :  { %30 = vsyncpa [#allocation4 + $0x1], 0  ;;  %s8067_s24 = smov 0   ;;  %s8069_s25 = smov 0  }
  0x10   :  { %s8071_s26 = smov 0   ;;  %s8073_s27 = smov 0  }
  0x11 LB: > { %11496 = sst [smem:[#allocation13_spill]] %s7946_s24  ;;  %s8088_s28 = sadd.s32 4294967295, %s7958_s27   ;;  %s7958_s27 = sphi %s8073_s27, %s11934_s27   ;;  %s7954_s26 = sphi %s8071_s26, %s11936_s26   ;;  %s7950_s25 = sphi %s8069_s25, %s11938_s25   ;;  %s7946_s24 = sphi %s8067_s24, %s11937_s24  }
  0x12   : > { %11497 = sst [smem:[#allocation14_spill]] %s7954_s26  ;;  %s7047_s29 = sadd.s32 4294967294, %s7958_s27  }
  0x13   : > { %s8092_s0 = sadd.s32 1, %s7958_s27   ;;  %s43_s30 = sadd.s32 1, %s7954_s26 }
  0x14   : > { %11498 = sst [smem:[#allocation15_spill]] %s8092_s0  ;;  %s40_s18 = ssub.s32 %s7958_s27, %s8092_s0 }
  0x15   : > { %p50_p0 = scmp.ne.s32.totalorder %s7954_s26, %s7950_s25  ;;  %p41_p1 = scmp.eq.s32.totalorder %s40_s18, 0 }
  0x16   : > { %p51_p2 = scmp.eq.s32.totalorder %s7958_s27, 0  ;;  %p56_p3 = scmp.ne.s32.totalorder %s7950_s25, %s7946_s24 }
  0x17   : > { %p11296_p4 = scmp.eq.s32.totalorder %s8088_s28, 0  ;;  %p421_p7 = scmp.eq.s32.totalorder %s8088_s28, 3 }
  0x18   : > { %s8104_s19 = scalar_select %p41_p1, %s7954_s26, %s43_s30  }
  0x19   : > { %p8106_p5 = por %p51_p2, %p50_p0  ;;  %p8112_p6 = por %p11296_p4, %p56_p3 }
  0x1a   : > { %11499 = sst [smem:[#allocation16_spill]] %s8104_s19  ;;  %p427_p8 = scmp.eq.s32.totalorder %s7047_s29, 3 }
  0x1b   : > { %s11501_s20 = scalar_select %p8112_p6, 1, 0 }
  0x1c   : > { %p7048_p9 = scmp.ge.s32.totalorder %s7958_s27, 1  ;;  %p434_p10 = scmp.lt.s32.totalorder %s7958_s27, 5 }
  0x1d   : > { %p8119_p11 = por %p421_p7, %p50_p0  ;;  %p8123_p12 = por %p427_p8, %p56_p3 }
  0x1e   : > { %p8127_p13 = pnand %p7048_p9, %p434_p10  ;;  %s7960_s30 = smov [#allocation7]  }
  0x1f   : > { %s11502_s21 = scalar_select %p8119_p11, 1, 0 }
  0x20   : > { %s11504_s22 = scalar_select %p8123_p12, 1, 0 }
  0x21   : > { %11503 = sst [smem:[#allocation17_spill]] %s11502_s21  ;;  %p7690_p1 = pneg %p8127_p13 }
  0x22   : > { %11505 = sst [smem:[#allocation18_spill]] %s11504_s22  ;;  %s471_s18 = sshll.u32 %s7960_s30, 4  ;;  %s472_s18 = int_to_ptr.vmem [resolvable:$true] %s471_s18 }
  0x23   : > { %p7706_p2 = scmp.lt.s32.totalorder %s7958_s27, 4  ;;  %p8136_p0 = pnand %p7690_p1, %p11296_p4 }
  0x24   : > { %s500_s19 = sand.u32 1, %s7954_s26   ;;  %s7815_s24 = scalar_lea.vmem %s472_s18, 64 }
  0x25   : > { %p8143_p3 = pnand %p7706_p2, %p8106_p5  ;;  %s8147_s22 = sshll.u32 %s500_s19, 7 }
  0x26   : > { %p7806_p7 = pneg %p8136_p0  ;;  %p7816_p8 = scmp.ne.s32.totalorder %s472_s18, %s7815_s24 }
  0x27   : > { %p7823_p12 = scmp.lt.s32.totalorder %s472_s18, %s472_s18  ;;  %p7824_p1 = scmp.lt.s32.totalorder %s7815_s24, %s7815_s24 }
  0x28   : > { %p7818_p9 = pnand %p7816_p8, %p7806_p7 }
  0x29   : > { %p7825_p4 = por %p7824_p1, %p7823_p12 }
  0x2a   : > { %p7819_p10 = pneg %p7818_p9 }
  0x2c   : > { %p7826_p11 = pnand %p7825_p4, %p7819_p10 }
  0x2e   : > { %7829 = shalt.err (!%p7826_p11)
}
  0x2f   : > { %s11509_s10 = sld [smem:[#allocation107_spill]]  ;;  %s11302_s26 = sshll.u32 %s7958_s27, 11 }
  0x30   : > { %s504_s17 = scalar_lea.vmem [#allocation2], %s8147_s22  ;;  %s11510_s15 = sld [smem:[#allocation105_spill]] }
  0x31   : > { %s512_s21 = sshll.u32 %s504_s17, 4  ;;  %s8167_s29 = scalar_lea.sflag [#allocation3], %s500_s19  ;;  %s8165_s21 = int_to_ptr.vmem [resolvable:$true] %s512_s21 }
  0x32   : > { %p7832_p5 = pneg %p8143_p3 }
  0x35   : > { %7693 = dma.hbm_to_vmem [thread:$0]  (!%p8136_p0), %s11509_s10, 64, %s472_s18, [#allocation6]  }
  0x36   : > { %s8163_s14 = scalar_lea.hbm %s11510_s15, %s11302_s26  ;;  %s7835_s16 = scalar_lea.hbm %s11510_s15, 8192 }
  0x37   : > { %s7830_s1 = scalar_lea.hbm %s8163_s14, 2048  ;;  %p7836_p2 = scmp.lt.s32.totalorder %s8163_s14, %s11510_s15 }
  0x38   : > { %p7831_p4 = scmp.ne.s32.totalorder %s8163_s14, %s7830_s1  ;;  %p7837_p0 = scmp.lt.s32.totalorder %s7835_s16, %s7830_s1 }
  0x3a   : > { %p7833_p11 = pnand %p7832_p5, %p7831_p4  ;;  %p7838_p7 = por %p7837_p0, %p7836_p2 }
  0x3c   : > { %p7834_p12 = pneg %p7833_p11 }
  0x3e   : > { %p7839_p8 = pnand %p7838_p7, %p7834_p12 }
  0x40   : > { %7842 = shalt.err (!%p7839_p8)
}
  0x41   : > { %s7843_s19 = scalar_lea.vmem %s8165_s21, 2048  ;;  %s7961_s17 = smov [#allocation2]  }
  0x42   : > { %p7844_p9 = scmp.ne.s32.totalorder %s8165_s21, %s7843_s19  ;;  %s7848_s18 = sshll.u32 %s7961_s17, 4  ;;  %s7849_s18 = int_to_ptr.vmem [resolvable:$false] %s7848_s18 }
  0x43   : > { %s7850_s26 = scalar_lea.vmem %s7849_s18, 4096  ;;  %p7851_p4 = scmp.lt.s32.totalorder %s8165_s21, %s7849_s18 }
  0x44   : > { %p7846_p10 = pnand %p7844_p9, %p7832_p5  ;;  %p7852_p11 = scmp.lt.s32.totalorder %s7850_s26, %s7843_s19 }
  0x46   : > { %p7847_p1 = pneg %p7846_p10  ;;  %p7853_p6 = por %p7852_p11, %p7851_p4 }
  0x48   : > { %p7854_p2 = pnand %p7853_p6, %p7847_p1 }
  0x4a   : > { %7857 = shalt.err (!%p7854_p2)
}
  0x4b   : > { %s7962_s1 = smov 128   ;;  %s7963_s16 = smov 8  }
  0x4c   : > { %7697 = dma.hbm_to_vmem [thread:$0]  (!%p8143_p3), %s8163_s14, 2048, %s8165_s21, %s8167_s29, %s7962_s1, %s7962_s1, %s7963_s16  }
  0x4d   : > { %s11511_s30 = sshll.u32 %s7958_s27, 11  ;;  %s11512_s19 = sld [smem:[#allocation106_spill]] }
  0x4e   : > { %s526_s18 = scalar_lea.vmem [#allocation5], %s8147_s22  ;;  %s522_s15 = sand.u32 1, %s7958_s27  }
  0x4f   : > { %s534_s10 = sshll.u32 %s526_s18, 4  ;;  %s523_s13 = scalar_lea.sflag [#allocation6], %s522_s15  ;;  %s8206_s10 = int_to_ptr.vmem [resolvable:$true] %s534_s10 }
  0x53   : > { %s8202_s17 = scalar_lea.hbm %s11512_s19, %s11511_s30  ;;  %s7863_s29 = scalar_lea.hbm %s11512_s19, 8192 }
  0x54   : > { %s7858_s12 = scalar_lea.hbm %s8202_s17, 2048  ;;  %p7864_p7 = scmp.lt.s32.totalorder %s8202_s17, %s11512_s19 }
  0x55   : > { %p7859_p6 = scmp.ne.s32.totalorder %s8202_s17, %s7858_s12  ;;  %p7865_p8 = scmp.lt.s32.totalorder %s7863_s29, %s7858_s12 }
  0x57   : > { %p7861_p12 = pnand %p7859_p6, %p7832_p5  ;;  %p7866_p9 = por %p7865_p8, %p7864_p7 }
  0x59   : > { %p7862_p0 = pneg %p7861_p12 }
  0x5b   : > { %p7867_p10 = pnand %p7866_p9, %p7862_p0 }
  0x5d   : > { %7870 = shalt.err (!%p7867_p10)
}
  0x5e   : > { %s7871_s15 = scalar_lea.vmem %s8206_s10, 2048  ;;  %s7964_s22 = smov [#allocation5]  }
  0x5f   : > { %p7872_p1 = scmp.ne.s32.totalorder %s8206_s10, %s7871_s15  ;;  %s7876_s24 = sshll.u32 %s7964_s22, 4  ;;  %s7877_s24 = int_to_ptr.vmem [resolvable:$false] %s7876_s24 }
  0x60   : > { %s7878_s18 = scalar_lea.vmem %s7877_s24, 4096  ;;  %p7879_p2 = scmp.lt.s32.totalorder %s8206_s10, %s7877_s24 }
  0x61   : > { %p7874_p4 = pnand %p7872_p1, %p7832_p5  ;;  %p7880_p6 = scmp.lt.s32.totalorder %s7878_s18, %s7871_s15 }
  0x63   : > { %p7875_p11 = pneg %p7874_p4  ;;  %p7881_p12 = por %p7880_p6, %p7879_p2 }
  0x65   : > { %p7882_p7 = pnand %p7881_p12, %p7875_p11 }
  0x67   : > { %7885 = shalt.err (!%p7882_p7)
}
  0x68   : > { %7700 = dma.hbm_to_vmem [thread:$0]  (!%p8143_p3), %s8202_s17, 2048, %s8206_s10, %s523_s13, %s7962_s1, %s7962_s1, %s7963_s16  }
  0x69   : > { %546 = sbr.rel (%p8127_p13) target bundleno = 4757 (0x1295), region = 88 }
  0x6e   : > { %s8236_s12 = sand.u32 1, %s7950_s25   ;;  %p11513_p5 = scmp.ne.s32.totalorder %s11501_s20, 0 }
  0x6f   : > { %s7060_s14 = sshll.u32 %s8236_s12, 7  ;;  %s549_s21 = scalar_lea.sflag [#allocation3], %s8236_s12 }
  0x70   : > { %s8240_s29 = scalar_lea.vmem [#allocation2], %s7060_s14 }
  0x71   : > { %7929 = dma.done.wait (%p11513_p5), %s549_s21, 2048  }
  0x72   : > { %7931 = vsyncadd (%p11513_p5), %s549_s21, 4294965248  ;;  %s557_s10 = sand.u32 1, %s8088_s28   ;;  %s8247_s0 = scalar_lea.vmem [#allocation5], %s7060_s14 }
  0x73   : > { %s558_s13 = scalar_lea.sflag [#allocation6], %s557_s10 }
  0x74   : > { %7933 = dma.done.wait (%p11513_p5), %s558_s13, 2048  }
  0x75   : > { %7935 = vsyncadd (%p11513_p5), %s558_s13, 4294965248  ;;  %p11514_p13 = scmp.eq.s32.totalorder %s8088_s28, 0 }
  0x77   : > { %7937 = dma.done.wait (%p11514_p13), [#allocation6], 64   ;;  %p11515_p3 = pmov %p11514_p13 }
  0x78   : > { %v7755_v0 = vld [vmem:[%s11274_s2 + $0x18] sm:$0xff]   ;;  %v7756_v1 = vld [vmem:[%s11274_s2 + $0x10] sm:$0xff]   ;;  %v7757_v2 = vld [vmem:[%s11274_s2 + $0x8] sm:$0xff]   ;;  %vm768_vm0 = vcmask 1041408   ;;  %vm905_vm1 = vcmask 1040384   ;;  %vm687_vm2 = vcmask 523264  }
  0x79   : > { %7939 = vsyncadd (%p11515_p3), [#allocation6], 4294967232  ;;  %7331 = vmatprep.subr.bf16.mxu0 %v7755_v0  ;;  %v623_v3 = vld [vmem:[%s8240_s29] sm:$0xff]  ;;  %v624_v4 = vld [vmem:[%s8240_s29 + $0x8] sm:$0xff]  ;;  %vm918_vm3 = vcmask 1042432   ;;  %vm923_vm4 = vcmask 1043456  }
  0x7a   : > { %7332 = vmatpush3.bf16.msra.mxu0 %v7755_v0  ;;  %v732_v5 = vrot.slane %v623_v3, 7  ;;  %v769_v6 = vrot.slane %v623_v3, 6  ;;  %v770_v7 = vrot.slane %v624_v4, 6  ;;  %v625_v8 = vld [vmem:[%s8240_s29 + $0x10] sm:$0xff]  ;;  %v626_v9 = vld [vmem:[%s8240_s29 + $0x18] sm:$0xff]  ;;  %v627_v10 = vld [vmem:[%s8240_s29 + $0x20] sm:$0xff] }
  0x7b   : > { %7333 = vmatprep.subr.bf16.mxu0 %v7756_v1  ;;  %v772_v13 = vrot.slane %v625_v8, 6  ;;  %v774_v14 = vrot.slane %v626_v9, 6  ;;  %v628_v15 = vld [vmem:[%s8240_s29 + $0x28] sm:$0xff]  ;;  %v7758_v16 = vld [vmem:[%s11274_s2] sm:$0xff]   ;;  %v776_v18 = vrot.slane %v627_v10, 6  ;;  %v630_v19 = vld [vmem:[%s8240_s29 + $0x38] sm:$0xff] }
  0x7c   : > { %v771_v11 = vsel %vm768_vm0, %v769_v6, %v770_v7  ;;  %v906_v12 = vsel %vm905_vm1, %v623_v3, %v732_v5  ;;  %v631_v21 = vld [vmem:[%s8240_s29 + $0x40] sm:$0xff]  ;;  %v778_v22 = vrot.slane %v628_v15, 6  ;;  %v782_v25 = vrot.slane %v630_v19, 6  ;;  %v629_v29 = vld [vmem:[%s8240_s29 + $0x30] sm:$0xff]  ;;  %v632_v44 = vld [vmem:[%s8240_s29 + $0x48] sm:$0xff]  ;;  %s7965_s22 = smov 64  }
  0x7d   : > { %v910_v17 = vsel %vm768_vm0, %v906_v12, %v769_v6  ;;  %v773_v23 = vsel %vm768_vm0, %v770_v7, %v772_v13  ;;  %v775_v24 = vsel %vm768_vm0, %v772_v13, %v774_v14  ;;  %v865_v26 = vrot.slane %v630_v19, 5  ;;  %v633_v45 = vld [vmem:[%s8240_s29 + $0x50] sm:$0xff]  ;;  %v634_v47 = vld [vmem:[%s8240_s29 + $0x58] sm:$0xff]  ;;  %v635_v58 = vld [vmem:[%s8240_s29 + $0x60] sm:$0xff]  ;;  %s7966_s14 = smov 32   ;;  %s7967_s1 = smov 96  }
  0x7e   : > { %7334 = vmatpush3.bf16.msra.mxu0 %v7756_v1  ;;  %v943_v20 = vpack.c.bf16 %v771_v11, %v910_v17  ;;  %v777_v27 = vsel %vm768_vm0, %v774_v14, %v776_v18  ;;  %v779_v28 = vsel %vm768_vm0, %v776_v18, %v778_v22  ;;  %v733_v30 = vrot.slane %v631_v21, 7  ;;  %v638_v48 = vld [vmem:[%s8240_s29 + $0x78] sm:$0xff]  ;;  %v636_v8 = vld [vmem:[%s8240_s29 + $0x68] sm:$0xff]  ;;  %v637_v9 = vld [vmem:[%s8240_s29 + $0x70] sm:$0xff]  ;;  %s7970_s26 = smov 16   ;;  %s7971_s18 = smov 112  }
  0x7f   : > { %7335 = vmatprep.subr.bf16.mxu0 %v7757_v2  ;;  %v873_v31 = vrot.slane %v630_v19, 4  ;;  %v914_v32 = vsel %vm768_vm0, %v782_v25, %v865_v26  ;;  %v881_v33 = vrot.slane %v630_v19, 3  ;;  %vm928_vm5 = vcmask 1044480   ;;  %v646_v26 = vld [vmem:[%s8247_s0 + $0x38] sm:$0xff]  ;;  %s7972_s10 = smov 8   ;;  %s11813_s16 = sld [smem:[#allocation108_spill]] }
  0x80   : > { %7339 = vmatprep.mubr.msk.bf16.mxu0 %vm687_vm2, %v943_v20  ;;  %vm933_vm6 = vcmask 1045504   ;;  %v944_v34 = vpack.c.bf16 %v775_v24, %v773_v23  ;;  %v889_v35 = vrot.slane %v630_v19, 2  ;;  %v897_v36 = vrot.slane %v630_v19, 1  ;;  %v641_v24 = vld [vmem:[%s8247_s0 + $0x10] sm:$0xff]  ;;  %s7973_s17 = smov 120   ;;  %s7974_s21 = smov 4  }
  0x81   : > { %v919_v37 = vsel %vm918_vm3, %v914_v32, %v873_v31  ;;  %v945_v38 = vpack.c.bf16 %v779_v28, %v777_v27  ;;  %v780_v39 = vrot.slane %v629_v29, 6  ;;  %v784_v40 = vrot.slane %v631_v21, 6  ;;  %s7975_s13 = smov 124   ;;  %s11928_s24 = sld [smem:[#allocation17_spill]] }
  0x82   : > { %7336 = vmatpush3.bf16.msra.mxu0 %v7757_v2  ;;  %v924_v41 = vsel %vm923_vm4, %v919_v37, %v881_v33  ;;  %v907_v42 = vsel %vm905_vm1, %v631_v21, %v733_v30  ;;  %vm938_vm7 = vcmask 1046528   ;;  %v797_v53 = vrot.slane %v638_v48, 6  ;;  %v640_v21 = vld [vmem:[%s8247_s0 + $0x8] sm:$0xff] }
  0x83   : > { %7337 = vmatprep.subr.bf16.mxu0 %v7758_v16  ;;  %v929_v43 = vsel %vm928_vm5, %v924_v41, %v889_v35  ;;  %v781_v49 = vsel %vm768_vm0, %v778_v22, %v780_v39  ;;  %v783_v50 = vsel %vm768_vm0, %v780_v39, %v782_v25  ;;  %v911_v51 = vsel %vm768_vm0, %v907_v42, %v784_v40  ;;  %v642_v25 = vld [vmem:[%s8247_s0 + $0x18] sm:$0xff]  ;;  %v643_v41 = vld [vmem:[%s8247_s0 + $0x20] sm:$0xff]  ;;  %v644_v42 = vld [vmem:[%s8247_s0 + $0x28] sm:$0xff] }
  0x84   : > { %v934_v46 = vsel %vm933_vm6, %v929_v43, %v897_v36  ;;  %v866_v54 = vrot.slane %v638_v48, 5  ;;  %v874_v55 = vrot.slane %v638_v48, 4  ;;  %v785_v56 = vrot.slane %v632_v44, 6  ;;  %v645_v44 = vld [vmem:[%s8247_s0 + $0x30] sm:$0xff] }
  0x85   : > { %v939_v52 = vsel %vm938_vm7, %v934_v46, %v630_v19  ;;  %v787_v57 = vrot.slane %v633_v45, 6  ;;  %v946_v59 = vpack.c.bf16 %v783_v50, %v781_v49  ;;  %v789_v60 = vrot.slane %v634_v47, 6 }
  0x86   : > { %7338 = vmatpush3.bf16.msra.mxu0 %v7758_v16  ;;  %v882_v61 = vrot.slane %v638_v48, 3  ;;  %v915_v62 = vsel %vm768_vm0, %v797_v53, %v866_v54  ;;  %v947_v63 = vpack.c.bf16 %v911_v51, %v939_v52  ;;  %v791_v0 = vrot.slane %v635_v58, 6  ;;  %v639_v16 = vld [vmem:[%s8247_s0] sm:$0xff] }
  0x87   : > { %v890_v1 = vrot.slane %v638_v48, 2  ;;  %v920_v2 = vsel %vm918_vm3, %v915_v62, %v874_v55  ;;  %v786_v3 = vsel %vm768_vm0, %v784_v40, %v785_v56  ;;  %v788_v4 = vsel %vm768_vm0, %v785_v56, %v787_v57  ;;  %v647_v52 = vld [vmem:[%s8247_s0 + $0x40] sm:$0xff]  ;;  %p11930_p8 = scmp.ne.s32.totalorder %s11928_s24, 0 }
  0x88   : > { %v925_v5 = vsel %vm923_vm4, %v920_v2, %v882_v61  ;;  %v790_v6 = vsel %vm768_vm0, %v787_v57, %v789_v60  ;;  %v792_v7 = vsel %vm768_vm0, %v789_v60, %v791_v0  ;;  %v898_v10 = vrot.slane %v638_v48, 1  ;;  %v648_v61 = vld [vmem:[%s8247_s0 + $0x48] sm:$0xff] }
  0x89   : > { %7340 = vmatmul.mubr.msk.bf16.vlgmr.msra.gmra.mxu0 %vm687_vm2, %v944_v34  ;;  %v948_v11 = vpack.c.bf16 %v788_v4, %v786_v3  ;;  %v930_v12 = vsel %vm928_vm5, %v925_v5, %v890_v1  ;;  %v949_v13 = vpack.c.bf16 %v792_v7, %v790_v6  ;;  %v793_v14 = vrot.slane %v636_v8, 6 }
  0x8a   : > { %7343 = vmatprep.mubr.msk.bf16.mxu0 %vm687_vm2, %v945_v38  ;;  %v795_v15 = vrot.slane %v637_v9, 6  ;;  %v935_v17 = vsel %vm933_vm6, %v930_v12, %v898_v10  ;;  %v734_v20 = vrot.slane %v639_v16, 7  ;;  %v799_v29 = vrot.slane %v639_v16, 6 }
  0x8b   : > { %v794_v18 = vsel %vm768_vm0, %v791_v0, %v793_v14  ;;  %v940_v23 = vsel %vm938_vm7, %v935_v17, %v638_v48  ;;  %v800_v30 = vrot.slane %v640_v21, 6  ;;  %v802_v32 = vrot.slane %v641_v24, 6  ;;  %v654_v0 = vld [vmem:[%s8247_s0 + $0x78] sm:$0xff] }
  0x8c   : > { %v796_v19 = vsel %vm768_vm0, %v793_v14, %v795_v15  ;;  %v798_v22 = vsel %vm768_vm0, %v795_v15, %v797_v53  ;;  %v908_v31 = vsel %vm905_vm1, %v639_v16, %v734_v20  ;;  %v804_v33 = vrot.slane %v642_v25, 6  ;;  %v650_v15 = vld [vmem:[%s8247_s0 + $0x58] sm:$0xff]  ;;  %v651_v16 = vld [vmem:[%s8247_s0 + $0x60] sm:$0xff] }
  0x8d   : > { %v950_v27 = vpack.c.bf16 %v796_v19, %v794_v18  ;;  %v951_v28 = vpack.c.bf16 %v940_v23, %v798_v22  ;;  %v812_v34 = vrot.slane %v646_v26, 6  ;;  %v867_v35 = vrot.slane %v646_v26, 5  ;;  %v652_v18 = vld [vmem:[%s8247_s0 + $0x68] sm:$0xff]  ;;  %v653_v19 = vld [vmem:[%s8247_s0 + $0x70] sm:$0xff] }
  0x8e   : > { %v801_v36 = vsel %vm768_vm0, %v799_v29, %v800_v30  ;;  %v912_v37 = vsel %vm768_vm0, %v908_v31, %v799_v29  ;;  %v875_v38 = vrot.slane %v646_v26, 4  ;;  %v803_v39 = vsel %vm768_vm0, %v800_v30, %v802_v32 }
  0x8f   : > { %v805_v40 = vsel %vm768_vm0, %v802_v32, %v804_v33  ;;  %v916_v43 = vsel %vm768_vm0, %v812_v34, %v867_v35  ;;  %v952_v45 = vpack.c.bf16 %v801_v36, %v912_v37  ;;  %v883_v46 = vrot.slane %v646_v26, 3 }
  0x90   : > { %v953_v47 = vpack.c.bf16 %v805_v40, %v803_v39  ;;  %v806_v48 = vrot.slane %v643_v41, 6  ;;  %v808_v49 = vrot.slane %v644_v42, 6  ;;  %v921_v50 = vsel %vm918_vm3, %v916_v43, %v875_v38 }
  0x91   : > { %7344 = vmatmul.mubr.msk.bf16.gmra.mxu0 %vm687_vm2, %v946_v59  ;;  %v810_v51 = vrot.slane %v645_v44, 6  ;;  %v891_v53 = vrot.slane %v646_v26, 2  ;;  %v926_v54 = vsel %vm923_vm4, %v921_v50, %v883_v46  ;;  %v735_v57 = vrot.slane %v647_v52, 7 }
  0x92   : > { %7347 = vmatprep.mubr.msk.bf16.mxu0 %vm687_vm2, %v947_v63  ;;  %v807_v55 = vsel %vm768_vm0, %v804_v33, %v806_v48  ;;  %v809_v56 = vsel %vm768_vm0, %v806_v48, %v808_v49  ;;  %v899_v60 = vrot.slane %v646_v26, 1  ;;  %v649_v63 = vld [vmem:[%s8247_s0 + $0x50] sm:$0xff]  ;;  %v814_v3 = vrot.slane %v647_v52, 6 }
  0x93   : > { %v811_v58 = vsel %vm768_vm0, %v808_v49, %v810_v51  ;;  %v813_v59 = vsel %vm768_vm0, %v810_v51, %v812_v34  ;;  %v931_v62 = vsel %vm928_vm5, %v926_v54, %v891_v53  ;;  %v954_v1 = vpack.c.bf16 %v809_v56, %v807_v55 }
  0x94   : > { %v955_v2 = vpack.c.bf16 %v813_v59, %v811_v58  ;;  %v909_v4 = vsel %vm905_vm1, %v647_v52, %v735_v57  ;;  %v815_v5 = vrot.slane %v648_v61, 6  ;;  %v936_v6 = vsel %vm933_vm6, %v931_v62, %v899_v60 }
  0x95   : > { %v817_v7 = vrot.slane %v649_v63, 6  ;;  %v827_v8 = vrot.slane %v654_v0, 6  ;;  %v868_v9 = vrot.slane %v654_v0, 5  ;;  %v913_v10 = vsel %vm768_vm0, %v909_v4, %v814_v3 }
  0x96   : > { %v876_v12 = vrot.slane %v654_v0, 4  ;;  %v884_v21 = vrot.slane %v654_v0, 3  ;;  %v819_v23 = vrot.slane %v650_v15, 6  ;;  %v821_v24 = vrot.slane %v651_v16, 6 }
  0x97   : > { %v818_v14 = vsel %vm768_vm0, %v815_v5, %v817_v7  ;;  %v917_v17 = vsel %vm768_vm0, %v827_v8, %v868_v9  ;;  %v900_v34 = vrot.slane %v654_v0, 1  ;;  %vm3451_vm8 = vcmask 261120  }
  0x98   : > { %v922_v25 = vsel %vm918_vm3, %v917_v17, %v876_v12  ;;  %v820_v30 = vsel %vm768_vm0, %v817_v7, %v819_v23  ;;  %v822_v31 = vsel %vm768_vm0, %v819_v23, %v821_v24  ;;  %vm7969_vm9 = vmmov 0  }
  0x99   : > { %7348 = vmatmul.mubr.msk.bf16.gmra.mxu0 %vm687_vm2, %v948_v11  ;;  %v941_v11 = vsel %vm938_vm7, %v936_v6, %v646_v26  ;;  %v825_v26 = vrot.slane %v653_v19, 6  ;;  %v927_v29 = vsel %vm923_vm4, %v922_v25, %v884_v21  ;;  %v958_v36 = vpack.c.bf16 %v822_v31, %v820_v30 }
  0x9a   : > { %7351 = vmatprep.mubr.msk.bf16.mxu0 %vm687_vm2, %v949_v13  ;;  %v816_v13 = vsel %vm768_vm0, %v814_v3, %v815_v5  ;;  %v956_v20 = vpack.c.bf16 %v913_v10, %v941_v11  ;;  %vm4872_vm10 = vcmask 130048   ;;  %vm5778_vm11 = vcmask 64512  }
  0x9b   : > { %v957_v22 = vpack.c.bf16 %v818_v14, %v816_v13  ;;  %v828_v39 = vsel %vm768_vm0, %v825_v26, %v827_v8  ;;  %vm6421_vm12 = vcmask 31744   ;;  %vm6632_vm13 = vcmask 27648  }
  0x9c   : > { %vm6891_vm14 = vcmask 9216  }
  0xa1   : > { %7352 = vmatmul.mubr.msk.bf16.gmra.mxu0 %vm687_vm2, %v950_v27  ;;  %v823_v27 = vrot.slane %v652_v18, 6 }
  0xa2   : > { %7355 = vmatprep.mubr.msk.bf16.mxu0 %vm687_vm2, %v951_v28  ;;  %v892_v28 = vrot.slane %v654_v0, 2 }
  0xa3   : > { %v824_v32 = vsel %vm768_vm0, %v821_v24, %v823_v27  ;;  %v826_v33 = vsel %vm768_vm0, %v823_v27, %v825_v26 }
  0xa4   : > { %v932_v35 = vsel %vm928_vm5, %v927_v29, %v892_v28  ;;  %v959_v37 = vpack.c.bf16 %v826_v33, %v824_v32 }
  0xa5   : > { %v937_v38 = vsel %vm933_vm6, %v932_v35, %v900_v34 }
  0xa6   : > { %v942_v40 = vsel %vm938_vm7, %v937_v38, %v654_v0 }
  0xa7   : > { %v960_v41 = vpack.c.bf16 %v942_v40, %v828_v39 }
  0xa9   : > { %7356 = vmatmul.mubr.msk.bf16.gmra.mxu0 %vm687_vm2, %v952_v45 }
  0xaa   : > { %7359 = vmatprep.mubr.msk.bf16.mxu0 %vm687_vm2, %v953_v47 }
  0xb1   : > { %7360 = vmatmul.mubr.msk.bf16.gmra.mxu0 %vm687_vm2, %v954_v1 }
  0xb2   : > { %7363 = vmatprep.mubr.msk.bf16.mxu0 %vm687_vm2, %v955_v2 }
  0xb9   : > { %7364 = vmatmul.mubr.msk.bf16.gmra.mxu0 %vm687_vm2, %v956_v20 }
  0xba   : > { %7367 = vmatprep.mubr.msk.bf16.mxu0 %vm687_vm2, %v957_v22 }
  0xc1   : > { %7368 = vmatmul.mubr.msk.bf16.gmra.mxu0 %vm687_vm2, %v958_v36 }
  0xc2   : > { %7371 = vmatprep.mubr.msk.bf16.mxu0 %vm687_vm2, %v959_v37 }
  0xc9   : > { %7372 = vmatmul.mubr.msk.bf16.gmra.mxu0 %vm687_vm2, %v960_v41 }
 0x149   : > { %v8379_v42 = vpop.f32.mrf.mxu0 }
 0x14a   : > { %v1915_v46 = vrot.slane %v8379_v42, 1  ;;  %v2223_v21 = vrot.slane %v8379_v42, 4 }
 0x14b   : > { %v8381_v43 = vpop.f32.mrf.mxu0 }
 0x14c   : > { %v1912_v50 = vrot.slane %v8381_v43, 1  ;;  %v2220_v8 = vrot.slane %v8381_v43, 4 }
 0x14d   : > { %v8383_v44 = vpop.f32.mrf.mxu0 }
 0x14e   : > { %v1917_v45 = vrot.slane %v8383_v44, 1  ;;  %v2225_v15 = vrot.slane %v8383_v44, 4 }
 0x14f   : > { %v8387_v47 = vpop.f32.mrf.mxu0 }
 0x150   : > { %v1913_v48 = vrot.slane %v8387_v47, 1  ;;  %v1918_v51 = vsel %vm938_vm7, %v1915_v46, %v1917_v45  ;;  %v2221_v2 = vrot.slane %v8387_v47, 4  ;;  %v2226_v29 = vsel %vm923_vm4, %v2223_v21, %v2225_v15 }
 0x151   : > { %v8390_v49 = vpop.f32.mrf.mxu0  ;;  %v2014_v57 = vadd.f32 %v8379_v42, %v1918_v51 }
 0x152   : > { %11516 = vst [vmem:[#allocation19_spill] sm:$0xff] %v8390_v49  ;;  %v1914_v53 = vsel %vm938_vm7, %v1912_v50, %v1913_v48  ;;  %v1916_v54 = vsel %vm938_vm7, %v1913_v48, %v1915_v46  ;;  %v1923_v0 = vrot.slane %v8390_v49, 1  ;;  %v2222_v14 = vsel %vm923_vm4, %v2220_v8, %v2221_v2 }
 0x153   : > { %v8394_v52 = vpop.f32.mrf.mxu0  ;;  %v2012_v56 = vadd.f32 %v1914_v53, %v8381_v43  ;;  %v2013_v59 = vadd.f32 %v1916_v54, %v8387_v47  ;;  %v2091_v3 = vrot.slane %v2014_v57, 2  ;;  %v2224_v26 = vsel %vm923_vm4, %v2221_v2, %v2223_v21 }
 0x154   : > { %11517 = vst [vmem:[#allocation20_spill] sm:$0xff] %v8394_v52  ;;  %v1919_v55 = vrot.slane %v8394_v52, 1  ;;  %v2227_v36 = vrot.slane %v8394_v52, 4 }
 0x155   : > { %v8401_v58 = vpop.f32.mrf.mxu0  ;;  %v2088_v61 = vrot.slane %v2012_v56, 2  ;;  %v2089_v62 = vrot.slane %v2013_v59, 2 }
 0x156   : > { %v1920_v63 = vsel %vm938_vm7, %v1917_v45, %v1919_v55  ;;  %v1925_v13 = vrot.slane %v8401_v58, 1 }
 0x157   : > { %v8404_v60 = vpop.f32.mrf.mxu0  ;;  %v2090_v5 = vsel %vm933_vm6, %v2088_v61, %v2089_v62  ;;  %v2015_v6 = vadd.f32 %v8383_v44, %v1920_v63  ;;  %v2092_v9 = vsel %vm933_vm6, %v2089_v62, %v2091_v3 }
 0x158   : > { %v1921_v1 = vrot.slane %v8404_v60, 1  ;;  %v2188_v12 = vadd.f32 %v2090_v5, %v2012_v56  ;;  %v2189_v18 = vadd.f32 %v2092_v9, %v2013_v59  ;;  %v2229_v33 = vrot.slane %v8404_v60, 4 }
 0x159   : > { %v8410_v4 = vpop.f32.mrf.mxu0  ;;  %v2093_v19 = vrot.slane %v2015_v6, 2  ;;  %v1926_v34 = vsel %vm938_vm7, %v1923_v0, %v1925_v13 }
 0x15a   : > { %v1924_v7 = vsel %vm938_vm7, %v1921_v1, %v1923_v0  ;;  %v2320_v16 = vadd.f32 %v2222_v14, %v2188_v12  ;;  %v1922_v20 = vsel %vm938_vm7, %v1919_v55, %v1921_v1  ;;  %v2321_v30 = vadd.f32 %v2224_v26, %v2189_v18 }
 0x15b   : > { %v2017_v10 = vadd.f32 %v1924_v7, %v8404_v60  ;;  %v8418_v11 = vpop.f32.mrf.mxu0  ;;  %v2094_v23 = vsel %vm933_vm6, %v2091_v3, %v2093_v19  ;;  %v2016_v24 = vadd.f32 %v1922_v20, %v8394_v52  ;;  %v2018_v40 = vadd.f32 %v8390_v49, %v1926_v34 }
 0x15c   : > { %2384 = vrot.lane.b32.xlu0 %v2320_v16, %s7965_s22  ;;  %v1927_v27 = vrot.slane %v8418_v11, 1  ;;  %v2190_v28 = vadd.f32 %v2094_v23, %v2014_v57  ;;  %v2230_v46 = vsel %vm923_vm4, %v2227_v36, %v2229_v33  ;;  %v2228_v55 = vsel %vm923_vm4, %v2225_v15, %v2227_v36 }
 0x15d   : > { %v8423_v17 = vpop.f32.mrf.mxu0  ;;  %v2097_v25 = vrot.slane %v2017_v10, 2  ;;  %v2095_v32 = vrot.slane %v2016_v24, 2  ;;  %v2099_v51 = vrot.slane %v2018_v40, 2  ;;  %v2231_v0 = vrot.slane %v8390_v49, 4 }
 0x15e   : > { %v2322_v35 = vadd.f32 %v2226_v29, %v2190_v28  ;;  %v2048_v41 = vadd.f32 %v1927_v27, %v8418_v11  ;;  %v1928_v53 = vsel %vm938_vm7, %v1925_v13, %v1927_v27  ;;  %v1932_v62 = vrot.slane %v8423_v17, 1 }
 0x15f   : > { %v8428_v22 = vpop.f32.mrf.mxu0  ;;  %v2098_v38 = vsel %vm933_vm6, %v2095_v32, %v2097_v25  ;;  %v2096_v39 = vsel %vm933_vm6, %v2093_v19, %v2095_v32  ;;  %v2100_v59 = vsel %vm933_vm6, %v2097_v25, %v2099_v51  ;;  %v2019_v61 = vadd.f32 %v8401_v58, %v1928_v53 }
 0x160   : > { %2386 = vrot.lane.b32.xlu0 %v2321_v30, %s7965_s22  ;;  %2388 = vrot.lane.b32.xlu1 %v2322_v35, %s7965_s22  ;;  %v2192_v45 = vadd.f32 %v2098_v38, %v2016_v24  ;;  %v2191_v48 = vadd.f32 %v2096_v39, %v2015_v6  ;;  %v1929_v63 = vrot.slane %v8428_v22, 1  ;;  %v2193_v1 = vadd.f32 %v2100_v59, %v2017_v10 }
 0x161   : > { %v8435_v31 = vpop.f32.mrf.mxu0  ;;  %v2101_v2 = vrot.slane %v2019_v61, 2  ;;  %v2233_v3 = vrot.slane %v8401_v58, 4  ;;  %v2103_v6 = vrot.slane %v2048_v41, 2  ;;  %v2232_v7 = vsel %vm923_vm4, %v2229_v33, %v2231_v0 }
 0x162   : > { %11518 = vst [vmem:[#allocation21_spill] sm:$0xff] %v8435_v31  ;;  %v2324_v54 = vadd.f32 %v2230_v46, %v2192_v45  ;;  %v2323_v56 = vadd.f32 %v2228_v55, %v2191_v48  ;;  %v1930_v8 = vrot.slane %v8410_v4, 1  ;;  %v2325_v9 = vadd.f32 %v2232_v7, %v2193_v1 }
 0x163   : > { %v8441_v37 = vpop.f32.mrf.mxu0  ;;  %v2102_v12 = vsel %vm933_vm6, %v2099_v51, %v2101_v2  ;;  %v1938_v14 = vrot.slane %v8435_v31, 1  ;;  %v2234_v16 = vsel %vm923_vm4, %v2231_v0, %v2233_v3  ;;  %v2104_v18 = vsel %vm933_vm6, %v2101_v2, %v2103_v6 }
 0x164   : > { %11519 = vst [vmem:[#allocation22_spill] sm:$0xff] %v8441_v37  ;;  %2392 = vrot.lane.b32.xlu0 %v2324_v54, %s7965_s22  ;;  %2390 = vrot.lane.b32.xlu1 %v2323_v56, %s7965_s22  ;;  %v2194_v10 = vadd.f32 %v2102_v12, %v2018_v40  ;;  %v2235_v19 = vrot.slane %v8418_v11, 4  ;;  %v1931_v20 = vsel %vm938_vm7, %v1929_v63, %v1930_v8  ;;  %v1934_v24 = vrot.slane %v8441_v37, 1 }
 0x165   : > { %v8449_v50 = vpop.f32.mrf.mxu0  ;;  %v1933_v21 = vsel %vm938_vm7, %v1930_v8, %v1932_v62  ;;  %v2195_v27 = vadd.f32 %v2104_v18, %v2019_v61  ;;  %v2020_v26 = vadd.f32 %v1931_v20, %v8428_v22  ;;  %v2237_v36 = vrot.slane %v8428_v22, 4 }
 0x166   : > { %11520 = vst [vmem:[#allocation23_spill] sm:$0xff] %v8449_v50  ;;  %v2326_v25 = vadd.f32 %v2234_v16, %v2194_v10  ;;  %v2236_v28 = vsel %vm923_vm4, %v2233_v3, %v2235_v19  ;;  %v2021_v29 = vadd.f32 %v8410_v4, %v1933_v21  ;;  %v1935_v39 = vsel %vm938_vm7, %v1932_v62, %v1934_v24 }
 0x167   : > { %v8453_v57 = vpop.f32.mrf.mxu0  ;;  %v2327_v33 = vadd.f32 %v2236_v28, %v2195_v27  ;;  %v2105_v34 = vrot.slane %v2020_v26, 2  ;;  %v2238_v45 = vrot.slane %v8410_v4, 4  ;;  %v2022_v46 = vadd.f32 %v8423_v17, %v1935_v39 }
 0x168   : > { %11521 = vst [vmem:[#allocation24_spill] sm:$0xff] %v8453_v57  ;;  %v1936_v15 = vrot.slane %v8453_v57, 1  ;;  %2394 = vrot.lane.b32.xlu1 %v2325_v9, %s7965_s22  ;;  %2396 = vrot.lane.b32.xlu0 %v2326_v25, %s7965_s22  ;;  %v2106_v35 = vrot.slane %v2021_v29, 2  ;;  %v2240_v55 = vrot.slane %v8423_v17, 4  ;;  %v1940_v2 = vrot.slane %v8449_v50, 1 }
 0x169   : > { %v8463_v5 = vpop.f32.mrf.mxu0  ;;  %v2239_v53 = vsel %vm923_vm4, %v2237_v36, %v2238_v45  ;;  %v2108_v54 = vrot.slane %v2022_v46, 2  ;;  %v2242_v9 = vrot.slane %v8441_v37, 4  ;;  %v2244_v12 = vrot.slane %v8453_v57, 4 }
 0x16a   : > { %11522 = vst [vmem:[#allocation25_spill] sm:$0xff] %v8463_v5  ;;  %v1939_v32 = vsel %vm938_vm7, %v1936_v15, %v1938_v14  ;;  %v2107_v41 = vsel %vm933_vm6, %v2105_v34, %v2106_v35  ;;  %v1937_v61 = vsel %vm938_vm7, %v1934_v24, %v1936_v15  ;;  %v2241_v7 = vsel %vm923_vm4, %v2238_v45, %v2240_v55 }
 0x16b   : > { %v8468_v13 = vpop.f32.mrf.mxu0  ;;  %v2024_v40 = vadd.f32 %v1939_v32, %v8453_v57  ;;  %v2196_v51 = vadd.f32 %v2107_v41, %v2020_v26  ;;  %v2109_v62 = vsel %vm933_vm6, %v2106_v35, %v2108_v54  ;;  %v2023_v63 = vadd.f32 %v1937_v61, %v8441_v37 }
 0x16c   : > { %11523 = vst [vmem:[#allocation26_spill] sm:$0xff] %v8468_v13  ;;  %2398 = vrot.lane.b32.xlu1 %v2327_v33, %s7965_s22  ;;  %v1942_v3 = vrot.slane %v8468_v13, 1  ;;  %v2197_v6 = vadd.f32 %v2109_v62, %v2021_v29  ;;  %v8517_v16 = vmul.f32 0.023647603, %v8379_v42  ;;  %v1941_v27 = vsel %vm938_vm7, %v1938_v14, %v1940_v2 }
 0x16d   : > { %v8478_v23 = vpop.f32.mrf.mxu0  ;;  %v2328_v59 = vadd.f32 %v2239_v53, %v2196_v51  ;;  %v2112_v0 = vrot.slane %v2024_v40, 2  ;;  %v2110_v8 = vrot.slane %v2023_v63, 2  ;;  %v2245_v26 = vsel %vm923_vm4, %v2242_v9, %v2244_v12 }
 0x16e   : > { %11524 = vst [vmem:[#allocation27_spill] sm:$0xff] %v8478_v23  ;;  %v2329_v10 = vadd.f32 %v2241_v7, %v2197_v6  ;;  %v2243_v28 = vsel %vm923_vm4, %v2240_v55, %v2242_v9  ;;  %v2025_v29 = vadd.f32 %v8435_v31, %v1941_v27  ;;  %v1943_v32 = vsel %vm938_vm7, %v1940_v2, %v1942_v3 }
 0x16f   : > { %v8484_v30 = vpop.f32.mrf.mxu0  ;;  %2400 = vrot.lane.b32.xlu0 %v2328_v59, %s7965_s22  ;;  %v2113_v19 = vsel %vm933_vm6, %v2110_v8, %v2112_v0  ;;  %v2111_v20 = vsel %vm933_vm6, %v2108_v54, %v2110_v8  ;;  %v8533_v34 = vmul.f32 0.030364122, %v8379_v42  ;;  %v2026_v39 = vadd.f32 %v8449_v50, %v1943_v32 }
 0x170   : > { %11525 = vst [vmem:[#allocation28_spill] sm:$0xff] %v8484_v30  ;;  %v1944_v18 = vrot.slane %v8484_v30, 1  ;;  %2402 = vrot.lane.b32.xlu1 %v2329_v10, %s7965_s22  ;;  %v2199_v24 = vadd.f32 %v2113_v19, %v2023_v63  ;;  %v2198_v25 = vadd.f32 %v2111_v20, %v2022_v46  ;;  %v2114_v45 = vrot.slane %v2025_v29, 2 }
 0x171   : > { %v8489_v38 = vpop.f32.mrf.mxu0  ;;  %v8541_v51 = vmul.f32 0.011170336, %v8379_v42  ;;  %v8544_v53 = vmul.f32 0.023647603, %v8381_v43  ;;  %v2116_v54 = vrot.slane %v2026_v39, 2  ;;  %v2248_v55 = vrot.slane %v8449_v50, 4 }
 0x172   : > { %11526 = vst [vmem:[#allocation29_spill] sm:$0xff] %v8489_v38  ;;  %v2331_v35 = vadd.f32 %v2245_v26, %v2199_v24  ;;  %v2330_v36 = vadd.f32 %v2243_v28, %v2198_v25  ;;  %v2049_v14 = vadd.f32 %v1944_v18, %v8484_v30  ;;  %v8550_v59 = vmul.f32 0.011170336, %v8381_v43 }
 0x173   : > { %v8497_v48 = vpop.f32.mrf.mxu0  ;;  %v2115_v61 = vsel %vm933_vm6, %v2112_v0, %v2114_v45  ;;  %v2246_v62 = vrot.slane %v8435_v31, 4  ;;  %v1945_v42 = vsel %vm938_vm7, %v1942_v3, %v1944_v18  ;;  %v8558_v2 = vmul.f32 0.030364122, %v8381_v43 }
 0x174   : > { %11527 = vst [vmem:[#allocation30_spill] sm:$0xff] %v8497_v48  ;;  %2406 = vrot.lane.b32.xlu1 %v2331_v35, %s7965_s22  ;;  %2404 = vrot.lane.b32.xlu0 %v2330_v36, %s7965_s22  ;;  %v1947_v6 = vrot.slane %v8478_v23, 1  ;;  %v2200_v8 = vadd.f32 %v2115_v61, %v2024_v40  ;;  %v2117_v9 = vsel %vm933_vm6, %v2114_v45, %v2116_v54  ;;  %v2120_v20 = vrot.slane %v2049_v14, 2 }
 0x175   : > { %v8501_v56 = vpop.f32.mrf.mxu0  ;;  %v2247_v10 = vsel %vm923_vm4, %v2244_v12, %v2246_v62  ;;  %v2201_v19 = vadd.f32 %v2117_v9, %v2025_v29  ;;  %v2027_v0 = vadd.f32 %v1945_v42, %v8468_v13  ;;  %v1953_v3 = vrot.slane %v8489_v38, 1 }
 0x176   : > { %11528 = vst [vmem:[#allocation31_spill] sm:$0xff] %v8501_v56  ;;  %v1949_v43 = vrot.slane %v8497_v48, 1  ;;  %v2332_v18 = vadd.f32 %v2247_v10, %v2200_v8  ;;  %v2249_v25 = vsel %vm923_vm4, %v2246_v62, %v2248_v55  ;;  %v2250_v40 = vrot.slane %v8468_v13, 4 }
 0x177   : > { %v8506_v1 = vpop.f32.mrf.mxu0  ;;  %v2333_v27 = vadd.f32 %v2249_v25, %v2201_v19  ;;  %v2118_v26 = vrot.slane %v2027_v0, 2  ;;  %v2252_v28 = vrot.slane %v8484_v30, 4  ;;  %v8574_v29 = vmul.f32 0.023647603, %v8383_v44 }
 0x178   : > { %11529 = vst [vmem:[#allocation32_spill] sm:$0xff] %v8506_v1  ;;  %v1951_v7 = vrot.slane %v8506_v1, 1  ;;  %v1946_v32 = vrot.slane %v8463_v5, 1  ;;  %2408 = vrot.lane.b32.xlu0 %v2332_v18, %s7965_s22  ;;  %v8580_v36 = vmul.f32 0.030364122, %v8383_v44  ;;  %v1950_v10 = vsel %vm938_vm7, %v1947_v6, %v1949_v43 }
 0x179   : > { %v8514_v15 = vpop.f32.mrf.mxu0  ;;  %2410 = vrot.lane.b32.xlu1 %v2333_v27, %s7965_s22  ;;  %v2121_v45 = vsel %vm933_vm6, %v2118_v26, %v2120_v20  ;;  %v2119_v61 = vsel %vm933_vm6, %v2116_v54, %v2118_v26  ;;  %v2253_v19 = vsel %vm923_vm4, %v2250_v40, %v2252_v28  ;;  %v2251_v18 = vsel %vm923_vm4, %v2248_v55, %v2250_v40 }
 0x17a   : > { %11530 = vst [vmem:[#allocation33_spill] sm:$0xff] %v8514_v15  ;;  %v1954_v14 = vsel %vm938_vm7, %v1951_v7, %v1953_v3  ;;  %v2203_v42 = vadd.f32 %v2121_v45, %v2027_v0  ;;  %v2202_v8 = vadd.f32 %v2119_v61, %v2026_v39  ;;  %v1948_v9 = vsel %vm938_vm7, %v1946_v32, %v1947_v6 }
 0x17b   : > { %v8522_v21 = vpop.f32.mrf.mxu0  ;;  %v2028_v25 = vadd.f32 %v8463_v5, %v1948_v9  ;;  %v2029_v27 = vadd.f32 %v8478_v23, %v1950_v10  ;;  %v8597_v20 = vadd.f32 %v1954_v14, %v8506_v1  ;;  %v2255_v6 = vrot.slane %v8478_v23, 4 }
 0x17c   : > { %11531 = vst [vmem:[#allocation34_spill] sm:$0xff] %v8522_v21  ;;  %v2335_v54 = vadd.f32 %v2253_v19, %v2203_v42  ;;  %v2334_v26 = vadd.f32 %v2251_v18, %v2202_v8  ;;  %v8605_v55 = vmul.f32 0.023647603, %v8387_v47  ;;  %v8608_v40 = vmul.f32 0.030364122, %v8387_v47 }
 0x17d   : > { %v8530_v33 = vpop.f32.mrf.mxu0  ;;  %v2122_v32 = vrot.slane %v2028_v25, 2  ;;  %v2123_v45 = vrot.slane %v2029_v27, 2  ;;  %v8613_v14 = vmul.f32 0.011170336, %v8383_v44  ;;  %v1961_v61 = vrot.slane %v8514_v15, 1 }
 0x17e   : > { %11532 = vst [vmem:[#allocation35_spill] sm:$0xff] %v8530_v33  ;;  %2414 = vrot.lane.b32.xlu1 %v2335_v54, %s7965_s22  ;;  %2412 = vrot.lane.b32.xlu0 %v2334_v26, %s7965_s22  ;;  %v2254_v8 = vrot.slane %v8463_v5, 4  ;;  %v1952_v9 = vsel %vm938_vm7, %v1949_v43, %v1951_v7  ;;  %v1955_v10 = vrot.slane %v8501_v56, 1  ;;  %v2127_v54 = vrot.slane %v8597_v20, 2 }
 0x17f   : > { %v8538_v46 = vpop.f32.mrf.mxu0  ;;  %v2124_v42 = vsel %vm933_vm6, %v2122_v32, %v2123_v45  ;;  %v2030_v18 = vadd.f32 %v1952_v9, %v8497_v48  ;;  %v1957_v26 = vrot.slane %v8522_v21, 1  ;;  %v8630_v0 = vmul.f32 0.011170336, %v8387_v47 }
 0x180   : > { %11533 = vst [vmem:[#allocation36_spill] sm:$0xff] %v8538_v46  ;;  %v11305_v39 = vrot.slane %v8538_v46, 1  ;;  %v2204_v19 = vadd.f32 %v2124_v42, %v2028_v25  ;;  %v2256_v35 = vsel %vm923_vm4, %v2254_v8, %v2255_v6  ;;  %v2257_v25 = vrot.slane %v8497_v48, 4 }
 0x181   : > { %v8555_v63 = vpop.f32.mrf.mxu0  ;;  %v2125_v43 = vrot.slane %v2030_v18, 2  ;;  %v2259_v42 = vrot.slane %v8506_v1, 4  ;;  %v8637_v12 = vmul.f32 0.023647603, %v8390_v49  ;;  %v8640_v8 = vmul.f32 0.030364122, %v8390_v49 }
 0x182   : > { %11534 = vst [vmem:[#allocation37_spill] sm:$0xff] %v8555_v63  ;;  %v1962_v44 = vsel %vm938_vm7, %v11305_v39, %v1961_v61  ;;  %v2336_v7 = vadd.f32 %v2256_v35, %v2204_v19  ;;  %v8643_v39 = vmul.f32 0.023647603, %v8394_v52  ;;  %v1956_v19 = vsel %vm938_vm7, %v1953_v3, %v1955_v10 }
 0x183   : > { %v8565_v24 = vpop.f32.mrf.mxu0  ;;  %11539 = vst [vmem:[#allocation42_spill] sm:$0xff] %v8640_v8  ;;  %v2128_v47 = vsel %vm933_vm6, %v2125_v43, %v2127_v54  ;;  %v2126_v35 = vsel %vm933_vm6, %v2123_v45, %v2125_v43  ;;  %v8652_v9 = vadd.f32 %v1962_v44, %v8538_v46  ;;  %v2032_v8 = vadd.f32 %v8489_v38, %v1956_v19 }
 0x184   : > { %11535 = vst [vmem:[#allocation38_spill] sm:$0xff] %v8565_v24  ;;  %2416 = vrot.lane.b32.xlu0 %v2336_v7, %s7965_s22  ;;  %v2206_v41 = vadd.f32 %v2128_v47, %v2030_v18  ;;  %v2205_v1 = vadd.f32 %v2126_v35, %v2029_v27  ;;  %v2260_v52 = vsel %vm923_vm4, %v2257_v25, %v2259_v42  ;;  %v8664_v27 = vmul.f32 0.023647603, %v8401_v58 }
 0x185   : > { %v8588_v62 = vpop.f32.mrf.mxu0  ;;  %v2258_v7 = vsel %vm923_vm4, %v2255_v6, %v2257_v25  ;;  %v1958_v45 = vsel %vm938_vm7, %v1955_v10, %v1957_v26  ;;  %v2129_v3 = vrot.slane %v2032_v8, 2  ;;  %v8667_v47 = vmul.f32 0.023647603, %v8404_v60 }
 0x186   : > { %11536 = vst [vmem:[#allocation39_spill] sm:$0xff] %v8588_v62  ;;  %v2338_v43 = vadd.f32 %v2260_v52, %v2206_v41  ;;  %v2337_v30 = vadd.f32 %v2258_v7, %v2205_v1  ;;  %v2033_v44 = vadd.f32 %v8501_v56, %v1958_v45  ;;  %v1968_v35 = vrot.slane %v8555_v63, 1 }
 0x187   : > { %v8602_v28 = vpop.f32.mrf.mxu0  ;;  %v2130_v52 = vsel %vm933_vm6, %v2127_v54, %v2129_v3  ;;  %v2261_v1 = vrot.slane %v8489_v38, 4  ;;  %v2263_v6 = vrot.slane %v8501_v56, 4  ;;  %v2050_v25 = vadd.f32 %v8514_v15, %v1961_v61 }
 0x188   : > { %11537 = vst [vmem:[#allocation40_spill] sm:$0xff] %v8602_v28  ;;  %v1966_v48 = vrot.slane %v8602_v28, 1  ;;  %2420 = vrot.lane.b32.xlu0 %v2338_v43, %s7965_s22  ;;  %2418 = vrot.lane.b32.xlu1 %v2337_v30, %s7965_s22  ;;  %v2131_v41 = vrot.slane %v2033_v44, 2  ;;  %v2207_v7 = vadd.f32 %v2130_v52, %v8597_v20  ;;  %v11542_v45 = vrot.slane %v8538_v46, 1 }
 0x189   : > { %v8627_v32 = vpop.f32.mrf.mxu0  ;;  %v2262_v30 = vsel %vm923_vm4, %v2259_v42, %v2261_v1  ;;  %v2135_v56 = vrot.slane %v8652_v9, 2  ;;  %v1963_v38 = vrot.slane %v8530_v33, 1  ;;  %v2265_v13 = vrot.slane %v8522_v21, 4 }
 0x18a   : > { %11538 = vst [vmem:[#allocation41_spill] sm:$0xff] %v8627_v32  ;;  %v1969_v19 = vsel %vm938_vm7, %v1966_v48, %v1968_v35  ;;  %v1960_v43 = vsel %vm938_vm7, %v1957_v26, %v11542_v45  ;;  %v2132_v54 = vsel %vm933_vm6, %v2129_v3, %v2131_v41  ;;  %v2339_v23 = vadd.f32 %v2262_v30, %v2207_v7 }
 0x18b   : > { %v8655_v49 = vpop.f32.mrf.mxu0  ;;  %v2034_v18 = vadd.f32 %v1960_v43, %v8522_v21  ;;  %v2208_v61 = vadd.f32 %v2132_v54, %v2032_v8  ;;  %v2038_v20 = vadd.f32 %v1969_v19, %v8602_v28  ;;  %v2264_v52 = vsel %vm923_vm4, %v2261_v1, %v2263_v6 }
 0x18c   : > { %11540 = vst [vmem:[#allocation43_spill] sm:$0xff] %v8655_v49  ;;  %v2267_v26 = vrot.slane %v8538_v46, 4  ;;  %v1964_v3 = vrot.slane %v8565_v24, 1  ;;  %v1970_v45 = vrot.slane %v8588_v62, 1  ;;  %2422 = vrot.lane.b32.xlu1 %v2339_v23, %s7965_s22  ;;  %v1976_v8 = vrot.slane %v8627_v32, 1 }
 0x18d   : > { %v8675_v10 = vpop.f32.mrf.mxu0  ;;  %v2133_v5 = vrot.slane %v2034_v18, 2  ;;  %v2340_v43 = vadd.f32 %v2264_v52, %v2208_v61  ;;  %v1972_v7 = vrot.slane %v8655_v49, 1  ;;  %v2266_v21 = vsel %vm923_vm4, %v2263_v6, %v2265_v13 }
 0x18e   : > { %11541 = vst [vmem:[#allocation44_spill] sm:$0xff] %v8675_v10  ;;  %v1978_v30 = vrot.slane %v8675_v10, 1  ;;  %v2268_v23 = vsel %vm923_vm4, %v2265_v13, %v2267_v26  ;;  %v2137_v61 = vrot.slane %v2050_v25, 2  ;;  %v1967_v52 = vsel %vm938_vm7, %v1964_v3, %v1966_v48 }
 0x18f   : > { %v8692_v42 = vpop.f32.mrf.mxu0  ;;  %v2136_v19 = vsel %vm933_vm6, %v2133_v5, %v2135_v56  ;;  %v2134_v1 = vsel %vm933_vm6, %v2131_v41, %v2133_v5  ;;  %2424 = vrot.lane.b32.xlu0 %v2340_v43, %s7965_s22  ;;  %v2142_v50 = vrot.slane %v2038_v20, 2  ;;  %v2037_v41 = vadd.f32 %v1967_v52, %v8565_v24 }
 0x190   : > { %11543 = vst [vmem:[#allocation45_spill] sm:$0xff] %v8692_v42  ;;  %v2210_v54 = vadd.f32 %v2136_v19, %v2034_v18  ;;  %v2209_v46 = vadd.f32 %v2134_v1, %v2033_v44  ;;  %v1974_v57 = vrot.slane %v8692_v42, 1  ;;  %v8710_v43 = vadd.f32 %v8675_v10, %v1978_v30 }
 0x191   : > { %v2138_v18 = vsel %vm933_vm6, %v2135_v56, %v2137_v61  ;;  %v2269_v13 = vrot.slane %v8514_v15, 4  ;;  %v1965_v6 = vsel %vm938_vm7, %v1963_v38, %v1964_v3  ;;  %v2272_v19 = vrot.slane %v8565_v24, 4 }
 0x192   : > { %v2342_v37 = vadd.f32 %v2268_v23, %v2210_v54  ;;  %v2341_v31 = vadd.f32 %v2266_v21, %v2209_v46  ;;  %v1977_v5 = vsel %vm938_vm7, %v1974_v57, %v1976_v8  ;;  %v2211_v48 = vadd.f32 %v2138_v18, %v8652_v9 }
 0x193   : > { %v8713_v44 = vadd.f32 %v1977_v5, %v8692_v42  ;;  %v2140_v21 = vrot.slane %v2037_v41, 2  ;;  %v2274_v46 = vrot.slane %v8602_v28, 4  ;;  %v2270_v25 = vsel %vm923_vm4, %v2267_v26, %v2269_v13 }
 0x194   : > { %2428 = vrot.lane.b32.xlu0 %v2342_v37, %s7965_s22  ;;  %2426 = vrot.lane.b32.xlu1 %v2341_v31, %s7965_s22  ;;  %v2036_v1 = vadd.f32 %v8530_v33, %v1965_v6  ;;  %v1971_v56 = vsel %vm938_vm7, %v1968_v35, %v1970_v45  ;;  %v2343_v54 = vadd.f32 %v2270_v25, %v2211_v48  ;;  %v2271_v31 = vrot.slane %v8530_v33, 4 }
 0x195   : > { %v2143_v37 = vsel %vm933_vm6, %v2140_v21, %v2142_v50  ;;  %v2039_v9 = vadd.f32 %v8555_v63, %v1971_v56  ;;  %v2275_v61 = vsel %vm923_vm4, %v2272_v19, %v2274_v46  ;;  %v2276_v38 = vrot.slane %v8555_v63, 4 }
 0x196   : > { %v2213_v23 = vadd.f32 %v2143_v37, %v2037_v41  ;;  %v2139_v52 = vrot.slane %v2036_v1, 2  ;;  %v1973_v3 = vsel %vm938_vm7, %v1970_v45, %v1972_v7  ;;  %v2278_v35 = vrot.slane %v8588_v62, 4 }
 0x197   : > { %v2144_v26 = vrot.slane %v2039_v9, 2  ;;  %v1975_v5 = vsel %vm938_vm7, %v1972_v7, %v1974_v57  ;;  %v2040_v48 = vadd.f32 %v8588_v62, %v1973_v3  ;;  %v2273_v25 = vsel %vm923_vm4, %v2271_v31, %v2272_v19 }
 0x198   : > { %2430 = vrot.lane.b32.xlu1 %v2343_v54, %s7965_s22  ;;  %v2345_v18 = vadd.f32 %v2275_v61, %v2213_v23  ;;  %v2141_v13 = vsel %vm933_vm6, %v2139_v52, %v2140_v21  ;;  %v2041_v41 = vadd.f32 %v1975_v5, %v8655_v49  ;;  %v2150_v54 = vrot.slane %v8713_v44, 2 }
 0x199   : > { %v2212_v6 = vadd.f32 %v2141_v13, %v2036_v1  ;;  %v2145_v56 = vsel %vm933_vm6, %v2142_v50, %v2144_v26  ;;  %v2146_v45 = vrot.slane %v2040_v48, 2  ;;  %v2280_v24 = vrot.slane %v8655_v49, 4 }
 0x19a   : > { %v2214_v37 = vadd.f32 %v2145_v56, %v2038_v20  ;;  %v2148_v28 = vrot.slane %v2041_v41, 2  ;;  %v2277_v7 = vsel %vm923_vm4, %v2274_v46, %v2276_v38  ;;  %v2282_v21 = vrot.slane %v8692_v42, 4  ;;  %v7760_v56 = vld [vmem:[%s11275_s3 + $0x10] sm:$0xff]  }
 0x19b   : > { %v2344_v57 = vadd.f32 %v2273_v25, %v2212_v6  ;;  %v1979_v1 = vsel %vm938_vm7, %v1976_v8, %v1978_v30  ;;  %v2147_v19 = vsel %vm933_vm6, %v2144_v26, %v2146_v45  ;;  %v2279_v50 = vsel %vm923_vm4, %v2276_v38, %v2278_v35  ;;  %v7759_v25 = vld [vmem:[%s11275_s3 + $0x18] sm:$0xff]  }
 0x19c   : > { %2434 = vrot.lane.b32.xlu1 %v2345_v18, %s7965_s22  ;;  %v2151_v31 = vsel %vm933_vm6, %v2148_v28, %v2150_v54  ;;  %v2149_v20 = vsel %vm933_vm6, %v2146_v45, %v2148_v28  ;;  %v2215_v23 = vadd.f32 %v2147_v19, %v2039_v9  ;;  %v2154_v3 = vrot.slane %v8710_v43, 2  ;;  %7375 = vmatprep.subr.bf16.mxu1 %v7759_v25 }
 0x19d   : > { %2432 = vrot.lane.b32.xlu0 %v2344_v57, %s7965_s22  ;;  %v2217_v61 = vadd.f32 %v2151_v31, %v2041_v41  ;;  %v2216_v52 = vadd.f32 %v2149_v20, %v2040_v48  ;;  %v2346_v46 = vadd.f32 %v2277_v7, %v2214_v37  ;;  %v2283_v5 = vsel %vm923_vm4, %v2280_v24, %v2282_v21 }
 0x19e   : > { %v2281_v8 = vsel %vm923_vm4, %v2278_v35, %v2280_v24  ;;  %v2043_v30 = vadd.f32 %v8627_v32, %v1979_v1  ;;  %v2347_v26 = vadd.f32 %v2279_v50, %v2215_v23  ;;  %v2284_v38 = vrot.slane %v8627_v32, 4  ;;  %7376 = vmatpush3.bf16.msra.mxu1 %v7759_v25 }
 0x19f   : > { %v2286_v18 = vrot.slane %v8675_v10, 4  ;;  %v11544_v28 = vrot.slane %v8605_v55, 1  ;;  %v11545_v9 = vrot.slane %v8544_v53, 1  ;;  %v2349_v48 = vadd.f32 %v2283_v5, %v2217_v61  ;;  %7377 = vmatprep.subr.bf16.mxu1 %v7760_v56 }
 0x1a0   : > { %v2348_v43 = vadd.f32 %v2281_v8, %v2216_v52  ;;  %v2152_v41 = vrot.slane %v2043_v30, 2  ;;  %v11546_v6 = vrot.slane %v8517_v16, 1  ;;  %2438 = vrot.lane.b32.xlu1 %v2347_v26, %s7965_s22  ;;  %v1745_v45 = vrot.slane %v8630_v0, 4 }
 0x1a1   : > { %v1370_v13 = vsel %vm938_vm7, %v11545_v9, %v11544_v28  ;;  %v11547_v24 = vmov %v11544_v28  ;;  %2436 = vrot.lane.b32.xlu0 %v2346_v46, %s7965_s22  ;;  %v11548_v1 = vrot.slane %v8574_v29, 1  ;;  %v11550_v61 = vrot.slane %v8550_v59, 4 }
 0x1a2   : > { %v1372_v35 = vsel %vm938_vm7, %v11547_v24, %v11546_v6  ;;  %v1468_v53 = vadd.f32 %v1370_v13, %v8550_v59  ;;  %v1504_v37 = vadd.f32 %v1370_v13, %v8558_v2  ;;  %v2155_v57 = vsel %vm933_vm6, %v2152_v41, %v2154_v3  ;;  %7378 = vmatpush3.bf16.msra.mxu1 %v7760_v56 }
 0x1a3   : > { %v1505_v55 = vadd.f32 %v1372_v35, %v8608_v40  ;;  %v2153_v7 = vsel %vm933_vm6, %v2150_v54, %v2152_v41  ;;  %v11549_v19 = vmov %v11546_v6  ;;  %v1469_v31 = vadd.f32 %v1372_v35, %v8630_v0  ;;  %v7761_v0 = vld [vmem:[%s11275_s3 + $0x8] sm:$0xff]  }
 0x1a4   : > { %v1374_v50 = vsel %vm938_vm7, %v11549_v19, %v11548_v1  ;;  %v2219_v20 = vadd.f32 %v2155_v57, %v2043_v30  ;;  %v2218_v2 = vadd.f32 %v2153_v7, %v8713_v44  ;;  %v1576_v23 = vrot.slane %v1504_v37, 2  ;;  %2442 = vrot.lane.b32.xlu1 %v2349_v48, %s7965_s22  ;;  %7379 = vmatprep.subr.bf16.mxu1 %v7761_v0 }
 0x1a5   : > { %v1577_v40 = vrot.slane %v1505_v55, 2  ;;  %v1746_v52 = vsel %vm923_vm4, %v11550_v61, %v1745_v45  ;;  %v1506_v54 = vadd.f32 %v1374_v50, %v8533_v34  ;;  %v11551_v3 = vrot.slane %v8541_v51, 4  ;;  %2440 = vrot.lane.b32.xlu0 %v2348_v43, %s7965_s22  ;;  %v11557_v61 = vld [vmem:[#allocation23_spill] sm:$0xff] }
 0x1a6   : > { %v1470_v46 = vadd.f32 %v1374_v50, %v8541_v51  ;;  %v8800_v44 = vmul.f32 0.023647603, %v8410_v4  ;;  %v2287_v34 = vsel %vm923_vm4, %v2284_v38, %v2286_v18  ;;  %v11341_v5 = vrot.slane %v8613_v14, 4  ;;  %7380 = vmatpush3.bf16.msra.mxu1 %v7761_v0  ;;  %v11555_v50 = vld [vmem:[#allocation21_spill] sm:$0xff] }
 0x1a7   : > { %v1748_v16 = vsel %vm923_vm4, %v1745_v45, %v11551_v3  ;;  %v1578_v59 = vsel %vm933_vm6, %v1576_v23, %v1577_v40  ;;  %v2285_v8 = vsel %vm923_vm4, %v2282_v21, %v2284_v38  ;;  %v1579_v26 = vrot.slane %v1506_v54, 2  ;;  %v11556_v23 = vld [vmem:[#allocation22_spill] sm:$0xff]  ;;  %v11559_v0 = vld [vmem:[#allocation25_spill] sm:$0xff]  ;;  %v11572_v38 = vld [vmem:[#allocation32_spill] sm:$0xff] }
 0x1a8   : > { %v1676_v30 = vadd.f32 %v1578_v59, %v1468_v53  ;;  %v11552_v28 = vrot.slane %v8643_v39, 1  ;;  %v11553_v9 = vmov %v11548_v1  ;;  %v2351_v48 = vadd.f32 %v2287_v34, %v2219_v20  ;;  %v11567_v45 = vld [vmem:[#allocation30_spill] sm:$0xff] }
 0x1a9   : > { %v2350_v41 = vadd.f32 %v2285_v8, %v2218_v2  ;;  %v11554_v18 = vmov %v11551_v3  ;;  %v8826_v29 = vmul.f32 0.023647603, %v8418_v11  ;;  %v1580_v24 = vsel %vm933_vm6, %v1577_v40, %v1579_v26  ;;  %v11558_v3 = vld [vmem:[#allocation24_spill] sm:$0xff]  ;;  %v11561_v8 = vld [vmem:[#allocation26_spill] sm:$0xff] }
 0x1aa   : > { %v8813_v13 = vsel %vm938_vm7, %v11553_v9, %v11552_v28  ;;  %v1750_v43 = vsel %vm923_vm4, %v11554_v18, %v11341_v5  ;;  %v8828_v6 = vadd.f32 %v1746_v52, %v1676_v30  ;;  %v8832_v35 = vmul.f32 0.030364122, %v8401_v58  ;;  %2446 = vrot.lane.b32.xlu1 %v2351_v48, %s7965_s22 }
 0x1ab   : > { %v8822_v21 = vadd.f32 %v8813_v13, %v8580_v36  ;;  %v8835_v51 = vmul.f32 0.030364122, %v8404_v60  ;;  %2444 = vrot.lane.b32.xlu0 %v2350_v41, %s7965_s22  ;;  %v1677_v36 = vadd.f32 %v1580_v24, %v1469_v31  ;;  %v1377_v53 = vrot.slane %v8667_v47, 1  ;;  %v11564_v41 = vld [vmem:[#allocation28_spill] sm:$0xff]  ;;  %v11565_v24 = vld [vmem:[#allocation29_spill] sm:$0xff] }
 0x1ac   : > { %v8843_v37 = vmul.f32 0.030364122, %v8410_v4  ;;  %v8846_v55 = vmul.f32 0.023647603, %v8423_v17  ;;  %v8850_v57 = vmul.f32 0.030364122, %v8418_v11 }
 0x1ad   : > { %v11342_v25 = vrot.slane %v8822_v21, 2  ;;  %v8852_v7 = vadd.f32 %v1748_v16, %v1677_v36  ;;  %v8859_v19 = vmul.f32 0.023647603, %v8428_v22  ;;  %v8862_v31 = vmul.f32 0.023647603, %v11555_v50 }
 0x1ae   : > { %v8865_v2 = vmul.f32 0.030364122, %v8423_v17  ;;  %v8868_v40 = vmul.f32 0.023647603, %v11556_v23  ;;  %v8871_v52 = vmul.f32 0.023647603, %v11557_v61 }
 0x1af   : > { %v1582_v1 = vsel %vm933_vm6, %v1579_v26, %v11342_v25  ;;  %v8875_v16 = vmul.f32 0.023647603, %v11558_v3  ;;  %v8878_v34 = vmul.f32 0.023647603, %v11559_v0  ;;  %v8886_v30 = vmul.f32 0.023647603, %v11561_v8 }
 0x1b0   : > { %v1678_v20 = vadd.f32 %v1582_v1, %v1470_v46  ;;  %v8883_v46 = vmul.f32 0.030364122, %v11555_v50  ;;  %v11562_v26 = vld [vmem:[#allocation27_spill] sm:$0xff]  ;;  %v8894_v18 = vmul.f32 0.023647603, %v11564_v41 }
 0x1b1   : > { %11560 = vst [vmem:[#allocation21_spill] sm:$0xff] %v8878_v34  ;;  %v8889_v28 = vmul.f32 0.023647603, %v11562_v26  ;;  %v8897_v36 = vmul.f32 0.023647603, %v11565_v24  ;;  %v11569_v25 = vld [vmem:[#allocation31_spill] sm:$0xff] }
 0x1b2   : > { %v8880_v59 = vadd.f32 %v1750_v43, %v1678_v20  ;;  %v8901_v1 = vmul.f32 0.030364122, %v11557_v61  ;;  %v8905_v54 = vmul.f32 0.030364122, %v11558_v3  ;;  %v8910_v5 = vmul.f32 0.023647603, %v11567_v45 }
 0x1b3   : > { %11563 = vst [vmem:[#allocation22_spill] sm:$0xff] %v8889_v28  ;;  %11566 = vst [vmem:[#allocation23_spill] sm:$0xff] %v8897_v36  ;;  %v8913_v47 = vmul.f32 0.023647603, %v11569_v25  ;;  %v8917_v56 = vmul.f32 0.030364122, %v11562_v26 }
 0x1b4   : > { %11568 = vst [vmem:[#allocation24_spill] sm:$0xff] %v8910_v5  ;;  %v8921_v0 = vmul.f32 0.023647603, %v11572_v38  ;;  %v8924_v9 = vmul.f32 0.030364122, %v11564_v41  ;;  %v11576_v26 = vld [vmem:[#allocation34_spill] sm:$0xff] }
 0x1b5   : > { %11570 = vst [vmem:[#allocation26_spill] sm:$0xff] %v8913_v47  ;;  %11571 = vst [vmem:[#allocation46_spill] sm:$0xff] %v8917_v56  ;;  %v8928_v45 = vmul.f32 0.030364122, %v11565_v24  ;;  %v8932_v43 = vmul.f32 0.023647603, %v8514_v15 }
 0x1b6   : > { %11573 = vst [vmem:[#allocation47_spill] sm:$0xff] %v8921_v0  ;;  %v8935_v56 = vmul.f32 0.023647603, %v11576_v26  ;;  %v8938_v20 = vmul.f32 0.023647603, %v8530_v33  ;;  %v11581_v26 = vrot.slane %v8643_v39, 1 }
 0x1b7   : > { %11574 = vst [vmem:[#allocation48_spill] sm:$0xff] %v8928_v45  ;;  %11575 = vst [vmem:[#allocation49_spill] sm:$0xff] %v8932_v43  ;;  %v8942_v41 = vmul.f32 0.030364122, %v11569_v25  ;;  %v8946_v24 = vmul.f32 0.030364122, %v11572_v38 }
 0x1b8   : > { %11577 = vst [vmem:[#allocation50_spill] sm:$0xff] %v8938_v20  ;;  %v8950_v45 = vmul.f32 0.030364122, %v8514_v15  ;;  %v1378_v33 = vsel %vm938_vm7, %v11581_v26, %v1377_v53  ;;  %v11582_v36 = vrot.slane %v8637_v12, 1  ;;  %v11583_v25 = vld [vmem:[#allocation36_spill] sm:$0xff] }
 0x1b9   : > { %11578 = vst [vmem:[#allocation51_spill] sm:$0xff] %v8942_v41  ;;  %11579 = vst [vmem:[#allocation52_spill] sm:$0xff] %v8946_v24  ;;  %v8959_v41 = vmul.f32 0.023647603, %v11583_v25  ;;  %v8962_v48 = vmul.f32 0.023647603, %v8555_v63 }
 0x1ba   : > { %11580 = vst [vmem:[#allocation53_spill] sm:$0xff] %v8950_v45  ;;  %v1380_v28 = vsel %vm938_vm7, %v1377_v53, %v11582_v36  ;;  %v11585_v38 = vld [vmem:[#allocation20_spill] sm:$0xff]  ;;  %v11586_v45 = vld [vmem:[#allocation38_spill] sm:$0xff]  ;;  %v8972_v24 = vmul.f32 0.030364122, %v11583_v25  ;;  %v11598_v25 = vrot.slane %v8637_v12, 1 }
 0x1bb   : > { %11584 = vst [vmem:[#allocation54_spill] sm:$0xff] %v8962_v48  ;;  %v1296_v47 = vmul.f32 0.030364122, %v11585_v38  ;;  %v8969_v26 = vmul.f32 0.023647603, %v11586_v45  ;;  %v1509_v0 = vadd.f32 %v1380_v28, %v8835_v51  ;;  %v11591_v34 = vld [vmem:[#allocation40_spill] sm:$0xff] }
 0x1bc   : > { %11588 = vst [vmem:[#allocation55_spill] sm:$0xff] %v8972_v24  ;;  %v8975_v53 = vmul.f32 0.023647603, %v8588_v62  ;;  %v8979_v5 = vmul.f32 0.030364122, %v8555_v63 }
 0x1bd   : > { %11587 = vst [vmem:[#allocation20_spill] sm:$0xff] %v8969_v26  ;;  %v1508_v36 = vadd.f32 %v1378_v33, %v1296_v47  ;;  %v8982_v43 = vmul.f32 0.023647603, %v11591_v34  ;;  %v8985_v39 = vmul.f32 0.023647603, %v8627_v32  ;;  %v7762_v32 = vld [vmem:[%s11275_s3] sm:$0xff]   ;;  %v1471_v26 = vadd.f32 %v8813_v13, %v8613_v14 }
 0x1be   : > { %11589 = vst [vmem:[#allocation56_spill] sm:$0xff] %v8975_v53  ;;  %11590 = vst [vmem:[#allocation57_spill] sm:$0xff] %v8979_v5  ;;  %v8990_v45 = vmul.f32 0.023647603, %v8655_v49  ;;  %v1228_v47 = vmul.f32 0.011170336, %v11585_v38  ;;  %7381 = vmatprep.subr.bf16.mxu1 %v7762_v32 }
 0x1bf   : > { %11592 = vst [vmem:[#allocation58_spill] sm:$0xff] %v8982_v43  ;;  %11593 = vst [vmem:[#allocation59_spill] sm:$0xff] %v8985_v39  ;;  %v8995_v63 = vmul.f32 0.023647603, %v8675_v10  ;;  %v1229_v5 = vmul.f32 0.011170336, %v8404_v60  ;;  %7382 = vmatpush3.bf16.msra.mxu1 %v7762_v32 }
 0x1c0   : > { %v9002_v15 = vmul.f32 0.030364122, %v8588_v62  ;;  %v1583_v49 = vrot.slane %v1508_v36, 2  ;;  %v1585_v48 = vrot.slane %v1509_v0, 2  ;;  %v9006_v38 = vmul.f32 0.030364122, %v11591_v34 }
 0x1c1   : > { %11594 = vst [vmem:[#allocation60_spill] sm:$0xff] %v8995_v63  ;;  %v11597_v60 = vrot.slane %v8664_v27, 1  ;;  %v9016_v62 = vmul.f32 0.023647603, %v8692_v42  ;;  %v1751_v20 = vrot.slane %v1228_v47, 4  ;;  %v11599_v36 = vld [vmem:[#allocation19_spill] sm:$0xff] }
 0x1c2   : > { %11595 = vst [vmem:[#allocation61_spill] sm:$0xff] %v9002_v15  ;;  %11596 = vst [vmem:[#allocation62_spill] sm:$0xff] %v9006_v38  ;;  %v1230_v0 = vmul.f32 0.011170336, %v11599_v36  ;;  %v11600_v15 = vrot.slane %v8826_v29, 1  ;;  %v1586_v38 = vsel %vm933_vm6, %v1583_v49, %v1585_v48  ;;  %v11603_v36 = vrot.slane %v8822_v21, 2 }
 0x1c3   : > { %v1382_v24 = vsel %vm938_vm7, %v11598_v25, %v11597_v60  ;;  %v11601_v53 = vmov %v11597_v60  ;;  %v9026_v12 = vmul.f32 0.030364122, %v8675_v10  ;;  %v1753_v60 = vrot.slane %v1229_v5, 4  ;;  %v11604_v43 = vld [vmem:[#allocation42_spill] sm:$0xff] }
 0x1c4   : > { %v1384_v51 = vsel %vm938_vm7, %v11601_v53, %v11600_v15  ;;  %v1584_v34 = vsel %vm933_vm6, %v11603_v36, %v1583_v49  ;;  %v1510_v27 = vadd.f32 %v1382_v24, %v11604_v43  ;;  %v1231_v15 = vmul.f32 0.011170336, %v8401_v58 }
 0x1c5   : > { %11602 = vst [vmem:[#allocation19_spill] sm:$0xff] %v9026_v12  ;;  %v9036_v32 = vmul.f32 0.030364122, %v8692_v42  ;;  %v1472_v53 = vadd.f32 %v1378_v33, %v1228_v47  ;;  %v1511_v25 = vadd.f32 %v1384_v51, %v8832_v35  ;;  %v11606_v12 = vrot.slane %v8613_v14, 4 }
 0x1c6   : > { %v1755_v49 = vrot.slane %v1230_v0, 4  ;;  %v11607_v43 = vrot.slane %v8826_v29, 1  ;;  %v1754_v42 = vsel %vm923_vm4, %v1751_v20, %v1753_v60  ;;  %v1679_v33 = vadd.f32 %v1584_v34, %v1471_v26 }
 0x1c7   : > { %11605 = vst [vmem:[#allocation42_spill] sm:$0xff] %v9036_v32  ;;  %v1752_v21 = vsel %vm923_vm4, %v11606_v12, %v1751_v20  ;;  %v1680_v36 = vadd.f32 %v1586_v38, %v1472_v53  ;;  %v1473_v47 = vadd.f32 %v1380_v28, %v1229_v5  ;;  %v1587_v13 = vrot.slane %v1510_v27, 2 }
 0x1c8   : > { %v1512_v58 = vadd.f32 %v11607_v43, %v8850_v57  ;;  %v1756_v35 = vsel %vm923_vm4, %v1753_v60, %v1755_v49  ;;  %v1757_v32 = vrot.slane %v1231_v15, 4  ;;  %v1328_v10 = vmul.f32 0.011170336, %v8418_v11 }
 0x1c9   : > { %v1589_v57 = vrot.slane %v1511_v25, 2  ;;  %v11610_v38 = vrot.slane %v8800_v44, 1  ;;  %v11611_v34 = vrot.slane %v8859_v19, 1  ;;  %v1588_v28 = vsel %vm933_vm6, %v1585_v48, %v1587_v13 }
 0x1ca   : > { %v1474_v20 = vadd.f32 %v1382_v24, %v1230_v0  ;;  %v1591_v26 = vrot.slane %v1512_v58, 2  ;;  %v1301_v11 = vmul.f32 0.030364122, %v8428_v22  ;;  %v11614_v19 = vrot.slane %v8868_v40, 1 }
 0x1cb   : > { %v1387_v5 = vsel %vm938_vm7, %v11611_v34, %v11610_v38  ;;  %v1847_v24 = vadd.f32 %v1752_v21, %v1679_v33  ;;  %v1475_v0 = vadd.f32 %v1384_v51, %v1231_v15  ;;  %v1759_v27 = vrot.slane %v1328_v10, 4 }
 0x1cc   : > { %v1513_v53 = vadd.f32 %v1387_v5, %v1301_v11  ;;  %v1758_v43 = vsel %vm923_vm4, %v1755_v49, %v1757_v32  ;;  %v1590_v44 = vsel %vm933_vm6, %v1587_v13, %v1589_v57  ;;  %v1233_v58 = vmul.f32 0.011170336, %v8410_v4 }
 0x1cd   : > { %v1232_v34 = vmul.f32 0.011170336, %v8428_v22  ;;  %v11618_v49 = vrot.slane %v8875_v16, 1  ;;  %v11619_v4 = vmov %v11614_v19 }
 0x1ce   : > { %v2385_v39 = vpop.permute.xlu0 %2384  ;;  %v1593_v13 = vrot.slane %v1513_v53, 2 }
 0x1cf   : > { %v9052_v14 = vadd.f32 %v2385_v39, %v8828_v6  ;;  %v1848_v39 = vadd.f32 %v1754_v42, %v1680_v36  ;;  %v1681_v42 = vadd.f32 %v1588_v28, %v1473_v47  ;;  %v1393_v33 = vsel %vm938_vm7, %v11619_v4, %v11618_v49 }
 0x1d0   : > { %v11620_v47 = vrot.slane %v8862_v31, 1 }
 0x1d1   : > { %11608 = vst [vmem:[#allocation63_spill] sm:$0xff] %v9052_v14  ;;  %v1849_v28 = vadd.f32 %v1756_v35, %v1681_v42  ;;  %v1476_v35 = vadd.f32 %v1387_v5, %v1232_v34 }
 0x1d2   : > { %v2387_v63 = vpop.permute.xlu0 %2386  ;;  %v2389_v29 = vpop.permute.xlu1 %2388 }
 0x1d3   : > { %v9055_v12 = vadd.f32 %v2387_v63, %v8852_v7  ;;  %v11612_v63 = vrot.slane %v8846_v55, 1  ;;  %v11613_v7 = vmov %v11610_v38  ;;  %v1592_v38 = vsel %vm933_vm6, %v1589_v57, %v1591_v26 }
 0x1d4   : > { %v9088_v51 = vadd.f32 %v2389_v29, %v8880_v59  ;;  %v1760_v59 = vsel %vm923_vm4, %v1757_v32, %v1759_v27  ;;  %v1304_v29 = vmul.f32 0.030364122, %v11556_v23  ;;  %v1683_v40 = vadd.f32 %v1592_v38, %v1475_v0 }
 0x1d5   : > { %11609 = vst [vmem:[#allocation64_spill] sm:$0xff] %v9055_v12  ;;  %v2744_v6 = vpack.c.bf16 %v9055_v12, %v9052_v14  ;;  %v1389_v25 = vsel %vm938_vm7, %v11613_v7, %v11612_v63  ;;  %v11615_v60 = vmov %v11612_v63  ;;  %v1762_v26 = vrot.slane %v1233_v58, 4 }
 0x1d6   : > { %v9076_v48 = vsel %vm938_vm7, %v11615_v60, %v11614_v19  ;;  %v2391_v36 = vpop.permute.xlu1 %2390  ;;  %v1514_v55 = vadd.f32 %v1389_v25, %v8843_v37  ;;  %11616 = vst [vmem:[#allocation65_spill] sm:$0xff] %v9088_v51  ;;  %v2393_v15 = vpop.permute.xlu0 %2392  ;;  %v11621_v37 = vmov %v11618_v49  ;;  %v1516_v7 = vadd.f32 %v1393_v33, %v1304_v29 }
 0x1d7   : > { %2784 = vrot.lane.b32.xlu0 %v2744_v6, %s7965_s22  ;;  %v1515_v10 = vadd.f32 %v9076_v48, %v8865_v2  ;;  %v9090_v21 = vadd.f32 %v2391_v36, %v1847_v24  ;;  %v9102_v22 = vsel %vm938_vm7, %v11621_v37, %v11620_v47  ;;  %v1682_v2 = vadd.f32 %v1590_v44, %v1474_v20 }
 0x1d8   : > { %v1594_v6 = vrot.slane %v1514_v55, 2  ;;  %v1517_v16 = vadd.f32 %v9102_v22, %v8905_v54  ;;  %v9110_v19 = vadd.f32 %v2393_v15, %v1848_v39  ;;  %v1761_v32 = vrot.slane %v1232_v34, 4 }
 0x1d9   : > { %11617 = vst [vmem:[#allocation66_spill] sm:$0xff] %v9090_v21  ;;  %v2745_v57 = vpack.c.bf16 %v9090_v21, %v9088_v51  ;;  %v1596_v63 = vrot.slane %v1515_v10, 2  ;;  %v1234_v60 = vmul.f32 0.011170336, %v8423_v17  ;;  %v1850_v24 = vadd.f32 %v1758_v43, %v1682_v2 }
 0x1da   : > { %v2395_v11 = vpop.permute.xlu1 %2394  ;;  %11622 = vst [vmem:[#allocation67_spill] sm:$0xff] %v9110_v19  ;;  %v1595_v0 = vsel %vm933_vm6, %v1593_v13, %v1594_v6  ;;  %v1235_v27 = vmul.f32 0.011170336, %v11556_v23  ;;  %v2397_v42 = vpop.permute.xlu0 %2396  ;;  %v1851_v54 = vadd.f32 %v1760_v59, %v1683_v40  ;;  %v1236_v39 = vmul.f32 0.011170336, %v11558_v3 }
 0x1db   : > { %v9112_v20 = vadd.f32 %v2395_v11, %v1849_v28  ;;  %2786 = vrot.lane.b32.xlu1 %v2745_v57, %s7965_s22  ;;  %v11624_v44 = vrot.slane %v8886_v30, 1  ;;  %v11625_v36 = vrot.slane %v8871_v52, 1  ;;  %v1597_v17 = vsel %vm933_vm6, %v1594_v6, %v1596_v63 }
 0x1dc   : > { %v1598_v5 = vrot.slane %v1516_v7, 2  ;;  %v1600_v43 = vrot.slane %v1517_v16, 2  ;;  %v11627_v23 = vmov %v11620_v47  ;;  %v1684_v15 = vadd.f32 %v1595_v0, %v1476_v35 }
 0x1dd   : > { %11623 = vst [vmem:[#allocation68_spill] sm:$0xff] %v9112_v20  ;;  %v2746_v53 = vpack.c.bf16 %v9112_v20, %v9110_v19  ;;  %v1399_v38 = vsel %vm938_vm7, %v11625_v36, %v11624_v44  ;;  %v11626_v55 = vmov %v11625_v36  ;;  %v1763_v3 = vsel %vm923_vm4, %v1761_v32, %v1762_v26 }
 0x1de   : > { %v1397_v34 = vsel %vm938_vm7, %v11627_v23, %v11626_v55  ;;  %v2399_v10 = vpop.permute.xlu1 %2398  ;;  %v1477_v49 = vadd.f32 %v1389_v25, %v1233_v58  ;;  %v1764_v4 = vrot.slane %v1234_v60, 4  ;;  %v9134_v47 = vadd.f32 %v2397_v42, %v1850_v24 }
 0x1df   : > { %2788 = vrot.lane.b32.xlu0 %v2746_v53, %s7965_s22  ;;  %v9136_v37 = vadd.f32 %v2399_v10, %v1851_v54  ;;  %v1766_v2 = vrot.slane %v1235_v27, 4  ;;  %v1519_v59 = vadd.f32 %v1399_v38, %v8901_v1  ;;  %v1768_v13 = vrot.slane %v1236_v39, 4 }
 0x1e0   : > { %11628 = vst [vmem:[#allocation69_spill] sm:$0xff] %v9134_v47  ;;  %v1685_v52 = vadd.f32 %v1597_v17, %v1477_v49  ;;  %v1518_v31 = vadd.f32 %v1397_v34, %v8883_v46  ;;  %v11630_v29 = vrot.slane %v8894_v18, 1  ;;  %v11631_v57 = vmov %v11624_v44  ;;  %v11633_v18 = vld [vmem:[#allocation28_spill] sm:$0xff] }
 0x1e1   : > { %11629 = vst [vmem:[#allocation70_spill] sm:$0xff] %v9136_v37  ;;  %v2747_v25 = vpack.c.bf16 %v9136_v37, %v9134_v47  ;;  %v1601_v58 = vsel %vm933_vm6, %v1598_v5, %v1600_v43  ;;  %v1599_v40 = vsel %vm933_vm6, %v1596_v63, %v1598_v5  ;;  %v1308_v11 = vmul.f32 0.030364122, %v11561_v8 }
 0x1e2   : > { %v1401_v28 = vsel %vm938_vm7, %v11631_v57, %v11630_v29  ;;  %v1765_v1 = vsel %vm923_vm4, %v1762_v26, %v1764_v4  ;;  %v1479_v6 = vadd.f32 %v1393_v33, %v1235_v27  ;;  %v1478_v46 = vadd.f32 %v9076_v48, %v1234_v60  ;;  %v2401_v60 = vpop.permute.xlu0 %2400  ;;  %v2403_v55 = vpop.permute.xlu1 %2402  ;;  %v11638_v57 = vld [vmem:[#allocation22_spill] sm:$0xff] }
 0x1e3   : > { %v1237_v7 = vmul.f32 0.011170336, %v11555_v50  ;;  %v1852_v16 = vadd.f32 %v1763_v3, %v1684_v15  ;;  %2790 = vrot.lane.b32.xlu1 %v2747_v25, %s7965_s22  ;;  %v1604_v30 = vrot.slane %v1519_v59, 2  ;;  %v1520_v32 = vadd.f32 %v1401_v28, %v1308_v11 }
 0x1e4   : > { %v11632_v24 = vmov %v11630_v29  ;;  %v1687_v0 = vadd.f32 %v1601_v58, %v1479_v6  ;;  %v1686_v63 = vadd.f32 %v1599_v40, %v1478_v46  ;;  %v1602_v53 = vrot.slane %v1518_v31, 2  ;;  %v11636_v29 = vld [vmem:[#allocation24_spill] sm:$0xff]  ;;  %v11642_v46 = vld [vmem:[#allocation47_spill] sm:$0xff] }
 0x1e5   : > { %v1521_v35 = vadd.f32 %v11632_v24, %v8924_v9  ;;  %v1238_v42 = vmul.f32 0.011170336, %v11557_v61  ;;  %v1853_v26 = vadd.f32 %v1765_v1, %v1685_v52  ;;  %v1769_v33 = vsel %vm923_vm4, %v1766_v2, %v1768_v13  ;;  %v11640_v1 = vld [vmem:[#allocation25_spill] sm:$0xff] }
 0x1e6   : > { %v1767_v48 = vsel %vm923_vm4, %v1764_v4, %v1766_v2  ;;  %v1239_v50 = vmul.f32 0.011170336, %v11561_v8  ;;  %v1770_v27 = vrot.slane %v1237_v7, 4  ;;  %v1480_v54 = vadd.f32 %v9102_v22, %v1236_v39  ;;  %v2407_v40 = vpop.permute.xlu1 %2406  ;;  %v2405_v11 = vpop.permute.xlu0 %2404 }
 0x1e7   : > { %v1603_v44 = vsel %vm933_vm6, %v1600_v43, %v1602_v53  ;;  %v1329_v9 = vmul.f32 0.011170336, %v11633_v18  ;;  %v1481_v36 = vadd.f32 %v1397_v34, %v1237_v7  ;;  %v1605_v17 = vsel %vm933_vm6, %v1602_v53, %v1604_v30 }
 0x1e8   : > { %v1606_v5 = vrot.slane %v1520_v32, 2  ;;  %v1608_v61 = vrot.slane %v1521_v35, 2  ;;  %v1855_v23 = vadd.f32 %v1769_v33, %v1687_v0  ;;  %v1854_v10 = vadd.f32 %v1767_v48, %v1686_v63  ;;  %v11645_v32 = vld [vmem:[#allocation23_spill] sm:$0xff] }
 0x1e9   : > { %v1771_v15 = vsel %vm923_vm4, %v1768_v13, %v1770_v27  ;;  %v1772_v3 = vrot.slane %v1238_v42, 4  ;;  %v9166_v8 = vadd.f32 %v2401_v60, %v1852_v16  ;;  %v9168_v49 = vadd.f32 %v2403_v55, %v1853_v26  ;;  %v11651_v26 = vld [vmem:[#allocation21_spill] sm:$0xff]  ;;  %v11655_v55 = vld [vmem:[#allocation52_spill] sm:$0xff] }
 0x1ea   : > { %v1688_v22 = vadd.f32 %v1603_v44, %v1480_v54  ;;  %v1774_v39 = vrot.slane %v1239_v50, 4  ;;  %v1689_v43 = vadd.f32 %v1605_v17, %v1481_v36  ;;  %v1483_v4 = vadd.f32 %v1401_v28, %v1239_v50  ;;  %v11653_v50 = vld [vmem:[#allocation30_spill] sm:$0xff] }
 0x1eb   : > { %11634 = vst [vmem:[#allocation28_spill] sm:$0xff] %v9166_v8  ;;  %11635 = vst [vmem:[#allocation71_spill] sm:$0xff] %v9168_v49  ;;  %v1776_v2 = vrot.slane %v1329_v9, 4  ;;  %v1482_v34 = vadd.f32 %v1399_v38, %v1238_v42  ;;  %v2748_v59 = vpack.c.bf16 %v9168_v49, %v9166_v8  ;;  %v1609_v52 = vsel %vm933_vm6, %v1606_v5, %v1608_v61  ;;  %v11641_v38 = vld [vmem:[#allocation27_spill] sm:$0xff]  ;;  %v11654_v9 = vld [vmem:[#allocation46_spill] sm:$0xff] }
 0x1ec   : > { %v1607_v31 = vsel %vm933_vm6, %v1604_v30, %v1606_v5  ;;  %v11637_v13 = vrot.slane %v11636_v29, 1  ;;  %v11639_v25 = vrot.slane %v11638_v57, 1  ;;  %v9182_v28 = vmul.f32 0.011170336, %v11640_v1 }
 0x1ed   : > { %v9185_v6 = vmul.f32 0.011170336, %v11641_v38  ;;  %v11643_v7 = vrot.slane %v11642_v46, 1  ;;  %v11646_v24 = vrot.slane %v11645_v32, 1  ;;  %v9199_v63 = vadd.f32 %v2407_v40, %v1855_v23  ;;  %2792 = vrot.lane.b32.xlu0 %v2748_v59, %s7965_s22  ;;  %v11662_v32 = vld [vmem:[#allocation48_spill] sm:$0xff] }
 0x1ee   : > { %v9179_v58 = vsel %vm938_vm7, %v11639_v25, %v11637_v13  ;;  %v11644_v16 = vmov %v11637_v13  ;;  %v9201_v53 = vadd.f32 %v2405_v11, %v1854_v10  ;;  %v11650_v42 = vmov %v11639_v25  ;;  %v11656_v13 = vld [vmem:[#allocation26_spill] sm:$0xff] }
 0x1ef   : > { %v1408_v30 = vsel %vm938_vm7, %v11644_v16, %v11643_v7  ;;  %v11647_v35 = vmov %v11643_v7  ;;  %11648 = vst [vmem:[#allocation24_spill] sm:$0xff] %v9199_v63  ;;  %v11652_v33 = vrot.slane %v11651_v26, 1  ;;  %v1312_v60 = vmul.f32 0.030364122, %v11653_v50 }
 0x1f0   : > { %v9197_v0 = vsel %vm938_vm7, %v11647_v35, %v11646_v24  ;;  %11649 = vst [vmem:[#allocation22_spill] sm:$0xff] %v9201_v53  ;;  %v1691_v54 = vadd.f32 %v1609_v52, %v1483_v4  ;;  %v1690_v44 = vadd.f32 %v1607_v31, %v1482_v34  ;;  %v1310_v18 = vmul.f32 0.030364122, %v11640_v1 }
 0x1f1   : > { %v1404_v48 = vsel %vm938_vm7, %v11652_v33, %v11650_v42  ;;  %v1523_v36 = vadd.f32 %v9179_v58, %v11654_v9  ;;  %v2749_v17 = vpack.c.bf16 %v9199_v63, %v9201_v53  ;;  %v1773_v5 = vsel %vm923_vm4, %v1770_v27, %v1772_v3 }
 0x1f2   : > { %v1524_v61 = vadd.f32 %v1408_v30, %v1312_v60  ;;  %v1525_v23 = vadd.f32 %v9197_v0, %v11655_v55  ;;  %v1856_v10 = vadd.f32 %v1771_v15, %v1688_v22  ;;  %v1857_v59 = vadd.f32 %v1773_v5, %v1689_v43  ;;  %v2409_v15 = vpop.permute.xlu0 %2408 }
 0x1f3   : > { %v1775_v29 = vsel %vm923_vm4, %v1772_v3, %v1774_v39  ;;  %v1522_v4 = vadd.f32 %v1404_v48, %v1310_v18  ;;  %2794 = vrot.lane.b32.xlu1 %v2749_v17, %s7965_s22  ;;  %v1777_v34 = vsel %vm923_vm4, %v1774_v39, %v1776_v2  ;;  %v1778_v52 = vrot.slane %v9182_v28, 4  ;;  %v2411_v39 = vpop.permute.xlu1 %2410  ;;  %v11660_v2 = vld [vmem:[#allocation32_spill] sm:$0xff]  ;;  %v11667_v18 = vld [vmem:[#allocation49_spill] sm:$0xff] }
 0x1f4   : > { %v1242_v31 = vmul.f32 0.011170336, %v11653_v50  ;;  %v11657_v57 = vrot.slane %v11656_v13, 1  ;;  %v11658_v27 = vmov %v11646_v24  ;;  %v1859_v22 = vadd.f32 %v1777_v34, %v1691_v54  ;;  %v11672_v13 = vld [vmem:[#allocation31_spill] sm:$0xff] }
 0x1f5   : > { %v1858_v43 = vadd.f32 %v1775_v29, %v1690_v44  ;;  %v1779_v3 = vrot.slane %v9185_v6, 4  ;;  %v1611_v40 = vrot.slane %v1523_v36, 2  ;;  %v9231_v11 = vadd.f32 %v2409_v15, %v1856_v10  ;;  %v11673_v15 = vld [vmem:[#allocation55_spill] sm:$0xff] }
 0x1f6   : > { %v9228_v25 = vsel %vm938_vm7, %v11658_v27, %v11657_v57  ;;  %v1243_v1 = vmul.f32 0.011170336, %v11660_v2  ;;  %v1613_v38 = vrot.slane %v1524_v61, 2  ;;  %v1615_v46 = vrot.slane %v1525_v23, 2 }
 0x1f7   : > { %11659 = vst [vmem:[#allocation25_spill] sm:$0xff] %v9231_v11  ;;  %v9234_v7 = vadd.f32 %v2411_v39, %v1857_v59  ;;  %v1610_v16 = vrot.slane %v1522_v4, 2  ;;  %v1526_v24 = vadd.f32 %v9228_v25, %v11662_v32  ;;  %v11663_v35 = vrot.slane %v8935_v56, 1  ;;  %v11671_v59 = vld [vmem:[#allocation51_spill] sm:$0xff]  ;;  %v2415_v4 = vpop.permute.xlu1 %2414 }
 0x1f8   : > { %v11664_v42 = vmov %v11657_v57  ;;  %v1484_v33 = vadd.f32 %v1404_v48, %v9182_v28  ;;  %v1781_v50 = vrot.slane %v1242_v31, 4  ;;  %v11665_v60 = vrot.slane %v8959_v41, 1  ;;  %v11670_v48 = vld [vmem:[#allocation34_spill] sm:$0xff]  ;;  %v2413_v41 = vpop.permute.xlu0 %2412 }
 0x1f9   : > { %11661 = vst [vmem:[#allocation27_spill] sm:$0xff] %v9234_v7  ;;  %v1414_v26 = vsel %vm938_vm7, %v11664_v42, %v11663_v35  ;;  %v11666_v54 = vmov %v11663_v35  ;;  %v11668_v9 = vrot.slane %v11667_v18, 1  ;;  %v2750_v5 = vpack.c.bf16 %v9234_v7, %v9231_v11 }
 0x1fa   : > { %v1416_v44 = vsel %vm938_vm7, %v11666_v54, %v11665_v60  ;;  %v11669_v36 = vmov %v11665_v60  ;;  %v1612_v61 = vsel %vm933_vm6, %v1610_v16, %v1611_v40  ;;  %v1486_v28 = vadd.f32 %v1408_v30, %v1242_v31  ;;  %v11676_v16 = vld [vmem:[#allocation29_spill] sm:$0xff] }
 0x1fb   : > { %v9254_v17 = vsel %vm938_vm7, %v11669_v36, %v11668_v9  ;;  %v1316_v55 = vmul.f32 0.030364122, %v11670_v48  ;;  %v1616_v23 = vsel %vm933_vm6, %v1613_v38, %v1615_v46  ;;  %v1783_v56 = vrot.slane %v1243_v1, 4  ;;  %2796 = vrot.lane.b32.xlu0 %v2750_v5, %s7965_s22  ;;  %v11677_v5 = vld [vmem:[#allocation36_spill] sm:$0xff] }
 0x1fc   : > { %v1614_v10 = vsel %vm933_vm6, %v1611_v40, %v1613_v38  ;;  %v1527_v29 = vadd.f32 %v1414_v26, %v11671_v59  ;;  %v1617_v34 = vrot.slane %v1526_v24, 2  ;;  %v1245_v57 = vmul.f32 0.011170336, %v11672_v13 }
 0x1fd   : > { %v1528_v27 = vadd.f32 %v1416_v44, %v1316_v55  ;;  %v1529_v30 = vadd.f32 %v9254_v17, %v11673_v15  ;;  %v9267_v31 = vadd.f32 %v2415_v4, %v1859_v22  ;;  %v9269_v39 = vadd.f32 %v2413_v41, %v1858_v43  ;;  %v11680_v4 = vld [vmem:[#allocation33_spill] sm:$0xff] }
 0x1fe   : > { %v1692_v2 = vadd.f32 %v1612_v61, %v1484_v33  ;;  %v1485_v40 = vadd.f32 %v9179_v58, %v9185_v6  ;;  %v1694_v38 = vadd.f32 %v1616_v23, %v1486_v28  ;;  %v1244_v32 = vmul.f32 0.011170336, %v11676_v16  ;;  %v2417_v28 = vpop.permute.xlu0 %2416 }
 0x1ff   : > { %11674 = vst [vmem:[#allocation47_spill] sm:$0xff] %v9267_v31  ;;  %11675 = vst [vmem:[#allocation23_spill] sm:$0xff] %v9269_v39  ;;  %v1618_v35 = vsel %vm933_vm6, %v1615_v46, %v1617_v34  ;;  %v1246_v24 = vmul.f32 0.011170336, %v11670_v48  ;;  %v2751_v42 = vpack.c.bf16 %v9267_v31, %v9269_v39  ;;  %v1487_v22 = vadd.f32 %v9197_v0, %v1243_v1  ;;  %v11678_v0 = vld [vmem:[#allocation53_spill] sm:$0xff] }
 0x200   : > { %v1693_v60 = vadd.f32 %v1614_v10, %v1485_v40  ;;  %v1619_v54 = vrot.slane %v1527_v29, 2  ;;  %v1780_v43 = vsel %vm923_vm4, %v1778_v52, %v1779_v3  ;;  %v1787_v33 = vrot.slane %v1245_v57, 4 }
 0x201   : > { %v1621_v9 = vrot.slane %v1528_v27, 2  ;;  %v1623_v36 = vrot.slane %v1529_v30, 2  ;;  %2798 = vrot.lane.b32.xlu1 %v2751_v42, %s7965_s22  ;;  %v1784_v58 = vsel %vm923_vm4, %v1781_v50, %v1783_v56  ;;  %v1782_v6 = vsel %vm923_vm4, %v1779_v3, %v1781_v50 }
 0x202   : > { %v1695_v46 = vadd.f32 %v1618_v35, %v1487_v22  ;;  %v1247_v61 = vmul.f32 0.011170336, %v11677_v5  ;;  %v1860_v48 = vadd.f32 %v1780_v43, %v1692_v2  ;;  %v1785_v55 = vrot.slane %v1244_v32, 4  ;;  %v2419_v35 = vpop.permute.xlu1 %2418 }
 0x203   : > { %v1789_v23 = vrot.slane %v1246_v24, 4  ;;  %v11679_v1 = vrot.slane %v11667_v18, 1  ;;  %v1862_v10 = vadd.f32 %v1784_v58, %v1694_v38  ;;  %v1861_v59 = vadd.f32 %v1782_v6, %v1693_v60  ;;  %v11685_v58 = vld [vmem:[#allocation54_spill] sm:$0xff] }
 0x204   : > { %v1620_v29 = vsel %vm933_vm6, %v1617_v34, %v1619_v54  ;;  %v1330_v41 = vmul.f32 0.011170336, %v11680_v4  ;;  %v1786_v13 = vsel %vm923_vm4, %v1783_v56, %v1785_v55  ;;  %v1488_v3 = vadd.f32 %v9228_v25, %v1244_v32  ;;  %v11681_v56 = vld [vmem:[#allocation58_spill] sm:$0xff]  ;;  %v11683_v25 = vld [vmem:[#allocation20_spill] sm:$0xff] }
 0x205   : > { %v1530_v52 = vadd.f32 %v11679_v1, %v11678_v0  ;;  %v1788_v50 = vsel %vm923_vm4, %v1785_v55, %v1787_v33  ;;  %v1624_v27 = vsel %vm933_vm6, %v1621_v9, %v1623_v36  ;;  %v1863_v15 = vadd.f32 %v1786_v13, %v1695_v46  ;;  %v11691_v0 = vld [vmem:[#allocation40_spill] sm:$0xff]  ;;  %v11696_v13 = vld [vmem:[#allocation35_spill] sm:$0xff] }
 0x206   : > { %v1490_v30 = vadd.f32 %v1416_v44, %v1246_v24  ;;  %v1791_v2 = vrot.slane %v1247_v61, 4  ;;  %v1489_v40 = vadd.f32 %v1414_v26, %v1245_v57  ;;  %v1696_v18 = vadd.f32 %v1620_v29, %v1488_v3  ;;  %v2421_v24 = vpop.permute.xlu0 %2420  ;;  %v11693_v29 = vld [vmem:[#allocation50_spill] sm:$0xff] }
 0x207   : > { %v1790_v38 = vsel %vm923_vm4, %v1787_v33, %v1789_v23  ;;  %v1622_v16 = vsel %vm933_vm6, %v1619_v54, %v1621_v9  ;;  %v1625_v34 = vrot.slane %v1530_v52, 2  ;;  %v1793_v60 = vrot.slane %v1330_v41, 4  ;;  %v11690_v9 = vld [vmem:[#allocation38_spill] sm:$0xff] }
 0x208   : > { %v1698_v42 = vadd.f32 %v1624_v27, %v1490_v30  ;;  %v11682_v22 = vrot.slane %v11681_v56, 1  ;;  %v11684_v32 = vrot.slane %v11683_v25, 1  ;;  %v11686_v6 = vrot.slane %v11685_v58, 1  ;;  %v11695_v41 = vld [vmem:[#allocation62_spill] sm:$0xff]  ;;  %v11697_v56 = vld [vmem:[#allocation56_spill] sm:$0xff] }
 0x209   : > { %v9305_v57 = vadd.f32 %v2417_v28, %v1860_v48  ;;  %v9307_v54 = vadd.f32 %v2419_v35, %v1861_v59  ;;  %v1626_v33 = vsel %vm933_vm6, %v1623_v36, %v1625_v34  ;;  %v1320_v46 = vmul.f32 0.030364122, %v11690_v9 }
 0x20a   : > { %v1423_v43 = vsel %vm938_vm7, %v11684_v32, %v11682_v22  ;;  %v11687_v44 = vmov %v11682_v22  ;;  %v1697_v5 = vadd.f32 %v1622_v16, %v1489_v40  ;;  %v1491_v55 = vadd.f32 %v9254_v17, %v1247_v61  ;;  %v2423_v40 = vpop.permute.xlu1 %2422 }
 0x20b   : > { %v1425_v26 = vsel %vm938_vm7, %v11687_v44, %v11686_v6  ;;  %11688 = vst [vmem:[#allocation21_spill] sm:$0xff] %v9305_v57  ;;  %11689 = vst [vmem:[#allocation30_spill] sm:$0xff] %v9307_v54  ;;  %v9313_v1 = vmul.f32 0.011170336, %v11691_v0  ;;  %v11692_v52 = vmov %v11684_v32  ;;  %v11694_v4 = vrot.slane %v11693_v29, 1 }
 0x20c   : > { %v2752_v48 = vpack.c.bf16 %v9307_v54, %v9305_v57  ;;  %v1532_v59 = vadd.f32 %v1423_v43, %v1320_v46  ;;  %v1533_v36 = vadd.f32 %v1425_v26, %v11695_v41  ;;  %v1319_v3 = vmul.f32 0.030364122, %v11696_v13  ;;  %v11704_v46 = vld [vmem:[#allocation57_spill] sm:$0xff] }
 0x20d   : > { %v1421_v28 = vsel %vm938_vm7, %v11694_v4, %v11692_v52  ;;  %v1864_v27 = vadd.f32 %v1788_v50, %v1696_v18  ;;  %v1792_v17 = vsel %vm923_vm4, %v1789_v23, %v1791_v2  ;;  %v1699_v61 = vadd.f32 %v1626_v33, %v1491_v55  ;;  %v11705_v52 = vld [vmem:[#allocation61_spill] sm:$0xff] }
 0x20e   : > { %v1249_v30 = vmul.f32 0.011170336, %v11690_v9  ;;  %2800 = vrot.lane.b32.xlu0 %v2752_v48, %s7965_s22  ;;  %v1866_v16 = vadd.f32 %v1792_v17, %v1698_v42  ;;  %v1794_v34 = vsel %vm923_vm4, %v1791_v2, %v1793_v60  ;;  %v1531_v35 = vadd.f32 %v1421_v28, %v1319_v3  ;;  %v2425_v2 = vpop.permute.xlu0 %2424  ;;  %v11711_v17 = vld [vmem:[#allocation37_spill] sm:$0xff] }
 0x20f   : > { %v11698_v22 = vrot.slane %v11697_v56, 1  ;;  %v11699_v25 = vmov %v11686_v6  ;;  %v9333_v6 = vadd.f32 %v2421_v24, %v1862_v10  ;;  %v9335_v50 = vadd.f32 %v2423_v40, %v1863_v15  ;;  %v11712_v40 = vld [vmem:[#allocation43_spill] sm:$0xff] }
 0x210   : > { %v1798_v23 = vrot.slane %v9313_v1, 4  ;;  %v11702_v18 = vrot.slane %v8990_v45, 1  ;;  %v1865_v60 = vadd.f32 %v1790_v38, %v1697_v5  ;;  %v1628_v33 = vrot.slane %v1532_v59, 2  ;;  %v11708_v5 = vld [vmem:[#allocation59_spill] sm:$0xff] }
 0x211   : > { %v1427_v32 = vsel %vm938_vm7, %v11699_v25, %v11698_v22  ;;  %11700 = vst [vmem:[#allocation46_spill] sm:$0xff] %v9333_v6  ;;  %11701 = vst [vmem:[#allocation52_spill] sm:$0xff] %v9335_v50  ;;  %v11703_v44 = vmov %v11698_v22  ;;  %v1630_v9 = vrot.slane %v1533_v36, 2  ;;  %v1248_v58 = vmul.f32 0.011170336, %v11696_v13 }
 0x212   : > { %v9343_v42 = vsel %vm938_vm7, %v11703_v44, %v11702_v18  ;;  %v2753_v10 = vpack.c.bf16 %v9335_v50, %v9333_v6  ;;  %v1867_v15 = vadd.f32 %v1794_v34, %v1699_v61  ;;  %v1796_v24 = vrot.slane %v1249_v30, 4  ;;  %v2427_v34 = vpop.permute.xlu1 %2426 }
 0x213   : > { %v1534_v55 = vadd.f32 %v1427_v32, %v11704_v46  ;;  %v1627_v0 = vrot.slane %v1531_v35, 2  ;;  %v1535_v29 = vadd.f32 %v9343_v42, %v11705_v52  ;;  %v11706_v4 = vrot.slane %v9016_v62, 1 }
 0x214   : > { %v11707_v48 = vmov %v11702_v18  ;;  %v11709_v59 = vrot.slane %v11708_v5, 1  ;;  %2802 = vrot.lane.b32.xlu1 %v2753_v10, %s7965_s22  ;;  %v1493_v13 = vadd.f32 %v1423_v43, %v1249_v30  ;;  %v1799_v3 = vsel %vm923_vm4, %v1796_v24, %v1798_v23  ;;  %v11715_v30 = vld [vmem:[#allocation42_spill] sm:$0xff]  ;;  %v2429_v10 = vpop.permute.xlu0 %2428 }
 0x215   : > { %v1431_v38 = vsel %vm938_vm7, %v11707_v48, %v11706_v4  ;;  %v11710_v41 = vmov %v11706_v4  ;;  %v1251_v61 = vmul.f32 0.011170336, %v11711_v17  ;;  %v1324_v45 = vmul.f32 0.030364122, %v11712_v40  ;;  %v11716_v4 = vld [vmem:[#allocation39_spill] sm:$0xff] }
 0x216   : > { %v9361_v36 = vsel %vm938_vm7, %v11710_v41, %v11709_v59  ;;  %v1631_v35 = vsel %vm933_vm6, %v1628_v33, %v1630_v9  ;;  %v1492_v56 = vadd.f32 %v1421_v28, %v1248_v58  ;;  %v1795_v22 = vrot.slane %v1248_v58, 4  ;;  %v2431_v41 = vpop.permute.xlu1 %2430 }
 0x217   : > { %v1629_v62 = vsel %vm933_vm6, %v1627_v0, %v1628_v33  ;;  %v9371_v25 = vadd.f32 %v2425_v2, %v1864_v27  ;;  %v9373_v18 = vadd.f32 %v2427_v34, %v1865_v60  ;;  %v1536_v43 = vadd.f32 %v1431_v38, %v1324_v45  ;;  %v11717_v2 = vld [vmem:[#allocation60_spill] sm:$0xff]  ;;  %v11720_v45 = vld [vmem:[#allocation41_spill] sm:$0xff] }
 0x218   : > { %v1537_v44 = vadd.f32 %v9361_v36, %v11715_v30  ;;  %v1632_v46 = vrot.slane %v1534_v55, 2  ;;  %v1494_v52 = vadd.f32 %v1425_v26, %v9313_v1  ;;  %v9379_v48 = vmul.f32 0.011170336, %v11716_v4 }
 0x219   : > { %11713 = vst [vmem:[#allocation26_spill] sm:$0xff] %v9371_v25  ;;  %11714 = vst [vmem:[#allocation32_spill] sm:$0xff] %v9373_v18  ;;  %v1634_v59 = vrot.slane %v1535_v29, 2  ;;  %v2754_v28 = vpack.c.bf16 %v9373_v18, %v9371_v25  ;;  %v1701_v33 = vadd.f32 %v1631_v35, %v1493_v13  ;;  %v1797_v27 = vsel %vm923_vm4, %v1795_v22, %v1796_v24 }
 0x21a   : > { %v11718_v60 = vrot.slane %v11717_v2, 1  ;;  %v11719_v58 = vrot.slane %v11708_v5, 1  ;;  %v1700_v55 = vadd.f32 %v1629_v62, %v1492_v56  ;;  %v1633_v26 = vsel %vm933_vm6, %v1630_v9, %v1632_v46  ;;  %v11723_v5 = vld [vmem:[#allocation45_spill] sm:$0xff] }
 0x21b   : > { %v1495_v17 = vadd.f32 %v1427_v32, %v1251_v61  ;;  %v1326_v34 = vmul.f32 0.030364122, %v11720_v45  ;;  %v9391_v29 = vadd.f32 %v2429_v10, %v1866_v16  ;;  %v9393_v30 = vadd.f32 %v2431_v41, %v1867_v15  ;;  %2804 = vrot.lane.b32.xlu0 %v2754_v28, %s7965_s22  ;;  %v2435_v10 = vpop.permute.xlu1 %2434 }
 0x21c   : > { %v1435_v0 = vsel %vm938_vm7, %v11719_v58, %v11718_v60  ;;  %v1636_v24 = vrot.slane %v1536_v43, 2  ;;  %v1638_v13 = vrot.slane %v1537_v44, 2  ;;  %v1635_v35 = vsel %vm933_vm6, %v1632_v46, %v1634_v59  ;;  %v11724_v60 = vld [vmem:[#allocation19_spill] sm:$0xff] }
 0x21d   : > { %11721 = vst [vmem:[#allocation48_spill] sm:$0xff] %v9391_v29  ;;  %11722 = vst [vmem:[#allocation49_spill] sm:$0xff] %v9393_v30  ;;  %v1254_v22 = vmul.f32 0.011170336, %v11723_v5  ;;  %v1538_v4 = vadd.f32 %v1435_v0, %v1326_v34  ;;  %v11725_v56 = vrot.slane %v11717_v2, 1  ;;  %v2755_v32 = vpack.c.bf16 %v9393_v30, %v9391_v29  ;;  %v2433_v34 = vpop.permute.xlu0 %2432 }
 0x21e   : > { %v1869_v16 = vadd.f32 %v1799_v3, %v1701_v33  ;;  %v1802_v15 = vrot.slane %v9379_v48, 4  ;;  %v1253_v62 = vmul.f32 0.011170336, %v11712_v40  ;;  %v1868_v43 = vadd.f32 %v1797_v27, %v1700_v55 }
 0x21f   : > { %v1539_v9 = vadd.f32 %v11725_v56, %v11724_v60  ;;  %v1800_v44 = vrot.slane %v1251_v61, 4  ;;  %v1702_v28 = vadd.f32 %v1633_v26, %v1494_v52  ;;  %2806 = vrot.lane.b32.xlu1 %v2755_v32, %s7965_s22  ;;  %v1703_v58 = vadd.f32 %v1635_v35, %v1495_v17  ;;  %v11728_v26 = vld [vmem:[#allocation44_spill] sm:$0xff] }
 0x220   : > { %v9405_v46 = vadd.f32 %v2435_v10, %v1869_v16  ;;  %v1497_v41 = vadd.f32 %v1431_v38, %v1253_v62  ;;  %v1639_v2 = vsel %vm933_vm6, %v1636_v24, %v1638_v13  ;;  %v1806_v5 = vrot.slane %v1254_v22, 4 }
 0x221   : > { %v1637_v3 = vsel %vm933_vm6, %v1634_v59, %v1636_v24  ;;  %v1640_v33 = vrot.slane %v1538_v4, 2  ;;  %v1642_v60 = vrot.slane %v1539_v9, 2  ;;  %v9410_v56 = vadd.f32 %v2433_v34, %v1868_v43  ;;  %v2437_v1 = vpop.permute.xlu0 %2436  ;;  %v2439_v9 = vpop.permute.xlu1 %2438 }
 0x222   : > { %11726 = vst [vmem:[#allocation34_spill] sm:$0xff] %v9405_v46  ;;  %v1801_v61 = vsel %vm923_vm4, %v1798_v23, %v1800_v44  ;;  %v1803_v40 = vsel %vm923_vm4, %v1800_v44, %v1802_v15  ;;  %v1496_v52 = vadd.f32 %v9343_v42, %v9379_v48  ;;  %v1804_v27 = vrot.slane %v1253_v62, 4 }
 0x223   : > { %11727 = vst [vmem:[#allocation51_spill] sm:$0xff] %v9410_v56  ;;  %v1870_v38 = vadd.f32 %v1801_v61, %v1702_v28  ;;  %v1705_v55 = vadd.f32 %v1639_v2, %v1497_v41  ;;  %v1331_v17 = vmul.f32 0.011170336, %v11728_v26  ;;  %v2756_v59 = vpack.c.bf16 %v9405_v46, %v9410_v56 }
 0x224   : > { %v1871_v24 = vadd.f32 %v1803_v40, %v1703_v58  ;;  %v1704_v35 = vadd.f32 %v1637_v3, %v1496_v52  ;;  %v1255_v4 = vmul.f32 0.011170336, %v11720_v45  ;;  %v1807_v23 = vsel %vm923_vm4, %v1804_v27, %v1806_v5 }
 0x225   : > { %v1643_v32 = vsel %vm933_vm6, %v1640_v33, %v1642_v60  ;;  %v1641_v42 = vsel %vm933_vm6, %v1638_v13, %v1640_v33  ;;  %v9425_v48 = vadd.f32 %v2437_v1, %v1870_v38  ;;  %2808 = vrot.lane.b32.xlu0 %v2756_v59, %s7965_s22  ;;  %v1498_v10 = vadd.f32 %v9361_v36, %v1254_v22  ;;  %v2443_v13 = vpop.permute.xlu1 %2442  ;;  %v2441_v34 = vpop.permute.xlu0 %2440 }
 0x226   : > { %v9427_v16 = vadd.f32 %v2439_v9, %v1871_v24  ;;  %v1499_v62 = vadd.f32 %v1435_v0, %v1255_v4  ;;  %v1873_v43 = vadd.f32 %v1807_v23, %v1705_v55  ;;  %v1805_v45 = vsel %vm923_vm4, %v1802_v15, %v1804_v27 }
 0x227   : > { %11729 = vst [vmem:[#allocation31_spill] sm:$0xff] %v9425_v48  ;;  %v1810_v44 = vrot.slane %v1331_v17, 4  ;;  %v1872_v58 = vadd.f32 %v1805_v45, %v1704_v35  ;;  %v1706_v2 = vadd.f32 %v1641_v42, %v1498_v10  ;;  %v1808_v3 = vrot.slane %v1255_v4, 4 }
 0x228   : > { %11730 = vst [vmem:[#allocation55_spill] sm:$0xff] %v9427_v16  ;;  %v2757_v28 = vpack.c.bf16 %v9427_v16, %v9425_v48  ;;  %v1707_v41 = vadd.f32 %v1643_v32, %v1499_v62  ;;  %v9434_v33 = vadd.f32 %v2443_v13, %v1873_v43 }
 0x229   : > { %v9436_v60 = vadd.f32 %v2441_v34, %v1872_v58  ;;  %v1811_v36 = vsel %vm923_vm4, %v1808_v3, %v1810_v44  ;;  %v1809_v0 = vsel %vm923_vm4, %v1806_v5, %v1808_v3  ;;  %v2447_v40 = vpop.permute.xlu1 %2446  ;;  %v2445_v52 = vpop.permute.xlu0 %2444  ;;  %v7763_v44 = vld [vmem:[%s11276_s4] sm:$0xff]  }
 0x22a   : > { %11731 = vst [vmem:[#allocation29_spill] sm:$0xff] %v9434_v33  ;;  %2810 = vrot.lane.b32.xlu1 %v2757_v28, %s7965_s22  ;;  %v1875_v15 = vadd.f32 %v1811_v36, %v1707_v41  ;;  %v1874_v61 = vadd.f32 %v1809_v0, %v1706_v2  ;;  %7435 = vmatprep.mubr.msk.bf16.mxu0 %vm687_vm2, %v7763_v44 }
 0x22b   : > { %11732 = vst [vmem:[#allocation36_spill] sm:$0xff] %v9436_v60  ;;  %v2758_v22 = vpack.c.bf16 %v9434_v33, %v9436_v60 }
 0x22c   : > { %v9443_v38 = vadd.f32 %v2447_v40, %v1875_v15  ;;  %v9445_v27 = vadd.f32 %v2445_v52, %v1874_v61 }
 0x22d   : > { %2812 = vrot.lane.b32.xlu0 %v2758_v22, %s7965_s22 }
 0x22e   : > { %11733 = vst [vmem:[#allocation53_spill] sm:$0xff] %v9443_v38  ;;  %11734 = vst [vmem:[#allocation33_spill] sm:$0xff] %v9445_v27  ;;  %v2759_v55 = vpack.c.bf16 %v9443_v38, %v9445_v27 }
 0x230   : > { %2814 = vrot.lane.b32.xlu1 %v2759_v55, %s7965_s22 }
 0x249   : > { %v2785_v26 = vpop.permute.xlu0 %2784 }
 0x24a   : > { %7383 = vmatprep.mubr.msk.bf16.mxu1 %vm687_vm2, %v2785_v26  ;;  %v9475_v26 = vld [vmem:[%s11276_s4 + $0x8] sm:$0xff]  }
 0x24d   : > { %v2787_v5 = vpop.permute.xlu1 %2786 }
 0x24e   : > { %7384 = vmatmul.mubr.msk.bf16.vlgmr.msra.gmra.mxu1 %vm687_vm2, %v2787_v5 }
 0x251   : > { %v2789_v17 = vpop.permute.xlu0 %2788 }
 0x252   : > { %7387 = vmatprep.mubr.msk.bf16.mxu1 %vm687_vm2, %v2789_v17 }
 0x255   : > { %v2791_v59 = vpop.permute.xlu1 %2790 }
 0x256   : > { %7388 = vmatmul.mubr.msk.bf16.gmra.mxu1 %vm687_vm2, %v2791_v59 }
 0x25f   : > { %v2793_v24 = vpop.permute.xlu0 %2792 }
 0x260   : > { %7391 = vmatprep.mubr.msk.bf16.mxu1 %vm687_vm2, %v2793_v24 }
 0x265   : > { %v2795_v35 = vpop.permute.xlu1 %2794 }
 0x266   : > { %7392 = vmatmul.mubr.msk.bf16.gmra.mxu1 %vm687_vm2, %v2795_v35 }
 0x26d   : > { %v2797_v4 = vpop.permute.xlu0 %2796 }
 0x26e   : > { %7395 = vmatprep.mubr.msk.bf16.mxu1 %vm687_vm2, %v2797_v4 }
 0x273   : > { %v2799_v1 = vpop.permute.xlu1 %2798 }
 0x274   : > { %7396 = vmatmul.mubr.msk.bf16.gmra.mxu1 %vm687_vm2, %v2799_v1 }
 0x280   : > { %v2801_v9 = vpop.permute.xlu0 %2800 }
 0x281   : > { %7399 = vmatprep.mubr.msk.bf16.mxu1 %vm687_vm2, %v2801_v9 }
 0x286   : > { %v2803_v23 = vpop.permute.xlu1 %2802 }
 0x287   : > { %7400 = vmatmul.mubr.msk.bf16.gmra.mxu1 %vm687_vm2, %v2803_v23 }
 0x28d   : > { %v2805_v32 = vpop.permute.xlu0 %2804 }
 0x28e   : > { %7403 = vmatprep.mubr.msk.bf16.mxu1 %vm687_vm2, %v2805_v32 }
 0x291   : > { %v2807_v42 = vpop.permute.xlu1 %2806 }
 0x292   : > { %7404 = vmatmul.mubr.msk.bf16.gmra.mxu1 %vm687_vm2, %v2807_v42 }
 0x297   : > { %v2809_v62 = vpop.permute.xlu0 %2808 }
 0x298   : > { %7407 = vmatprep.mubr.msk.bf16.mxu1 %vm687_vm2, %v2809_v62 }
 0x29c   : > { %v2811_v10 = vpop.permute.xlu1 %2810 }
 0x29d   : > { %7408 = vmatmul.mubr.msk.bf16.gmra.mxu1 %vm687_vm2, %v2811_v10 }
 0x29f   : > { %v2813_v43 = vpop.permute.xlu0 %2812 }
 0x2a0   : > { %7411 = vmatprep.mubr.msk.bf16.mxu1 %vm687_vm2, %v2813_v43 }
 0x2a2   : > { %v2815_v45 = vpop.permute.xlu1 %2814 }
 0x2a5   : > { %7412 = vmatmul.mubr.msk.bf16.gmra.mxu1 %vm687_vm2, %v2815_v45 }
 0x2a6   : > { %7423 = vmatprep.mubr.msk.bf16.mxu1 %vm687_vm2, %v7763_v44 }
 0x30e   : > { %v7385_v28 = vpop.f32.mrf.mxu1 }
 0x310   : > { %v2922_v58 = vpop.f32.mrf.mxu1 }
 0x312   : > { %v7386_v41 = vpop.f32.mrf.mxu1 }
 0x313   : > { %v3054_v15 = vpack.c.bf16 %v7386_v41, %v7385_v28 }
 0x314   : > { %v2925_v2 = vpop.f32.mrf.mxu1 }
 0x315   : > { %v3053_v40 = vpack.c.bf16 %v2925_v2, %v2922_v58 }
 0x316   : > { %v7389_v13 = vpop.f32.mrf.mxu1 }
 0x318   : > { %v2938_v34 = vpop.f32.mrf.mxu1 }
 0x31a   : > { %v7390_v3 = vpop.f32.mrf.mxu1 }
 0x31b   : > { %v3056_v36 = vpack.c.bf16 %v7390_v3, %v7389_v13 }
 0x31c   : > { %v2941_v0 = vpop.f32.mrf.mxu1 }
 0x31d   : > { %v3055_v22 = vpack.c.bf16 %v2941_v0, %v2938_v34  ;;  %7415 = vmatprep.subr.bf16.mxu1 %v3056_v36 }
 0x31e   : > { %7416 = vmatpush3.bf16.msra.mxu1 %v3056_v36 }
 0x31f   : > { %7417 = vmatprep.subr.bf16.mxu1 %v3055_v22 }
 0x322   : > { %7418 = vmatpush3.bf16.msra.mxu1 %v3055_v22 }
 0x323   : > { %7419 = vmatprep.subr.bf16.mxu1 %v3054_v15 }
 0x326   : > { %v7393_v61 = vpop.f32.mrf.mxu1  ;;  %7420 = vmatpush3.bf16.msra.mxu1 %v3054_v15 }
 0x327   : > { %7421 = vmatprep.subr.bf16.mxu1 %v3053_v40 }
 0x328   : > { %v2954_v52 = vpop.f32.mrf.mxu1 }
 0x32a   : > { %v7394_v55 = vpop.f32.mrf.mxu1  ;;  %7422 = vmatpush3.bf16.msra.mxu1 %v3053_v40 }
 0x32b   : > { %v3058_v9 = vpack.c.bf16 %v7394_v55, %v7393_v61 }
 0x32c   : > { %v2957_v5 = vpop.f32.mrf.mxu1 }
 0x32d   : > { %7424 = vmatmul.mubr.msk.bf16.vlgmr.msra.gmra.mxu1 %vm687_vm2, %v9475_v26  ;;  %v3057_v23 = vpack.c.bf16 %v2957_v5, %v2954_v52 }
 0x32e   : > { %7447 = vmatprep.mubr.msk.bf16.mxu1 %vm687_vm2, %v7763_v44 }
 0x334   : > { %v7397_v17 = vpop.f32.mrf.mxu1 }
 0x336   : > { %v2970_v59 = vpop.f32.mrf.mxu1 }
 0x338   : > { %v7398_v24 = vpop.f32.mrf.mxu1 }
 0x339   : > { %v3060_v35 = vpack.c.bf16 %v7398_v24, %v7397_v17  ;;  %v7766_v24 = vld [vmem:[%s11277_s5] sm:$0xff]  }
 0x33a   : > { %v2973_v4 = vpop.f32.mrf.mxu1 }
 0x33b   : > { %v3059_v1 = vpack.c.bf16 %v2973_v4, %v2970_v59  ;;  %7427 = vmatprep.subr.bf16.mxu0 %v3060_v35  ;;  %v7765_v59 = vld [vmem:[%s11277_s5 + $0x8] sm:$0xff]  }
 0x33c   : > { %7428 = vmatpush3.bf16.msra.mxu0 %v3060_v35 }
 0x33d   : > { %7429 = vmatprep.subr.bf16.mxu0 %v3059_v1 }
 0x340   : > { %7430 = vmatpush3.bf16.msra.mxu0 %v3059_v1 }
 0x341   : > { %7431 = vmatprep.subr.bf16.mxu0 %v3058_v9 }
 0x344   : > { %7432 = vmatpush3.bf16.msra.mxu0 %v3058_v9 }
 0x345   : > { %7433 = vmatprep.subr.bf16.mxu0 %v3057_v23 }
 0x347   : > { %v7401_v32 = vpop.f32.mrf.mxu1 }
 0x348   : > { %7434 = vmatpush3.bf16.msra.mxu0 %v3057_v23 }
 0x349   : > { %v2986_v42 = vpop.f32.mrf.mxu1 }
 0x34b   : > { %v7402_v62 = vpop.f32.mrf.mxu1  ;;  %7436 = vmatmul.mubr.msk.bf16.vlgmr.msra.gmra.mxu0 %vm687_vm2, %v9475_v26 }
 0x34c   : > { %7459 = vmatprep.mubr.msk.bf16.mxu0 %vm687_vm2, %v7763_v44  ;;  %v3062_v34 = vpack.c.bf16 %v7402_v62, %v7401_v32 }
 0x34d   : > { %v2989_v10 = vpop.f32.mrf.mxu1 }
 0x34e   : > { %v3061_v0 = vpack.c.bf16 %v2989_v10, %v2986_v42 }
 0x352   : > { %v7405_v43 = vpop.f32.mrf.mxu1 }
 0x354   : > { %v3002_v45 = vpop.f32.mrf.mxu1 }
 0x356   : > { %v7406_v28 = vpop.f32.mrf.mxu1 }
 0x357   : > { %v3064_v58 = vpack.c.bf16 %v7406_v28, %v7405_v43 }
 0x358   : > { %v3005_v41 = vpop.f32.mrf.mxu1 }
 0x359   : > { %v3063_v2 = vpack.c.bf16 %v3005_v41, %v3002_v45  ;;  %7439 = vmatprep.subr.bf16.mxu1 %v3064_v58 }
 0x35a   : > { %7440 = vmatpush3.bf16.msra.mxu1 %v3064_v58 }
 0x35b   : > { %7441 = vmatprep.subr.bf16.mxu1 %v3063_v2 }
 0x35d   : > { %v7409_v13 = vpop.f32.mrf.mxu1 }
 0x35e   : > { %7442 = vmatpush3.bf16.msra.mxu1 %v3063_v2 }
 0x35f   : > { %v3018_v3 = vpop.f32.mrf.mxu1  ;;  %7443 = vmatprep.subr.bf16.mxu1 %v3062_v34 }
 0x361   : > { %v7410_v36 = vpop.f32.mrf.mxu1 }
 0x362   : > { %7444 = vmatpush3.bf16.msra.mxu1 %v3062_v34  ;;  %v3066_v5 = vpack.c.bf16 %v7410_v36, %v7409_v13 }
 0x363   : > { %v3021_v22 = vpop.f32.mrf.mxu1  ;;  %7445 = vmatprep.subr.bf16.mxu1 %v3061_v0 }
 0x364   : > { %v3065_v17 = vpack.c.bf16 %v3021_v22, %v3018_v3 }
 0x365   : > { %v7413_v44 = vpop.f32.mrf.mxu1 }
 0x366   : > { %7446 = vmatpush3.bf16.msra.mxu1 %v3061_v0 }
 0x367   : > { %v3034_v15 = vpop.f32.mrf.mxu1  ;;  %7463 = vmatprep.subr.bf16.mxu1 %v7765_v59 }
 0x369   : > { %v7414_v61 = vpop.f32.mrf.mxu1  ;;  %7448 = vmatmul.mubr.msk.bf16.vlgmr.msra.gmra.mxu1 %vm687_vm2, %v9475_v26 }
 0x36a   : > { %v3068_v40 = vpack.c.bf16 %v7414_v61, %v7413_v44  ;;  %7464 = vmatpush3.bf16.msra.mxu1 %v7765_v59 }
 0x36b   : > { %v3037_v52 = vpop.f32.mrf.mxu1  ;;  %7465 = vmatprep.subr.bf16.mxu1 %v7766_v24 }
 0x36c   : > { %v3067_v55 = vpack.c.bf16 %v3037_v52, %v3034_v15  ;;  %7451 = vmatprep.subr.bf16.mxu0 %v3068_v40 }
 0x36d   : > { %7452 = vmatpush3.bf16.msra.mxu0 %v3068_v40 }
 0x36e   : > { %7453 = vmatprep.subr.bf16.mxu0 %v3067_v55  ;;  %7466 = vmatpush3.bf16.msra.mxu1 %v7766_v24 }
 0x371   : > { %7454 = vmatpush3.bf16.msra.mxu0 %v3067_v55 }
 0x372   : > { %7455 = vmatprep.subr.bf16.mxu0 %v3066_v5 }
 0x375   : > { %7456 = vmatpush3.bf16.msra.mxu0 %v3066_v5 }
 0x376   : > { %7457 = vmatprep.subr.bf16.mxu0 %v3065_v17 }
 0x379   : > { %7458 = vmatpush3.bf16.msra.mxu0 %v3065_v17 }
 0x37c   : > { %7460 = vmatmul.mubr.msk.bf16.vlgmr.msra.gmra.mxu0 %vm687_vm2, %v9475_v26 }
 0x3ed   : > { %v9493_v35 = vpop.f32.mrf.mxu1 }
 0x3ee   : > { %11735 = vst [vmem:[#allocation58_spill] sm:$0xff] %v9493_v35  ;;  %v3308_v1 = vrot.slane %v9493_v35, 6 }
 0x3ef   : > { %v9495_v4 = vpop.f32.mrf.mxu1 }
 0x3f0   : > { %11736 = vst [vmem:[#allocation20_spill] sm:$0xff] %v9495_v4  ;;  %v3285_v26 = vrot.slane %v9495_v4, 7  ;;  %v3305_v9 = vrot.slane %v9495_v4, 6 }
 0x3f1   : > { %v9500_v23 = vpop.f32.mrf.mxu1 }
 0x3f2   : > { %11737 = vst [vmem:[#allocation54_spill] sm:$0xff] %v9500_v23  ;;  %v3393_v32 = vsel %vm905_vm1, %v9495_v4, %v3285_v26  ;;  %v3310_v42 = vrot.slane %v9500_v23, 6  ;;  %v3353_v13 = vrot.slane %v9500_v23, 5  ;;  %v3361_v34 = vrot.slane %v9500_v23, 4 }
 0x3f3   : > { %v9505_v62 = vpop.f32.mrf.mxu1  ;;  %v3397_v10 = vsel %vm768_vm0, %v3393_v32, %v3305_v9  ;;  %v3369_v36 = vrot.slane %v9500_v23, 3  ;;  %v3377_v22 = vrot.slane %v9500_v23, 2  ;;  %v3385_v15 = vrot.slane %v9500_v23, 1 }
 0x3f4   : > { %11738 = vst [vmem:[#allocation38_spill] sm:$0xff] %v9505_v62  ;;  %v3306_v43 = vrot.slane %v9505_v62, 6  ;;  %v3311_v45 = vsel %vm768_vm0, %v3308_v1, %v3310_v42  ;;  %v3401_v3 = vsel %vm768_vm0, %v3310_v42, %v3353_v13 }
 0x3f5   : > { %v3405_v0 = vsel %vm918_vm3, %v3401_v3, %v3361_v34 }
 0x3f6   : > { %v3307_v28 = vsel %vm768_vm0, %v3305_v9, %v3306_v43  ;;  %v3309_v58 = vsel %vm768_vm0, %v3306_v43, %v3308_v1  ;;  %v3409_v44 = vsel %vm923_vm4, %v3405_v0, %v3369_v36 }
 0x3f7   : > { %v3425_v41 = vpack.c.bf16 %v3307_v28, %v3397_v10  ;;  %v3426_v2 = vpack.c.bf16 %v3311_v45, %v3309_v58  ;;  %v3413_v61 = vsel %vm928_vm5, %v3409_v44, %v3377_v22 }
 0x3f8   : > { %v3417_v52 = vsel %vm933_vm6, %v3413_v61, %v3385_v15 }
 0x3f9   : > { %7467 = vmatprep.mubr.msk.bf16.mxu1 %vm3451_vm8, %v3425_v41  ;;  %v3421_v1 = vsel %vm938_vm7, %v3417_v52, %v9500_v23 }
 0x3fa   : > { %7468 = vmatmul.mubr.msk.bf16.vlgmr.msra.gmra.mxu1 %vm3451_vm8, %v3426_v2 }
 0x40b   : > { %v9523_v40 = vpop.f32.mrf.mxu0 }
 0x40c   : > { %11739 = vst [vmem:[#allocation40_spill] sm:$0xff] %v9523_v40  ;;  %v3315_v59 = vrot.slane %v9523_v40, 6 }
 0x40d   : > { %v9526_v55 = vpop.f32.mrf.mxu0 }
 0x40e   : > { %11740 = vst [vmem:[#allocation50_spill] sm:$0xff] %v9526_v55  ;;  %v3286_v5 = vrot.slane %v9526_v55, 7  ;;  %v3312_v17 = vrot.slane %v9526_v55, 6 }
 0x40f   : > { %v9531_v24 = vpop.f32.mrf.mxu0 }
 0x410   : > { %11741 = vst [vmem:[#allocation62_spill] sm:$0xff] %v9531_v24  ;;  %v3394_v26 = vsel %vm905_vm1, %v9526_v55, %v3286_v5  ;;  %v3354_v9 = vrot.slane %v9531_v24, 5  ;;  %v3362_v32 = vrot.slane %v9531_v24, 4  ;;  %v3317_v42 = vrot.slane %v9531_v24, 6 }
 0x411   : > { %v3398_v10 = vsel %vm768_vm0, %v3394_v26, %v3312_v17  ;;  %v9541_v43 = vpop.f32.mrf.mxu0  ;;  %v3370_v45 = vrot.slane %v9531_v24, 3  ;;  %v3378_v28 = vrot.slane %v9531_v24, 2  ;;  %v3386_v2 = vrot.slane %v9531_v24, 1 }
 0x412   : > { %11742 = vst [vmem:[#allocation35_spill] sm:$0xff] %v9541_v43  ;;  %v3313_v58 = vrot.slane %v9541_v43, 6  ;;  %v3427_v41 = vpack.c.bf16 %v3398_v10, %v3421_v1  ;;  %v3402_v13 = vsel %vm768_vm0, %v3317_v42, %v3354_v9  ;;  %v3318_v44 = vsel %vm768_vm0, %v3315_v59, %v3317_v42 }
 0x413   : > { %v3406_v34 = vsel %vm918_vm3, %v3402_v13, %v3362_v32 }
 0x414   : > { %v3314_v3 = vsel %vm768_vm0, %v3312_v17, %v3313_v58  ;;  %v3316_v36 = vsel %vm768_vm0, %v3313_v58, %v3315_v59  ;;  %7471 = vmatprep.mubr.msk.bf16.mxu1 %vm3451_vm8, %v3427_v41  ;;  %v3410_v0 = vsel %vm923_vm4, %v3406_v34, %v3370_v45 }
 0x415   : > { %v3428_v22 = vpack.c.bf16 %v3316_v36, %v3314_v3  ;;  %v3414_v15 = vsel %vm928_vm5, %v3410_v0, %v3378_v28 }
 0x416   : > { %v3418_v61 = vsel %vm933_vm6, %v3414_v15, %v3386_v2 }
 0x417   : > { %7472 = vmatmul.mubr.msk.bf16.gmra.mxu1 %vm3451_vm8, %v3428_v22  ;;  %v3422_v52 = vsel %vm938_vm7, %v3418_v61, %v9531_v24 }
 0x418   : > { %v3429_v5 = vpack.c.bf16 %v3422_v52, %v3318_v44 }
 0x41a   : > { %7475 = vmatprep.mubr.msk.bf16.mxu1 %vm3451_vm8, %v3429_v5 }
 0x429   : > { %v9560_v17 = vpop.f32.mrf.mxu1 }
 0x42a   : > { %11743 = vst [vmem:[#allocation56_spill] sm:$0xff] %v9560_v17  ;;  %v3322_v26 = vrot.slane %v9560_v17, 6 }
 0x42b   : > { %v9562_v1 = vpop.f32.mrf.mxu1 }
 0x42c   : > { %11744 = vst [vmem:[#allocation57_spill] sm:$0xff] %v9562_v1  ;;  %v3287_v59 = vrot.slane %v9562_v1, 7  ;;  %v3319_v32 = vrot.slane %v9562_v1, 6 }
 0x42d   : > { %v9566_v9 = vpop.f32.mrf.mxu1 }
 0x42e   : > { %11745 = vst [vmem:[#allocation61_spill] sm:$0xff] %v9566_v9  ;;  %v3355_v42 = vrot.slane %v9566_v9, 5  ;;  %v3324_v10 = vrot.slane %v9566_v9, 6  ;;  %v3395_v45 = vsel %vm905_vm1, %v9562_v1, %v3287_v59  ;;  %v3363_v2 = vrot.slane %v9566_v9, 4 }
 0x42f   : > { %v9573_v28 = vpop.f32.mrf.mxu1  ;;  %v3399_v13 = vsel %vm768_vm0, %v3395_v45, %v3319_v32  ;;  %v3371_v44 = vrot.slane %v9566_v9, 3  ;;  %v3379_v52 = vrot.slane %v9566_v9, 2  ;;  %v3387_v59 = vrot.slane %v9566_v9, 1 }
 0x430   : > { %11746 = vst [vmem:[#allocation59_spill] sm:$0xff] %v9573_v28  ;;  %v3320_v58 = vrot.slane %v9573_v28, 6  ;;  %v3325_v41 = vsel %vm768_vm0, %v3322_v26, %v3324_v10  ;;  %v3403_v36 = vsel %vm768_vm0, %v3324_v10, %v3355_v42 }
 0x431   : > { %v3407_v15 = vsel %vm918_vm3, %v3403_v36, %v3363_v2 }
 0x432   : > { %v3321_v34 = vsel %vm768_vm0, %v3319_v32, %v3320_v58  ;;  %v3323_v3 = vsel %vm768_vm0, %v3320_v58, %v3322_v26  ;;  %v3411_v61 = vsel %vm923_vm4, %v3407_v15, %v3371_v44 }
 0x433   : > { %v3430_v0 = vpack.c.bf16 %v3321_v34, %v3399_v13  ;;  %v3431_v22 = vpack.c.bf16 %v3325_v41, %v3323_v3  ;;  %v3415_v26 = vsel %vm928_vm5, %v3411_v61, %v3379_v52 }
 0x434   : > { %v3419_v45 = vsel %vm933_vm6, %v3415_v26, %v3387_v59 }
 0x435   : > { %7476 = vmatmul.mubr.msk.bf16.gmra.mxu1 %vm3451_vm8, %v3430_v0  ;;  %v3423_v0 = vsel %vm938_vm7, %v3419_v45, %v9566_v9 }
 0x436   : > { %7479 = vmatprep.mubr.msk.bf16.mxu1 %vm3451_vm8, %v3431_v22 }
 0x43c   : > { %v9588_v5 = vpop.f32.mrf.mxu0 }
 0x43d   : > { %11747 = vst [vmem:[#allocation37_spill] sm:$0xff] %v9588_v5  ;;  %v3329_v3 = vrot.slane %v9588_v5, 6 }
 0x43e   : > { %v9592_v32 = vpop.f32.mrf.mxu0 }
 0x43f   : > { %11748 = vst [vmem:[#allocation43_spill] sm:$0xff] %v9592_v32  ;;  %v3288_v42 = vrot.slane %v9592_v32, 7  ;;  %v3326_v10 = vrot.slane %v9592_v32, 6 }
 0x440   : > { %v9597_v58 = vpop.f32.mrf.mxu0 }
 0x441   : > { %11749 = vst [vmem:[#allocation42_spill] sm:$0xff] %v9597_v58  ;;  %v3396_v41 = vsel %vm905_vm1, %v9592_v32, %v3288_v42  ;;  %v3356_v2 = vrot.slane %v9597_v58, 5  ;;  %v3364_v13 = vrot.slane %v9597_v58, 4  ;;  %v3331_v34 = vrot.slane %v9597_v58, 6 }
 0x442   : > { %v3400_v36 = vsel %vm768_vm0, %v3396_v41, %v3326_v10  ;;  %v9608_v22 = vpop.f32.mrf.mxu0  ;;  %v3372_v61 = vrot.slane %v9597_v58, 3  ;;  %v3380_v26 = vrot.slane %v9597_v58, 2  ;;  %v3388_v45 = vrot.slane %v9597_v58, 1 }
 0x443   : > { %11750 = vst [vmem:[#allocation39_spill] sm:$0xff] %v9608_v22  ;;  %v3432_v44 = vpack.c.bf16 %v3400_v36, %v3423_v0  ;;  %v3327_v15 = vrot.slane %v9608_v22, 6  ;;  %v3404_v52 = vsel %vm768_vm0, %v3331_v34, %v3356_v2 }
 0x444   : > { %v3408_v59 = vsel %vm918_vm3, %v3404_v52, %v3364_v13  ;;  %v3332_v13 = vsel %vm768_vm0, %v3329_v3, %v3331_v34 }
 0x445   : > { %7480 = vmatmul.mubr.msk.bf16.gmra.mxu1 %vm3451_vm8, %v3432_v44  ;;  %v3328_v42 = vsel %vm768_vm0, %v3326_v10, %v3327_v15  ;;  %v3330_v41 = vsel %vm768_vm0, %v3327_v15, %v3329_v3  ;;  %v3412_v36 = vsel %vm923_vm4, %v3408_v59, %v3372_v61 }
 0x446   : > { %v3433_v0 = vpack.c.bf16 %v3330_v41, %v3328_v42  ;;  %v3416_v24 = vsel %vm928_vm5, %v3412_v36, %v3380_v26 }
 0x447   : > { %v3420_v40 = vsel %vm933_vm6, %v3416_v24, %v3388_v45 }
 0x448   : > { %7483 = vmatprep.mubr.msk.bf16.mxu1 %vm3451_vm8, %v3433_v0  ;;  %v3424_v2 = vsel %vm938_vm7, %v3420_v40, %v9597_v58 }
 0x449   : > { %v3434_v44 = vpack.c.bf16 %v3424_v2, %v3332_v13 }
 0x44d   : > { %7484 = vmatmul.mubr.msk.bf16.gmra.mxu1 %vm3451_vm8, %v3434_v44 }
 0x4ba   : > { %v9627_v10 = vpop.f32.mrf.mxu1 }
 0x4bb   : > { %v3613_v15 = vmul.f32 0.023647603, %v9627_v10  ;;  %v9631_v52 = vmul.f32 0.011170336, %v9627_v10  ;;  %v3966_v24 = vrot.slane %v9627_v10, 1 }
 0x4bc   : > { %v3516_v61 = vpop.f32.mrf.mxu1  ;;  %v3633_v59 = vmul.f32 0.030364122, %v9627_v10 }
 0x4bd   : > { %v3611_v26 = vmul.f32 0.023647603, %v3516_v61  ;;  %v3678_v34 = vrot.slane %v3613_v15, 1  ;;  %v3963_v3 = vrot.slane %v3516_v61, 1  ;;  %v4127_v2 = vrot.slane %v3516_v61, 4 }
 0x4be   : > { %v9635_v42 = vpop.f32.mrf.mxu1  ;;  %v3878_v13 = vrot.slane %v9631_v52, 4  ;;  %v3595_v44 = vmul.f32 0.011170336, %v3516_v61  ;;  %v3631_v55 = vmul.f32 0.030364122, %v3516_v61 }
 0x4bf   : > { %v9639_v41 = vmul.f32 0.023647603, %v9635_v42  ;;  %v11400_v45 = vrot.slane %v9635_v42, 1  ;;  %v3675_v36 = vrot.slane %v3611_v26, 1 }
 0x4c0   : > { %v3519_v0 = vpop.f32.mrf.mxu1  ;;  %v3875_v35 = vrot.slane %v3595_v44, 4 }
 0x4c1   : > { %v11406_v58 = vrot.slane %v9639_v41, 1  ;;  %v3612_v5 = vmul.f32 0.023647603, %v3519_v0  ;;  %v3964_v43 = vrot.slane %v3519_v0, 1  ;;  %v3969_v15 = vsel %vm938_vm7, %v3966_v24, %v11400_v45 }
 0x4c2   : > { %v9648_v40 = vadd.f32 %v9627_v10, %v3969_v15  ;;  %v4128_v22 = vrot.slane %v3519_v0, 4  ;;  %v3596_v32 = vmul.f32 0.011170336, %v3519_v0  ;;  %v11751_v45 = vrot.slane %v9627_v10, 4 }
 0x4c3   : > { %v3676_v26 = vrot.slane %v3612_v5, 1  ;;  %v3967_v9 = vsel %vm938_vm7, %v3964_v43, %v3966_v24  ;;  %v3965_v23 = vsel %vm938_vm7, %v3963_v3, %v3964_v43  ;;  %v3681_v17 = vsel %vm938_vm7, %v3678_v34, %v11406_v58 }
 0x4c4   : > { %v4016_v62 = vadd.f32 %v3967_v9, %v3519_v0  ;;  %v4131_v15 = vsel %vm923_vm4, %v4128_v22, %v11751_v45  ;;  %v4015_v28 = vadd.f32 %v3965_v23, %v3516_v61  ;;  %v4129_v4 = vsel %vm923_vm4, %v4127_v2, %v4128_v22 }
 0x4c5   : > { %v9660_v1 = vadd.f32 %v3681_v17, %v3633_v59  ;;  %v3632_v5 = vmul.f32 0.030364122, %v3519_v0  ;;  %v3679_v24 = vsel %vm938_vm7, %v3676_v26, %v3678_v34  ;;  %v3876_v27 = vrot.slane %v3596_v32, 4 }
 0x4c6   : > { %v4060_v43 = vrot.slane %v4016_v62, 2  ;;  %v4059_v3 = vrot.slane %v4015_v28, 2  ;;  %v3728_v38 = vadd.f32 %v3679_v24, %v3596_v32  ;;  %v3677_v33 = vsel %vm938_vm7, %v3675_v36, %v3676_v26 }
 0x4c7   : > { %v11409_v9 = vrot.slane %v9660_v1, 2  ;;  %v3748_v58 = vadd.f32 %v3679_v24, %v3632_v5  ;;  %v11752_v45 = vrot.slane %v9648_v40, 2  ;;  %v3879_v61 = vsel %vm923_vm4, %v3876_v27, %v3878_v13 }
 0x4c8   : > { %v4061_v22 = vsel %vm933_vm6, %v4059_v3, %v4060_v43  ;;  %v3727_v59 = vadd.f32 %v3677_v33, %v3595_v44  ;;  %v3747_v60 = vadd.f32 %v3677_v33, %v3631_v55  ;;  %v3877_v32 = vsel %vm923_vm4, %v3875_v35, %v3876_v27 }
 0x4c9   : > { %v4063_v23 = vsel %vm933_vm6, %v4060_v43, %v11752_v45  ;;  %v4111_v0 = vadd.f32 %v4061_v22, %v4015_v28  ;;  %v3788_v2 = vrot.slane %v3748_v58, 2  ;;  %v9672_v5 = vmul.f32 0.011170336, %v9635_v42 }
 0x4ca   : > { %v4112_v34 = vadd.f32 %v4063_v23, %v4016_v62  ;;  %v9675_v36 = vadd.f32 %v3681_v17, %v9631_v52  ;;  %v3787_v3 = vrot.slane %v3747_v60, 2  ;;  %v4132_v60 = vrot.slane %v9635_v42, 4 }
 0x4cb   : > { %v4179_v24 = vadd.f32 %v4129_v4, %v4111_v0  ;;  %v3791_v43 = vsel %vm933_vm6, %v3788_v2, %v11409_v9  ;;  %v11410_v62 = vrot.slane %v9672_v5, 4  ;;  %v3634_v58 = vmul.f32 0.030364122, %v9635_v42 }
 0x4cc   : > { %v4180_v26 = vadd.f32 %v4131_v15, %v4112_v34  ;;  %v3840_v44 = vadd.f32 %v3791_v43, %v3728_v38  ;;  %v3789_v33 = vsel %vm933_vm6, %v3787_v3, %v3788_v2  ;;  %v11753_v23 = vrot.slane %v9627_v10, 4 }
 0x4cd   : > { %4211 = vrot.lane.b32.xlu0 %v4179_v24, %s7966_s14  ;;  %v3839_v35 = vadd.f32 %v3789_v33, %v3727_v59  ;;  %v9689_v4 = vsel %vm923_vm4, %v3878_v13, %v11410_v62  ;;  %v11754_v33 = vrot.slane %v9635_v42, 1 }
 0x4ce   : > { %4213 = vrot.lane.b32.xlu1 %v4180_v26, %s7966_s14  ;;  %v9684_v27 = vadd.f32 %v3879_v61, %v3840_v44  ;;  %v4133_v22 = vsel %vm923_vm4, %v11753_v23, %v4132_v60 }
 0x4cf   : > { %v9691_v55 = vadd.f32 %v3877_v32, %v3839_v35 }
 0x4d7   : > { %v9694_v38 = vpop.f32.mrf.mxu1 }
 0x4d8   : > { %v9697_v17 = vmul.f32 0.023647603, %v9694_v38  ;;  %v9701_v52 = vmul.f32 0.011170336, %v9694_v38  ;;  %v3637_v15 = vmul.f32 0.030364122, %v9694_v38 }
 0x4d9   : > { %v3532_v28 = vpop.f32.mrf.mxu1  ;;  %v3973_v59 = vrot.slane %v9694_v38, 1 }
 0x4da   : > { %v3615_v45 = vmul.f32 0.023647603, %v3532_v28  ;;  %v3970_v13 = vrot.slane %v3532_v28, 1  ;;  %v3685_v61 = vrot.slane %v9697_v17, 1  ;;  %v4134_v0 = vrot.slane %v3532_v28, 4 }
 0x4db   : > { %v9709_v34 = vpop.f32.mrf.mxu1  ;;  %v3635_v32 = vmul.f32 0.030364122, %v3532_v28  ;;  %v3651_v43 = vmul.f32 0.011170336, %v3532_v28  ;;  %v3885_v17 = vrot.slane %v9701_v52, 4 }
 0x4dc   : > { %v4035_v26 = vadd.f32 %v3970_v13, %v3532_v28  ;;  %v9713_v24 = vmul.f32 0.023647603, %v9709_v34  ;;  %v3682_v3 = vrot.slane %v3615_v45, 1  ;;  %v11416_v10 = vrot.slane %v9709_v34, 1 }
 0x4dd   : > { %v3535_v44 = vpop.f32.mrf.mxu1  ;;  %v3971_v35 = vsel %vm938_vm7, %v11754_v33, %v3970_v13  ;;  %v4135_v2 = vsel %vm923_vm4, %v4132_v60, %v4134_v0  ;;  %v11756_v0 = vrot.slane %v9639_v41, 1  ;;  %v3882_v41 = vrot.slane %v3651_v43, 4 }
 0x4de   : > { %v3616_v23 = vmul.f32 0.023647603, %v3535_v44  ;;  %v3972_v9 = vrot.slane %v3535_v44, 1  ;;  %v4018_v62 = vadd.f32 %v9635_v42, %v3971_v35  ;;  %v4066_v48 = vrot.slane %v4035_v26, 2 }
 0x4df   : > { %v3976_v28 = vsel %vm938_vm7, %v3973_v59, %v11416_v10  ;;  %v4136_v45 = vrot.slane %v3535_v44, 4  ;;  %v11755_v42 = vrot.slane %v9694_v38, 4  ;;  %v3683_v26 = vsel %vm938_vm7, %v11756_v0, %v3682_v3 }
 0x4e0   : > { %v3684_v46 = vrot.slane %v3616_v23, 1  ;;  %v4064_v56 = vrot.slane %v4018_v62, 2  ;;  %v3974_v13 = vsel %vm938_vm7, %v3972_v9, %v3973_v59  ;;  %v9728_v33 = vadd.f32 %v9694_v38, %v3976_v28 }
 0x4e1   : > { %v4019_v30 = vadd.f32 %v3974_v13, %v3535_v44  ;;  %v4138_v60 = vsel %vm923_vm4, %v4136_v45, %v11755_v42  ;;  %v3751_v35 = vadd.f32 %v3682_v3, %v3635_v32  ;;  %v11757_v23 = vrot.slane %v9648_v40, 2 }
 0x4e2   : > { %v4067_v10 = vsel %vm933_vm6, %v4064_v56, %v4066_v48  ;;  %v11422_v9 = vrot.slane %v9728_v33, 2  ;;  %v3730_v59 = vadd.f32 %v3683_v26, %v9672_v5  ;;  %v3750_v45 = vadd.f32 %v3683_v26, %v3634_v58 }
 0x4e3   : > { %v4065_v16 = vsel %vm933_vm6, %v11757_v23, %v4064_v56  ;;  %v4114_v28 = vadd.f32 %v4067_v10, %v4018_v62  ;;  %v4068_v29 = vrot.slane %v4019_v30, 2  ;;  %v3794_v42 = vrot.slane %v3751_v35, 2 }
 0x4e4   : > { %v4113_v13 = vadd.f32 %v4065_v16, %v9648_v40  ;;  %v11758_v0 = vrot.slane %v9713_v24, 1  ;;  %v3599_v48 = vmul.f32 0.011170336, %v3535_v44  ;;  %v3792_v23 = vrot.slane %v3750_v45, 2 }
 0x4e5   : > { %v4182_v3 = vadd.f32 %v4135_v2, %v4114_v28  ;;  %v4070_v56 = vsel %vm933_vm6, %v4068_v29, %v11422_v9  ;;  %v11759_v62 = vrot.slane %v9672_v5, 4  ;;  %v3636_v58 = vmul.f32 0.030364122, %v3535_v44 }
 0x4e6   : > { %v3688_v32 = vsel %vm938_vm7, %v3685_v61, %v11758_v0  ;;  %v4181_v18 = vadd.f32 %v4133_v22, %v4113_v13  ;;  %v4115_v25 = vadd.f32 %v4070_v56, %v4019_v30  ;;  %v3795_v2 = vsel %vm933_vm6, %v3792_v23, %v3794_v42 }
 0x4e7   : > { %v3883_v16 = vsel %vm923_vm4, %v11759_v62, %v3882_v41  ;;  %v9752_v40 = vadd.f32 %v3688_v32, %v3637_v15  ;;  %4217 = vrot.lane.b32.xlu1 %v4182_v3, %s7966_s14  ;;  %v11760_v22 = vrot.slane %v9660_v1, 2  ;;  %v3686_v29 = vsel %vm938_vm7, %v3684_v46, %v3685_v61 }
 0x4e8   : > { %4215 = vrot.lane.b32.xlu0 %v4181_v18, %s7966_s14  ;;  %v3884_v30 = vrot.slane %v3599_v48, 4  ;;  %v4183_v10 = vadd.f32 %v4138_v60, %v4115_v25  ;;  %v3842_v5 = vadd.f32 %v3795_v2, %v3730_v59  ;;  %v3731_v44 = vadd.f32 %v3686_v29, %v3599_v48 }
 0x4e9   : > { %v3793_v43 = vsel %vm933_vm6, %v11760_v22, %v3792_v23  ;;  %v11421_v15 = vrot.slane %v9752_v40, 2  ;;  %v3752_v35 = vadd.f32 %v3686_v29, %v3636_v58  ;;  %v9765_v18 = vmul.f32 0.011170336, %v9709_v34 }
 0x4ea   : > { %v3841_v26 = vadd.f32 %v3793_v43, %v9675_v36  ;;  %v3886_v28 = vsel %vm923_vm4, %v3884_v30, %v3885_v17  ;;  %v9767_v13 = vadd.f32 %v3883_v16, %v3842_v5  ;;  %v9773_v46 = vadd.f32 %v3688_v32, %v9701_v52 }
 0x4eb   : > { %v3796_v25 = vrot.slane %v3752_v35, 2  ;;  %v11420_v36 = vrot.slane %v9765_v18, 4  ;;  %v3638_v0 = vmul.f32 0.030364122, %v9709_v34  ;;  %v11764_v48 = vrot.slane %v9694_v38, 4 }
 0x4ec   : > { %11761 = vst [vmem:[#allocation60_spill] sm:$0xff] %v9767_v13  ;;  %v9770_v1 = vadd.f32 %v9689_v4, %v3841_v26  ;;  %4219 = vrot.lane.b32.xlu0 %v4183_v10, %s7966_s14  ;;  %v4139_v4 = vrot.slane %v9709_v34, 4  ;;  %v11765_v35 = vrot.slane %v9709_v34, 1 }
 0x4ed   : > { %v3798_v61 = vsel %vm933_vm6, %v3796_v25, %v11421_v15  ;;  %v9783_v60 = vsel %vm923_vm4, %v3885_v17, %v11420_v36  ;;  %v11767_v36 = vrot.slane %v9713_v24, 1 }
 0x4ee   : > { %11762 = vst [vmem:[#allocation41_spill] sm:$0xff] %v9770_v1  ;;  %v3843_v59 = vadd.f32 %v3798_v61, %v3731_v44  ;;  %v4140_v3 = vsel %vm923_vm4, %v11764_v48, %v4139_v4 }
 0x4f0   : > { %v9786_v45 = vadd.f32 %v3886_v28, %v3843_v59 }
 0x4f2   : > { %11763 = vst [vmem:[#allocation45_spill] sm:$0xff] %v9786_v45 }
 0x4f5   : > { %v7477_v52 = vpop.f32.mrf.mxu1 }
 0x4f6   : > { %v9788_v42 = vmul.f32 0.023647603, %v7477_v52  ;;  %v9790_v41 = vmul.f32 0.011170336, %v7477_v52  ;;  %v3981_v56 = vrot.slane %v7477_v52, 1  ;;  %v4145_v2 = vrot.slane %v7477_v52, 4 }
 0x4f7   : > { %v3548_v32 = vpop.f32.mrf.mxu1  ;;  %v9801_v43 = vmul.f32 0.030364122, %v7477_v52 }
 0x4f8   : > { %v3619_v17 = vmul.f32 0.023647603, %v3548_v32  ;;  %v3977_v23 = vrot.slane %v3548_v32, 1  ;;  %v4141_v62 = vrot.slane %v3548_v32, 4  ;;  %v9799_v22 = vmul.f32 0.011170336, %v3548_v32 }
 0x4f9   : > { %v9797_v58 = vpop.f32.mrf.mxu1  ;;  %v3639_v30 = vmul.f32 0.030364122, %v3548_v32 }
 0x4fa   : > { %v9804_v29 = vmul.f32 0.023647603, %v9797_v58  ;;  %v11427_v38 = vrot.slane %v9797_v58, 1  ;;  %v3689_v5 = vrot.slane %v3619_v17, 1  ;;  %v9809_v26 = vmul.f32 0.030364122, %v9797_v58 }
 0x4fb   : > { %v3551_v44 = vpop.f32.mrf.mxu1  ;;  %v3978_v28 = vsel %vm938_vm7, %v11765_v35, %v3977_v23  ;;  %v4142_v48 = vsel %vm923_vm4, %v4139_v4, %v4141_v62  ;;  %v11766_v4 = vrot.slane %v9797_v58, 4 }
 0x4fc   : > { %v3620_v61 = vmul.f32 0.023647603, %v3551_v44  ;;  %v3979_v59 = vrot.slane %v3551_v44, 1  ;;  %v3640_v10 = vmul.f32 0.030364122, %v3551_v44  ;;  %v4021_v17 = vadd.f32 %v9709_v34, %v3978_v28 }
 0x4fd   : > { %v3983_v15 = vsel %vm938_vm7, %v3981_v56, %v11427_v38  ;;  %v4143_v25 = vrot.slane %v3551_v44, 4  ;;  %v9826_v16 = vsel %vm923_vm4, %v4145_v2, %v11766_v4  ;;  %v3690_v34 = vsel %vm938_vm7, %v11767_v36, %v3689_v5 }
 0x4fe   : > { %v3691_v9 = vrot.slane %v3620_v61, 1  ;;  %v4036_v50 = vadd.f32 %v3979_v59, %v3551_v44  ;;  %v3980_v35 = vsel %vm938_vm7, %v3977_v23, %v3979_v59  ;;  %v4071_v54 = vrot.slane %v4021_v17, 2 }
 0x4ff   : > { %v4022_v57 = vadd.f32 %v3980_v35, %v3548_v32  ;;  %v9831_v47 = vadd.f32 %v7477_v52, %v3983_v15  ;;  %v9833_v56 = vadd.f32 %v3690_v34, %v3638_v0  ;;  %v3652_v61 = vmul.f32 0.011170336, %v3551_v44 }
 0x500   : > { %v4075_v28 = vrot.slane %v4036_v50, 2  ;;  %v11768_v23 = vrot.slane %v9728_v33, 2  ;;  %v3692_v35 = vsel %vm938_vm7, %v3689_v5, %v3691_v9  ;;  %v3756_v38 = vadd.f32 %v3691_v9, %v3640_v10 }
 0x501   : > { %v4073_v32 = vrot.slane %v4022_v57, 2  ;;  %v11429_v24 = vrot.slane %v9833_v56, 2  ;;  %v3734_v36 = vadd.f32 %v3692_v35, %v9799_v22  ;;  %v9842_v50 = vadd.f32 %v3692_v35, %v3639_v30 }
 0x502   : > { %v4072_v59 = vsel %vm933_vm6, %v11768_v23, %v4071_v54  ;;  %v3803_v0 = vrot.slane %v3756_v38, 2  ;;  %v3891_v44 = vrot.slane %v3652_v61, 4  ;;  %v4077_v38 = vrot.slane %v9831_v47, 2 }
 0x503   : > { %v4116_v2 = vadd.f32 %v4072_v59, %v9728_v33  ;;  %v4076_v15 = vsel %vm933_vm6, %v4073_v32, %v4075_v28  ;;  %v4074_v52 = vsel %vm933_vm6, %v4071_v54, %v4073_v32  ;;  %v11769_v33 = vrot.slane %v9752_v40, 2 }
 0x504   : > { %v4118_v20 = vadd.f32 %v4076_v15, %v4022_v57  ;;  %v4117_v5 = vadd.f32 %v4074_v52, %v4021_v17  ;;  %v4144_v54 = vsel %vm923_vm4, %v4141_v62, %v4143_v25  ;;  %v11430_v40 = vrot.slane %v9842_v50, 2 }
 0x505   : > { %v9846_v4 = vpop.f32.mrf.mxu1  ;;  %v4184_v23 = vadd.f32 %v4140_v3, %v4116_v2  ;;  %v3800_v9 = vsel %vm933_vm6, %v11769_v33, %v11429_v24  ;;  %v11771_v35 = vrot.slane %v9799_v22, 4 }
 0x506   : > { %v9854_v30 = vmul.f32 0.023647603, %v9846_v4  ;;  %v3988_v10 = vrot.slane %v9846_v4, 1  ;;  %v4186_v57 = vadd.f32 %v4144_v54, %v4118_v20  ;;  %v4185_v17 = vadd.f32 %v4142_v48, %v4117_v5 }
 0x507   : > { %4221 = vrot.lane.b32.xlu1 %v4184_v23, %s7966_s14  ;;  %v9860_v3 = vpop.f32.mrf.mxu1  ;;  %v3844_v28 = vadd.f32 %v3800_v9, %v9773_v46  ;;  %v9865_v61 = vmul.f32 0.030364122, %v9846_v4  ;;  %v3804_v48 = vsel %vm933_vm6, %v11430_v40, %v3803_v0  ;;  %v9885_v2 = vsel %vm923_vm4, %v11771_v35, %v3891_v44 }
 0x508   : > { %v4037_v59 = vadd.f32 %v9846_v4, %v3988_v10  ;;  %v9869_v32 = vmul.f32 0.023647603, %v9860_v3  ;;  %v3984_v62 = vrot.slane %v9860_v3, 1  ;;  %4223 = vrot.lane.b32.xlu0 %v4185_v17, %s7966_s14  ;;  %v4148_v20 = vrot.slane %v9860_v3, 4 }
 0x509   : > { %v9872_v25 = vpop.f32.mrf.mxu1  ;;  %v9877_v46 = vadd.f32 %v9783_v60, %v3844_v28  ;;  %v11772_v23 = vrot.slane %v9797_v58, 1  ;;  %v4152_v60 = vrot.slane %v9846_v4, 4  ;;  %v11773_v54 = vrot.slane %v9797_v58, 4 }
 0x50a   : > { %v9889_v52 = vmul.f32 0.023647603, %v9872_v25  ;;  %v3990_v0 = vrot.slane %v9872_v25, 1  ;;  %v4154_v15 = vrot.slane %v9872_v25, 4  ;;  %v3846_v40 = vadd.f32 %v3804_v48, %v3734_v36 }
 0x50b   : > { %11770 = vst [vmem:[#allocation19_spill] sm:$0xff] %v9877_v46  ;;  %v3985_v5 = vsel %vm938_vm7, %v11772_v23, %v3984_v62  ;;  %4225 = vrot.lane.b32.xlu1 %v4186_v57, %s7966_s14  ;;  %v9898_v9 = vpop.f32.mrf.mxu1  ;;  %v4149_v17 = vsel %vm923_vm4, %v11773_v54, %v4148_v20  ;;  %v4084_v23 = vrot.slane %v4037_v59, 2 }
 0x50c   : > { %v4024_v44 = vadd.f32 %v9797_v58, %v3985_v5  ;;  %v9905_v28 = vmul.f32 0.023647603, %v9898_v9  ;;  %v3986_v35 = vrot.slane %v9898_v9, 1  ;;  %v4150_v57 = vrot.slane %v9898_v9, 4 }
 0x50d   : > { %v9909_v33 = vpop.f32.mrf.mxu1  ;;  %v9913_v5 = vadd.f32 %v3690_v34, %v9765_v18  ;;  %v9917_v54 = vmul.f32 0.030364122, %v9898_v9 }
 0x50e   : > { %v4078_v24 = vrot.slane %v4024_v44, 2  ;;  %v3989_v21 = vsel %vm938_vm7, %v3986_v35, %v3988_v10  ;;  %v9921_v59 = vmul.f32 0.023647603, %v9909_v33  ;;  %v3987_v34 = vsel %vm938_vm7, %v3984_v62, %v3986_v35 }
 0x50f   : > { %v4026_v12 = vadd.f32 %v3989_v21, %v9898_v9  ;;  %v9925_v31 = vpop.f32.mrf.mxu1  ;;  %v3995_v48 = vrot.slane %v9909_v33, 1  ;;  %v4151_v10 = vsel %vm923_vm4, %v4148_v20, %v4150_v57  ;;  %v4025_v21 = vadd.f32 %v3987_v34, %v9860_v3 }
 0x510   : > { %v4079_v36 = vsel %vm933_vm6, %v4077_v38, %v4078_v24  ;;  %v3991_v19 = vrot.slane %v9925_v31, 1  ;;  %v4155_v11 = vrot.slane %v9925_v31, 4  ;;  %v9939_v38 = vmul.f32 0.023647603, %v9925_v31 }
 0x511   : > { %v4119_v14 = vadd.f32 %v4079_v36, %v9831_v47  ;;  %v9934_v7 = vpop.f32.mrf.mxu1  ;;  %v4082_v51 = vrot.slane %v4026_v12, 2  ;;  %v4153_v47 = vsel %vm923_vm4, %v4150_v57, %v4152_v60  ;;  %v4080_v39 = vrot.slane %v4025_v21, 2 }
 0x512   : > { %v3997_v62 = vrot.slane %v9934_v7, 1  ;;  %v9945_v20 = vmul.f32 0.023647603, %v9934_v7  ;;  %v3992_v63 = vsel %vm938_vm7, %v3990_v0, %v3991_v19 }
 0x513   : > { %v4187_v35 = vadd.f32 %v9826_v16, %v4119_v14  ;;  %v9947_v36 = vpop.f32.mrf.mxu1  ;;  %v4085_v34 = vsel %vm933_vm6, %v4082_v51, %v4084_v23  ;;  %v4156_v14 = vsel %vm923_vm4, %v4154_v15, %v4155_v11  ;;  %v4083_v16 = vsel %vm933_vm6, %v4080_v39, %v4082_v51 }
 0x514   : > { %v4038_v53 = vadd.f32 %v9934_v7, %v3997_v62  ;;  %v9953_v49 = vmul.f32 0.023647603, %v9947_v36  ;;  %v3993_v8 = vrot.slane %v9947_v36, 1  ;;  %v4081_v60 = vsel %vm933_vm6, %v4078_v24, %v4080_v39 }
 0x515   : > { %4227 = vrot.lane.b32.xlu0 %v4187_v35, %s7966_s14  ;;  %v4122_v57 = vadd.f32 %v4085_v34, %v4026_v12  ;;  %v4157_v23 = vrot.slane %v9947_v36, 4  ;;  %v4121_v37 = vadd.f32 %v4083_v16, %v4025_v21  ;;  %v4120_v6 = vadd.f32 %v4081_v60, %v4024_v44 }
 0x516   : > { %v3996_v0 = vsel %vm938_vm7, %v3993_v8, %v3995_v48  ;;  %v3994_v46 = vsel %vm938_vm7, %v3991_v19, %v3993_v8  ;;  %v4027_v39 = vadd.f32 %v9872_v25, %v3992_v63  ;;  %v3998_v12 = vsel %vm938_vm7, %v3995_v48, %v3997_v62 }
 0x517   : > { %v4029_v45 = vadd.f32 %v3996_v0, %v9947_v36  ;;  %v4190_v1 = vadd.f32 %v4153_v47, %v4122_v57  ;;  %v4028_v35 = vadd.f32 %v3994_v46, %v9925_v31  ;;  %v4158_v15 = vsel %vm923_vm4, %v4155_v11, %v4157_v23 }
 0x518   : > { %v4189_v13 = vadd.f32 %v4151_v10, %v4121_v37  ;;  %v4188_v51 = vadd.f32 %v4149_v17, %v4120_v6  ;;  %v4030_v21 = vadd.f32 %v9909_v33, %v3998_v12  ;;  %v4093_v44 = vrot.slane %v4038_v53, 2 }
 0x519   : > { %v4087_v24 = vrot.slane %v4028_v35, 2  ;;  %v4089_v34 = vrot.slane %v4029_v45, 2  ;;  %v4086_v19 = vrot.slane %v4027_v39, 2  ;;  %v4159_v8 = vrot.slane %v9909_v33, 4 }
 0x51a   : > { %4231 = vrot.lane.b32.xlu0 %v4189_v13, %s7966_s14  ;;  %4229 = vrot.lane.b32.xlu1 %v4188_v51, %s7966_s14  ;;  %v4161_v11 = vrot.slane %v9934_v7, 4  ;;  %v9974_v37 = vadd.f32 %v9885_v2, %v3846_v40  ;;  %v4091_v6 = vrot.slane %v4030_v21, 2  ;;  %v11774_v46 = vrot.slane %v9799_v22, 4 }
 0x51b   : > { %v4090_v63 = vsel %vm933_vm6, %v4087_v24, %v4089_v34  ;;  %v11775_v17 = vrot.slane %v9765_v18, 4  ;;  %v11776_v13 = vrot.slane %v9842_v50, 2  ;;  %v11777_v48 = vrot.slane %v9833_v56, 2 }
 0x51c   : > { %v4124_v62 = vadd.f32 %v4090_v63, %v4028_v35  ;;  %v4088_v47 = vsel %vm933_vm6, %v4086_v19, %v4087_v24  ;;  %v4162_v40 = vsel %vm923_vm4, %v4159_v8, %v4161_v11  ;;  %v4160_v2 = vsel %vm923_vm4, %v4157_v23, %v4159_v8 }
 0x51d   : > { %v3890_v53 = vsel %vm923_vm4, %v11775_v17, %v11774_v46  ;;  %v3802_v10 = vsel %vm933_vm6, %v11777_v48, %v11776_v13  ;;  %v4123_v16 = vadd.f32 %v4088_v47, %v4027_v39  ;;  %v4094_v22 = vsel %vm933_vm6, %v4091_v6, %v4093_v44 }
 0x51e   : > { %v4092_v18 = vsel %vm933_vm6, %v4089_v34, %v4091_v6  ;;  %v3845_v60 = vadd.f32 %v3802_v10, %v9913_v5  ;;  %4233 = vrot.lane.b32.xlu1 %v4190_v1, %s7966_s14  ;;  %v4192_v50 = vadd.f32 %v4158_v15, %v4124_v62  ;;  %v4126_v56 = vadd.f32 %v4094_v22, %v4030_v21 }
 0x51f   : > { %v4125_v57 = vadd.f32 %v4092_v18, %v4029_v45  ;;  %v3604_v0 = vmul.f32 0.011170336, %v9797_v58  ;;  %v4191_v35 = vadd.f32 %v4156_v14, %v4123_v16  ;;  %v11778_v12 = vrot.slane %v9804_v29, 1 }
 0x520   : > { %v9995_v51 = vadd.f32 %v3890_v53, %v3845_v60  ;;  %v11779_v23 = vrot.slane %v9788_v42, 1  ;;  %v11780_v24 = vrot.slane %v9869_v32, 1  ;;  %v4194_v15 = vadd.f32 %v4162_v40, %v4126_v56 }
 0x521   : > { %v11781_v5 = vmov %v11778_v12  ;;  %v4193_v34 = vadd.f32 %v4160_v2, %v4125_v57  ;;  %4235 = vrot.lane.b32.xlu0 %v4191_v35, %s7966_s14  ;;  %v3894_v14 = vrot.slane %v3604_v0, 4  ;;  %v3605_v42 = vmul.f32 0.011170336, %v9860_v3 }
 0x522   : > { %v3695_v39 = vsel %vm938_vm7, %v11779_v23, %v11778_v12  ;;  %v3697_v1 = vsel %vm938_vm7, %v11781_v5, %v11780_v24  ;;  %v3643_v44 = vmul.f32 0.030364122, %v9860_v3  ;;  %4237 = vrot.lane.b32.xlu1 %v4192_v50, %s7966_s14  ;;  %v3606_v19 = vmul.f32 0.011170336, %v9898_v9 }
 0x523   : > { %v3735_v45 = vadd.f32 %v3695_v39, %v9790_v41  ;;  %v3757_v58 = vadd.f32 %v3695_v39, %v9801_v43  ;;  %v3758_v21 = vadd.f32 %v3697_v1, %v9809_v26  ;;  %v11782_v8 = vrot.slane %v9905_v28, 1 }
 0x524   : > { %v11783_v11 = vmov %v11780_v24  ;;  %v11784_v63 = vrot.slane %v9854_v30, 1  ;;  %v11786_v46 = vrot.slane %v9790_v41, 4  ;;  %v3896_v53 = vrot.slane %v3605_v42, 4 }
 0x525   : > { %v3805_v29 = vrot.slane %v3757_v58, 2  ;;  %v3699_v43 = vsel %vm938_vm7, %v11783_v11, %v11782_v8  ;;  %v11785_v6 = vmov %v11782_v8  ;;  %v3806_v17 = vrot.slane %v3758_v21, 2  ;;  %4239 = vrot.lane.b32.xlu0 %v4193_v34, %s7966_s14 }
 0x526   : > { %v3701_v26 = vsel %vm938_vm7, %v11785_v6, %v11784_v63  ;;  %v3895_v3 = vsel %vm923_vm4, %v11786_v46, %v3894_v14  ;;  %v3737_v13 = vadd.f32 %v3699_v43, %v3605_v42  ;;  %v3759_v9 = vadd.f32 %v3699_v43, %v3643_v44  ;;  %4241 = vrot.lane.b32.xlu1 %v4194_v15, %s7966_s14  ;;  %s11815_s14 = sld [smem:[#allocation110_spill]] }
 0x527   : > { %v3760_v48 = vadd.f32 %v3701_v26, %v9917_v54  ;;  %v3898_v10 = vrot.slane %v3606_v19, 4  ;;  %v3736_v32 = vadd.f32 %v3697_v1, %v3604_v0  ;;  %v3807_v62 = vsel %vm933_vm6, %v3805_v29, %v3806_v17 }
 0x528   : > { %v3897_v28 = vsel %vm923_vm4, %v3894_v14, %v3896_v53  ;;  %v3653_v47 = vmul.f32 0.011170336, %v9846_v4  ;;  %v11787_v41 = vmov %v11784_v63  ;;  %v3847_v2 = vadd.f32 %v3807_v62, %v3735_v45 }
 0x529   : > { %v3761_v40 = vadd.f32 %v11787_v41, %v9865_v61  ;;  %v3808_v16 = vrot.slane %v3759_v9, 2  ;;  %v3810_v22 = vrot.slane %v3760_v48, 2  ;;  %v3899_v54 = vsel %vm923_vm4, %v3896_v53, %v3898_v10 }
 0x52a   : > { %v3900_v60 = vrot.slane %v3653_v47, 4  ;;  %v3738_v50 = vadd.f32 %v3701_v26, %v3606_v19  ;;  %v3608_v56 = vmul.f32 0.011170336, %v9925_v31  ;;  %v3648_v57 = vmul.f32 0.030364122, %v9947_v36 }
 0x52b   : > { %v3812_v18 = vrot.slane %v3761_v40, 2  ;;  %v10040_v0 = vadd.f32 %v3895_v3, %v3847_v2  ;;  %v3811_v4 = vsel %vm933_vm6, %v3808_v16, %v3810_v22  ;;  %v3809_v30 = vsel %vm933_vm6, %v3806_v17, %v3808_v16 }
 0x52c   : > { %v3849_v61 = vadd.f32 %v3811_v4, %v3737_v13  ;;  %v3848_v35 = vadd.f32 %v3809_v30, %v3736_v32  ;;  %v3901_v23 = vsel %vm923_vm4, %v3898_v10, %v3900_v60  ;;  %v3703_v24 = vrot.slane %v9939_v38, 1 }
 0x52d   : > { %v3813_v12 = vsel %vm933_vm6, %v3810_v22, %v3812_v18  ;;  %v3903_v5 = vrot.slane %v3608_v56, 4  ;;  %v3609_v1 = vmul.f32 0.011170336, %v9947_v36  ;;  %v3705_v45 = vrot.slane %v9953_v49, 1 }
 0x52e   : > { %v3850_v39 = vadd.f32 %v3813_v12, %v3738_v50  ;;  %v10048_v15 = vadd.f32 %v3899_v54, %v3849_v61  ;;  %v10050_v34 = vadd.f32 %v3897_v28, %v3848_v35  ;;  %v3607_v58 = vmul.f32 0.011170336, %v9872_v25  ;;  %v7767_v12 = vld [vmem:[%s11278_s6 + $0x8] sm:$0xff]  }
 0x52f   : > { %v3647_v21 = vmul.f32 0.030364122, %v9925_v31  ;;  %v3646_v42 = vmul.f32 0.030364122, %v9872_v25  ;;  %v11788_v44 = vrot.slane %v9889_v52, 1  ;;  %v3706_v36 = vsel %vm938_vm7, %v3703_v24, %v3705_v45  ;;  %7487 = vmatprep.subr.bf16.mxu0 %v7767_v12 }
 0x530   : > { %v10054_v14 = vadd.f32 %v3901_v23, %v3850_v39  ;;  %v11789_v29 = vrot.slane %v9921_v59, 1  ;;  %v3902_v49 = vrot.slane %v3607_v58, 4  ;;  %v3650_v11 = vmul.f32 0.030364122, %v9934_v7  ;;  %v7768_v23 = vld [vmem:[%s11278_s6] sm:$0xff]   ;;  %7488 = vmatpush3.bf16.msra.mxu0 %v7767_v12 }
 0x531   : > { %v3704_v38 = vsel %vm938_vm7, %v11788_v44, %v3703_v24  ;;  %v3763_v43 = vadd.f32 %v3706_v36, %v3647_v21  ;;  %v3905_v6 = vrot.slane %v3609_v1, 4  ;;  %v3610_v52 = vmul.f32 0.011170336, %v9909_v33  ;;  %7489 = vmatprep.subr.bf16.mxu0 %v7768_v23 }
 0x532   : > { %v3708_v19 = vsel %vm938_vm7, %v3705_v45, %v11789_v29  ;;  %v3739_v8 = vadd.f32 %v3704_v38, %v3607_v58  ;;  %v3762_v31 = vadd.f32 %v3704_v38, %v3646_v42  ;;  %v3904_v25 = vsel %vm923_vm4, %v3902_v49, %v3903_v5  ;;  %v11791_v42 = vld [vmem:[#allocation60_spill] sm:$0xff]  ;;  %v11792_v38 = vld [vmem:[#allocation41_spill] sm:$0xff]  ;;  %v11794_v49 = vld [vmem:[#allocation19_spill] sm:$0xff] }
 0x533   : > { %v3764_v63 = vadd.f32 %v3708_v19, %v3648_v57  ;;  %v3815_v26 = vrot.slane %v3763_v43, 2  ;;  %v3654_v3 = vmul.f32 0.011170336, %v9934_v7  ;;  %v3709_v17 = vrot.slane %v9945_v20, 1 }
 0x534   : > { %v3740_v53 = vadd.f32 %v3706_v36, %v3608_v56  ;;  %v3814_v13 = vrot.slane %v3762_v31, 2  ;;  %v3649_v9 = vmul.f32 0.030364122, %v9909_v33  ;;  %v3907_v48 = vrot.slane %v3610_v52, 4  ;;  %7490 = vmatpush3.bf16.msra.mxu0 %v7768_v23 }
 0x535   : > { %v3817_v46 = vrot.slane %v3764_v63, 2  ;;  %v11790_v32 = vmov %v11789_v29  ;;  %v3766_v28 = vadd.f32 %v3709_v17, %v3650_v11  ;;  %v3909_v47 = vrot.slane %v3654_v3, 4 }
 0x536   : > { %v3710_v62 = vsel %vm938_vm7, %v11790_v32, %v3709_v17  ;;  %v3816_v40 = vsel %vm933_vm6, %v3814_v13, %v3815_v26  ;;  %v3906_v20 = vsel %vm923_vm4, %v3903_v5, %v3905_v6  ;;  %v3741_v50 = vadd.f32 %v3708_v19, %v3609_v1  ;;  %v11793_v19 = vld [vmem:[#allocation45_spill] sm:$0xff] }
 0x537   : > { %v3818_v10 = vsel %vm933_vm6, %v3815_v26, %v3817_v46  ;;  %v3742_v2 = vadd.f32 %v3710_v62, %v3610_v52  ;;  %v3765_v7 = vadd.f32 %v3710_v62, %v3649_v9  ;;  %v3851_v16 = vadd.f32 %v3816_v40, %v3739_v8 }
 0x538   : > { %v3852_v41 = vadd.f32 %v3818_v10, %v3740_v53  ;;  %v3821_v22 = vrot.slane %v3766_v28, 2  ;;  %v3910_v33 = vsel %vm923_vm4, %v3907_v48, %v3909_v47  ;;  %v3908_v30 = vsel %vm923_vm4, %v3905_v6, %v3907_v48 }
 0x539   : > { %v3819_v18 = vrot.slane %v3765_v7, 2  ;;  %v3939_v60 = vadd.f32 %v3904_v25, %v3851_v16 }
 0x53a   : > { %v3940_v54 = vadd.f32 %v3906_v20, %v3852_v41 }
 0x53b   : > { %v3822_v59 = vsel %vm933_vm6, %v3819_v18, %v3821_v22  ;;  %v3820_v56 = vsel %vm933_vm6, %v3817_v46, %v3819_v18  ;;  %v11446_v18 = vmov 0.0  }
 0x53c   : > { %v3854_v57 = vadd.f32 %v3822_v59, %v3742_v2  ;;  %v3853_v4 = vadd.f32 %v3820_v56, %v3741_v50  ;;  %7507 = vmatprep.subr.bf16.mxu0 %v11446_v18  ;;  %7515 = vmatprep.subr.bf16.mxu1 %v11446_v18 }
 0x53d   : > { %7519 = vmatprep.mubr.msk.bf16.mxu1 %vm7969_vm9, %v11446_v18 }
 0x53e   : > { %v3942_v61 = vadd.f32 %v3910_v33, %v3854_v57  ;;  %v3941_v35 = vadd.f32 %v3908_v30, %v3853_v4  ;;  %v7769_v30 = vld [vmem:[%s11279_s7] sm:$0xff]  }
 0x53f   : > { %v4212_v24 = vpop.permute.xlu0 %4211 }
 0x540   : > { %v4214_v39 = vpop.permute.xlu1 %4213  ;;  %v10091_v1 = vadd.f32 %v4212_v24, %v9691_v55 }
 0x541   : > { %v10088_v5 = vadd.f32 %v4214_v39, %v9684_v27 }
 0x543   : > { %v4395_v45 = vpack.c.bf16 %v10088_v5, %v10091_v1 }
 0x545   : > { %4415 = vrot.lane.b32.xlu0 %v4395_v45, %s7967_s1 }
 0x559   : > { %v4218_v58 = vpop.permute.xlu1 %4217 }
 0x55a   : > { %v4216_v21 = vpop.permute.xlu0 %4215  ;;  %v10097_v44 = vadd.f32 %v4218_v58, %v11791_v42 }
 0x55b   : > { %v10100_v36 = vadd.f32 %v4216_v21, %v11792_v38 }
 0x55d   : > { %v4396_v27 = vpack.c.bf16 %v10097_v44, %v10100_v36 }
 0x55e   : > { %v4220_v55 = vpop.permute.xlu0 %4219 }
 0x55f   : > { %4417 = vrot.lane.b32.xlu1 %v4396_v27, %s7967_s1  ;;  %v10106_v8 = vadd.f32 %v4220_v55, %v11793_v19 }
 0x579   : > { %v4222_v29 = vpop.permute.xlu1 %4221 }
 0x57a   : > { %v10109_v11 = vadd.f32 %v4222_v29, %v11794_v49  ;;  %v4224_v43 = vpop.permute.xlu0 %4223 }
 0x57b   : > { %v10114_v6 = vadd.f32 %v4224_v43, %v9995_v51 }
 0x57c   : > { %v4397_v63 = vpack.c.bf16 %v10109_v11, %v10106_v8 }
 0x57d   : > { %v4226_v31 = vpop.permute.xlu1 %4225 }
 0x57e   : > { %v10117_v25 = vadd.f32 %v4226_v31, %v9974_v37  ;;  %4419 = vrot.lane.b32.xlu0 %v4397_v63, %s7967_s1  ;;  %v7770_v31 = vld [vmem:[%s11280_s8] sm:$0xff]  }
 0x580   : > { %v4398_v52 = vpack.c.bf16 %v10117_v25, %v10114_v6 }
 0x582   : > { %4421 = vrot.lane.b32.xlu1 %v4398_v52, %s7967_s1 }
 0x587   : > { %v4228_v26 = vpop.permute.xlu0 %4227 }
 0x588   : > { %v10124_v3 = vadd.f32 %v4228_v26, %v10040_v0 }
 0x58c   : > { %v4230_v46 = vpop.permute.xlu1 %4229  ;;  %v4232_v51 = vpop.permute.xlu0 %4231 }
 0x58d   : > { %v10127_v17 = vadd.f32 %v4230_v46, %v10050_v34  ;;  %v10132_v13 = vadd.f32 %v4232_v51, %v10048_v15 }
 0x58f   : > { %v4399_v37 = vpack.c.bf16 %v10127_v17, %v10124_v3 }
 0x590   : > { %v4234_v53 = vpop.permute.xlu1 %4233 }
 0x591   : > { %v10135_v9 = vadd.f32 %v4234_v53, %v10054_v14  ;;  %4423 = vrot.lane.b32.xlu0 %v4399_v37, %s7967_s1 }
 0x593   : > { %v4400_v0 = vpack.c.bf16 %v10135_v9, %v10132_v13  ;;  %v4236_v48 = vpop.permute.xlu0 %4235 }
 0x594   : > { %v4238_v10 = vpop.permute.xlu1 %4237  ;;  %v10140_v34 = vadd.f32 %v4236_v48, %v3939_v60 }
 0x595   : > { %v10142_v32 = vadd.f32 %v4238_v10, %v3940_v54  ;;  %4425 = vrot.lane.b32.xlu1 %v4400_v0, %s7967_s1 }
 0x597   : > { %v4401_v15 = vpack.c.bf16 %v10142_v32, %v10140_v34  ;;  %v4240_v62 = vpop.permute.xlu0 %4239 }
 0x598   : > { %v4242_v28 = vpop.permute.xlu1 %4241  ;;  %v10147_v14 = vadd.f32 %v4240_v62, %v3941_v35 }
 0x599   : > { %v10149_v47 = vadd.f32 %v4242_v28, %v3942_v61  ;;  %4427 = vrot.lane.b32.xlu0 %v4401_v15, %s7967_s1 }
 0x59a   : > { %11795 = vst [vmem:[#allocation44_spill] sm:$0xff] %v10147_v14 }
 0x59b   : > { %11796 = vst [vmem:[#allocation60_spill] sm:$0xff] %v10149_v47  ;;  %v4402_v41 = vpack.c.bf16 %v10149_v47, %v10147_v14 }
 0x59d   : > { %4429 = vrot.lane.b32.xlu1 %v4402_v41, %s7967_s1 }
 0x5b7   : > { %v4416_v40 = vpop.permute.xlu0 %4415 }
 0x5b8   : > { %7491 = vmatprep.mubr.msk.bf16.mxu0 %vm3451_vm8, %v4416_v40 }
 0x5d1   : > { %v4418_v2 = vpop.permute.xlu1 %4417 }
 0x5d2   : > { %7492 = vmatmul.mubr.msk.bf16.vlgmr.msra.gmra.mxu0 %vm3451_vm8, %v4418_v2 }
 0x5f0   : > { %v4420_v7 = vpop.permute.xlu0 %4419 }
 0x5f1   : > { %7495 = vmatprep.mubr.msk.bf16.mxu0 %vm3451_vm8, %v4420_v7 }
 0x5f4   : > { %v4422_v20 = vpop.permute.xlu1 %4421 }
 0x5f5   : > { %7496 = vmatmul.mubr.msk.bf16.gmra.mxu0 %vm3451_vm8, %v4422_v20 }
 0x603   : > { %v4424_v16 = vpop.permute.xlu0 %4423 }
 0x604   : > { %7499 = vmatprep.mubr.msk.bf16.mxu0 %vm3451_vm8, %v4424_v16 }
 0x607   : > { %v4426_v22 = vpop.permute.xlu1 %4425 }
 0x608   : > { %7500 = vmatmul.mubr.msk.bf16.gmra.mxu0 %vm3451_vm8, %v4426_v22 }
 0x60b   : > { %v4428_v33 = vpop.permute.xlu0 %4427 }
 0x60c   : > { %7503 = vmatprep.mubr.msk.bf16.mxu0 %vm3451_vm8, %v4428_v33 }
 0x60f   : > { %v4430_v54 = vpop.permute.xlu1 %4429 }
 0x610   : > { %7504 = vmatmul.mubr.msk.bf16.gmra.mxu0 %vm3451_vm8, %v4430_v54 }
 0x611   : > { %7511 = vmatprep.mubr.msk.bf16.mxu0 %vm7969_vm9, %v11446_v18 }
 0x692   : > { %v7493_v60 = vpop.f32.mrf.mxu0 }
 0x694   : > { %v4501_v50 = vpop.f32.mrf.mxu0 }
 0x696   : > { %v7494_v59 = vpop.f32.mrf.mxu0 }
 0x697   : > { %v4567_v56 = vpack.c.bf16 %v7494_v59, %v7493_v60 }
 0x698   : > { %v4504_v57 = vpop.f32.mrf.mxu0 }
 0x699   : > { %7508 = vmatpush3.bf16.msra.mxu0 %v4567_v56  ;;  %v4566_v4 = vpack.c.bf16 %v4504_v57, %v4501_v50 }
 0x69a   : > { %7509 = vmatprep.subr.bf16.mxu0 %v11446_v18 }
 0x69d   : > { %7510 = vmatpush3.bf16.msra.mxu0 %v4566_v4 }
 0x69e   : > { %7523 = vmatprep.subr.bf16.mxu0 %v11446_v18 }
 0x6a0   : > { %7512 = vmatmul.mubr.msk.bf16.vlgmr.msra.gmra.mxu0 %vm3451_vm8, %v7769_v30 }
 0x6a1   : > { %7527 = vmatprep.mubr.msk.bf16.mxu0 %vm7969_vm9, %v11446_v18 }
 0x6b5   : > { %v7497_v61 = vpop.f32.mrf.mxu0 }
 0x6b7   : > { %v4517_v35 = vpop.f32.mrf.mxu0 }
 0x6b9   : > { %v7498_v12 = vpop.f32.mrf.mxu0 }
 0x6ba   : > { %v4569_v23 = vpack.c.bf16 %v7498_v12, %v7497_v61 }
 0x6bb   : > { %v4520_v39 = vpop.f32.mrf.mxu0 }
 0x6bc   : > { %7516 = vmatpush3.bf16.msra.mxu1 %v4569_v23  ;;  %v4568_v24 = vpack.c.bf16 %v4520_v39, %v4517_v35 }
 0x6bd   : > { %7517 = vmatprep.subr.bf16.mxu1 %v11446_v18 }
 0x6c0   : > { %7518 = vmatpush3.bf16.msra.mxu1 %v4568_v24 }
 0x6c1   : > { %7531 = vmatprep.subr.bf16.mxu1 %v11446_v18 }
 0x6c3   : > { %7520 = vmatmul.mubr.msk.bf16.vlgmr.msra.gmra.mxu1 %vm3451_vm8, %v7769_v30 }
 0x6c4   : > { %7535 = vmatprep.mubr.msk.bf16.mxu1 %vm7969_vm9, %v11446_v18 }
 0x6c8   : > { %v7501_v45 = vpop.f32.mrf.mxu0 }
 0x6ca   : > { %v4533_v58 = vpop.f32.mrf.mxu0 }
 0x6cc   : > { %v7502_v21 = vpop.f32.mrf.mxu0 }
 0x6cd   : > { %v4571_v42 = vpack.c.bf16 %v7502_v21, %v7501_v45 }
 0x6ce   : > { %v4536_v38 = vpop.f32.mrf.mxu0 }
 0x6cf   : > { %7524 = vmatpush3.bf16.msra.mxu0 %v4571_v42  ;;  %v4570_v55 = vpack.c.bf16 %v4536_v38, %v4533_v58 }
 0x6d0   : > { %v7505_v27 = vpop.f32.mrf.mxu0  ;;  %7525 = vmatprep.subr.bf16.mxu0 %v11446_v18 }
 0x6d2   : > { %v4549_v29 = vpop.f32.mrf.mxu0 }
 0x6d3   : > { %7526 = vmatpush3.bf16.msra.mxu0 %v4570_v55 }
 0x6d4   : > { %v7506_v19 = vpop.f32.mrf.mxu0  ;;  %7539 = vmatprep.subr.bf16.mxu0 %v7770_v31 }
 0x6d5   : > { %v4573_v49 = vpack.c.bf16 %v7506_v19, %v7505_v27 }
 0x6d6   : > { %v4552_v43 = vpop.f32.mrf.mxu0  ;;  %7528 = vmatmul.mubr.msk.bf16.vlgmr.msra.gmra.mxu0 %vm3451_vm8, %v7769_v30 }
 0x6d7   : > { %7532 = vmatpush3.bf16.msra.mxu1 %v4573_v49  ;;  %v4572_v63 = vpack.c.bf16 %v4552_v43, %v4549_v29  ;;  %7540 = vmatpush3.bf16.msra.mxu0 %v7770_v31 }
 0x6d8   : > { %7533 = vmatprep.subr.bf16.mxu1 %v11446_v18  ;;  %7569 = vmatprep.subr.bf16.mxu0 %v11446_v18 }
 0x6db   : > { %7534 = vmatpush3.bf16.msra.mxu1 %v4572_v63 }
 0x6de   : > { %7536 = vmatmul.mubr.msk.bf16.vlgmr.msra.gmra.mxu1 %vm3451_vm8, %v7769_v30 }
 0x760   : > { %v10190_v52 = vpop.f32.mrf.mxu0 }
 0x761   : > { %11797 = vst [vmem:[#allocation41_spill] sm:$0xff] %v10190_v52  ;;  %v4750_v26 = vrot.slane %v10190_v52, 7  ;;  %v4762_v46 = vrot.slane %v10190_v52, 6 }
 0x762   : > { %v7513_v51 = vpop.f32.mrf.mxu0 }
 0x763   : > { %v4826_v37 = vsel %vm905_vm1, %v10190_v52, %v4750_v26 }
 0x764   : > { %v10196_v53 = vpop.f32.mrf.mxu0  ;;  %v4830_v0 = vsel %vm768_vm0, %v4826_v37, %v4762_v46 }
 0x765   : > { %11798 = vst [vmem:[#allocation45_spill] sm:$0xff] %v10196_v53  ;;  %v4763_v48 = vrot.slane %v10196_v53, 6  ;;  %v4786_v28 = vrot.slane %v10196_v53, 5  ;;  %v4794_v41 = vrot.slane %v10196_v53, 4  ;;  %v4802_v2 = vrot.slane %v10196_v53, 3 }
 0x766   : > { %v7514_v10 = vpop.f32.mrf.mxu0  ;;  %v4810_v20 = vrot.slane %v10196_v53, 2  ;;  %v4818_v22 = vrot.slane %v10196_v53, 1 }
 0x767   : > { %v4764_v15 = vsel %vm768_vm0, %v4762_v46, %v4763_v48  ;;  %v4834_v40 = vsel %vm768_vm0, %v4763_v48, %v4786_v28 }
 0x768   : > { %v4858_v62 = vpack.c.bf16 %v4764_v15, %v4830_v0  ;;  %v4838_v7 = vsel %vm918_vm3, %v4834_v40, %v4794_v41 }
 0x769   : > { %v4842_v16 = vsel %vm923_vm4, %v4838_v7, %v4802_v2 }
 0x76a   : > { %7541 = vmatprep.mubr.msk.bf16.mxu0 %vm4872_vm10, %v4858_v62  ;;  %v4846_v33 = vsel %vm928_vm5, %v4842_v16, %v4810_v20 }
 0x76b   : > { %v4850_v54 = vsel %vm933_vm6, %v4846_v33, %v4818_v22 }
 0x76c   : > { %v4854_v56 = vsel %vm938_vm7, %v4850_v54, %v10196_v53 }
 0x783   : > { %v10212_v60 = vpop.f32.mrf.mxu1 }
 0x784   : > { %11799 = vst [vmem:[#allocation19_spill] sm:$0xff] %v10212_v60  ;;  %v4751_v50 = vrot.slane %v10212_v60, 7  ;;  %v4765_v59 = vrot.slane %v10212_v60, 6 }
 0x785   : > { %v7521_v57 = vpop.f32.mrf.mxu1 }
 0x786   : > { %v4827_v4 = vsel %vm905_vm1, %v10212_v60, %v4751_v50 }
 0x787   : > { %v4831_v30 = vsel %vm768_vm0, %v4827_v4, %v4765_v59  ;;  %v10221_v61 = vpop.f32.mrf.mxu1 }
 0x788   : > { %11800 = vst [vmem:[#allocation72_spill] sm:$0xff] %v10221_v61  ;;  %v4859_v35 = vpack.c.bf16 %v4831_v30, %v4854_v56  ;;  %v4787_v12 = vrot.slane %v10221_v61, 5  ;;  %v4795_v23 = vrot.slane %v10221_v61, 4  ;;  %v4766_v39 = vrot.slane %v10221_v61, 6 }
 0x789   : > { %v7522_v24 = vpop.f32.mrf.mxu1  ;;  %v4803_v45 = vrot.slane %v10221_v61, 3  ;;  %v4811_v58 = vrot.slane %v10221_v61, 2  ;;  %v4819_v21 = vrot.slane %v10221_v61, 1 }
 0x78a   : > { %7542 = vmatmul.mubr.msk.bf16.vlgmr.msra.gmra.mxu0 %vm4872_vm10, %v4859_v35  ;;  %v4835_v42 = vsel %vm768_vm0, %v4766_v39, %v4787_v12  ;;  %v4767_v55 = vsel %vm768_vm0, %v4765_v59, %v4766_v39 }
 0x78b   : > { %v4839_v38 = vsel %vm918_vm3, %v4835_v42, %v4795_v23 }
 0x78c   : > { %v4843_v27 = vsel %vm923_vm4, %v4839_v38, %v4803_v45 }
 0x78d   : > { %v4847_v29 = vsel %vm928_vm5, %v4843_v27, %v4811_v58 }
 0x78e   : > { %v4851_v19 = vsel %vm933_vm6, %v4847_v29, %v4819_v21 }
 0x78f   : > { %v4855_v49 = vsel %vm938_vm7, %v4851_v19, %v10221_v61 }
 0x790   : > { %v4860_v43 = vpack.c.bf16 %v4855_v49, %v4767_v55 }
 0x792   : > { %7545 = vmatprep.mubr.msk.bf16.mxu0 %vm4872_vm10, %v4860_v43 }
 0x796   : > { %v10239_v63 = vpop.f32.mrf.mxu0 }
 0x797   : > { %11801 = vst [vmem:[#allocation73_spill] sm:$0xff] %v10239_v63  ;;  %v4752_v31 = vrot.slane %v10239_v63, 7  ;;  %v4768_v26 = vrot.slane %v10239_v63, 6 }
 0x798   : > { %v7529_v46 = vpop.f32.mrf.mxu0 }
 0x799   : > { %v4828_v51 = vsel %vm905_vm1, %v10239_v63, %v4752_v31 }
 0x79a   : > { %v4832_v37 = vsel %vm768_vm0, %v4828_v51, %v4768_v26  ;;  %v10246_v0 = vpop.f32.mrf.mxu0 }
 0x79b   : > { %11802 = vst [vmem:[#allocation74_spill] sm:$0xff] %v10246_v0  ;;  %v4788_v48 = vrot.slane %v10246_v0, 5  ;;  %v4796_v10 = vrot.slane %v10246_v0, 4  ;;  %v4769_v15 = vrot.slane %v10246_v0, 6  ;;  %v4804_v62 = vrot.slane %v10246_v0, 3 }
 0x79c   : > { %v7530_v28 = vpop.f32.mrf.mxu0  ;;  %v4812_v20 = vrot.slane %v10246_v0, 2  ;;  %v4820_v54 = vrot.slane %v10246_v0, 1 }
 0x79d   : > { %v4770_v41 = vsel %vm768_vm0, %v4768_v26, %v4769_v15  ;;  %v4836_v40 = vsel %vm768_vm0, %v4769_v15, %v4788_v48 }
 0x79e   : > { %v10254_v2 = vpop.f32.mrf.mxu1  ;;  %v4861_v7 = vpack.c.bf16 %v4770_v41, %v4832_v37  ;;  %v4840_v16 = vsel %vm918_vm3, %v4836_v40, %v4796_v10 }
 0x79f   : > { %11803 = vst [vmem:[#allocation75_spill] sm:$0xff] %v10254_v2  ;;  %v4753_v22 = vrot.slane %v10254_v2, 7  ;;  %v4771_v33 = vrot.slane %v10254_v2, 6  ;;  %v4844_v50 = vsel %vm923_vm4, %v4840_v16, %v4804_v62 }
 0x7a0   : > { %v7537_v59 = vpop.f32.mrf.mxu1  ;;  %7546 = vmatmul.mubr.msk.bf16.gmra.mxu0 %vm4872_vm10, %v4861_v7  ;;  %v4848_v56 = vsel %vm928_vm5, %v4844_v50, %v4812_v20 }
 0x7a1   : > { %v4829_v57 = vsel %vm905_vm1, %v10254_v2, %v4753_v22  ;;  %v4852_v4 = vsel %vm933_vm6, %v4848_v56, %v4820_v54 }
 0x7a2   : > { %v4833_v30 = vsel %vm768_vm0, %v4829_v57, %v4771_v33  ;;  %v10268_v35 = vpop.f32.mrf.mxu1  ;;  %v4856_v12 = vsel %vm938_vm7, %v4852_v4, %v10246_v0 }
 0x7a3   : > { %11804 = vst [vmem:[#allocation76_spill] sm:$0xff] %v10268_v35  ;;  %v4789_v23 = vrot.slane %v10268_v35, 5  ;;  %v4797_v39 = vrot.slane %v10268_v35, 4  ;;  %v4862_v24 = vpack.c.bf16 %v4833_v30, %v4856_v12  ;;  %v4772_v45 = vrot.slane %v10268_v35, 6 }
 0x7a4   : > { %v7538_v58 = vpop.f32.mrf.mxu1  ;;  %v4805_v21 = vrot.slane %v10268_v35, 3  ;;  %v4813_v38 = vrot.slane %v10268_v35, 2  ;;  %v4821_v55 = vrot.slane %v10268_v35, 1 }
 0x7a5   : > { %7549 = vmatprep.mubr.msk.bf16.mxu0 %vm4872_vm10, %v4862_v24  ;;  %v4837_v42 = vsel %vm768_vm0, %v4772_v45, %v4789_v23  ;;  %v4773_v43 = vsel %vm768_vm0, %v4771_v33, %v4772_v45 }
 0x7a6   : > { %v4841_v27 = vsel %vm918_vm3, %v4837_v42, %v4797_v39 }
 0x7a7   : > { %v4845_v29 = vsel %vm923_vm4, %v4841_v27, %v4805_v21 }
 0x7a8   : > { %v4849_v19 = vsel %vm928_vm5, %v4845_v29, %v4813_v38 }
 0x7a9   : > { %v4853_v49 = vsel %vm933_vm6, %v4849_v19, %v4821_v55 }
 0x7aa   : > { %v4857_v31 = vsel %vm938_vm7, %v4853_v49, %v10268_v35 }
 0x7ab   : > { %v4863_v26 = vpack.c.bf16 %v4857_v31, %v4773_v43 }
 0x7ad   : > { %7550 = vmatmul.mubr.msk.bf16.gmra.mxu0 %vm4872_vm10, %v4863_v26 }
 0x7ae   : > { %7571 = vmatprep.mubr.msk.bf16.mxu0 %vm7969_vm9, %v11446_v18 }
 0x84a   : > { %v7543_v46 = vpop.f32.mrf.mxu0 }
 0x84b   : > { %v4982_v37 = vmul.f32 0.023647603, %v7543_v46  ;;  %v5183_v48 = vrot.slane %v7543_v46, 1  ;;  %v5004_v15 = vmul.f32 0.011170336, %v7543_v46  ;;  %v5275_v20 = vrot.slane %v7543_v46, 4 }
 0x84c   : > { %v4925_v51 = vpop.f32.mrf.mxu0  ;;  %v4994_v40 = vmul.f32 0.030364122, %v7543_v46 }
 0x84d   : > { %v4980_v62 = vmul.f32 0.023647603, %v4925_v51  ;;  %v5180_v28 = vrot.slane %v4925_v51, 1  ;;  %v4972_v41 = vmul.f32 0.011170336, %v4925_v51  ;;  %v5220_v16 = vadd.f32 %v7543_v46, %v5183_v48 }
 0x84e   : > { %v10290_v10 = vpop.f32.mrf.mxu0  ;;  %v5023_v54 = vrot.slane %v4982_v37, 1  ;;  %v5272_v50 = vrot.slane %v4925_v51, 4  ;;  %v5135_v59 = vrot.slane %v5004_v15, 4  ;;  %v4992_v57 = vmul.f32 0.030364122, %v4925_v51 }
 0x84f   : > { %v5020_v4 = vrot.slane %v4980_v62, 1  ;;  %v5132_v23 = vrot.slane %v4972_v41, 4  ;;  %v5239_v21 = vrot.slane %v5220_v16, 2 }
 0x850   : > { %v4928_v7 = vpop.f32.mrf.mxu0  ;;  %v5062_v38 = vadd.f32 %v5023_v54, %v4994_v40 }
 0x851   : > { %v4981_v22 = vmul.f32 0.023647603, %v4928_v7  ;;  %v5181_v33 = vrot.slane %v4928_v7, 1  ;;  %v4973_v56 = vmul.f32 0.011170336, %v4928_v7  ;;  %v5273_v42 = vrot.slane %v4928_v7, 4 }
 0x852   : > { %v4993_v27 = vmul.f32 0.030364122, %v4928_v7  ;;  %v5087_v40 = vrot.slane %v5062_v38, 2 }
 0x853   : > { %v5184_v30 = vsel %vm938_vm7, %v5181_v33, %v5183_v48  ;;  %v5182_v12 = vsel %vm938_vm7, %v5180_v28, %v5181_v33  ;;  %v5021_v45 = vrot.slane %v4981_v22, 1  ;;  %v5133_v58 = vrot.slane %v4973_v56, 4 }
 0x854   : > { %v5209_v39 = vadd.f32 %v5184_v30, %v4928_v7  ;;  %v5208_v24 = vadd.f32 %v5182_v12, %v4925_v51  ;;  %v5276_v16 = vsel %vm923_vm4, %v5273_v42, %v5275_v20  ;;  %v5274_v22 = vsel %vm923_vm4, %v5272_v50, %v5273_v42 }
 0x855   : > { %v5024_v19 = vsel %vm938_vm7, %v5021_v45, %v5023_v54  ;;  %v5136_v49 = vsel %vm923_vm4, %v5133_v58, %v5135_v59  ;;  %v5022_v26 = vsel %vm938_vm7, %v5020_v4, %v5021_v45  ;;  %v5134_v46 = vsel %vm923_vm4, %v5132_v23, %v5133_v58 }
 0x856   : > { %v5237_v55 = vrot.slane %v5209_v39, 2  ;;  %v5236_v29 = vrot.slane %v5208_v24, 2  ;;  %v5049_v43 = vadd.f32 %v5024_v19, %v4973_v56  ;;  %v5061_v31 = vadd.f32 %v5024_v19, %v4993_v27 }
 0x857   : > { %v5048_v48 = vadd.f32 %v5022_v26, %v4972_v41  ;;  %v5060_v15 = vadd.f32 %v5022_v26, %v4992_v57  ;;  %v4983_v57 = vmul.f32 0.023647603, %v10290_v10  ;;  %v4974_v20 = vmul.f32 0.011170336, %v10290_v10 }
 0x858   : > { %v5240_v51 = vsel %vm933_vm6, %v5237_v55, %v5239_v21  ;;  %v5238_v37 = vsel %vm933_vm6, %v5236_v29, %v5237_v55  ;;  %v5085_v7 = vrot.slane %v5061_v31, 2  ;;  %v5277_v45 = vrot.slane %v10290_v10, 4 }
 0x859   : > { %v5265_v62 = vadd.f32 %v5240_v51, %v5209_v39  ;;  %v5264_v28 = vadd.f32 %v5238_v37, %v5208_v24  ;;  %v5084_v33 = vrot.slane %v5060_v15, 2  ;;  %v5185_v39 = vrot.slane %v10290_v10, 1 }
 0x85a   : > { %v5088_v56 = vsel %vm933_vm6, %v5085_v7, %v5087_v40  ;;  %v5025_v21 = vrot.slane %v4983_v57, 1  ;;  %v4995_v27 = vmul.f32 0.030364122, %v10290_v10  ;;  %v5137_v55 = vrot.slane %v4974_v20, 4 }
 0x85b   : > { %v5301_v54 = vadd.f32 %v5276_v16, %v5265_v62  ;;  %v5300_v59 = vadd.f32 %v5274_v22, %v5264_v28  ;;  %v5113_v4 = vadd.f32 %v5088_v56, %v5049_v43  ;;  %v5086_v30 = vsel %vm933_vm6, %v5084_v33, %v5085_v7 }
 0x85c   : > { %v5112_v41 = vadd.f32 %v5086_v30, %v5048_v48 }
 0x85d   : > { %5318 = vrot.lane.b32.xlu1 %v5301_v54, %s7970_s26  ;;  %5316 = vrot.lane.b32.xlu0 %v5300_v59, %s7970_s26  ;;  %v10307_v12 = vadd.f32 %v5136_v49, %v5113_v4 }
 0x85e   : > { %v10310_v50 = vadd.f32 %v5134_v46, %v5112_v41 }
 0x860   : > { %v7547_v23 = vpop.f32.mrf.mxu0 }
 0x861   : > { %v10313_v24 = vmul.f32 0.023647603, %v7547_v23  ;;  %v10316_v58 = vmul.f32 0.011170336, %v7547_v23  ;;  %v5190_v42 = vrot.slane %v7547_v23, 1  ;;  %v5282_v46 = vrot.slane %v7547_v23, 4 }
 0x862   : > { %v4941_v38 = vpop.f32.mrf.mxu0  ;;  %v10319_v43 = vmul.f32 0.030364122, %v7547_v23 }
 0x863   : > { %v4984_v29 = vmul.f32 0.023647603, %v4941_v38  ;;  %v5186_v19 = vrot.slane %v4941_v38, 1  ;;  %v5278_v49 = vrot.slane %v4941_v38, 4  ;;  %v4975_v51 = vmul.f32 0.011170336, %v4941_v38 }
 0x864   : > { %v10322_v26 = vpop.f32.mrf.mxu0  ;;  %v4996_v37 = vmul.f32 0.030364122, %v4941_v38 }
 0x865   : > { %v10325_v48 = vmul.f32 0.023647603, %v10322_v26  ;;  %v11451_v15 = vrot.slane %v10322_v26, 1  ;;  %v5187_v62 = vsel %vm938_vm7, %v5185_v39, %v5186_v19  ;;  %v5279_v16 = vsel %vm923_vm4, %v5277_v45, %v5278_v49 }
 0x866   : > { %v4944_v40 = vpop.f32.mrf.mxu0  ;;  %v5210_v7 = vadd.f32 %v10290_v10, %v5187_v62  ;;  %v5283_v22 = vrot.slane %v10322_v26, 4  ;;  %v5026_v33 = vrot.slane %v4984_v29, 1  ;;  %v5138_v4 = vrot.slane %v4975_v51, 4 }
 0x867   : > { %v4985_v54 = vmul.f32 0.023647603, %v4944_v40  ;;  %v5188_v59 = vrot.slane %v4944_v40, 1  ;;  %v5280_v56 = vrot.slane %v4944_v40, 4  ;;  %v4997_v30 = vmul.f32 0.030364122, %v4944_v40 }
 0x868   : > { %v5241_v41 = vrot.slane %v5210_v7, 2  ;;  %v5192_v57 = vsel %vm938_vm7, %v5190_v42, %v11451_v15  ;;  %v5005_v39 = vmul.f32 0.011170336, %v4944_v40  ;;  %v10342_v45 = vsel %vm923_vm4, %v5282_v46, %v5283_v22 }
 0x869   : > { %v5221_v18 = vadd.f32 %v5188_v59, %v4944_v40  ;;  %v5189_v28 = vsel %vm938_vm7, %v5186_v19, %v5188_v59  ;;  %v10337_v10 = vadd.f32 %v7547_v23, %v5192_v57  ;;  %v5028_v62 = vrot.slane %v4985_v54, 1 }
 0x86a   : > { %v5211_v29 = vadd.f32 %v5189_v28, %v4941_v38  ;;  %v5140_v31 = vrot.slane %v5005_v39, 4  ;;  %v5027_v35 = vsel %vm938_vm7, %v5025_v21, %v5026_v33  ;;  %v5281_v2 = vsel %vm923_vm4, %v5278_v49, %v5280_v56 }
 0x86b   : > { %v5244_v61 = vrot.slane %v5221_v18, 2  ;;  %v5050_v42 = vadd.f32 %v5027_v35, %v4974_v20  ;;  %v5063_v15 = vadd.f32 %v5027_v35, %v4995_v27  ;;  %v5246_v19 = vrot.slane %v10337_v10, 2 }
 0x86c   : > { %v5242_v40 = vrot.slane %v5211_v29, 2  ;;  %v5029_v23 = vsel %vm938_vm7, %v5026_v33, %v5028_v62  ;;  %v5141_v59 = vsel %vm923_vm4, %v5138_v4, %v5140_v31  ;;  %v5065_v28 = vadd.f32 %v5028_v62, %v4997_v30 }
 0x86d   : > { %v10349_v57 = vpop.f32.mrf.mxu0  ;;  %v5051_v46 = vadd.f32 %v5029_v23, %v4975_v51  ;;  %v5064_v38 = vadd.f32 %v5029_v23, %v4996_v37  ;;  %v5139_v54 = vsel %vm923_vm4, %v5137_v55, %v5138_v4  ;;  %v5089_v21 = vrot.slane %v5063_v15, 2 }
 0x86e   : > { %v10353_v18 = vmul.f32 0.023647603, %v10349_v57  ;;  %v5245_v20 = vsel %vm933_vm6, %v5242_v40, %v5244_v61  ;;  %v5243_v35 = vsel %vm933_vm6, %v5241_v41, %v5242_v40  ;;  %v5196_v27 = vrot.slane %v10349_v57, 1 }
 0x86f   : > { %v4957_v49 = vpop.f32.mrf.mxu0  ;;  %v5267_v33 = vadd.f32 %v5245_v20, %v5211_v29  ;;  %v5266_v31 = vadd.f32 %v5243_v35, %v5210_v7  ;;  %v5090_v56 = vrot.slane %v5064_v38, 2  ;;  %v5288_v55 = vrot.slane %v10349_v57, 4 }
 0x870   : > { %v10358_v39 = vmul.f32 0.023647603, %v4957_v49  ;;  %v5193_v51 = vrot.slane %v4957_v49, 1  ;;  %v5285_v37 = vrot.slane %v4957_v49, 4  ;;  %v5092_v61 = vrot.slane %v5065_v28, 2 }
 0x871   : > { %v10361_v4 = vpop.f32.mrf.mxu0  ;;  %v5303_v30 = vadd.f32 %v5281_v2, %v5267_v33  ;;  %v5302_v62 = vadd.f32 %v5279_v16, %v5266_v31  ;;  %v5091_v41 = vsel %vm933_vm6, %v5089_v21, %v5090_v56  ;;  %v5000_v15 = vmul.f32 0.030364122, %v4957_v49 }
 0x872   : > { %v5222_v40 = vadd.f32 %v5193_v51, %v4957_v49  ;;  %v10365_v23 = vmul.f32 0.023647603, %v10361_v4  ;;  %v5198_v7 = vrot.slane %v10361_v4, 1  ;;  %v10369_v29 = vmul.f32 0.030364122, %v10361_v4 }
 0x873   : > { %5322 = vrot.lane.b32.xlu1 %v5303_v30, %s7970_s26  ;;  %5320 = vrot.lane.b32.xlu0 %v5302_v62, %s7970_s26  ;;  %v10373_v38 = vpop.f32.mrf.mxu0  ;;  %v11805_v2 = vrot.slane %v10322_v26, 1  ;;  %v5290_v28 = vrot.slane %v10361_v4, 4  ;;  %v5093_v20 = vsel %vm933_vm6, %v5090_v56, %v5092_v61  ;;  %v5286_v62 = vsel %vm923_vm4, %v5283_v22, %v5285_v37 }
 0x874   : > { %v5223_v35 = vadd.f32 %v10361_v4, %v5198_v7  ;;  %v10382_v21 = vmul.f32 0.023647603, %v10373_v38  ;;  %v5195_v33 = vrot.slane %v10373_v38, 1  ;;  %v5249_v30 = vrot.slane %v5222_v40, 2 }
 0x875   : > { %v5194_v16 = vsel %vm938_vm7, %v11805_v2, %v5193_v51  ;;  %v5199_v51 = vsel %vm938_vm7, %v5196_v27, %v5198_v7  ;;  %v5291_v2 = vsel %vm923_vm4, %v5288_v55, %v5290_v28  ;;  %v5287_v52 = vrot.slane %v10373_v38, 4 }
 0x876   : > { %v5213_v31 = vadd.f32 %v10322_v26, %v5194_v16  ;;  %v5215_v56 = vadd.f32 %v10349_v57, %v5199_v51  ;;  %v5254_v61 = vrot.slane %v5223_v35, 2  ;;  %v5035_v53 = vrot.slane %v10382_v21, 1 }
 0x877   : > { %v5197_v63 = vsel %vm938_vm7, %v5195_v33, %v5196_v27  ;;  %v5115_v16 = vadd.f32 %v5093_v20, %v5051_v46  ;;  %v5114_v40 = vadd.f32 %v5091_v41, %v5050_v42  ;;  %v5289_v46 = vsel %vm923_vm4, %v5287_v52, %v5288_v55 }
 0x878   : > { %v5247_v60 = vrot.slane %v5213_v31, 2  ;;  %v5252_v37 = vrot.slane %v5215_v56, 2  ;;  %v5214_v7 = vadd.f32 %v5197_v63, %v10373_v38  ;;  %v4977_v42 = vmul.f32 0.011170336, %v10322_v26 }
 0x879   : > { %v10399_v51 = vadd.f32 %v5141_v59, %v5115_v16  ;;  %v10401_v35 = vadd.f32 %v5139_v54, %v5114_v40  ;;  %v5031_v63 = vrot.slane %v10325_v48, 1  ;;  %v5006_v59 = vmul.f32 0.011170336, %v4957_v49 }
 0x87a   : > { %v5250_v0 = vsel %vm933_vm6, %v5247_v60, %v5249_v30  ;;  %v5248_v22 = vsel %vm933_vm6, %v5246_v19, %v5247_v60  ;;  %v5255_v21 = vsel %vm933_vm6, %v5252_v37, %v5254_v61  ;;  %v5251_v14 = vrot.slane %v5214_v7, 2 }
 0x87b   : > { %v5269_v28 = vadd.f32 %v5250_v0, %v5213_v31  ;;  %v5268_v47 = vadd.f32 %v5248_v22, %v10337_v10  ;;  %v5271_v19 = vadd.f32 %v5255_v21, %v5215_v56  ;;  %v5143_v10 = vrot.slane %v4977_v42, 4 }
 0x87c   : > { %v5253_v0 = vsel %vm933_vm6, %v5251_v14, %v5252_v37  ;;  %v5033_v54 = vrot.slane %v10358_v39, 1  ;;  %v4999_v55 = vmul.f32 0.030364122, %v10322_v26  ;;  %v11806_v20 = vrot.slane %v10313_v24, 1 }
 0x87d   : > { %v5305_v27 = vadd.f32 %v5286_v62, %v5269_v28  ;;  %v5304_v60 = vadd.f32 %v10342_v45, %v5268_v47  ;;  %v5307_v41 = vadd.f32 %v5291_v2, %v5271_v19  ;;  %v5270_v52 = vadd.f32 %v5253_v0, %v5214_v7 }
 0x87e   : > { %v5032_v47 = vsel %vm938_vm7, %v11806_v20, %v5031_v63  ;;  %v5034_v48 = vsel %vm938_vm7, %v5031_v63, %v5033_v54  ;;  %v5068_v45 = vadd.f32 %v5033_v54, %v5000_v15  ;;  %v5145_v14 = vrot.slane %v5006_v59, 4 }
 0x87f   : > { %5326 = vrot.lane.b32.xlu1 %v5305_v27, %s7970_s26  ;;  %5324 = vrot.lane.b32.xlu0 %v5304_v60, %s7970_s26  ;;  %v5052_v49 = vadd.f32 %v5032_v47, %v10316_v58  ;;  %v5306_v33 = vadd.f32 %v5289_v46, %v5270_v52  ;;  %v5053_v39 = vadd.f32 %v5034_v48, %v4977_v42  ;;  %v11807_v26 = vrot.slane %v10316_v58, 4 }
 0x880   : > { %v5067_v31 = vadd.f32 %v5034_v48, %v4999_v55  ;;  %v5066_v30 = vadd.f32 %v5032_v47, %v10319_v43  ;;  %v5097_v62 = vrot.slane %v5068_v45, 2  ;;  %v5146_v2 = vsel %vm923_vm4, %v5143_v10, %v5145_v14  ;;  %v7771_v14 = vld [vmem:[%s11281_s9] sm:$0xff]  }
 0x881   : > { %v5144_v24 = vsel %vm923_vm4, %v11807_v26, %v5143_v10  ;;  %v4979_v56 = vmul.f32 0.011170336, %v10349_v57  ;;  %v5002_v16 = vmul.f32 0.030364122, %v10349_v57  ;;  %v5036_v40 = vrot.slane %v10353_v18, 1  ;;  %7553 = vmatprep.subr.bf16.mxu1 %v7771_v14 }
 0x882   : > { %v5095_v15 = vrot.slane %v5067_v31, 2  ;;  %v5094_v61 = vrot.slane %v5066_v30, 2  ;;  %v5007_v43 = vmul.f32 0.011170336, %v10361_v4  ;;  %v5038_v22 = vrot.slane %v10365_v23, 1  ;;  %7554 = vmatpush3.bf16.msra.mxu1 %v7771_v14 }
 0x883   : > { %5330 = vrot.lane.b32.xlu1 %v5307_v41, %s7970_s26  ;;  %5328 = vrot.lane.b32.xlu0 %v5306_v33, %s7970_s26  ;;  %v4978_v58 = vmul.f32 0.011170336, %v10373_v38  ;;  %v5001_v28 = vmul.f32 0.030364122, %v10373_v38  ;;  %v5037_v21 = vsel %vm938_vm7, %v5035_v53, %v5036_v40  ;;  %v5148_v27 = vrot.slane %v4979_v56, 4  ;;  %s11814_s26 = sld [smem:[#allocation109_spill]] }
 0x884   : > { %v5098_v37 = vsel %vm933_vm6, %v5095_v15, %v5097_v62  ;;  %v5096_v7 = vsel %vm933_vm6, %v5094_v61, %v5095_v15  ;;  %v5039_v57 = vsel %vm938_vm7, %v5036_v40, %v5038_v22  ;;  %v5071_v18 = vadd.f32 %v5038_v22, %v10369_v29 }
 0x885   : > { %v5117_v46 = vadd.f32 %v5098_v37, %v5053_v39  ;;  %v5116_v42 = vadd.f32 %v5096_v7, %v5052_v49  ;;  %v5055_v4 = vadd.f32 %v5039_v57, %v4979_v56  ;;  %v5070_v60 = vadd.f32 %v5039_v57, %v5002_v16 }
 0x886   : > { %v5150_v23 = vrot.slane %v5007_v43, 4  ;;  %v5102_v0 = vrot.slane %v5071_v18, 2  ;;  %v5069_v10 = vadd.f32 %v5037_v21, %v5001_v28  ;;  %v5147_v41 = vrot.slane %v4978_v58, 4 }
 0x887   : > { %v5165_v19 = vadd.f32 %v5146_v2, %v5117_v46  ;;  %v5164_v63 = vadd.f32 %v5144_v24, %v5116_v42  ;;  %v5100_v59 = vrot.slane %v5070_v60, 2  ;;  %v5054_v52 = vadd.f32 %v5037_v21, %v4978_v58  ;;  %v5513_v60 = vld [vmem:[#allocation7] sm:$0xf] }
 0x888   : > { %v5151_v54 = vsel %vm923_vm4, %v5148_v27, %v5150_v23  ;;  %v5099_v38 = vrot.slane %v5069_v10, 2  ;;  %v5149_v48 = vsel %vm923_vm4, %v5147_v41, %v5148_v27  ;;  %v11808_v49 = vmov 0.0  }
 0x889   : > { %v5103_v53 = vsel %vm933_vm6, %v5100_v59, %v5102_v0  ;;  %7563 = vmatprep.subr.bf16.mxu1 %v11808_v49 }
 0x88a   : > { %v5119_v55 = vadd.f32 %v5103_v53, %v5055_v4  ;;  %v5101_v20 = vsel %vm933_vm6, %v5099_v38, %v5100_v59 }
 0x88b   : > { %v5118_v29 = vadd.f32 %v5101_v20, %v5054_v52 }
 0x88c   : > { %v5167_v47 = vadd.f32 %v5151_v54, %v5119_v55  ;;  %v5777_v54 = vld [vmem:[%s11283_s11] sm:$0xf] }
 0x88d   : > { %v5166_v45 = vadd.f32 %v5149_v48, %v5118_v29  ;;  %v5792_v38 = vsel %vm923_vm4, %v5777_v54, 0 }
 0x8cf   : > { %v5319_v33 = vpop.permute.xlu1 %5318  ;;  %v5317_v39 = vpop.permute.xlu0 %5316 }
 0x8d0   : > { %v10446_v31 = vadd.f32 %v5319_v33, %v10307_v12  ;;  %v10449_v30 = vadd.f32 %v5317_v39, %v10310_v50 }
 0x8d2   : > { %v5412_v62 = vpack.c.bf16 %v10446_v31, %v10449_v30 }
 0x8d4   : > { %5422 = vrot.lane.b32.xlu0 %v5412_v62, %s7971_s18 }
 0x8e5   : > { %v5323_v2 = vpop.permute.xlu1 %5322  ;;  %v5321_v26 = vpop.permute.xlu0 %5320 }
 0x8e6   : > { %v10455_v24 = vadd.f32 %v5323_v2, %v10399_v51  ;;  %v10458_v56 = vadd.f32 %v5321_v26, %v10401_v35 }
 0x8e8   : > { %v5413_v12 = vpack.c.bf16 %v10455_v24, %v10458_v56 }
 0x8ea   : > { %5424 = vrot.lane.b32.xlu1 %v5413_v12, %s7971_s18 }
 0x8f1   : > { %v5327_v50 = vpop.permute.xlu1 %5326  ;;  %v5325_v15 = vpop.permute.xlu0 %5324 }
 0x8f2   : > { %v10463_v61 = vadd.f32 %v5327_v50, %v5165_v19  ;;  %v10465_v16 = vadd.f32 %v5325_v15, %v5164_v63 }
 0x8f4   : > { %v5414_v40 = vpack.c.bf16 %v10463_v61, %v10465_v16 }
 0x8f5   : > { %v5331_v43 = vpop.permute.xlu1 %5330  ;;  %v5329_v51 = vpop.permute.xlu0 %5328 }
 0x8f6   : > { %v10469_v22 = vadd.f32 %v5331_v43, %v5167_v47  ;;  %v10471_v35 = vadd.f32 %v5329_v51, %v5166_v45  ;;  %5426 = vrot.lane.b32.xlu0 %v5414_v40, %s7971_s18 }
 0x8f8   : > { %v5415_v58 = vpack.c.bf16 %v10469_v22, %v10471_v35 }
 0x8fa   : > { %5428 = vrot.lane.b32.xlu1 %v5415_v58, %s7971_s18 }
 0x946   : > { %v5423_v37 = vpop.permute.xlu0 %5422 }
 0x947   : > { %7555 = vmatprep.mubr.msk.bf16.mxu1 %vm4872_vm10, %v5423_v37 }
 0x95c   : > { %v5425_v7 = vpop.permute.xlu1 %5424 }
 0x95d   : > { %7556 = vmatmul.mubr.msk.bf16.vlgmr.msra.gmra.mxu1 %vm4872_vm10, %v5425_v7 }
 0x968   : > { %v5427_v28 = vpop.permute.xlu0 %5426 }
 0x969   : > { %7559 = vmatprep.mubr.msk.bf16.mxu1 %vm4872_vm10, %v5427_v28 }
 0x96c   : > { %v5429_v21 = vpop.permute.xlu1 %5428 }
 0x96d   : > { %7560 = vmatmul.mubr.msk.bf16.gmra.mxu1 %vm4872_vm10, %v5429_v21 }
 0x96e   : > { %7565 = vmatprep.mubr.msk.bf16.mxu1 %vm7969_vm9, %v11808_v49 }
 0xa1d   : > { %v7557_v46 = vpop.f32.mrf.mxu1 }
 0xa1f   : > { %v5482_v42 = vpop.f32.mrf.mxu1 }
 0xa21   : > { %v7558_v57 = vpop.f32.mrf.mxu1 }
 0xa22   : > { %v5515_v18 = vpack.c.bf16 %v7558_v57, %v7557_v46 }
 0xa23   : > { %v5485_v27 = vpop.f32.mrf.mxu1 }
 0xa24   : > { %v5514_v4 = vpack.c.bf16 %v5485_v27, %v5482_v42  ;;  %7570 = vmatpush3.bf16.msra.mxu0 %v5515_v18 }
 0xa25   : > { %7581 = vmatprep.subr.bf16.mxu0 %v11808_v49 }
 0xa26   : > { %7564 = vmatpush3.bf16.msra.mxu1 %v5514_v4 }
 0xa27   : > { %7572 = vmatmul.mubr.msk.bf16.vlgmr.msra.gmra.mxu0 %vm4872_vm10, %v5513_v60  ;;  %7575 = vmatprep.subr.bf16.mxu1 %v11808_v49 }
 0xa28   : > { %7583 = vmatprep.mubr.msk.bf16.mxu0 %vm7969_vm9, %v11808_v49 }
 0xa29   : > { %7566 = vmatmul.mubr.msk.bf16.vlgmr.msra.gmra.mxu1 %vm4872_vm10, %v5513_v60 }
 0xa2a   : > { %7577 = vmatprep.mubr.msk.bf16.mxu1 %vm7969_vm9, %v11808_v49 }
 0xa2d   : > { %v7561_v23 = vpop.f32.mrf.mxu1 }
 0xa2f   : > { %v5498_v19 = vpop.f32.mrf.mxu1 }
 0xa31   : > { %v7562_v63 = vpop.f32.mrf.mxu1 }
 0xa32   : > { %v5517_v0 = vpack.c.bf16 %v7562_v63, %v7561_v23 }
 0xa33   : > { %v5501_v10 = vpop.f32.mrf.mxu1 }
 0xa34   : > { %v5516_v59 = vpack.c.bf16 %v5501_v10, %v5498_v19  ;;  %7582 = vmatpush3.bf16.msra.mxu0 %v5517_v0 }
 0xa36   : > { %7576 = vmatpush3.bf16.msra.mxu1 %v5516_v59 }
 0xa37   : > { %7584 = vmatmul.mubr.msk.bf16.vlgmr.msra.gmra.mxu0 %vm4872_vm10, %v5513_v60  ;;  %7663 = vmatprep.subr.msk.bf16.mxu1 %vm923_vm4, %v5777_v54 }
 0xa39   : > { %7578 = vmatmul.mubr.msk.bf16.vlgmr.msra.gmra.mxu1 %vm4872_vm10, %v5513_v60 }
 0xa3a   : > { %7588 = vmatpush3.bf16.msra.mxu1 %v5792_v38 }
 0xa3b   : > { %7609 = vmatprep.subr.bf16.mxu1 %v11808_v49 }
 0xae7   : > { %v10499_v41 = vpop.f32.mrf.mxu0 }
 0xae8   : > { %11809 = vst [vmem:[#allocation77_spill] sm:$0xff] %v10499_v41  ;;  %v5694_v53 = vrot.slane %v10499_v41, 6  ;;  %v5702_v52 = vrot.slane %v10499_v41, 5  ;;  %v5686_v29 = vrot.slane %v10499_v41, 7  ;;  %v5710_v47 = vrot.slane %v10499_v41, 4 }
 0xae9   : > { %v10503_v55 = vpop.f32.mrf.mxu1  ;;  %v7573_v20 = vpop.f32.mrf.mxu0  ;;  %v5718_v48 = vrot.slane %v10499_v41, 3  ;;  %v5726_v50 = vrot.slane %v10499_v41, 2  ;;  %v5734_v15 = vrot.slane %v10499_v41, 1 }
 0xaea   : > { %11810 = vst [vmem:[#allocation78_spill] sm:$0xff] %v10503_v55  ;;  %v5685_v45 = vrot.slane %v10503_v55, 7  ;;  %v5693_v14 = vrot.slane %v10503_v55, 6  ;;  %v5701_v33 = vrot.slane %v10503_v55, 5  ;;  %v5709_v39 = vrot.slane %v10503_v55, 4 }
 0xaeb   : > { %v7567_v62 = vpop.f32.mrf.mxu1  ;;  %v5598_v2 = vpop.f32.mrf.mxu0  ;;  %v5717_v26 = vrot.slane %v10503_v55, 3  ;;  %v5725_v12 = vrot.slane %v10503_v55, 2  ;;  %v5733_v40 = vrot.slane %v10503_v55, 1  ;;  %v5750_v58 = vsel %vm768_vm0, %v5694_v53, %v5702_v52 }
 0xaec   : > { %v5741_v43 = vsel %vm905_vm1, %v10503_v55, %v5685_v45  ;;  %v5749_v51 = vsel %vm768_vm0, %v5693_v14, %v5701_v33  ;;  %v5742_v21 = vsel %vm905_vm1, %v10499_v41, %v5686_v29  ;;  %v5754_v46 = vsel %vm918_vm3, %v5750_v58, %v5710_v47 }
 0xaed   : > { %v5558_v37 = vpop.f32.mrf.mxu1  ;;  %v5753_v7 = vsel %vm918_vm3, %v5749_v51, %v5709_v39  ;;  %v7574_v28 = vpop.f32.mrf.mxu0  ;;  %v5758_v57 = vsel %vm923_vm4, %v5754_v46, %v5718_v48  ;;  %v5745_v27 = vsel %vm768_vm0, %v5741_v43, %v5693_v14  ;;  %v5746_v19 = vsel %vm768_vm0, %v5742_v21, %v5694_v53 }
 0xaee   : > { %v5757_v42 = vsel %vm923_vm4, %v5753_v7, %v5717_v26  ;;  %v5762_v60 = vsel %vm928_vm5, %v5758_v57, %v5726_v50 }
 0xaef   : > { %v7568_v18 = vpop.f32.mrf.mxu1  ;;  %v5761_v4 = vsel %vm928_vm5, %v5757_v42, %v5725_v12  ;;  %v5766_v63 = vsel %vm933_vm6, %v5762_v60, %v5734_v15 }
 0xaf0   : > { %v5765_v23 = vsel %vm933_vm6, %v5761_v4, %v5733_v40  ;;  %v5770_v10 = vsel %vm938_vm7, %v5766_v63, %v10499_v41 }
 0xaf1   : > { %v5769_v0 = vsel %vm938_vm7, %v5765_v23, %v10503_v55  ;;  %v5774_v54 = vpack.c.bf16 %v5770_v10, %v5746_v19 }
 0xaf2   : > { %v5773_v59 = vpack.c.bf16 %v5769_v0, %v5745_v27 }
 0xaf4   : > { %7589 = vmatprep.mubr.msk.bf16.mxu1 %vm5778_vm11, %v5773_v59 }
 0xaf5   : > { %7590 = vmatmul.mubr.msk.bf16.vlgmr.msra.gmra.mxu1 %vm5778_vm11, %v5774_v54 }
 0xaf7   : > { %v10539_v38 = vpop.f32.mrf.mxu0 }
 0xaf8   : > { %11811 = vst [vmem:[#allocation79_spill] sm:$0xff] %v10539_v38  ;;  %v5696_v52 = vrot.slane %v10539_v38, 6  ;;  %v5704_v53 = vrot.slane %v10539_v38, 5  ;;  %v5712_v29 = vrot.slane %v10539_v38, 4  ;;  %v5720_v47 = vrot.slane %v10539_v38, 3 }
 0xaf9   : > { %v10543_v20 = vpop.f32.mrf.mxu1  ;;  %v7585_v48 = vpop.f32.mrf.mxu0  ;;  %v5688_v62 = vrot.slane %v10539_v38, 7  ;;  %v5728_v2 = vrot.slane %v10539_v38, 2  ;;  %v5736_v40 = vrot.slane %v10539_v38, 1 }
 0xafa   : > { %11812 = vst [vmem:[#allocation80_spill] sm:$0xff] %v10543_v20  ;;  %v5687_v45 = vrot.slane %v10543_v20, 7  ;;  %v5695_v14 = vrot.slane %v10543_v20, 6  ;;  %v5703_v33 = vrot.slane %v10543_v20, 5  ;;  %v5711_v39 = vrot.slane %v10543_v20, 4 }
 0xafb   : > { %v7579_v26 = vpop.f32.mrf.mxu1  ;;  %v5678_v12 = vpop.f32.mrf.mxu0  ;;  %v5719_v50 = vrot.slane %v10543_v20, 3  ;;  %v5752_v43 = vsel %vm768_vm0, %v5696_v52, %v5704_v53  ;;  %v5727_v51 = vrot.slane %v10543_v20, 2  ;;  %v5735_v21 = vrot.slane %v10543_v20, 1 }
 0xafc   : > { %v5751_v15 = vsel %vm768_vm0, %v5695_v14, %v5703_v33  ;;  %v5756_v37 = vsel %vm918_vm3, %v5752_v43, %v5712_v29  ;;  %v5743_v46 = vsel %vm905_vm1, %v10543_v20, %v5687_v45  ;;  %v5744_v27 = vsel %vm905_vm1, %v10539_v38, %v5688_v62 }
 0xafd   : > { %v5755_v58 = vsel %vm918_vm3, %v5751_v15, %v5711_v39  ;;  %v5638_v7 = vpop.f32.mrf.mxu1  ;;  %v7586_v28 = vpop.f32.mrf.mxu0  ;;  %v5760_v57 = vsel %vm923_vm4, %v5756_v37, %v5720_v47  ;;  %v5747_v63 = vsel %vm768_vm0, %v5743_v46, %v5695_v14  ;;  %v5748_v54 = vsel %vm768_vm0, %v5744_v27, %v5696_v52 }
 0xafe   : > { %v5759_v42 = vsel %vm923_vm4, %v5755_v58, %v5719_v50  ;;  %v5764_v4 = vsel %vm928_vm5, %v5760_v57, %v5728_v2 }
 0xaff   : > { %v5763_v18 = vsel %vm928_vm5, %v5759_v42, %v5727_v51  ;;  %v7580_v60 = vpop.f32.mrf.mxu1  ;;  %v5768_v19 = vsel %vm933_vm6, %v5764_v4, %v5736_v40 }
 0xb00   : > { %v5767_v23 = vsel %vm933_vm6, %v5763_v18, %v5735_v21  ;;  %v5772_v10 = vsel %vm938_vm7, %v5768_v19, %v10539_v38 }
 0xb01   : > { %v5771_v0 = vsel %vm938_vm7, %v5767_v23, %v10543_v20  ;;  %v5776_v53 = vpack.c.bf16 %v5772_v10, %v5748_v54  ;;  %v10813_v20 = vld [vmem:[%s8247_s0 + $0x38] sm:$0xff] }
 0xb02   : > { %v5775_v59 = vpack.c.bf16 %v5771_v0, %v5747_v63 }
 0xb04   : > { %7593 = vmatprep.mubr.msk.bf16.mxu1 %vm5778_vm11, %v5775_v59 }
 0xb05   : > { %7594 = vmatmul.mubr.msk.bf16.gmra.mxu1 %vm5778_vm11, %v5776_v53 }
 0xb06   : > { %7611 = vmatprep.mubr.msk.bf16.mxu1 %vm7969_vm9, %v11808_v49 }
 0xbb5   : > { %v7591_v29 = vpop.f32.mrf.mxu1 }
 0xbb6   : > { %v5865_v47 = vmul.f32 0.023647603, %v7591_v29  ;;  %v5860_v45 = vmul.f32 0.011170336, %v7591_v29  ;;  %v5990_v14 = vrot.slane %v7591_v29, 1  ;;  %v6046_v62 = vrot.slane %v7591_v29, 4 }
 0xbb7   : > { %v5828_v48 = vpop.f32.mrf.mxu1  ;;  %v5873_v2 = vmul.f32 0.030364122, %v7591_v29 }
 0xbb8   : > { %v5863_v33 = vmul.f32 0.023647603, %v5828_v48  ;;  %v5987_v26 = vrot.slane %v5828_v48, 1  ;;  %v6043_v50 = vrot.slane %v5828_v48, 4  ;;  %v5894_v40 = vrot.slane %v5865_v47, 1 }
 0xbb9   : > { %v7592_v39 = vpop.f32.mrf.mxu1  ;;  %v5962_v43 = vrot.slane %v5860_v45, 4  ;;  %v10581_v51 = vmul.f32 0.011170336, %v5828_v48  ;;  %v5871_v58 = vmul.f32 0.030364122, %v5828_v48 }
 0xbba   : > { %v5866_v12 = vmul.f32 0.023647603, %v7592_v39  ;;  %v5991_v52 = vrot.slane %v7592_v39, 1  ;;  %v5874_v37 = vmul.f32 0.030364122, %v7592_v39  ;;  %v6047_v21 = vrot.slane %v7592_v39, 4 }
 0xbbb   : > { %v5831_v15 = vpop.f32.mrf.mxu1  ;;  %v5880_v57 = vmul.f32 0.011170336, %v7592_v39 }
 0xbbc   : > { %v6012_v7 = vadd.f32 %v7592_v39, %v5991_v52  ;;  %v5988_v28 = vrot.slane %v5831_v15, 1  ;;  %v5864_v46 = vmul.f32 0.023647603, %v5831_v15  ;;  %v5992_v42 = vsel %vm938_vm7, %v5990_v14, %v5991_v52 }
 0xbbd   : > { %v5895_v18 = vrot.slane %v5866_v12, 1  ;;  %v6004_v4 = vadd.f32 %v7591_v29, %v5992_v42  ;;  %v6044_v63 = vrot.slane %v5831_v15, 4  ;;  %v5963_v55 = vrot.slane %v5880_v57, 4 }
 0xbbe   : > { %v6011_v27 = vadd.f32 %v5988_v28, %v5831_v15  ;;  %v6027_v60 = vrot.slane %v6012_v7, 2  ;;  %v5989_v23 = vsel %vm938_vm7, %v5987_v26, %v5988_v28  ;;  %v5879_v14 = vmul.f32 0.011170336, %v5831_v15 }
 0xbbf   : > { %v6003_v19 = vadd.f32 %v5989_v23, %v5828_v48  ;;  %v5896_v0 = vsel %vm938_vm7, %v5894_v40, %v5895_v18  ;;  %v5918_v10 = vadd.f32 %v5895_v18, %v5874_v37  ;;  %v6026_v59 = vrot.slane %v6004_v4, 2 }
 0xbc0   : > { %v6024_v54 = vrot.slane %v6011_v27, 2  ;;  %v5908_v53 = vadd.f32 %v5896_v0, %v5860_v45  ;;  %v5917_v47 = vadd.f32 %v5896_v0, %v5873_v2  ;;  %v5891_v29 = vrot.slane %v5863_v33, 1 }
 0xbc1   : > { %v6023_v38 = vrot.slane %v6003_v19, 2  ;;  %v5935_v41 = vrot.slane %v5918_v10, 2  ;;  %v6028_v39 = vsel %vm933_vm6, %v6026_v59, %v6027_v60  ;;  %v5892_v52 = vrot.slane %v5864_v46, 1 }
 0xbc2   : > { %v5934_v12 = vrot.slane %v5917_v47, 2  ;;  %v5872_v7 = vmul.f32 0.030364122, %v5831_v15  ;;  %v6040_v48 = vadd.f32 %v6028_v39, %v6004_v4  ;;  %v5964_v40 = vsel %vm923_vm4, %v5962_v43, %v5963_v55 }
 0xbc3   : > { %v6025_v28 = vsel %vm933_vm6, %v6023_v38, %v6024_v54  ;;  %v6048_v37 = vsel %vm923_vm4, %v6046_v62, %v6047_v21  ;;  %v6045_v2 = vsel %vm923_vm4, %v6043_v50, %v6044_v63  ;;  %v5960_v42 = vrot.slane %v5879_v14, 4 }
 0xbc4   : > { %v6039_v45 = vadd.f32 %v6025_v28, %v6003_v19  ;;  %v6060_v18 = vadd.f32 %v6048_v37, %v6040_v48  ;;  %v5936_v27 = vsel %vm933_vm6, %v5934_v12, %v5935_v41  ;;  %v5893_v33 = vsel %vm938_vm7, %v5891_v29, %v5892_v52 }
 0xbc5   : > { %v7595_v26 = vpop.f32.mrf.mxu1  ;;  %v5916_v15 = vadd.f32 %v5892_v52, %v5872_v7  ;;  %v5959_v4 = vrot.slane %v10581_v51, 4  ;;  %v5948_v38 = vadd.f32 %v5936_v27, %v5908_v53  ;;  %v5907_v62 = vadd.f32 %v5893_v33, %v10581_v51 }
 0xbc6   : > { %v6059_v46 = vadd.f32 %v6045_v2, %v6039_v45  ;;  %6069 = vrot.lane.b32.xlu1 %v6060_v18, %s7972_s10  ;;  %v5915_v50 = vadd.f32 %v5893_v33, %v5871_v58  ;;  %v5869_v21 = vmul.f32 0.023647603, %v7595_v26  ;;  %v5996_v60 = vrot.slane %v7595_v26, 1 }
 0xbc7   : > { %v10591_v57 = vpop.f32.mrf.mxu1  ;;  %v5932_v43 = vrot.slane %v5916_v15, 2  ;;  %v6052_v19 = vrot.slane %v7595_v26, 4  ;;  %v10601_v63 = vadd.f32 %v5964_v40, %v5948_v38  ;;  %v5961_v10 = vsel %vm923_vm4, %v5959_v4, %v5960_v42 }
 0xbc8   : > { %6067 = vrot.lane.b32.xlu0 %v6059_v46, %s7972_s10  ;;  %v5931_v0 = vrot.slane %v5915_v50, 2  ;;  %v5993_v59 = vrot.slane %v10591_v57, 1  ;;  %v5862_v39 = vmul.f32 0.011170336, %v7595_v26  ;;  %v6049_v40 = vrot.slane %v10591_v57, 4 }
 0xbc9   : > { %v7596_v55 = vpop.f32.mrf.mxu1  ;;  %v5900_v18 = vrot.slane %v5869_v21, 1  ;;  %v5877_v50 = vmul.f32 0.030364122, %v7595_v26 }
 0xbca   : > { %v5997_v23 = vrot.slane %v7596_v55, 1  ;;  %v5870_v54 = vmul.f32 0.023647603, %v7596_v55  ;;  %v6053_v47 = vrot.slane %v7596_v55, 4  ;;  %v5933_v14 = vsel %vm933_vm6, %v5931_v0, %v5932_v43 }
 0xbcb   : > { %v10599_v41 = vpop.f32.mrf.mxu1  ;;  %v5878_v48 = vmul.f32 0.030364122, %v7596_v55  ;;  %v5947_v37 = vadd.f32 %v5933_v14, %v5907_v62  ;;  %v5882_v15 = vmul.f32 0.011170336, %v7596_v55  ;;  %v5968_v43 = vrot.slane %v5862_v39, 4 }
 0xbcc   : > { %v6014_v53 = vadd.f32 %v7596_v55, %v5997_v23  ;;  %v5994_v51 = vrot.slane %v10599_v41, 1  ;;  %v5998_v58 = vsel %vm938_vm7, %v5996_v60, %v5997_v23  ;;  %v6050_v42 = vrot.slane %v10599_v41, 4 }
 0xbcd   : > { %v6006_v29 = vadd.f32 %v7595_v26, %v5998_v58  ;;  %v5975_v33 = vadd.f32 %v5961_v10, %v5947_v37  ;;  %v5901_v46 = vrot.slane %v5870_v54, 1  ;;  %v6054_v38 = vsel %vm923_vm4, %v6052_v19, %v6053_v47 }
 0xbce   : > { %v6013_v12 = vadd.f32 %v5994_v51, %v10599_v41  ;;  %v6033_v52 = vrot.slane %v6014_v53, 2  ;;  %v5995_v7 = vsel %vm938_vm7, %v5993_v59, %v5994_v51  ;;  %v5969_v21 = vrot.slane %v5882_v15, 4 }
 0xbcf   : > { %v6005_v28 = vadd.f32 %v5995_v7, %v10591_v57  ;;  %v6032_v45 = vrot.slane %v6006_v29, 2  ;;  %v5902_v62 = vsel %vm938_vm7, %v5900_v18, %v5901_v46  ;;  %v5922_v0 = vadd.f32 %v5901_v46, %v5878_v48  ;;  %v6121_v7 = vld [vmem:[%s11813_s16] sm:$0xf] }
 0xbd0   : > { %v6030_v2 = vrot.slane %v6013_v12, 2  ;;  %v5910_v53 = vadd.f32 %v5902_v62, %v5862_v39  ;;  %v5921_v51 = vadd.f32 %v5902_v62, %v5877_v50  ;;  %v6051_v55 = vsel %vm923_vm4, %v6049_v40, %v6050_v42  ;;  %7664 = vmatprep.subr.msk.bf16.mxu0 %vm923_vm4, %v6121_v7 }
 0xbd1   : > { %v6029_v27 = vrot.slane %v6005_v28, 2  ;;  %v6034_v4 = vsel %vm933_vm6, %v6032_v45, %v6033_v52  ;;  %v5941_v10 = vrot.slane %v5922_v0, 2  ;;  %v5970_v19 = vsel %vm923_vm4, %v5968_v43, %v5969_v21 }
 0xbd2   : > { %v6042_v60 = vadd.f32 %v6034_v4, %v6006_v29  ;;  %v5940_v14 = vrot.slane %v5921_v51, 2  ;;  %v5868_v39 = vmul.f32 0.023647603, %v10599_v41  ;;  %v5867_v29 = vmul.f32 0.023647603, %v10591_v57 }
 0xbd3   : > { %v6031_v23 = vsel %vm933_vm6, %v6029_v27, %v6030_v2  ;;  %v5876_v37 = vmul.f32 0.030364122, %v10599_v41  ;;  %v5875_v45 = vmul.f32 0.030364122, %v10591_v57  ;;  %v5881_v43 = vmul.f32 0.011170336, %v10599_v41 }
 0xbd4   : > { %v6041_v59 = vadd.f32 %v6031_v23, %v6005_v28  ;;  %v6062_v58 = vadd.f32 %v6054_v38, %v6042_v60  ;;  %v5942_v26 = vsel %vm933_vm6, %v5940_v14, %v5941_v10  ;;  %v5898_v52 = vrot.slane %v5868_v39, 1 }
 0xbd5   : > { %v5950_v47 = vadd.f32 %v5942_v26, %v5910_v53  ;;  %v5897_v48 = vrot.slane %v5867_v29, 1  ;;  %v6135_v28 = vsel %vm923_vm4, %v6121_v7, 0  ;;  %v5861_v60 = vmul.f32 0.011170336, %v10591_v57  ;;  %v6186_v29 = vld [vmem:[%s11814_s26] sm:$0x3] }
 0xbd6   : > { %v6061_v54 = vadd.f32 %v6051_v55, %v6041_v59  ;;  %6073 = vrot.lane.b32.xlu1 %v6062_v58, %s7972_s10  ;;  %7598 = vmatpush3.bf16.msra.mxu0 %v6135_v28  ;;  %v5920_v42 = vadd.f32 %v5898_v52, %v5876_v37  ;;  %v5966_v0 = vrot.slane %v5881_v43, 4  ;;  %v6420_v37 = vld [vmem:[%s11815_s14] sm:$0x3]  ;;  %s7175_s14 = sshll.u32 %s8088_s28, 4 }
 0xbd7   : > { %v5978_v12 = vadd.f32 %v5970_v19, %v5950_v47  ;;  %v5899_v40 = vsel %vm938_vm7, %v5897_v48, %v5898_v52  ;;  %7603 = vmatprep.subr.bf16.mxu0 %v11808_v49  ;;  %v5965_v59 = vrot.slane %v5861_v60, 4 }
 0xbd8   : > { %6071 = vrot.lane.b32.xlu0 %v6061_v54, %s7972_s10  ;;  %v5919_v2 = vadd.f32 %v5899_v40, %v5875_v45  ;;  %v5938_v38 = vrot.slane %v5920_v42, 2  ;;  %v5909_v62 = vadd.f32 %v5899_v40, %v5861_v60  ;;  %v6429_v45 = vsel %vm768_vm0, %v6420_v37, 0  ;;  %s11848_s10 = sld [smem:[#allocation111_spill]] }
 0xbda   : > { %v5937_v4 = vrot.slane %v5919_v2, 2 }
 0xbdc   : > { %v5939_v23 = vsel %vm933_vm6, %v5937_v4, %v5938_v38 }
 0xc38   : > { %v6070_v18 = vpop.permute.xlu1 %6069 }
 0xc39   : > { %v10634_v15 = vadd.f32 %v6070_v18, %v10601_v63  ;;  %v5949_v63 = vadd.f32 %v5939_v23, %v5909_v62 }
 0xc3a   : > { %v6068_v27 = vpop.permute.xlu0 %6067 }
 0xc3b   : > { %v10636_v46 = vadd.f32 %v6068_v27, %v5975_v33  ;;  %v5967_v33 = vsel %vm923_vm4, %v5965_v59, %v5966_v0 }
 0xc3c   : > { %v5977_v51 = vadd.f32 %v5967_v33, %v5949_v63 }
 0xc3d   : > { %v6119_v50 = vpack.c.bf16 %v10634_v15, %v10636_v46 }
 0xc3f   : > { %6124 = vrot.lane.b32.xlu0 %v6119_v50, %s7973_s17 }
 0xc48   : > { %v6074_v53 = vpop.permute.xlu1 %6073 }
 0xc49   : > { %v10645_v58 = vadd.f32 %v6074_v53, %v5978_v12 }
 0xc4a   : > { %v6072_v21 = vpop.permute.xlu0 %6071 }
 0xc4b   : > { %v10647_v55 = vadd.f32 %v6072_v21, %v5977_v51 }
 0xc4d   : > { %v6120_v41 = vpack.c.bf16 %v10645_v58, %v10647_v55 }
 0xc4f   : > { %6126 = vrot.lane.b32.xlu1 %v6120_v41, %s7973_s17 }
 0xcb1   : > { %v6125_v57 = vpop.permute.xlu0 %6124 }
 0xcb2   : > { %7599 = vmatprep.mubr.msk.bf16.mxu0 %vm5778_vm11, %v6125_v57 }
 0xcc1   : > { %v6127_v10 = vpop.permute.xlu1 %6126 }
 0xcc2   : > { %7600 = vmatmul.mubr.msk.bf16.vlgmr.msra.gmra.mxu0 %vm5778_vm11, %v6127_v10 }
 0xcc3   : > { %7605 = vmatprep.mubr.msk.bf16.mxu0 %vm7969_vm9, %v11808_v49 }
 0xd82   : > { %v7601_v54 = vpop.f32.mrf.mxu0 }
 0xd83   : > { %v6189_v47 = vpack.c.bf16 %v7601_v54, %v7601_v54 }
 0xd84   : > { %v6171_v14 = vpop.f32.mrf.mxu0 }
 0xd85   : > { %v6187_v19 = vpack.c.bf16 %v6171_v14, %v6171_v14  ;;  %v6281_v7 = vsel %vm923_vm4, %v6189_v47, 0 }
 0xd86   : > { %v7602_v26 = vpop.f32.mrf.mxu0 }
 0xd87   : > { %v6195_v12 = vsel %vm923_vm4, %v6187_v19, 0  ;;  %v6190_v48 = vpack.c.bf16 %v7602_v26, %v7602_v26 }
 0xd88   : > { %v6174_v39 = vpop.f32.mrf.mxu0  ;;  %7604 = vmatpush3.bf16.msra.mxu0 %v6195_v12 }
 0xd89   : > { %v6188_v52 = vpack.c.bf16 %v6174_v39, %v6174_v39  ;;  %7615 = vmatprep.subr.bf16.mxu0 %v11808_v49  ;;  %v6324_v40 = vsel %vm923_vm4, %v6190_v48, 0 }
 0xd8b   : > { %v6238_v28 = vsel %vm923_vm4, %v6188_v52, 0  ;;  %7606 = vmatmul.mubr.msk.bf16.vlgmr.msra.gmra.mxu0 %vm5778_vm11, %v6186_v29 }
 0xd8c   : > { %7610 = vmatpush3.bf16.msra.mxu1 %v6238_v28  ;;  %7616 = vmatpush3.bf16.msra.mxu0 %v6281_v7 }
 0xd8d   : > { %7621 = vmatprep.subr.bf16.mxu1 %v11808_v49  ;;  %7617 = vmatprep.mubr.msk.bf16.mxu0 %vm7969_vm9, %v11808_v49 }
 0xd8e   : > { %7665 = vmatprep.subr.msk.bf16.mxu0 %vm768_vm0, %v6420_v37 }
 0xd8f   : > { %7612 = vmatmul.mubr.msk.bf16.vlgmr.msra.gmra.mxu1 %vm5778_vm11, %v6186_v29 }
 0xd90   : > { %7622 = vmatpush3.bf16.msra.mxu1 %v6324_v40  ;;  %7623 = vmatprep.mubr.msk.bf16.mxu1 %vm7969_vm9, %v11808_v49 }
 0xd91   : > { %7633 = vmatprep.subr.bf16.mxu1 %v11808_v49 }
 0xd93   : > { %7618 = vmatmul.mubr.msk.bf16.vlgmr.msra.gmra.mxu0 %vm5778_vm11, %v6186_v29 }
 0xd94   : > { %7628 = vmatpush3.bf16.msra.mxu0 %v6429_v45 }
 0xd95   : > { %7639 = vmatprep.subr.bf16.mxu0 %v11808_v49 }
 0xd97   : > { %7624 = vmatmul.mubr.msk.bf16.vlgmr.msra.gmra.mxu1 %vm5778_vm11, %v6186_v29 }
 0xd98   : > { %7635 = vmatprep.mubr.msk.bf16.mxu1 %vm7969_vm9, %v11808_v49 }
 0xe4b   : > { %v10682_v2 = vpop.f32.mrf.mxu0 }
 0xe4c   : > { %11816 = vst [vmem:[#allocation81_spill] sm:$0xff] %v10682_v2  ;;  %v6370_v42 = vrot.slane %v10682_v2, 7  ;;  %v6378_v18 = vrot.slane %v10682_v2, 6  ;;  %v6386_v38 = vrot.slane %v10682_v2, 5  ;;  %v6394_v59 = vrot.slane %v10682_v2, 4 }
 0xe4d   : > { %v7607_v27 = vpop.f32.mrf.mxu0 }
 0xe4e   : > { %v6402_v4 = vsel %vm905_vm1, %v10682_v2, %v6370_v42 }
 0xe4f   : > { %v10689_v50 = vpop.f32.mrf.mxu1  ;;  %v6234_v43 = vpop.f32.mrf.mxu0  ;;  %v6406_v62 = vsel %vm768_vm0, %v6402_v4, %v6378_v18 }
 0xe50   : > { %11817 = vst [vmem:[#allocation82_spill] sm:$0xff] %v10689_v50  ;;  %v6371_v60 = vrot.slane %v10689_v50, 7  ;;  %v6379_v23 = vrot.slane %v10689_v50, 6  ;;  %v6387_v53 = vrot.slane %v10689_v50, 5  ;;  %v6410_v57 = vsel %vm933_vm6, %v6406_v62, %v6386_v38 }
 0xe51   : > { %v7613_v0 = vpop.f32.mrf.mxu1  ;;  %v7608_v63 = vpop.f32.mrf.mxu0  ;;  %v6395_v10 = vrot.slane %v10689_v50, 4  ;;  %v6414_v29 = vsel %vm938_vm7, %v6410_v57, %v6394_v59 }
 0xe52   : > { %v6403_v33 = vsel %vm905_vm1, %v10689_v50, %v6371_v60 }
 0xe53   : > { %v6277_v51 = vpop.f32.mrf.mxu1  ;;  %v10698_v21 = vpop.f32.mrf.mxu0  ;;  %v6407_v41 = vsel %vm768_vm0, %v6403_v33, %v6379_v23 }
 0xe54   : > { %11818 = vst [vmem:[#allocation83_spill] sm:$0xff] %v10698_v21  ;;  %v6372_v54 = vrot.slane %v10698_v21, 7  ;;  %v6380_v14 = vrot.slane %v10698_v21, 6  ;;  %v6411_v26 = vsel %vm933_vm6, %v6407_v41, %v6387_v53  ;;  %v6388_v12 = vrot.slane %v10698_v21, 5  ;;  %v10731_v51 = vld [vmem:[%s8240_s29] sm:$0xff] }
 0xe55   : > { %v7614_v19 = vpop.f32.mrf.mxu1  ;;  %v7619_v47 = vpop.f32.mrf.mxu0  ;;  %v6415_v52 = vsel %vm938_vm7, %v6411_v26, %v6395_v10  ;;  %v6396_v42 = vrot.slane %v10698_v21, 4  ;;  %v10734_v41 = vld [vmem:[%s8247_s0] sm:$0xff]  ;;  %v10739_v10 = vld [vmem:[%s8240_s29 + $0x8] sm:$0xff] }
 0xe56   : > { %v6404_v39 = vsel %vm905_vm1, %v10698_v21, %v6372_v54  ;;  %v6418_v28 = vpack.c.bf16 %v6415_v52, %v6414_v29  ;;  %v655_v57 = vsub.f32 %v10731_v51, %v10734_v41  ;;  %v10742_v54 = vld [vmem:[%s8247_s0 + $0x8] sm:$0xff]  ;;  %v10747_v47 = vld [vmem:[%s8240_s29 + $0x10] sm:$0xff]  ;;  %v10810_v21 = vld [vmem:[%s8240_s29 + $0x38] sm:$0xff] }
 0xe57   : > { %v6408_v7 = vsel %vm768_vm0, %v6404_v39, %v6380_v14  ;;  %v10712_v48 = vpop.f32.mrf.mxu1  ;;  %v6320_v40 = vpop.f32.mrf.mxu0  ;;  %v656_v14 = vsub.f32 %v10739_v10, %v10742_v54 }
 0xe58   : > { %11819 = vst [vmem:[#allocation84_spill] sm:$0xff] %v10712_v48  ;;  %v6373_v37 = vrot.slane %v10712_v48, 7  ;;  %v6381_v45 = vrot.slane %v10712_v48, 6  ;;  %7629 = vmatprep.mubr.msk.bf16.mxu0 %vm6421_vm12, %v6418_v28  ;;  %v6389_v4 = vrot.slane %v10712_v48, 5  ;;  %v6412_v43 = vsel %vm933_vm6, %v6408_v7, %v6388_v12  ;;  %v10750_v12 = vld [vmem:[%s8247_s0 + $0x10] sm:$0xff]  ;;  %v10757_v7 = vld [vmem:[%s8240_s29 + $0x18] sm:$0xff] }
 0xe59   : > { %v7625_v18 = vpop.f32.mrf.mxu1  ;;  %v7620_v27 = vpop.f32.mrf.mxu0  ;;  %v6397_v60 = vrot.slane %v10712_v48, 4  ;;  %v6416_v63 = vsel %vm938_vm7, %v6412_v43, %v6396_v42  ;;  %v671_v19 = vmul.f32 %v655_v57, %v655_v57  ;;  %v672_v26 = vmul.f32 %v656_v14, %v656_v14  ;;  %v10760_v28 = vld [vmem:[%s8247_s0 + $0x18] sm:$0xff] }
 0xe5a   : > { %v6405_v38 = vsel %vm905_vm1, %v10712_v48, %v6373_v37  ;;  %v657_v39 = vsub.f32 %v10747_v47, %v10750_v12  ;;  %v658_v40 = vsub.f32 %v10757_v7, %v10760_v28  ;;  %v10766_v27 = vld [vmem:[%s8240_s29 + $0x20] sm:$0xff] }
 0xe5b   : > { %v6409_v23 = vsel %vm768_vm0, %v6405_v38, %v6381_v45  ;;  %v6363_v62 = vpop.f32.mrf.mxu1  ;;  %v688_v29 = vsel %vm687_vm2, %v671_v19, 0.0  ;;  %v689_v52 = vsel %vm687_vm2, %v672_v26, 0.0 }
 0xe5c   : > { %v6413_v0 = vsel %vm933_vm6, %v6409_v23, %v6389_v4  ;;  %v673_v37 = vmul.f32 %v657_v39, %v657_v39  ;;  %v690_v45 = vadd.f32 %v689_v52, %v688_v29  ;;  %v674_v42 = vmul.f32 %v658_v40, %v658_v40  ;;  %v10769_v4 = vld [vmem:[%s8247_s0 + $0x20] sm:$0xff] }
 0xe5d   : > { %v6417_v59 = vsel %vm938_vm7, %v6413_v0, %v6397_v60  ;;  %v7626_v33 = vpop.f32.mrf.mxu1  ;;  %v659_v38 = vsub.f32 %v10766_v27, %v10769_v4  ;;  %v10778_v0 = vld [vmem:[%s8240_s29 + $0x28] sm:$0xff]  ;;  %vm6934_vm6 = vcmask 49152  }
 0xe5e   : > { %v6419_v53 = vpack.c.bf16 %v6417_v59, %v6416_v63  ;;  %v691_v18 = vsel %vm687_vm2, %v673_v37, 0.0  ;;  %v693_v62 = vsel %vm687_vm2, %v674_v42, 0.0  ;;  %11820 = vst [vmem:[#allocation85_spill] sm:$0xff] %v10778_v0  ;;  %v10781_v63 = vld [vmem:[%s8247_s0 + $0x28] sm:$0xff]  ;;  %v10795_v37 = vld [vmem:[%s8240_s29 + $0x30] sm:$0xff] }
 0xe5f   : > { %v692_v60 = vadd.f32 %v691_v18, %v690_v45  ;;  %11821 = vst [vmem:[#allocation86_spill] sm:$0xff] %v10781_v63  ;;  %v660_v59 = vsub.f32 %v10778_v0, %v10781_v63  ;;  %v675_v33 = vmul.f32 %v659_v38, %v659_v38  ;;  %11822 = vst [vmem:[#allocation87_spill] sm:$0xff] %v10795_v37  ;;  %v10798_v45 = vld [vmem:[%s8247_s0 + $0x30] sm:$0xff]  ;;  %v10821_v63 = vld [vmem:[%s8240_s29 + $0x40] sm:$0xff] }
 0xe60   : > { %7630 = vmatmul.mubr.msk.bf16.vlgmr.msra.gmra.mxu0 %vm6421_vm12, %v6419_v53  ;;  %11823 = vst [vmem:[#allocation88_spill] sm:$0xff] %v10798_v45  ;;  %v661_v42 = vsub.f32 %v10795_v37, %v10798_v45  ;;  %v662_v45 = vsub.f32 %v10810_v21, %v10813_v20  ;;  %11824 = vst [vmem:[#allocation89_spill] sm:$0xff] %v10821_v63  ;;  %v10824_v0 = vld [vmem:[%s8247_s0 + $0x40] sm:$0xff] }
 0xe61   : > { %7641 = vmatprep.mubr.msk.bf16.mxu0 %vm7969_vm9, %v11808_v49  ;;  %v694_v26 = vadd.f32 %v693_v62, %v692_v60  ;;  %v676_v52 = vmul.f32 %v660_v59, %v660_v59  ;;  %v695_v40 = vsel %vm687_vm2, %v675_v33, 0.0  ;;  %11825 = vst [vmem:[#allocation90_spill] sm:$0xff] %v10824_v0 }
 0xe62   : > { %v677_v2 = vmul.f32 %v661_v42, %v661_v42 }
 0xe63   : > { %v696_v59 = vadd.f32 %v695_v40, %v694_v26  ;;  %v697_v50 = vsel %vm687_vm2, %v676_v52, 0.0 }
 0xe65   : > { %v698_v40 = vadd.f32 %v697_v50, %v696_v59 }
 0xf20   : > { %v10773_v43 = vpop.f32.mrf.mxu0 }
 0xf21   : > { %v6550_v23 = vrot.slane %v10773_v43, 1  ;;  %v6578_v52 = vrot.slane %v10773_v43, 4 }
 0xf22   : > { %v10785_v53 = vpop.f32.mrf.mxu0 }
 0xf23   : > { %v6548_v57 = vrot.slane %v10785_v53, 1  ;;  %v6558_v14 = vadd.f32 %v10773_v43, %v6550_v23  ;;  %v6576_v33 = vrot.slane %v10785_v53, 4 }
 0xf24   : > { %v10789_v19 = vpop.f32.mrf.mxu0 }
 0xf25   : > { %v6556_v39 = vadd.f32 %v6548_v57, %v10785_v53  ;;  %v6551_v29 = vrot.slane %v10789_v19, 1  ;;  %v6566_v60 = vrot.slane %v6558_v14, 2 }
 0xf26   : > { %v10802_v18 = vpop.f32.mrf.mxu0 }
 0xf27   : > { %v6564_v38 = vrot.slane %v6556_v39, 2  ;;  %v6549_v23 = vrot.slane %v10802_v18, 1  ;;  %v6559_v62 = vadd.f32 %v10789_v19, %v6551_v29  ;;  %v6574_v29 = vadd.f32 %v6566_v60, %v6558_v14 }
 0xf28   : > { %v663_v14 = vsub.f32 %v10821_v63, %v10824_v0  ;;  %v678_v60 = vmul.f32 %v662_v45, %v662_v45 }
 0xf29   : > { %v6572_v57 = vadd.f32 %v6564_v38, %v6556_v39  ;;  %v6557_v48 = vadd.f32 %v6549_v23, %v10802_v18  ;;  %v6567_v39 = vrot.slane %v6559_v62, 2  ;;  %v6577_v38 = vrot.slane %v10802_v18, 4 }
 0xf2a   : > { %v699_v23 = vsel %vm687_vm2, %v677_v2, 0.0  ;;  %v6586_v50 = vadd.f32 %v6578_v52, %v6574_v29  ;;  %v10830_v2 = vld [vmem:[%s8240_s29 + $0x48] sm:$0xff]  ;;  %v679_v45 = vmul.f32 %v663_v14, %v663_v14  ;;  %v701_v29 = vsel %vm687_vm2, %v678_v60, 0.0  ;;  %v10851_v60 = vld [vmem:[%s8247_s0 + $0x58] sm:$0xff] }
 0xf2b   : > { %v6584_v37 = vadd.f32 %v6576_v33, %v6572_v57  ;;  %v6565_v26 = vrot.slane %v6557_v48, 2  ;;  %v6575_v59 = vadd.f32 %v6567_v39, %v6559_v62  ;;  %v700_v57 = vadd.f32 %v699_v23, %v698_v40  ;;  %11826 = vst [vmem:[#allocation91_spill] sm:$0xff] %v10830_v2  ;;  %v10833_v33 = vld [vmem:[%s8247_s0 + $0x48] sm:$0xff]  ;;  %v10839_v39 = vld [vmem:[%s8240_s29 + $0x50] sm:$0xff]  ;;  %11831 = vst [vmem:[#allocation96_spill] sm:$0xff] %v10851_v60 }
 0xf2c   : > { %11827 = vst [vmem:[#allocation92_spill] sm:$0xff] %v10833_v33  ;;  %11828 = vst [vmem:[#allocation93_spill] sm:$0xff] %v10839_v39  ;;  %v703_v23 = vsel %vm687_vm2, %v679_v45, 0.0 }
 0xf2d   : > { %6592 = vrot.lane.b32.xlu0 %v6584_v37, %s7974_s21  ;;  %v6573_v42 = vadd.f32 %v6565_v26, %v6557_v48  ;;  %v6579_v48 = vrot.slane %v10789_v19, 4  ;;  %v664_v26 = vsub.f32 %v10830_v2, %v10833_v33  ;;  %v702_v62 = vadd.f32 %v701_v29, %v700_v57  ;;  %v10857_v29 = vld [vmem:[%s8240_s29 + $0x60] sm:$0xff] }
 0xf2e   : > { %11832 = vst [vmem:[#allocation97_spill] sm:$0xff] %v10857_v29 }
 0xf2f   : > { %v6585_v37 = vadd.f32 %v6577_v38, %v6573_v42  ;;  %v6587_v52 = vadd.f32 %v6579_v48, %v6575_v59  ;;  %v10842_v42 = vld [vmem:[%s8247_s0 + $0x50] sm:$0xff]  ;;  %v680_v38 = vmul.f32 %v664_v26, %v664_v26  ;;  %v704_v14 = vadd.f32 %v703_v23, %v702_v62  ;;  %v10860_v26 = vld [vmem:[%s8247_s0 + $0x60] sm:$0xff] }
 0xf30   : > { %11829 = vst [vmem:[#allocation94_spill] sm:$0xff] %v10842_v42  ;;  %v665_v40 = vsub.f32 %v10839_v39, %v10842_v42  ;;  %11833 = vst [vmem:[#allocation98_spill] sm:$0xff] %v10860_v26  ;;  %v667_v45 = vsub.f32 %v10857_v29, %v10860_v26  ;;  %v10875_v39 = vld [vmem:[%s8240_s29 + $0x70] sm:$0xff]  ;;  %v10884_v26 = vld [vmem:[%s8240_s29 + $0x78] sm:$0xff] }
 0xf31   : > { %6596 = vrot.lane.b32.xlu0 %v6586_v50, %s7974_s21  ;;  %6594 = vrot.lane.b32.xlu1 %v6585_v37, %s7974_s21  ;;  %v10848_v50 = vld [vmem:[%s8240_s29 + $0x58] sm:$0xff]  ;;  %v705_v48 = vsel %vm687_vm2, %v680_v38, 0.0  ;;  %11836 = vst [vmem:[#allocation101_spill] sm:$0xff] %v10875_v39  ;;  %v10878_v29 = vld [vmem:[%s8247_s0 + $0x70] sm:$0xff]  ;;  %11838 = vst [vmem:[#allocation103_spill] sm:$0xff] %v10884_v26 }
 0xf32   : > { %11830 = vst [vmem:[#allocation95_spill] sm:$0xff] %v10848_v50  ;;  %v666_v37 = vsub.f32 %v10848_v50, %v10851_v60  ;;  %v681_v59 = vmul.f32 %v665_v40, %v665_v40  ;;  %v706_v57 = vadd.f32 %v705_v48, %v704_v14  ;;  %v10866_v50 = vld [vmem:[%s8240_s29 + $0x68] sm:$0xff]  ;;  %v683_v14 = vmul.f32 %v667_v45, %v667_v45  ;;  %v10887_v42 = vld [vmem:[%s8247_s0 + $0x78] sm:$0xff] }
 0xf33   : > { %11834 = vst [vmem:[#allocation99_spill] sm:$0xff] %v10866_v50  ;;  %v10869_v40 = vld [vmem:[%s8247_s0 + $0x68] sm:$0xff]  ;;  %11837 = vst [vmem:[#allocation102_spill] sm:$0xff] %v10878_v29  ;;  %v670_v45 = vsub.f32 %v10884_v26, %v10887_v42 }
 0xf34   : > { %v707_v62 = vsel %vm687_vm2, %v681_v59, 0.0  ;;  %11835 = vst [vmem:[#allocation100_spill] sm:$0xff] %v10869_v40  ;;  %v668_v38 = vsub.f32 %v10866_v50, %v10869_v40  ;;  %11839 = vst [vmem:[#allocation104_spill] sm:$0xff] %v10887_v42 }
 0xf35   : > { %6598 = vrot.lane.b32.xlu1 %v6587_v52, %s7974_s21  ;;  %v682_v52 = vmul.f32 %v666_v37, %v666_v37  ;;  %v708_v23 = vadd.f32 %v707_v62, %v706_v57  ;;  %v669_v37 = vsub.f32 %v10875_v39, %v10878_v29  ;;  %v711_v57 = vsel %vm687_vm2, %v683_v14, 0.0  ;;  %v11841_v14 = vld [vmem:[#allocation70_spill] sm:$0xff]  ;;  %s619_s21 = scalar_lea.vmem [#allocation8], %s8236_s12 }
 0xf36   : > { %v684_v59 = vmul.f32 %v668_v38, %v668_v38  ;;  %v686_v50 = vmul.f32 %v670_v45, %v670_v45  ;;  %s6949_s29 = sshll.u32 %s619_s21, 4  ;;  %s6950_s29 = int_to_ptr.vmem [resolvable:$true] %s6949_s29 }
 0xf37   : > { %v709_v48 = vsel %vm687_vm2, %v682_v52, 0.0  ;;  %v685_v52 = vmul.f32 %v669_v37, %v669_v37  ;;  %v11843_v37 = vld [vmem:[#allocation71_spill] sm:$0xff] }
 0xf38   : > { %v710_v60 = vadd.f32 %v709_v48, %v708_v23  ;;  %v713_v23 = vsel %vm687_vm2, %v684_v59, 0.0  ;;  %v717_v38 = vsel %vm687_vm2, %v686_v50, 0.0  ;;  %v6485_v50 = vmul.f32 0.023647603, %v10802_v18 }
 0xf39   : > { %v715_v40 = vsel %vm687_vm2, %v685_v52, 0.0  ;;  %v6487_v59 = vmul.f32 0.023647603, %v10789_v19  ;;  %v6489_v52 = vmul.f32 0.030364122, %v10802_v18 }
 0xf3a   : > { %v712_v62 = vadd.f32 %v711_v57, %v710_v60  ;;  %v11840_v60 = vld [vmem:[#allocation46_spill] sm:$0xff]  ;;  %v11842_v57 = vld [vmem:[#allocation28_spill] sm:$0xff] }
 0xf3c   : > { %v714_v48 = vadd.f32 %v713_v23, %v712_v62  ;;  %v6497_v62 = vrot.slane %v6485_v50, 1  ;;  %v6490_v23 = vmul.f32 0.030364122, %v10773_v43 }
 0xf3e   : > { %v716_v2 = vadd.f32 %v715_v40, %v714_v48  ;;  %v6486_v40 = vmul.f32 0.023647603, %v10773_v43  ;;  %v6488_v48 = vmul.f32 0.030364122, %v10785_v53 }
 0xf40   : > { %v718_v39 = vadd.f32 %v717_v38, %v716_v2  ;;  %v11844_v2 = vld [vmem:[#allocation22_spill] sm:$0xff]  ;;  %v6498_v45 = vrot.slane %v6486_v40, 1  ;;  %v6509_v38 = vadd.f32 %v6497_v62, %v6489_v52 }
 0xf42   : > { %v6517_v50 = vrot.slane %v6509_v38, 2 }
 0xf59   : > { %719 = vadd.xlane.f32.xlu1 %v718_v39  ;;  %v11845_v39 = vld [vmem:[#allocation24_spill] sm:$0xff] }
 0xf6a   : > { %2580 = vrot.lane.b32.xlu1 %v11840_v60, %s7965_s22  ;;  %v6491_v60 = vmul.f32 0.030364122, %v10789_v19 }
 0xf6e   : > { %2558 = vrot.lane.b32.xlu1 %v11841_v14, %s7965_s22  ;;  %v6510_v14 = vadd.f32 %v6498_v45, %v6490_v23 }
 0xf72   : > { %2560 = vrot.lane.b32.xlu1 %v11842_v57, %s7965_s22  ;;  %v11847_v57 = vld [vmem:[#allocation27_spill] sm:$0xff] }
 0xf76   : > { %2562 = vrot.lane.b32.xlu1 %v11843_v37, %s7965_s22 }
 0xf7a   : > { %4291 = vrot.lane.b32.xlu1 %v10091_v1, %s7967_s1  ;;  %v11846_v1 = vld [vmem:[#allocation25_spill] sm:$0xff] }
 0xf7e   : > { %4307 = vrot.lane.b32.xlu1 %v10124_v3, %s7967_s1  ;;  %v6484_v3 = vmul.f32 0.023647603, %v10785_v53 }
 0xf82   : > { %2564 = vrot.lane.b32.xlu1 %v11844_v2, %s7965_s22 }
 0xf86   : > { %4295 = vrot.lane.b32.xlu1 %v10100_v36, %s7967_s1  ;;  %v6496_v36 = vrot.slane %v6484_v3, 1  ;;  %v6482_v3 = vmul.f32 0.011170336, %v10773_v43  ;;  %v11849_v43 = vld [vmem:[#allocation23_spill] sm:$0xff] }
 0xf88   : > { %v6508_v37 = vadd.f32 %v6496_v36, %v6488_v48  ;;  %v6483_v48 = vmul.f32 0.011170336, %v10789_v19 }
 0xf8a   : > { %2566 = vrot.lane.b32.xlu1 %v11845_v39, %s7965_s22  ;;  %v6481_v39 = vmul.f32 0.011170336, %v10802_v18  ;;  %v6516_v52 = vrot.slane %v6508_v37, 2  ;;  %v6535_v19 = vrot.slane %v6483_v48, 4 }
 0xf8c   : > { %v6505_v23 = vadd.f32 %v6497_v62, %v6481_v39  ;;  %v6534_v62 = vrot.slane %v6482_v3, 4 }
 0xf8e   : > { %4297 = vrot.lane.b32.xlu1 %v10097_v44, %s7967_s1  ;;  %v6499_v44 = vrot.slane %v6487_v59, 1  ;;  %v6518_v59 = vrot.slane %v6510_v14, 2 }
 0xf90   : > { %v6511_v2 = vadd.f32 %v6499_v44, %v6491_v60  ;;  %v6507_v42 = vadd.f32 %v6499_v44, %v6483_v48  ;;  %v11865_v48 = vld [vmem:[#allocation51_spill] sm:$0xff] }
 0xf92   : > { %2568 = vrot.lane.b32.xlu1 %v11846_v1, %s7965_s22  ;;  %v6480_v1 = vmul.f32 0.011170336, %v10785_v53  ;;  %v6519_v60 = vrot.slane %v6511_v2, 2 }
 0xf94   : > { %v6504_v38 = vadd.f32 %v6496_v36, %v6480_v1  ;;  %v6527_v26 = vadd.f32 %v6519_v60, %v6507_v42  ;;  %v6532_v37 = vrot.slane %v6480_v1, 4  ;;  %v11866_v60 = vld [vmem:[#allocation34_spill] sm:$0xff] }
 0xf96   : > { %4299 = vrot.lane.b32.xlu1 %v10106_v8, %s7967_s1  ;;  %v6650_v8 = vld [vmem:[%s11848_s10] sm:$0x3]  ;;  %v6524_v53 = vadd.f32 %v6516_v52, %v6504_v38  ;;  %v11863_v52 = vld [vmem:[#allocation48_spill] sm:$0xff]  ;;  %v11868_v38 = vld [vmem:[#allocation55_spill] sm:$0xff] }
 0xf97   : > { %v6658_v40 = vsel %vm768_vm0, %v6650_v8, 0  ;;  %v6525_v8 = vadd.f32 %v6517_v50, %v6505_v23  ;;  %v11864_v23 = vld [vmem:[#allocation49_spill] sm:$0xff] }
 0xf98   : > { %7634 = vmatpush3.bf16.msra.mxu1 %v6658_v40  ;;  %v6533_v40 = vrot.slane %v6481_v39, 4  ;;  %v6540_v63 = vadd.f32 %v6532_v37, %v6524_v53 }
 0xf99   : > { %7645 = vmatprep.subr.bf16.mxu1 %v11808_v49 }
 0xf9a   : > { %2570 = vrot.lane.b32.xlu1 %v11847_v57, %s7965_s22  ;;  %v6506_v57 = vadd.f32 %v6498_v45, %v6482_v3  ;;  %v6541_v29 = vadd.f32 %v6533_v40, %v6525_v8  ;;  %v6543_v45 = vadd.f32 %v6535_v19, %v6527_v26  ;;  %v11858_v26 = vld [vmem:[#allocation21_spill] sm:$0xff]  ;;  %v11861_v3 = vld [vmem:[#allocation26_spill] sm:$0xff] }
 0xf9b   : > { %v11871_v8 = vld [vmem:[#allocation33_spill] sm:$0xff] }
 0xf9c   : > { %v6526_v14 = vadd.f32 %v6518_v59, %v6506_v57  ;;  %v11869_v57 = vld [vmem:[#allocation36_spill] sm:$0xff]  ;;  %v11873_v40 = vld [vmem:[#allocation53_spill] sm:$0xff] }
 0xf9e   : > { %4301 = vrot.lane.b32.xlu1 %v10109_v11, %s7967_s1  ;;  %v6542_v33 = vadd.f32 %v6534_v62, %v6526_v14  ;;  %v11874_v62 = vld [vmem:[#allocation60_spill] sm:$0xff] }
 0xf9f   : > { %v6593_v18 = vpop.permute.xlu0 %6592 }
 0xfa0   : > { %v6604_v44 = vadd.f32 %v6593_v18, %v6540_v63  ;;  %v11851_v63 = vld [vmem:[#allocation47_spill] sm:$0xff] }
 0xfa1   : > { %v11867_v18 = vld [vmem:[#allocation31_spill] sm:$0xff] }
 0xfa2   : > { %2572 = vrot.lane.b32.xlu1 %v11849_v43, %s7965_s22 }
 0xfa3   : > { %v6595_v11 = vpop.permute.xlu1 %6594  ;;  %v6597_v2 = vpop.permute.xlu0 %6596 }
 0xfa4   : > { %v10941_v0 = vadd.f32 %v6595_v11, %v6541_v29  ;;  %v6606_v50 = vadd.f32 %v6597_v2, %v6542_v33  ;;  %v11852_v33 = vld [vmem:[#allocation64_spill] sm:$0xff]  ;;  %v11855_v29 = vld [vmem:[#allocation67_spill] sm:$0xff] }
 0xfa6   : > { %4303 = vrot.lane.b32.xlu1 %v10114_v6, %s7967_s1  ;;  %v6645_v42 = vcombine.low %v6604_v44, %v10941_v0  ;;  %v11850_v6 = vld [vmem:[#allocation63_spill] sm:$0xff] }
 0xfa7   : > { %v6599_v36 = vpop.permute.xlu1 %6598 }
 0xfa8   : > { %v10945_v59 = vadd.f32 %v6599_v36, %v6543_v45 }
 0xfaa   : > { %v6646_v39 = vcombine.low %v6606_v50, %v10945_v59  ;;  %5356 = vrot.lane.b32.xlu1 %v10449_v30, %s7971_s18  ;;  %v11853_v30 = vld [vmem:[#allocation65_spill] sm:$0xff] }
 0xfac   : > { %v6649_v1 = vpack.c.bf16 %v6646_v39, %v6645_v42 }
 0xfae   : > { %6652 = vrot.lane.b32.xlu0 %v6649_v1, %s7975_s13  ;;  %5364 = vrot.lane.b32.xlu1 %v10465_v16, %s7971_s18  ;;  %v11854_v16 = vld [vmem:[#allocation66_spill] sm:$0xff] }
 0xfb2   : > { %2544 = vrot.lane.b32.xlu0 %v11850_v6, %s7965_s22  ;;  %2574 = vrot.lane.b32.xlu1 %v11851_v63, %s7965_s22 }
 0xfb6   : > { %2546 = vrot.lane.b32.xlu0 %v11852_v33, %s7965_s22  ;;  %4305 = vrot.lane.b32.xlu1 %v10117_v25, %s7967_s1  ;;  %v11856_v25 = vld [vmem:[#allocation68_spill] sm:$0xff] }
 0xfba   : > { %2548 = vrot.lane.b32.xlu0 %v11853_v30, %s7965_s22  ;;  %5360 = vrot.lane.b32.xlu1 %v10458_v56, %s7971_s18  ;;  %v11857_v56 = vld [vmem:[#allocation69_spill] sm:$0xff] }
 0xfbe   : > { %2550 = vrot.lane.b32.xlu0 %v11854_v16, %s7965_s22  ;;  %5362 = vrot.lane.b32.xlu1 %v10455_v24, %s7971_s18  ;;  %v11859_v24 = vld [vmem:[#allocation30_spill] sm:$0xff] }
 0xfc2   : > { %2552 = vrot.lane.b32.xlu0 %v11855_v29, %s7965_s22  ;;  %6087 = vrot.lane.b32.xlu1 %v10636_v46, %s7973_s17  ;;  %v11860_v46 = vld [vmem:[#allocation52_spill] sm:$0xff] }
 0xfc6   : > { %2554 = vrot.lane.b32.xlu0 %v11856_v25, %s7965_s22  ;;  %6091 = vrot.lane.b32.xlu1 %v10647_v55, %s7973_s17  ;;  %v11862_v55 = vld [vmem:[#allocation32_spill] sm:$0xff] }
 0xfca   : > { %2556 = vrot.lane.b32.xlu0 %v11857_v56, %s7965_s22  ;;  %6612 = vrot.lane.b32.xlu1 %v6604_v44, %s7975_s13 }
 0xfce   : > { %2576 = vrot.lane.b32.xlu0 %v11858_v26, %s7965_s22  ;;  %6616 = vrot.lane.b32.xlu1 %v6606_v50, %s7975_s13 }
 0xfd2   : > { %2578 = vrot.lane.b32.xlu0 %v11859_v24, %s7965_s22 }
 0xfd6   : > { %2582 = vrot.lane.b32.xlu0 %v11860_v46, %s7965_s22 }
 0xfda   : > { %2584 = vrot.lane.b32.xlu0 %v11861_v3, %s7965_s22 }
 0xfde   : > { %2586 = vrot.lane.b32.xlu0 %v11862_v55, %s7965_s22 }
 0xfe2   : > { %2588 = vrot.lane.b32.xlu0 %v11863_v52, %s7965_s22 }
 0xfe6   : > { %2590 = vrot.lane.b32.xlu0 %v11864_v23, %s7965_s22 }
 0xfea   : > { %2592 = vrot.lane.b32.xlu0 %v11865_v48, %s7965_s22 }
 0xfee   : > { %2594 = vrot.lane.b32.xlu0 %v11866_v60, %s7965_s22  ;;  %v11875_v60 = vld [vmem:[#allocation85_spill] sm:$0xff] }
 0xff2   : > { %4293 = vrot.lane.b32.xlu0 %v10088_v5, %s7967_s1  ;;  %v11870_v5 = vld [vmem:[#allocation29_spill] sm:$0xff] }
 0xff6   : > { %4309 = vrot.lane.b32.xlu0 %v10127_v17, %s7967_s1  ;;  %v11018_v17 = vpop.xlane.xlu1 %719 }
 0xffa   : > { %2596 = vrot.lane.b32.xlu0 %v11867_v18, %s7965_s22 }
 0xffe   : > { %4311 = vrot.lane.b32.xlu0 %v10132_v13, %s7967_s1  ;;  %v2581_v13 = vpop.permute.xlu1 %2580 }
0x1002   : > { %2598 = vrot.lane.b32.xlu0 %v11868_v38, %s7965_s22  ;;  %v11026_v53 = vpop.permute.xlu1 %2558 }
0x1006   : > { %4313 = vrot.lane.b32.xlu0 %v10135_v9, %s7967_s1  ;;  %v11872_v9 = vld [vmem:[#allocation44_spill] sm:$0xff] }
0x100a   : > { %2600 = vrot.lane.b32.xlu0 %v11869_v57, %s7965_s22  ;;  %v11876_v57 = vld [vmem:[#allocation86_spill] sm:$0xff] }
0x100e   : > { %4315 = vrot.lane.b32.xlu0 %v10140_v34, %s7967_s1 }
0x1012   : > { %2602 = vrot.lane.b32.xlu0 %v11870_v5, %s7965_s22 }
0x1016   : > { %4317 = vrot.lane.b32.xlu0 %v10142_v32, %s7967_s1  ;;  %v11033_v32 = vpop.permute.xlu1 %2560 }
0x101a   : > { %2604 = vrot.lane.b32.xlu0 %v11871_v8, %s7965_s22  ;;  %v11039_v11 = vpop.permute.xlu1 %2562 }
0x101e   : > { %4319 = vrot.lane.b32.xlu0 %v11872_v9, %s7967_s1  ;;  %v11043_v19 = vpop.permute.xlu1 %4291 }
0x1020   : > { %v6653_v43 = vpop.permute.xlu0 %6652 }
0x1021   : > { %7636 = vmatmul.mubr.msk.bf16.vlgmr.msra.gmra.mxu1 %vm6421_vm12, %v6653_v43  ;;  %v11877_v43 = vld [vmem:[#allocation87_spill] sm:$0xff] }
0x1022   : > { %5358 = vrot.lane.b32.xlu0 %v10446_v31, %s7971_s18  ;;  %7647 = vmatprep.mubr.msk.bf16.mxu1 %vm7969_vm9, %v11808_v49 }
0x1024   : > { %v2545_v34 = vpop.permute.xlu0 %2544 }
0x1025   : > { %v2640_v42 = vsub.f32 %v10731_v51, %v2545_v34 }
0x1026   : > { %5366 = vrot.lane.b32.xlu0 %v10463_v61, %s7971_s18  ;;  %v11049_v61 = vpop.permute.xlu1 %4307 }
0x1028   : > { %v2547_v14 = vpop.permute.xlu0 %2546 }
0x1029   : > { %v2641_v63 = vsub.f32 %v10739_v10, %v2547_v14  ;;  %v11878_v14 = vld [vmem:[#allocation88_spill] sm:$0xff] }
0x102a   : > { %2606 = vrot.lane.b32.xlu0 %v11873_v40, %s7965_s22  ;;  %v11053_v44 = vpop.permute.xlu1 %2564 }
0x102c   : > { %v2549_v37 = vpop.permute.xlu0 %2548 }
0x102e   : > { %4321 = vrot.lane.b32.xlu0 %v11874_v62, %s7967_s1  ;;  %s6937_s1 = scalar_lea.sflag [#allocation4], %s8236_s12 }
0x1030   : > { %v2551_v31 = vpop.permute.xlu0 %2550 }
0x1032   : > { %5368 = vrot.lane.b32.xlu0 %v10471_v35, %s7971_s18  ;;  %v2642_v35 = vsub.f32 %v10747_v47, %v2549_v37 }
0x1034   : > { %v2553_v2 = vpop.permute.xlu0 %2552 }
0x1035   : > { %v2644_v24 = vsub.f32 %v10766_v27, %v2553_v2 }
0x1036   : > { %5370 = vrot.lane.b32.xlu0 %v10469_v22, %s7971_s18  ;;  %v2658_v22 = vsub.f32 %v10750_v12, %v2581_v13  ;;  %s11927_s18 = sld [smem:[#allocation112_spill]] }
0x1038   : > { %v2555_v45 = vpop.permute.xlu0 %2554  ;;  %v2674_v33 = vsub.f32 %v2642_v35, %v2658_v22 }
0x1039   : > { %v2645_v18 = vsub.f32 %v11875_v60, %v2555_v45 }
0x103a   : > { %6089 = vrot.lane.b32.xlu0 %v10634_v15, %s7973_s17  ;;  %v11063_v15 = vpop.permute.xlu1 %4295  ;;  %v2690_v30 = vand.u32 2147483647, %v2674_v33 }
0x103c   : > { %v2557_v36 = vpop.permute.xlu0 %2556 }
0x103e   : > { %6093 = vrot.lane.b32.xlu0 %v10645_v58, %s7973_s17  ;;  %v11071_v29 = vpop.permute.xlu1 %2566 }
0x1040   : > { %v2577_v50 = vpop.permute.xlu0 %2576 }
0x1041   : > { %v2656_v39 = vsub.f32 %v10734_v41, %v2577_v50 }
0x1042   : > { %6614 = vrot.lane.b32.xlu0 %v10941_v0, %s7975_s13  ;;  %v2643_v0 = vsub.f32 %v10757_v7, %v2551_v31  ;;  %v11079_v52 = vpop.permute.xlu1 %4297 }
0x1043   : > { %v2672_v1 = vsub.f32 %v2640_v42, %v2656_v39 }
0x1044   : > { %v2579_v6 = vpop.permute.xlu0 %2578 }
0x1045   : > { %v2657_v58 = vsub.f32 %v10742_v54, %v2579_v6  ;;  %v2688_v51 = vand.u32 2147483647, %v2672_v1 }
0x1046   : > { %6618 = vrot.lane.b32.xlu0 %v10945_v59, %s7975_s13  ;;  %v2707_v59 = vsel %vm687_vm2, %v2690_v30, 0.0  ;;  %v11086_v37 = vpop.permute.xlu1 %2568  ;;  %s11929_s13 = sld [smem:[#allocation113_spill]] }
0x1047   : > { %v2673_v47 = vsub.f32 %v2641_v63, %v2657_v58  ;;  %v2704_v25 = vsel %vm687_vm2, %v2688_v51, 0.0 }
0x1048   : > { %v2583_v41 = vpop.permute.xlu0 %2582 }
0x1049   : > { %v2689_v16 = vand.u32 2147483647, %v2673_v47  ;;  %v2659_v12 = vsub.f32 %v10760_v28, %v2583_v41 }
0x104a   : > { %v11090_v35 = vpop.permute.xlu1 %4299 }
0x104b   : > { %v2705_v10 = vsel %vm687_vm2, %v2689_v16, 0.0  ;;  %v2675_v56 = vsub.f32 %v2643_v0, %v2659_v12 }
0x104c   : > { %v2706_v54 = vadd.f32 %v2705_v10, %v2704_v25  ;;  %v2585_v26 = vpop.permute.xlu0 %2584  ;;  %s6947_s22 = scalar_lea.hbm %s11929_s13, %s7175_s14 }
0x104d   : > { %v2691_v46 = vand.u32 2147483647, %v2675_v56  ;;  %v2660_v3 = vsub.f32 %v10769_v4, %v2585_v26  ;;  %v2646_v4 = vsub.f32 %v11877_v43, %v2557_v36  ;;  %v11879_v26 = vld [vmem:[#allocation57_spill] sm:$0xff] }
0x104e   : > { %v2708_v7 = vadd.f32 %v2707_v59, %v2706_v54  ;;  %v11094_v36 = vpop.permute.xlu1 %2570  ;;  %v4347_v59 = vsub.f32 %v11879_v26, %v11049_v61  ;;  %v11884_v61 = vld [vmem:[#allocation91_spill] sm:$0xff] }
0x104f   : > { %v2709_v55 = vsel %vm687_vm2, %v2691_v46, 0.0  ;;  %v2676_v28 = vsub.f32 %v2644_v24, %v2660_v3  ;;  %v2647_v46 = vsub.f32 %v10810_v21, %v11026_v53  ;;  %v11880_v3 = vld [vmem:[#allocation90_spill] sm:$0xff] }
0x1050   : > { %v2710_v23 = vadd.f32 %v2709_v55, %v2708_v7  ;;  %v2587_v48 = vpop.permute.xlu0 %2586  ;;  %v11881_v55 = vld [vmem:[#allocation20_spill] sm:$0xff] }
0x1051   : > { %v2692_v38 = vand.u32 2147483647, %v2676_v28  ;;  %v2661_v5 = vsub.f32 %v11876_v57, %v2587_v48  ;;  %v4339_v28 = vsub.f32 %v11881_v55, %v11043_v19  ;;  %v2649_v57 = vsub.f32 %v11884_v61, %v11039_v11  ;;  %v11889_v11 = vld [vmem:[#allocation58_spill] sm:$0xff] }
0x1052   : > { %v11096_v63 = vpop.permute.xlu1 %4301 }
0x1053   : > { %v2711_v13 = vsel %vm687_vm2, %v2692_v38, 0.0  ;;  %v2677_v8 = vsub.f32 %v2645_v18, %v2661_v5  ;;  %v11883_v18 = vld [vmem:[#allocation89_spill] sm:$0xff]  ;;  %v11123_v5 = vsub.f32 %v4339_v28, %v4347_v59 }
0x1054   : > { %v2712_v27 = vadd.f32 %v2711_v13, %v2710_v23  ;;  %v2589_v9 = vpop.permute.xlu0 %2588  ;;  %v11882_v23 = vld [vmem:[#allocation92_spill] sm:$0xff]  ;;  %v11885_v13 = vld [vmem:[#allocation94_spill] sm:$0xff] }
0x1055   : > { %v2693_v34 = vand.u32 2147483647, %v2677_v8  ;;  %v2662_v40 = vsub.f32 %v11878_v14, %v2589_v9  ;;  %v11886_v8 = vld [vmem:[#allocation93_spill] sm:$0xff] }
0x1056   : > { %v11098_v51 = vpop.permute.xlu1 %2572 }
0x1057   : > { %v2713_v62 = vsel %vm687_vm2, %v2693_v34, 0.0  ;;  %v2678_v31 = vsub.f32 %v2646_v4, %v2662_v40  ;;  %v11887_v34 = vld [vmem:[#allocation59_spill] sm:$0xff] }
0x1058   : > { %v2714_v2 = vadd.f32 %v2713_v62, %v2712_v27  ;;  %v2591_v45 = vpop.permute.xlu0 %2590  ;;  %v2650_v27 = vsub.f32 %v11886_v8, %v11053_v44  ;;  %v4363_v62 = vand.u32 2147483647, %v11123_v5  ;;  %v11891_v44 = vld [vmem:[#allocation38_spill] sm:$0xff] }
0x1059   : > { %v2694_v50 = vand.u32 2147483647, %v2678_v31  ;;  %v2663_v54 = vsub.f32 %v10813_v20, %v2591_v45  ;;  %v2648_v20 = vsub.f32 %v11883_v18, %v11033_v32  ;;  %v11888_v32 = vld [vmem:[#allocation96_spill] sm:$0xff]  ;;  %v4341_v31 = vsub.f32 %v11889_v11, %v11063_v15 }
0x105a   : > { %v11100_v41 = vpop.permute.xlu1 %4303 }
0x105b   : > { %v2715_v42 = vsel %vm687_vm2, %v2694_v50, 0.0  ;;  %v2679_v38 = vsub.f32 %v2647_v46, %v2663_v54  ;;  %v11893_v54 = vld [vmem:[#allocation98_spill] sm:$0xff] }
0x105c   : > { %v11092_v39 = vadd.f32 %v2715_v42, %v2714_v2  ;;  %v2593_v22 = vpop.permute.xlu0 %2592  ;;  %v11890_v2 = vld [vmem:[#allocation95_spill] sm:$0xff] }
0x105d   : > { %v2664_v7 = vsub.f32 %v11880_v3, %v2593_v22  ;;  %v2695_v4 = vand.u32 2147483647, %v2679_v38  ;;  %v2651_v45 = vsub.f32 %v11890_v2, %v11071_v29 }
0x105e   : > { %v11102_v16 = vpop.permute.xlu1 %5356 }
0x105f   : > { %v2680_v53 = vsub.f32 %v2648_v20, %v2664_v7  ;;  %v11896_v7 = vld [vmem:[#allocation61_spill] sm:$0xff]  ;;  %v2717_v29 = vsel %vm687_vm2, %v2695_v4, 0.0 }
0x1060   : > { %v2595_v1 = vpop.permute.xlu0 %2594  ;;  %v2718_v8 = vadd.f32 %v2717_v29, %v11092_v39 }
0x1061   : > { %v2665_v48 = vsub.f32 %v11882_v23, %v2595_v1  ;;  %v2696_v42 = vand.u32 2147483647, %v2680_v53  ;;  %v11892_v1 = vld [vmem:[#allocation56_spill] sm:$0xff]  ;;  %v11902_v53 = vld [vmem:[#allocation101_spill] sm:$0xff] }
0x1062   : > { %v11104_v25 = vpop.permute.xlu1 %5364 }
0x1063   : > { %v2681_v9 = vsub.f32 %v2649_v57, %v2665_v48  ;;  %v11897_v48 = vld [vmem:[#allocation100_spill] sm:$0xff] }
0x1064   : > { %v4294_v6 = vpop.permute.xlu0 %4293 }
0x1065   : > { %v4340_v22 = vsub.f32 %v11891_v44, %v4294_v6  ;;  %v2697_v3 = vand.u32 2147483647, %v2681_v9 }
0x1066   : > { %v11109_v24 = vpop.permute.xlu1 %2574 }
0x1068   : > { %v4310_v33 = vpop.permute.xlu0 %4309 }
0x1069   : > { %v4348_v14 = vsub.f32 %v11887_v34, %v4310_v33  ;;  %v11894_v33 = vld [vmem:[#allocation54_spill] sm:$0xff] }
0x106a   : > { %v11128_v19 = vpop.permute.xlu1 %4305  ;;  %v4342_v59 = vsub.f32 %v11894_v33, %v11079_v52 }
0x106b   : > { %v4356_v28 = vsub.f32 %v4340_v22, %v4348_v14 }
0x106c   : > { %v2597_v58 = vpop.permute.xlu0 %2596 }
0x106d   : > { %v2666_v21 = vsub.f32 %v11885_v13, %v2597_v58  ;;  %v11901_v13 = vld [vmem:[#allocation102_spill] sm:$0xff]  ;;  %v4364_v9 = vand.u32 2147483647, %v4356_v28 }
0x106e   : > { %v11151_v52 = vpop.permute.xlu1 %5360 }
0x106f   : > { %v2682_v50 = vsub.f32 %v2650_v27, %v2666_v21 }
0x1070   : > { %v4312_v47 = vpop.permute.xlu0 %4311 }
0x1071   : > { %v4349_v58 = vsub.f32 %v11892_v1, %v4312_v47  ;;  %v11898_v47 = vld [vmem:[#allocation50_spill] sm:$0xff]  ;;  %v2698_v38 = vand.u32 2147483647, %v2682_v50 }
0x1072   : > { %v4343_v18 = vsub.f32 %v11898_v47, %v11090_v35  ;;  %v2721_v35 = vsel %vm687_vm2, %v2697_v3, 0.0  ;;  %v11168_v22 = vpop.permute.xlu1 %5362 }
0x1073   : > { %v4357_v57 = vsub.f32 %v4341_v31, %v4349_v58 }
0x1074   : > { %v2599_v30 = vpop.permute.xlu0 %2598 }
0x1075   : > { %v2667_v40 = vsub.f32 %v11888_v32, %v2599_v30  ;;  %v11895_v30 = vld [vmem:[#allocation97_spill] sm:$0xff]  ;;  %v11904_v32 = vld [vmem:[#allocation35_spill] sm:$0xff] }
0x1076   : > { %v2652_v46 = vsub.f32 %v11895_v30, %v11086_v37  ;;  %v11900_v37 = vld [vmem:[#allocation43_spill] sm:$0xff] }
0x1077   : > { %v2683_v23 = vsub.f32 %v2651_v45, %v2667_v40  ;;  %v4344_v40 = vsub.f32 %v11904_v32, %v11096_v63  ;;  %v11905_v45 = vld [vmem:[#allocation37_spill] sm:$0xff] }
0x1078   : > { %v4314_v0 = vpop.permute.xlu0 %4313 }
0x1079   : > { %v4350_v15 = vsub.f32 %v11896_v7, %v4314_v0  ;;  %v2719_v0 = vsel %vm687_vm2, %v2696_v42, 0.0  ;;  %v2699_v4 = vand.u32 2147483647, %v2683_v23  ;;  %v11906_v42 = vld [vmem:[#allocation40_spill] sm:$0xff] }
0x107a   : > { %v2720_v11 = vadd.f32 %v2719_v0, %v2718_v8  ;;  %v4345_v44 = vsub.f32 %v11906_v42, %v11100_v41  ;;  %v6088_v0 = vpop.permute.xlu1 %6087 }
0x107b   : > { %v4358_v27 = vsub.f32 %v4342_v59, %v4350_v15  ;;  %v2725_v63 = vsel %vm687_vm2, %v2699_v4, 0.0  ;;  %v4371_v59 = vsel %vm3451_vm8, %v4363_v62, 0.0  ;;  %v11908_v62 = vld [vmem:[#allocation74_spill] sm:$0xff] }
0x107c   : > { %v2601_v12 = vpop.permute.xlu0 %2600  ;;  %v2722_v1 = vadd.f32 %v2721_v35, %v2720_v11  ;;  %v11912_v35 = vld [vmem:[#allocation41_spill] sm:$0xff]  ;;  %v11914_v11 = vld [vmem:[#allocation42_spill] sm:$0xff] }
0x107d   : > { %v2668_v26 = vsub.f32 %v11893_v54, %v2601_v12  ;;  %v11899_v12 = vld [vmem:[#allocation99_spill] sm:$0xff]  ;;  %v4366_v58 = vand.u32 2147483647, %v4358_v27  ;;  %v4372_v54 = vsel %vm3451_vm8, %v4364_v9, 0.0  ;;  %v5380_v27 = vsub.f32 %v11912_v35, %v11102_v16  ;;  %v11913_v9 = vld [vmem:[#allocation62_spill] sm:$0xff] }
0x107e   : > { %v2653_v20 = vsub.f32 %v11899_v12, %v11094_v36  ;;  %v4373_v28 = vadd.f32 %v4372_v54, %v4371_v59  ;;  %v4346_v4 = vsub.f32 %v11913_v9, %v11128_v19  ;;  %v11916_v54 = vld [vmem:[#allocation75_spill] sm:$0xff] }
0x107f   : > { %v2684_v5 = vsub.f32 %v2652_v46, %v2668_v26 }
0x1080   : > { %v4316_v10 = vpop.permute.xlu0 %4315 }
0x1081   : > { %v4351_v61 = vsub.f32 %v11900_v37, %v4316_v10  ;;  %v11903_v10 = vld [vmem:[#allocation39_spill] sm:$0xff]  ;;  %v2700_v2 = vand.u32 2147483647, %v2684_v5  ;;  %v11910_v37 = vld [vmem:[#allocation73_spill] sm:$0xff] }
0x1083   : > { %v4359_v31 = vsub.f32 %v4343_v18, %v4351_v61  ;;  %v2727_v7 = vsel %vm687_vm2, %v2700_v2, 0.0  ;;  %v5384_v61 = vsub.f32 %v11910_v37, %v11104_v25 }
0x1084   : > { %v2603_v56 = vpop.permute.xlu0 %2602 }
0x1085   : > { %v2669_v6 = vsub.f32 %v11897_v48, %v2603_v56  ;;  %v2654_v56 = vsub.f32 %v11902_v53, %v11098_v51  ;;  %v4365_v51 = vand.u32 2147483647, %v4357_v57  ;;  %v4367_v46 = vand.u32 2147483647, %v4359_v31  ;;  %v11911_v53 = vld [vmem:[#allocation45_spill] sm:$0xff] }
0x1086   : > { %v4376_v48 = vsel %vm3451_vm8, %v4366_v58, 0.0  ;;  %v5388_v2 = vsub.f32 %v5380_v27, %v5384_v61  ;;  %v11923_v27 = vld [vmem:[#allocation83_spill] sm:$0xff] }
0x1087   : > { %v2685_v34 = vsub.f32 %v2653_v20, %v2669_v6  ;;  %v4374_v3 = vsel %vm3451_vm8, %v4365_v51, 0.0  ;;  %v11909_v20 = vld [vmem:[#allocation104_spill] sm:$0xff] }
0x1088   : > { %v11117_v60 = vpop.permute.xlu0 %4317  ;;  %v4375_v57 = vadd.f32 %v4374_v3, %v4373_v28 }
0x1089   : > { %v4352_v14 = vsub.f32 %v11903_v10, %v11117_v60  ;;  %v2701_v26 = vand.u32 2147483647, %v2685_v34 }
0x108a   : > { %v4377_v34 = vadd.f32 %v4376_v48, %v4375_v57  ;;  %v11919_v48 = vld [vmem:[#allocation80_spill] sm:$0xff] }
0x108b   : > { %v4360_v33 = vsub.f32 %v4344_v40, %v4352_v14  ;;  %v2729_v47 = vsel %vm687_vm2, %v2701_v26, 0.0 }
0x108c   : > { %v2605_v43 = vpop.permute.xlu0 %2604 }
0x108d   : > { %v2670_v21 = vsub.f32 %v11901_v13, %v2605_v43  ;;  %v2723_v43 = vsel %vm687_vm2, %v2698_v38, 0.0  ;;  %v4368_v18 = vand.u32 2147483647, %v4360_v33  ;;  %v5392_v33 = vand.u32 2147483647, %v5388_v2  ;;  %v11925_v2 = vld [vmem:[#allocation82_spill] sm:$0xff] }
0x108e   : > { %v2724_v30 = vadd.f32 %v2723_v43, %v2722_v1 }
0x108f   : > { %v2686_v39 = vsub.f32 %v2654_v56, %v2670_v21  ;;  %v4380_v14 = vsel %vm3451_vm8, %v4368_v18, 0.0 }
0x1090   : > { %v4320_v55 = vpop.permute.xlu0 %4319  ;;  %v2726_v23 = vadd.f32 %v2725_v63, %v2724_v30 }
0x1091   : > { %v4353_v50 = vsub.f32 %v11905_v45, %v4320_v55  ;;  %v2702_v41 = vand.u32 2147483647, %v2686_v39  ;;  %v11907_v55 = vld [vmem:[#allocation103_spill] sm:$0xff]  ;;  %v6092_v45 = vpop.permute.xlu1 %6091 }
0x1092   : > { %v2655_v29 = vsub.f32 %v11907_v55, %v11109_v24  ;;  %v2728_v5 = vadd.f32 %v2727_v7, %v2726_v23  ;;  %v4378_v24 = vsel %vm3451_vm8, %v4367_v46, 0.0  ;;  %v11917_v7 = vld [vmem:[#allocation72_spill] sm:$0xff]  ;;  %v5396_v23 = vsel %vm4872_vm10, %v5392_v33, 0.0 }
0x1093   : > { %v4361_v15 = vsub.f32 %v4345_v44, %v4353_v50  ;;  %v2731_v13 = vsel %vm687_vm2, %v2702_v41, 0.0  ;;  %v4379_v31 = vadd.f32 %v4378_v24, %v4377_v34  ;;  %v11915_v44 = vld [vmem:[#allocation19_spill] sm:$0xff]  ;;  %v5383_v41 = vsub.f32 %v11917_v7, %v11168_v22  ;;  %v6707_v7 = vld [vmem:[%s11927_s18] sm:$0x1]  ;;  %s7886_s18 = scalar_lea.vmem %s6950_s29, 16 }
0x1094   : > { %v5359_v36 = vpop.permute.xlu0 %5358  ;;  %v2730_v10 = vadd.f32 %v2729_v47, %v2728_v5  ;;  %v5382_v1 = vsub.f32 %v11915_v44, %v11151_v52  ;;  %v721_v34 = vrot.slane %v11018_v17, 4  ;;  %p7887_p0 = scmp.ne.s32.totalorder %s6950_s29, %s7886_s18 }
0x1095   : > { %v4369_v21 = vand.u32 2147483647, %v4361_v15  ;;  %v5381_v56 = vsub.f32 %v11911_v53, %v5359_v36  ;;  %v4381_v50 = vadd.f32 %v4380_v14, %v4379_v31  ;;  %v6613_v28 = vpop.permute.xlu1 %6612 }
0x1096   : > { %v2732_v51 = vadd.f32 %v2731_v13, %v2730_v10  ;;  %v11924_v10 = vld [vmem:[#allocation81_spill] sm:$0xff]  ;;  %p7888_p9 = pnand %p7887_p0, %p11930_p8 }
0x1097   : > { %v4382_v36 = vsel %vm3451_vm8, %v4369_v21, 0.0  ;;  %v11921_v21 = vld [vmem:[#allocation77_spill] sm:$0xff] }
0x1098   : > { %v5367_v60 = vpop.permute.xlu0 %5366  ;;  %v4383_v26 = vadd.f32 %v4382_v36, %v4381_v50  ;;  %p7889_p10 = pneg %p7888_p9 }
0x1099   : > { %v5385_v12 = vsub.f32 %v11908_v62, %v5367_v60  ;;  %v6617_v5 = vpop.permute.xlu1 %6616 }
0x109a   : > { %v6626_v9 = vsub.f32 %v11923_v27, %v6617_v5 }
0x109b   : > { %v5389_v32 = vsub.f32 %v5381_v56, %v5385_v12  ;;  %v11922_v56 = vld [vmem:[#allocation79_spill] sm:$0xff] }
0x109c   : > { %v2607_v6 = vpop.permute.xlu0 %2606 }
0x109d   : > { %v2671_v38 = vsub.f32 %v11909_v20, %v2607_v6  ;;  %v5393_v58 = vand.u32 2147483647, %v5389_v32  ;;  %v6101_v6 = vsub.f32 %v11919_v48, %v6092_v45  ;;  %v11920_v20 = vld [vmem:[#allocation78_spill] sm:$0xff] }
0x109f   : > { %v2687_v8 = vsub.f32 %v2655_v29, %v2671_v38  ;;  %v5397_v15 = vsel %vm4872_vm10, %v5393_v58, 0.0  ;;  %v11918_v29 = vld [vmem:[#allocation76_spill] sm:$0xff]  ;;  %v6099_v38 = vsub.f32 %v11920_v20, %v6088_v0 }
0x10a0   : > { %v4322_v25 = vpop.permute.xlu0 %4321  ;;  %v5398_v62 = vadd.f32 %v5397_v15, %v5396_v23 }
0x10a1   : > { %v2703_v40 = vand.u32 2147483647, %v2687_v8  ;;  %v4354_v43 = vsub.f32 %v11914_v11, %v4322_v25  ;;  %v6103_v61 = vsub.f32 %v6099_v38, %v6101_v6  ;;  %v6624_v25 = vsub.f32 %v11924_v10, %v6613_v28 }
0x10a3   : > { %v4362_v39 = vsub.f32 %v4346_v4, %v4354_v43  ;;  %v2733_v16 = vsel %vm687_vm2, %v2703_v40, 0.0  ;;  %v6105_v35 = vand.u32 2147483647, %v6103_v61  ;;  %v6628_v32 = vsub.f32 %v6624_v25, %v6626_v9 }
0x10a4   : > { %v5369_v19 = vpop.permute.xlu0 %5368  ;;  %v2734_v42 = vadd.f32 %v2733_v16, %v2732_v51  ;;  %v722_v43 = vadd.f32 %v721_v34, %v11018_v17 }
0x10a5   : > { %v4370_v60 = vand.u32 2147483647, %v4362_v39  ;;  %v5386_v63 = vsub.f32 %v11916_v54, %v5369_v19  ;;  %v6107_v40 = vsel %vm5778_vm11, %v6105_v35, 0.0  ;;  %v11926_v39 = vld [vmem:[#allocation84_spill] sm:$0xff]  ;;  %v6630_v45 = vand.u32 2147483647, %v6628_v32 }
0x10a6   : > { %2735 = vadd.xlane.f32.xlu1 %v2734_v42  ;;  %v723_v19 = vrot.slane %v722_v43, 2 }
0x10a7   : > { %v5390_v59 = vsub.f32 %v5382_v1, %v5386_v63  ;;  %v4384_v30 = vsel %vm3451_vm8, %v4370_v60, 0.0  ;;  %v6633_v44 = vsel %vm6632_vm13, %v6630_v45, 0.0 }
0x10a8   : > { %v5371_v46 = vpop.permute.xlu0 %5370  ;;  %v4385_v3 = vadd.f32 %v4384_v30, %v4383_v26  ;;  %v724_v60 = vadd.f32 %v723_v19, %v722_v43 }
0x10a9   : > { %v5394_v55 = vand.u32 2147483647, %v5390_v59  ;;  %v5387_v52 = vsub.f32 %v11918_v29, %v5371_v46 }
0x10aa   : > { %4386 = vadd.xlane.f32.xlu0 %v4385_v3  ;;  %v725_v54 = vrot.slane %v724_v60, 1 }
0x10ab   : > { %v5399_v47 = vsel %vm4872_vm10, %v5394_v55, 0.0  ;;  %v5391_v18 = vsub.f32 %v5383_v41, %v5387_v52 }
0x10ac   : > { %v6090_v12 = vpop.permute.xlu0 %6089  ;;  %v5400_v22 = vadd.f32 %v5399_v47, %v5398_v62  ;;  %v726_v63 = vadd.f32 %v725_v54, %v724_v60 }
0x10ad   : > { %v5395_v37 = vand.u32 2147483647, %v5391_v18  ;;  %v6100_v53 = vsub.f32 %v11921_v21, %v6090_v12 }
0x10ae   : > { %7666 = vpush %v726_v63 }
0x10af   : > { %v5401_v57 = vsel %vm4872_vm10, %v5395_v37, 0.0 }
0x10b0   : > { %v6094_v24 = vpop.permute.xlu0 %6093  ;;  %v5402_v13 = vadd.f32 %v5401_v57, %v5400_v22 }
0x10b1   : > { %v6102_v8 = vsub.f32 %v11922_v56, %v6094_v24 }
0x10b2   : > { %5403 = vadd.xlane.f32.xlu0 %v5402_v13 }
0x10b3   : > { %v6104_v4 = vsub.f32 %v6100_v53, %v6102_v8 }
0x10b4   : > { %v6615_v0 = vpop.permute.xlu0 %6614 }
0x10b5   : > { %v6106_v14 = vand.u32 2147483647, %v6104_v4  ;;  %v6625_v36 = vsub.f32 %v11925_v2, %v6615_v0 }
0x10b7   : > { %v6108_v11 = vsel %vm5778_vm11, %v6106_v14, 0.0 }
0x10b8   : > { %v6619_v31 = vpop.permute.xlu0 %6618  ;;  %v6109_v51 = vadd.f32 %v6108_v11, %v6107_v40 }
0x10b9   : > { %v6627_v16 = vsub.f32 %v11926_v39, %v6619_v31 }
0x10ba   : > { %6110 = vadd.xlane.f32.xlu1 %v6109_v51 }
0x10bb   : > { %v6629_v50 = vsub.f32 %v6625_v36, %v6627_v16 }
0x10bd   : > { %v6631_v42 = vand.u32 2147483647, %v6629_v50 }
0x10bf   : > { %v6634_v1 = vsel %vm6632_vm13, %v6631_v42, 0.0 }
0x10c0   : > { %v6635_v58 = vadd.f32 %v6634_v1, %v6633_v44 }
0x10c2   : > { %6636 = vadd.xlane.f32.xlu0 %v6635_v58 }
0x10df   : > { %s11234_s23 = spop %7666 }
0x10e1   : > { %v6694_v17 = vpop.f32.mrf.mxu1 }
0x10e2   : > { %v6703_v26 = vcombine.high %v6694_v17, %v6694_v17  ;;  %v6708_v33 = vpack.c.bf16 %v6694_v17, %v6694_v17 }
0x10e3   : > { %v7637_v59 = vpop.f32.mrf.mxu1 }
0x10e4   : > { %v6709_v30 = vpack.c.bf16 %v6703_v26, %v6703_v26  ;;  %v6716_v46 = vsel %vm768_vm0, %v6708_v33, 0 }
0x10e5   : > { %v6697_v3 = vpop.f32.mrf.mxu1  ;;  %7640 = vmatpush3.bf16.msra.mxu0 %v6716_v46 }
0x10e6   : > { %v6704_v41 = vcombine.high %v6697_v3, %v6697_v3  ;;  %v6710_v15 = vpack.c.bf16 %v6697_v3, %v6697_v3  ;;  %v6759_v55 = vsel %vm768_vm0, %v6709_v30, 0  ;;  %7651 = vmatprep.subr.bf16.mxu0 %v11808_v49 }
0x10e7   : > { %v7638_v29 = vpop.f32.mrf.mxu1  ;;  %7646 = vmatpush3.bf16.msra.mxu1 %v6759_v55 }
0x10e8   : > { %v6711_v52 = vpack.c.bf16 %v6704_v41, %v6704_v41  ;;  %7642 = vmatmul.mubr.msk.bf16.vlgmr.msra.gmra.mxu0 %vm6421_vm12, %v6707_v7  ;;  %v6802_v28 = vsel %vm768_vm0, %v6710_v15, 0  ;;  %7657 = vmatprep.subr.bf16.mxu1 %v11808_v49 }
0x10e9   : > { %7652 = vmatpush3.bf16.msra.mxu0 %v6802_v28  ;;  %7653 = vmatprep.mubr.msk.bf16.mxu0 %vm7969_vm9, %v11808_v49 }
0x10ea   : > { %7648 = vmatmul.mubr.msk.bf16.vlgmr.msra.gmra.mxu1 %vm6421_vm12, %v6707_v7  ;;  %v6845_v23 = vsel %vm768_vm0, %v6711_v52, 0 }
0x10eb   : > { %7658 = vmatpush3.bf16.msra.mxu1 %v6845_v23  ;;  %7659 = vmatprep.mubr.msk.bf16.mxu1 %vm7969_vm9, %v11808_v49 }
0x10f0   : > { %7654 = vmatmul.mubr.msk.bf16.vlgmr.msra.gmra.mxu0 %vm6421_vm12, %v6707_v7 }
0x10f2   : > { %7660 = vmatmul.mubr.msk.bf16.vlgmr.msra.gmra.mxu1 %vm6421_vm12, %v6707_v7 }
0x112f   : > { %v2736_v48 = vpop.xlane.xlu1 %2735 }
0x1130   : > { %v2737_v6 = vrot.slane %v2736_v48, 4 }
0x1132   : > { %v2738_v47 = vadd.f32 %v2737_v6, %v2736_v48  ;;  %v6904_v6 = vlaneseq }
0x1133   : > { %v4387_v18 = vpop.xlane.xlu0 %4386 }
0x1134   : > { %v2739_v62 = vrot.slane %v2738_v47, 2  ;;  %v4388_v12 = vrot.slane %v4387_v18, 4 }
0x1136   : > { %v4389_v20 = vadd.f32 %v4388_v12, %v4387_v18  ;;  %v2740_v38 = vadd.f32 %v2739_v62, %v2738_v47  ;;  %v6905_v47 = vand.u32 127, %v6904_v6 }
0x1138   : > { %v4390_v37 = vrot.slane %v4389_v20, 2  ;;  %v2741_v22 = vrot.slane %v2740_v38, 1  ;;  %vm6910_vm15 = vcmp.eq.s32.totalorder %v6905_v47, 1  ;;  %vm6906_vm0 = vcmp.eq.s32.totalorder %v6905_v47, 0 }
0x1139   : > { %vm6914_vm1 = vcmp.eq.s32.totalorder %v6905_v47, 2  ;;  %vm6918_vm2 = vcmp.eq.s32.totalorder %v6905_v47, 3  ;;  %vm6922_vm3 = vcmp.eq.s32.totalorder %v6905_v47, 4  ;;  %vm6926_vm4 = vcmp.eq.s32.totalorder %v6905_v47, 5 }
0x113a   : > { %v2742_v61 = vadd.f32 %v2741_v22, %v2740_v38  ;;  %v4391_v57 = vadd.f32 %v4390_v37, %v4389_v20  ;;  %vm6930_vm5 = vcmp.eq.s32.totalorder %v6905_v47, 6 }
0x113b   : > { %v5404_v5 = vpop.xlane.xlu0 %5403 }
0x113c   : > { %v5405_v24 = vrot.slane %v5404_v5, 4  ;;  %7668 = vpush %v2742_v61  ;;  %v4392_v49 = vrot.slane %v4391_v57, 1 }
0x113e   : > { %v5406_v13 = vadd.f32 %v5405_v24, %v5404_v5  ;;  %v4393_v21 = vadd.f32 %v4392_v49, %v4391_v57 }
0x1140   : > { %v5407_v53 = vrot.slane %v5406_v13, 2  ;;  %7670 = vpush %v4393_v21  ;;  %v6931_v21 = vstv %s11234_s23  ;;  %s7976_s23 = smov [#allocation8]  }
0x1141   : > { %s7890_s28 = sshll.u32 %s7976_s23, 4  ;;  %s7891_s28 = int_to_ptr.vmem [resolvable:$false] %s7890_s28 }
0x1142   : > { %v5408_v56 = vadd.f32 %v5407_v53, %v5406_v13  ;;  %p7893_p1 = scmp.lt.s32.totalorder %s6950_s29, %s7891_s28 }
0x1143   : > { %v6111_v8 = vpop.xlane.xlu1 %6110 }
0x1144   : > { %v6112_v35 = vrot.slane %v6111_v8, 4  ;;  %v5409_v27 = vrot.slane %v5408_v56, 1 }
0x1146   : > { %v6113_v9 = vadd.f32 %v6112_v35, %v6111_v8  ;;  %v5410_v4 = vadd.f32 %v5409_v27, %v5408_v56  ;;  %v6932_v27 = vsel %vm6930_vm5, %v6931_v21, 0.0 }
0x1148   : > { %v6114_v34 = vrot.slane %v6113_v9, 2  ;;  %7672 = vpush %v5410_v4 }
0x114a   : > { %v6115_v0 = vadd.f32 %v6114_v34, %v6113_v9 }
0x114b   : > { %v6637_v10 = vpop.xlane.xlu0 %6636 }
0x114c   : > { %v6638_v25 = vrot.slane %v6637_v10, 4  ;;  %v6116_v14 = vrot.slane %v6115_v0, 1 }
0x114e   : > { %v6639_v32 = vadd.f32 %v6638_v25, %v6637_v10  ;;  %v6117_v40 = vadd.f32 %v6116_v14, %v6115_v0 }
0x1150   : > { %v6640_v11 = vrot.slane %v6639_v32, 2  ;;  %7674 = vpush %v6117_v40 }
0x1152   : > { %v6641_v43 = vadd.f32 %v6640_v11, %v6639_v32 }
0x1154   : > { %v6642_v31 = vrot.slane %v6641_v43, 1 }
0x1156   : > { %v6643_v51 = vadd.f32 %v6642_v31, %v6641_v43 }
0x1158   : > { %7676 = vpush %v6643_v51 }
0x116d   : > { %s7669_s16 = spop %7668 }
0x116e   : > { %v6907_v62 = vstv %s7669_s16  ;;  %s7892_s16 = scalar_lea.vmem %s7891_s28, 32 }
0x116f   : > { %v6908_v37 = vsel %vm6906_vm0, %v6907_v62, 0.0  ;;  %p7894_p4 = scmp.lt.s32.totalorder %s7892_s16, %s7886_s18 }
0x1171   : > { %s7671_s17 = spop %7670  ;;  %p7895_p11 = por %p7894_p4, %p7893_p1 }
0x1172   : > { %v6911_v18 = vstv %s7671_s17 }
0x1173   : > { %v6912_v20 = vsel %vm6910_vm15, %v6911_v18, 0.0  ;;  %p7896_p2 = pnand %p7895_p11, %p7889_p10 }
0x1174   : > { %v6913_v61 = vadd.f32 %v6912_v20, %v6908_v37 }
0x1179   : > { %s7673_s20 = spop %7672 }
0x117a   : > { %v6915_v12 = vstv %s7673_s20 }
0x117b   : > { %v6916_v22 = vsel %vm6914_vm1, %v6915_v12, 0.0 }
0x117c   : > { %v6917_v24 = vadd.f32 %v6916_v22, %v6913_v61 }
0x1181   : > { %s7675_s30 = spop %7674 }
0x1182   : > { %v6919_v38 = vstv %s7675_s30 }
0x1183   : > { %v6920_v5 = vsel %vm6918_vm2, %v6919_v38, 0.0 }
0x1184   : > { %v6921_v13 = vadd.f32 %v6920_v5, %v6917_v24 }
0x1189   : > { %s7677_s26 = spop %7676 }
0x118a   : > { %v6923_v57 = vstv %s7677_s26 }
0x118b   : > { %v6924_v49 = vsel %vm6922_vm3, %v6923_v57, 0.0 }
0x118c   : > { %v6925_v53 = vadd.f32 %v6924_v49, %v6921_v13 }
0x11a8   : > { %v6752_v2 = vpop.f32.mrf.mxu0 }
0x11aa   : > { %v6795_v36 = vpop.f32.mrf.mxu1  ;;  %v7643_v39 = vpop.f32.mrf.mxu0 }
0x11ac   : > { %v7649_v16 = vpop.f32.mrf.mxu1  ;;  %v6755_v45 = vpop.f32.mrf.mxu0 }
0x11ae   : > { %v6798_v50 = vpop.f32.mrf.mxu1  ;;  %v7644_v19 = vpop.f32.mrf.mxu0 }
0x11b0   : > { %v7650_v42 = vpop.f32.mrf.mxu1  ;;  %v6838_v44 = vpop.f32.mrf.mxu0 }
0x11b1   : > { %v6887_v1 = vsub.f32 %v6752_v2, %v6838_v44 }
0x11b2   : > { %v6881_v58 = vpop.f32.mrf.mxu1  ;;  %v7655_v60 = vpop.f32.mrf.mxu0 }
0x11b3   : > { %v6889_v54 = vand.u32 2147483647, %v6887_v1  ;;  %v6888_v63 = vsub.f32 %v6795_v36, %v6881_v58 }
0x11b4   : > { %v7661_v17 = vpop.f32.mrf.mxu1  ;;  %v6841_v26 = vpop.f32.mrf.mxu0 }
0x11b5   : > { %v6890_v33 = vand.u32 2147483647, %v6888_v63  ;;  %v6892_v46 = vsel %vm6891_vm14, %v6889_v54, 0.0 }
0x11b6   : > { %v6884_v59 = vpop.f32.mrf.mxu1  ;;  %v7656_v30 = vpop.f32.mrf.mxu0 }
0x11b7   : > { %v6893_v3 = vsel %vm6891_vm14, %v6890_v33, 0.0 }
0x11b8   : > { %v6894_v7 = vadd.f32 %v6893_v3, %v6892_v46  ;;  %v7662_v41 = vpop.f32.mrf.mxu1 }
0x11ba   : > { %6895 = vadd.xlane.f32.xlu1 %v6894_v7 }
0x1243   : > { %v6896_v15 = vpop.xlane.xlu1 %6895 }
0x1244   : > { %v6897_v55 = vrot.slane %v6896_v15, 4 }
0x1246   : > { %v6898_v29 = vadd.f32 %v6897_v55, %v6896_v15 }
0x1248   : > { %v6899_v52 = vrot.slane %v6898_v29, 2 }
0x124a   : > { %v6900_v28 = vadd.f32 %v6899_v52, %v6898_v29 }
0x124c   : > { %v6901_v23 = vrot.slane %v6900_v28, 1 }
0x124e   : > { %v6902_v48 = vadd.f32 %v6901_v23, %v6900_v28 }
0x1250   : > { %7678 = vpush %v6902_v48 }
0x1281   : > { %s7679_s15 = spop %7678 }
0x1282   : > { %v6927_v56 = vstv %s7679_s15 }
0x1283   : > { %v6928_v8 = vsel %vm6926_vm4, %v6927_v56, 0.0 }
0x1284   : > { %v6929_v35 = vadd.f32 %v6928_v8, %v6925_v53 }
0x1286   : > { %v6933_v9 = vadd.f32 %v6932_v27, %v6929_v35 }
0x1288   : > { %6935 = vst.msk [vmem:[%s619_s21] sm:$0x1] %vm6934_vm6, %v6933_v9 }
0x1289   : > { %7899 = shalt.err (!%p7896_p2)
}
0x128a   : > { %s7900_s17 = scalar_lea.hbm %s6947_s22, 16  ;;  %s7904_s30 = scalar_lea.hbm %s11929_s13, 64 }
0x128b   : > { %p7901_p6 = scmp.ne.s32.totalorder %s6947_s22, %s7900_s17  ;;  %p7905_p5 = scmp.lt.s32.totalorder %s6947_s22, %s11929_s13 }
0x128c   : > { %p7906_p13 = scmp.lt.s32.totalorder %s7904_s30, %s7900_s17 }
0x128d   : > { %p7902_p12 = pnand %p7901_p6, %p11930_p8 }
0x128e   : > { %p7907_p3 = por %p7906_p13, %p7905_p5 }
0x128f   : > { %p7903_p7 = pneg %p7902_p12 }
0x1291   : > { %p7908_p0 = pnand %p7907_p3, %p7903_p7 }
0x1293   : > { %7911 = shalt.err (!%p7908_p0)
}
0x1294   : > { %7688 = dma.vmem_to_hbm [thread:$0]  (%p11930_p8), %s6950_s29, 16, %s6947_s22, %s6937_s1  }
0x1295 PF: > { %s11931_s14 = sld [smem:[#allocation13_spill]]  ;;  %p7708_p9 = scmp.ge.s32.totalorder %s7958_s27, 2 }
0x1296   : > { %s11932_s21 = sld [smem:[#allocation18_spill]] }
0x129b   : > { %s6961_s0 = sand.u32 1, %s11931_s14  }
0x129c   : > { %p11933_p10 = scmp.ne.s32.totalorder %s11932_s21, 0  ;;  %s6962_s10 = scalar_lea.sflag [#allocation4], %s6961_s0 }
0x129e   : > { %p7702_p1 = pnand %p7708_p9, %p11933_p10 }
0x12a0   : > { %p7703_p4 = pneg %p7702_p1 }
0x12a2   : > { %7941 = dma.done.wait (%p7703_p4), %s6962_s10, 16  }
0x12a3   : > { %7943 = vsyncadd (%p7703_p4), %s6962_s10, 4294967280  ;;  %s11934_s27 = sld [smem:[#allocation15_spill]]  ;;  %s11937_s24 = smov %s7950_s25 }
0x12a4   : > { %s11935_s18 = sld [smem:[#allocation14_spill]] }
0x12a5   : > { %s11936_s26 = sld [smem:[#allocation16_spill]] }
0x12a9   : > { %p33_p11 = scmp.ge.s32.totalorder %s11934_s27, 6  }
0x12aa   : > { %s11938_s25 = smov %s11935_s18 }
0x12ab   :  { %35 = sbr.rel (!%p33_p11) target bundleno = 17 (0x11), region = 150 }
0x12b0   :  { %6966 = vsyncpa [#allocation3], 1 }
0x12b1   :  { %6968 = vsyncpa [#allocation3 + $0x1], 1 }
0x12b2   :  { %6969 = vsyncpa [#allocation6], 1 }
0x12b3   :  { %6971 = vsyncpa [#allocation6 + $0x1], 1 }
0x12b4   :  { %6972 = vsyncpa [#allocation4], 1 }
0x12b5   :  { %6974 = vsyncpa [#allocation4 + $0x1], 1 }

</bundles_post_ra>
